<compile_context>
chip_gen: v5e
topology: v5e:2x2
jax: 0.10.0
libtpu: 0.0.40
codegen_flags: <defaults>
</compile_context>

<pallas_src>
import jax
import jax.numpy as jnp
from jax.experimental import pallas as pl
from jax.experimental.pallas import tpu as pltpu


def _round_up(x, m):
    return ((x + m - 1) // m) * m


def ptrnet_forward(seq, seq_m, target, params, *, block_b=None,
                   use_bf16_mxu=False, att_slab_bytes=4 * 1024 * 1024):
    """Pointer-network forward (num_layers == 1, inference)."""
    B, E = seq.shape
    D = target.shape[1]
    H = params["w_hh_e"].shape[0]

    # batch tile: multiple of 8 sublanes if possible, else the whole (small) batch
    if block_b is None:
        block_b = 8 if (B > 8 and B % 8 == 0) else B
    TB = block_b
    assert B % TB == 0 and (TB % 8 == 0 or TB == B), (B, TB)

    E_pad = _round_up(E, 8)   # sublane-aligned scratch -> clean (TB*T, H) reshape
    D_pad = _round_up(D, 8)

    # decoder-chunk size: only a (TB, TD, E, H) f32 tanh slab is live at once
    TD = max(1, min(D, att_slab_bytes // max(1, TB * E * H * 4)))

    fused_gates = (4 * H) <= 128          # gate slab fits a single vreg lane width
    mxu_dtype = jnp.bfloat16 if use_bf16_mxu else jnp.float32

    # ------------------------------- kernel ---------------------------------------
    def kernel(seq_ref, seq_m_ref, tgt_ref,
               w_ih_e_ref, w_hh_e_ref, b_e_ref,
               w_ih_d_ref, w_hh_d_ref, b_d_ref,
               we_ref, be_ref, wd_ref, bd_ref, v_ref,
               out_ref, e_scr_ref, d_scr_ref):
        seq_v = seq_ref[...]              # (TB, E)
        seq_m_v = seq_m_ref[...]          # (TB, 1) int32
        tgt_v = tgt_ref[...]              # (TB, D)

        w_ih_e = w_ih_e_ref[...]          # elementwise math stays f32 (v5e-safe)
        w_ih_d = w_ih_d_ref[...]
        b_e = b_e_ref[...]
        b_d = b_d_ref[...]
        be = be_ref[...]
        bd = bd_ref[...]
        v_row = v_ref[...]                # (1, H)
        w_hh_e = w_hh_e_ref[...].astype(mxu_dtype)   # MXU operands (bf16 optional)
        w_hh_d = w_hh_d_ref[...].astype(mxu_dtype)
        we = we_ref[...].astype(mxu_dtype)
        wd = wd_ref[...].astype(mxu_dtype)

        if fused_gates:
            # hoisted once (JAX does not CSE broadcast_in_dim inside the unrolled loop)
            lanes = jax.lax.broadcasted_iota(jnp.int32, (TB, 4 * H), 1)
            g_sel = jnp.logical_and(lanes >= 2 * H, lanes < 3 * H)

        def lstm_step(x_col, h, c, w_ih, w_hh, b):
            # x_col: (TB, 1); per-step VPU broadcast-FMA instead of a materialized
            # (TB, T, 4H) pre-gate tensor.
            gates = (x_col * w_ih + b
                     + jnp.dot(h.astype(mxu_dtype), w_hh,
                               preferred_element_type=jnp.float32))
            if fused_gates:
                # single-vreg slab: 2 EUP pushes + 1 VPU select
                act = jnp.where(g_sel, jnp.tanh(gates), jax.nn.sigmoid(gates))
                i_g = act[:, 0 * H:1 * H]
                f_g = act[:, 1 * H:2 * H]
                g_g = act[:, 2 * H:3 * H]
                o_g = act[:, 3 * H:4 * H]
            else:
                # sliced activations: ~1.8x less EUP work on the serial chain
                sig_if = jax.nn.sigmoid(gates[:, 0:2 * H])
                i_g, f_g = sig_if[:, :H], sig_if[:, H:]
                g_g = jnp.tanh(gates[:, 2 * H:3 * H])
                o_g = jax.nn.sigmoid(gates[:, 3 * H:4 * H])
            c_new = f_g * c + i_g * g_g
            h_new = o_g * jnp.tanh(c_new)
            return h_new, c_new

        # zero the padding rows of the scratch so the batched projections below never
        # touch uninitialized VMEM
        if E_pad > E:
            e_scr_ref[:, E:, :] = jnp.zeros((TB, E_pad - E, H), jnp.float32)
        if D_pad > D:
            d_scr_ref[:, D:, :] = jnp.zeros((TB, D_pad - D, H), jnp.float32)

        # ---------------- encoder recurrence (only the LSTM chain is serial) --------
        h = jnp.zeros((TB, H), jnp.float32)
        c = jnp.zeros((TB, H), jnp.float32)
        e_hs = jnp.zeros((TB, H), jnp.float32)   # state captured at step seq_m - 1
        e_cs = jnp.zeros((TB, H), jnp.float32)
        for j in range(E):
            x_j = seq_v[:, j:j + 1]                          # (TB, 1) static slice
            h, c = lstm_step(x_j, h, c, w_ih_e, w_hh_e, b_e)
            e_scr_ref[:, j:j + 1, :] = h[:, None, :]         # store kills live range
            sel = seq_m_v == (j + 1)
            e_hs = jnp.where(sel, h, e_hs)
            e_cs = jnp.where(sel, c, e_cs)

        # ---------------- decoder recurrence ----------------------------------------
        h, c = e_hs, e_cs
        for i in range(D):
            x_i = tgt_v[:, i:i + 1]
            h, c = lstm_step(x_i, h, c, w_ih_d, w_hh_d, b_d)
            d_scr_ref[:, i:i + 1, :] = h[:, None, :]

        # ---------------- batched projections (one MXU pass each, from scratch) -----
        e_all = e_scr_ref[...].reshape(TB * E_pad, H)
        d_all = d_scr_ref[...].reshape(TB * D_pad, H)
        e_lin = (jnp.dot(e_all.astype(mxu_dtype), we,
                         preferred_element_type=jnp.float32) + be
                 ).reshape(TB, E_pad, H)[:, :E, :]
        d_lin = (jnp.dot(d_all.astype(mxu_dtype), wd,
                         preferred_element_type=jnp.float32) + bd
                 ).reshape(TB, D_pad, H)

        # ---------------- attention + masked softmax, tiled over decoder steps ------
        # Mask follows the torch module: encoder positions whose input value is 0.0
        # get -1000, with position 0 forced valid (mirrors `sq[:, 0, :] = 0.1`).
        col = jax.lax.broadcasted_iota(jnp.int32, (TB, E), 1)
        valid = jnp.logical_or(seq_v != 0.0, col == 0)
        mask_add = jnp.where(valid, 0.0, -1000.0)            # (TB, E)
        v4 = v_row.reshape(1, 1, 1, H)

        for d0 in range(0, D, TD):
            td = min(TD, D - d0)
            d_chunk = d_lin[:, d0:d0 + td, :]                # (TB, td, H)
            att = jnp.tanh(e_lin[:, None, :, :] + d_chunk[:, :, None, :]) * v4
            scores = jnp.sum(att, axis=-1) + mask_add[:, None, :]   # (TB, td, E)
            s_max = jnp.max(scores, axis=-1, keepdims=True)
            ex = jnp.exp(scores - s_max)
            denom = jnp.sum(ex, axis=-1, keepdims=True)
            # exact division (NOT approx reciprocal): rows must sum to 1
            out_ref[:, d0:d0 + td, :] = ex / denom

    # ------------------------------- specs / call ----------------------------------
    def batch_spec(shape):
        nd = len(shape)
        return pl.BlockSpec((TB,) + tuple(shape[1:]),
                            lambda b, _nd=nd: (b,) + (0,) * (_nd - 1))

    def const_spec(shape):
        nd = len(shape)
        return pl.BlockSpec(tuple(shape), lambda b, _nd=nd: (0,) * _nd)

    weight_order = ("w_ih_e", "w_hh_e", "b_e", "w_ih_d", "w_hh_d", "b_d",
                    "we", "be", "wd", "bd", "v")
    in_specs = ([batch_spec(seq.shape), batch_spec(seq_m.shape), batch_spec(target.shape)]
                + [const_spec(params[k].shape) for k in weight_order])
    out_specs = pl.BlockSpec((TB, D, E), lambda b: (b, 0, 0))

    # advisory cost estimate
    n_act = (9 if fused_gates else 5) * H
    flops = int(2 * (E + D) * B * H * 4 * H
                + 2 * B * (E_pad + D_pad) * H * H
                + 5 * B * D * E * H)
    transcendentals = int((E + D) * B * n_act + B * D * E * H + B * D * E)
    bytes_accessed = int(4 * (seq.size + seq_m.size + target.size + B * D * E
                              + sum(int(p.size) for p in params.values())))

    # VMEM budget: weights + double-buffered i/o blocks + scratch + attention slab
    weights_bytes = 4 * sum(int(params[k].size) for k in weight_order)
    io_bytes = 4 * 2 * (TB * E + TB + TB * D + TB * D * E)
    scratch_bytes = 4 * TB * (E_pad + D_pad) * H
    att_bytes = 4 * TB * TD * E * H * 2
    footprint = 2 * weights_bytes + io_bytes + scratch_bytes + att_bytes
    vmem_limit = int(min(48 * 1024 * 1024, max(16 * 1024 * 1024, 2 * footprint)))

    return pl.pallas_call(
        kernel,
        out_shape=jax.ShapeDtypeStruct((B, D, E), jnp.float32),
        grid=(B // TB,),
        in_specs=in_specs,
        out_specs=out_specs,
        scratch_shapes=[pltpu.VMEM((TB, E_pad, H), jnp.float32),
                        pltpu.VMEM((TB, D_pad, H), jnp.float32)],
        compiler_params=pltpu.CompilerParams(
            dimension_semantics=("parallel",),       # v7x: both TCs split the batch
            vmem_limit_bytes=vmem_limit),
        cost_estimate=pl.CostEstimate(flops=flops,
                                      transcendentals=transcendentals,
                                      bytes_accessed=bytes_accessed),
    )(seq, seq_m, target, *[params[k] for k in weight_order])


# ----------------------------- pure-JAX reference --------------------------------
def ptrnet_reference(seq, seq_m, target, params):
    B, E = seq.shape
    D = target.shape[1]
    H = params["w_hh_e"].shape[0]

    def step(x, h, c, w_ih, w_hh, b):
        g = x * w_ih + h @ w_hh + b
        i = jax.nn.sigmoid(g[:, :H])
        f = jax.nn.sigmoid(g[:, H:2 * H])
        gg = jnp.tanh(g[:, 2 * H:3 * H])
        o = jax.nn.sigmoid(g[:, 3 * H:])
        c = f * c + i * gg
        return o * jnp.tanh(c), c

    h = jnp.zeros((B, H)); c = jnp.zeros((B, H))
    e_hs = jnp.zeros((B, H)); e_cs = jnp.zeros((B, H))
    e_list = []
    for j in range(E):
        h, c = step(seq[:, j:j + 1], h, c, params["w_ih_e"], params["w_hh_e"], params["b_e"])
        e_list.append(h)
        sel = (seq_m == j + 1)
        e_hs = jnp.where(sel, h, e_hs)
        e_cs = jnp.where(sel, c, e_cs)
    e = jnp.stack(e_list, axis=1)
    h, c = e_hs, e_cs
    d_list = []
    for i in range(D):
        h, c = step(target[:, i:i + 1], h, c, params["w_ih_d"], params["w_hh_d"], params["b_d"])
        d_list.append(h)
    d = jnp.stack(d_list, axis=1)
    e = e @ params["we"] + params["be"]
    d = d @ params["wd"] + params["bd"]
    att = jnp.tanh(e[:, None, :, :] + d[:, :, None, :]) * params["v"][None, None, :, :]
    p = att.sum(-1)                                        # (B, D, E)
    col = jnp.arange(E)[None, :]
    valid = (seq != 0.0) | (col == 0)
    p = p + jnp.where(valid, 0.0, -1000.0)[:, None, :]
    return jax.nn.softmax(p, axis=-1)


def make_params(key, hidden_size):
    H = hidden_size
    ks = jax.random.split(key, 10)
    k = 1.0 / jnp.sqrt(H)
    u = lambda kk, shape: jax.random.uniform(kk, shape, jnp.float32, -k, k)
    return {
        "w_ih_e": u(ks[0], (1, 4 * H)),
        "w_hh_e": u(ks[1], (H, 4 * H)),
        "b_e":    u(ks[2], (1, 4 * H)),
        "w_ih_d": u(ks[3], (1, 4 * H)),
        "w_hh_d": u(ks[4], (H, 4 * H)),
        "b_d":    u(ks[5], (1, 4 * H)),
        "we":     u(ks[6], (H, H)),
        "be":     u(ks[7], (1, H)),
        "wd":     u(ks[8], (H, H)),
        "bd":     u(ks[9], (1, H)),
        "v":      jnp.ones((1, H), jnp.float32),   # Parameter(torch.ones(hidden_size))
    }


if __name__ == "__main__":
    # batch=16 so the batch grid actually iterates (TB=8 -> grid=(2,)); feat_len = 1.
    B, E, D, H = 16, 8, 6, 32

    root = jax.random.PRNGKey(0)
    k_seq, k_tgt, k_par = jax.random.split(root, 3)

    seq = jax.random.normal(k_seq, (B, E), jnp.float32)
    seq_m = ((jnp.arange(B) * 3) % E + 1).astype(jnp.int32).reshape(B, 1)   # lengths 1..E
    pos = jnp.arange(E)[None, :]
    seq = jnp.where(pos < seq_m, seq, 0.0)          # zero-pad beyond each true length
    target = jax.random.normal(k_tgt, (B, D), jnp.float32)

    params = make_params(k_par, H)

    out = ptrnet_forward(seq, seq_m, target, params)
    out = jax.block_until_ready(out)

    ref = ptrnet_reference(seq, seq_m, target, params)
    assert out.shape == (B, D, E)
    assert bool(jnp.all(jnp.isfinite(out)))
    assert bool(jnp.allclose(out, ref, atol=5e-3, rtol=5e-3)), "mismatch vs JAX reference"
    assert bool(jnp.allclose(out.sum(-1), 1.0, atol=1e-3)), "softmax rows must sum to 1"

    print("KERNEL_OK")
</pallas_src>

<mosaic_0001>
module attributes {stable_mosaic.version = 11 : i64} {
  func.func @kernel(%arg0: i32, %arg1: memref<8x8xf32, #tpu.memory_space<vmem>>, %arg2: memref<8x1xi32, #tpu.memory_space<vmem>>, %arg3: memref<8x6xf32, #tpu.memory_space<vmem>>, %arg4: memref<1x128xf32, #tpu.memory_space<vmem>>, %arg5: memref<32x128xf32, #tpu.memory_space<vmem>>, %arg6: memref<1x128xf32, #tpu.memory_space<vmem>>, %arg7: memref<1x128xf32, #tpu.memory_space<vmem>>, %arg8: memref<32x128xf32, #tpu.memory_space<vmem>>, %arg9: memref<1x128xf32, #tpu.memory_space<vmem>>, %arg10: memref<32x32xf32, #tpu.memory_space<vmem>>, %arg11: memref<1x32xf32, #tpu.memory_space<vmem>>, %arg12: memref<32x32xf32, #tpu.memory_space<vmem>>, %arg13: memref<1x32xf32, #tpu.memory_space<vmem>>, %arg14: memref<1x32xf32, #tpu.memory_space<vmem>>, %arg15: memref<8x6x8xf32, #tpu.memory_space<vmem>>, %arg16: memref<8x8x32xf32, #tpu.memory_space<vmem>>, %arg17: memref<8x8x32xf32, #tpu.memory_space<vmem>>) attributes {dimension_semantics = [#tpu.dimension_semantics<parallel>], iteration_bounds = array<i64: 2>, scalar_prefetch = 0 : i64, scratch_operands = 2 : i64, tpu.core_type = #tpu.core_type<tc>, window_params = [{transform_indices = @transform_0, window_bounds = array<i64: 8, 8>}, {transform_indices = @transform_1, window_bounds = array<i64: 8, 1>}, {transform_indices = @transform_2, window_bounds = array<i64: 8, 6>}, {pipeline_mode = #tpu.pipeline_mode<synchronous>, transform_indices = @transform_3, window_bounds = array<i64: 1, 128>}, {pipeline_mode = #tpu.pipeline_mode<synchronous>, transform_indices = @transform_4, window_bounds = array<i64: 32, 128>}, {pipeline_mode = #tpu.pipeline_mode<synchronous>, transform_indices = @transform_5, window_bounds = array<i64: 1, 128>}, {pipeline_mode = #tpu.pipeline_mode<synchronous>, transform_indices = @transform_6, window_bounds = array<i64: 1, 128>}, {pipeline_mode = #tpu.pipeline_mode<synchronous>, transform_indices = @transform_7, window_bounds = array<i64: 32, 128>}, {pipeline_mode = #tpu.pipeline_mode<synchronous>, transform_indices = @transform_8, window_bounds = array<i64: 1, 128>}, {pipeline_mode = #tpu.pipeline_mode<synchronous>, transform_indices = @transform_9, window_bounds = array<i64: 32, 32>}, {pipeline_mode = #tpu.pipeline_mode<synchronous>, transform_indices = @transform_10, window_bounds = array<i64: 1, 32>}, {pipeline_mode = #tpu.pipeline_mode<synchronous>, transform_indices = @transform_11, window_bounds = array<i64: 32, 32>}, {pipeline_mode = #tpu.pipeline_mode<synchronous>, transform_indices = @transform_12, window_bounds = array<i64: 1, 32>}, {pipeline_mode = #tpu.pipeline_mode<synchronous>, transform_indices = @transform_13, window_bounds = array<i64: 1, 32>}, {transform_indices = @transform_14, window_bounds = array<i64: 8, 6, 8>}]} {
    %c0 = arith.constant 0 : index
    %c0_0 = arith.constant 0 : index
    %0 = vector.load %arg1[%c0, %c0_0] : memref<8x8xf32, #tpu.memory_space<vmem>>, vector<8x8xf32>
    %c0_1 = arith.constant 0 : index
    %c0_2 = arith.constant 0 : index
    %1 = vector.load %arg2[%c0_1, %c0_2] : memref<8x1xi32, #tpu.memory_space<vmem>>, vector<8x1xi32>
    %c0_3 = arith.constant 0 : index
    %c0_4 = arith.constant 0 : index
    %2 = vector.load %arg3[%c0_3, %c0_4] : memref<8x6xf32, #tpu.memory_space<vmem>>, vector<8x6xf32>
    %c0_5 = arith.constant 0 : index
    %c0_6 = arith.constant 0 : index
    %3 = vector.load %arg4[%c0_5, %c0_6] : memref<1x128xf32, #tpu.memory_space<vmem>>, vector<1x128xf32>
    %c0_7 = arith.constant 0 : index
    %c0_8 = arith.constant 0 : index
    %4 = vector.load %arg7[%c0_7, %c0_8] : memref<1x128xf32, #tpu.memory_space<vmem>>, vector<1x128xf32>
    %c0_9 = arith.constant 0 : index
    %c0_10 = arith.constant 0 : index
    %5 = vector.load %arg6[%c0_9, %c0_10] : memref<1x128xf32, #tpu.memory_space<vmem>>, vector<1x128xf32>
    %c0_11 = arith.constant 0 : index
    %c0_12 = arith.constant 0 : index
    %6 = vector.load %arg9[%c0_11, %c0_12] : memref<1x128xf32, #tpu.memory_space<vmem>>, vector<1x128xf32>
    %c0_13 = arith.constant 0 : index
    %c0_14 = arith.constant 0 : index
    %7 = vector.load %arg11[%c0_13, %c0_14] : memref<1x32xf32, #tpu.memory_space<vmem>>, vector<1x32xf32>
    %c0_15 = arith.constant 0 : index
    %c0_16 = arith.constant 0 : index
    %8 = vector.load %arg13[%c0_15, %c0_16] : memref<1x32xf32, #tpu.memory_space<vmem>>, vector<1x32xf32>
    %c0_17 = arith.constant 0 : index
    %c0_18 = arith.constant 0 : index
    %9 = vector.load %arg14[%c0_17, %c0_18] : memref<1x32xf32, #tpu.memory_space<vmem>>, vector<1x32xf32>
    %c0_19 = arith.constant 0 : index
    %c0_20 = arith.constant 0 : index
    %10 = vector.load %arg5[%c0_19, %c0_20] : memref<32x128xf32, #tpu.memory_space<vmem>>, vector<32x128xf32>
    %c0_21 = arith.constant 0 : index
    %c0_22 = arith.constant 0 : index
    %11 = vector.load %arg8[%c0_21, %c0_22] : memref<32x128xf32, #tpu.memory_space<vmem>>, vector<32x128xf32>
    %c0_23 = arith.constant 0 : index
    %c0_24 = arith.constant 0 : index
    %12 = vector.load %arg10[%c0_23, %c0_24] : memref<32x32xf32, #tpu.memory_space<vmem>>, vector<32x32xf32>
    %c0_25 = arith.constant 0 : index
    %c0_26 = arith.constant 0 : index
    %13 = vector.load %arg12[%c0_25, %c0_26] : memref<32x32xf32, #tpu.memory_space<vmem>>, vector<32x32xf32>
    %14 = tpu.iota {dimensions = array<i32: 1>} : vector<8x128xi32>
    %c64_i32 = arith.constant 64 : i32
    %15 = vector.broadcast %c64_i32 : i32 to vector<8x128xi32>
    %16 = arith.cmpi sge, %14, %15 : vector<8x128xi32>
    %c96_i32 = arith.constant 96 : i32
    %17 = vector.broadcast %c96_i32 : i32 to vector<8x128xi32>
    %18 = arith.cmpi slt, %14, %17 : vector<8x128xi32>
    %19 = arith.andi %16, %18 : vector<8x128xi1>
    %cst = arith.constant 0.000000e+00 : f32
    %20 = vector.broadcast %cst : f32 to vector<8x2x32xf32>
    %c0_27 = arith.constant 0 : index
    %c6 = arith.constant 6 : index
    %c0_28 = arith.constant 0 : index
    %21 = vector.load %arg17[%c0_27, %c6, %c0_28] : memref<8x8x32xf32, #tpu.memory_space<vmem>>, vector<8x2x32xf32>
    tpu.vector_store %arg17[%c0_27, %c6, %c0_28], %20 {strides = array<i32>} : memref<8x8x32xf32, #tpu.memory_space<vmem>>, vector<8x2x32xf32>,
    %cst_29 = arith.constant 0.000000e+00 : f32
    %22 = vector.broadcast %cst_29 : f32 to vector<8x32xf32>
    %cst_30 = arith.constant 0.000000e+00 : f32
    %23 = vector.broadcast %cst_30 : f32 to vector<8x32xf32>
    %cst_31 = arith.constant 0.000000e+00 : f32
    %24 = vector.broadcast %cst_31 : f32 to vector<8x32xf32>
    %cst_32 = arith.constant 0.000000e+00 : f32
    %25 = vector.broadcast %cst_32 : f32 to vector<8x32xf32>
    %26 = vector.extract_strided_slice %0 {offsets = [0, 0], sizes = [8, 1], strides = [1, 1]} : vector<8x8xf32> to vector<8x1xf32>
    %27 = vector.broadcast %26 : vector<8x1xf32> to vector<8x128xf32>
    %28 = vector.broadcast %3 : vector<1x128xf32> to vector<8x128xf32>
    %29 = arith.mulf %27, %28 : vector<8x128xf32>
    %30 = vector.broadcast %5 : vector<1x128xf32> to vector<8x128xf32>
    %31 = arith.addf %29, %30 : vector<8x128xf32>
    %cst_33 = arith.constant dense<0.000000e+00> : vector<8x128xf32>
    %32 = tpu.matmul %22, %10, %cst_33 {dimension_numbers = #tpu.dot_dimension_numbers<[1], [0], [0], [1], [0, 0, 1, 1], [], []>} : vector<8x32xf32>, vector<32x128xf32>, vector<8x128xf32> -> vector<8x128xf32>
    %33 = arith.addf %31, %32 : vector<8x128xf32>
    %34 = math.tanh %33 : vector<8x128xf32>
    %35 = arith.negf %33 : vector<8x128xf32>
    %36 = math.exp %35 : vector<8x128xf32>
    %cst_34 = arith.constant 1.000000e+00 : f32
    %37 = vector.broadcast %cst_34 : f32 to vector<8x128xf32>
    %38 = arith.addf %37, %36 : vector<8x128xf32>
    %39 = arith.divf %37, %38 : vector<8x128xf32>
    %40 = arith.select %19, %34, %39 : vector<8x128xi1>, vector<8x128xf32>
    %41 = vector.extract_strided_slice %40 {offsets = [0, 0], sizes = [8, 32], strides = [1, 1]} : vector<8x128xf32> to vector<8x32xf32>
    %42 = vector.extract_strided_slice %40 {offsets = [0, 32], sizes = [8, 32], strides = [1, 1]} : vector<8x128xf32> to vector<8x32xf32>
    %43 = vector.extract_strided_slice %40 {offsets = [0, 64], sizes = [8, 32], strides = [1, 1]} : vector<8x128xf32> to vector<8x32xf32>
    %44 = vector.extract_strided_slice %40 {offsets = [0, 96], sizes = [8, 32], strides = [1, 1]} : vector<8x128xf32> to vector<8x32xf32>
    %45 = arith.mulf %42, %23 : vector<8x32xf32>
    %46 = arith.mulf %41, %43 : vector<8x32xf32>
    %47 = arith.addf %45, %46 : vector<8x32xf32>
    %48 = math.tanh %47 : vector<8x32xf32>
    %49 = arith.mulf %44, %48 : vector<8x32xf32>
    %50 = vector.shape_cast %49 : vector<8x32xf32> to vector<8x1x32xf32>
    %c0_35 = arith.constant 0 : index
    %c0_36 = arith.constant 0 : index
    %c0_37 = arith.constant 0 : index
    %51 = vector.load %arg16[%c0_35, %c0_36, %c0_37] : memref<8x8x32xf32, #tpu.memory_space<vmem>>, vector<8x1x32xf32>
    tpu.vector_store %arg16[%c0_35, %c0_36, %c0_37], %50 {strides = array<i32>} : memref<8x8x32xf32, #tpu.memory_space<vmem>>, vector<8x1x32xf32>,
    %c1_i32 = arith.constant 1 : i32
    %52 = vector.broadcast %c1_i32 : i32 to vector<8x1xi32>
    %53 = arith.cmpi eq, %1, %52 : vector<8x1xi32>
    %54 = vector.shape_cast %53 : vector<8x1xi1> to vector<8x1xi1>
    %55 = vector.broadcast %54 : vector<8x1xi1> to vector<8x32xi1>
    %56 = arith.select %55, %49, %24 : vector<8x32xi1>, vector<8x32xf32>
    %57 = vector.shape_cast %53 : vector<8x1xi1> to vector<8x1xi1>
    %58 = vector.broadcast %57 : vector<8x1xi1> to vector<8x32xi1>
    %59 = arith.select %58, %47, %25 : vector<8x32xi1>, vector<8x32xf32>
    %60 = vector.extract_strided_slice %0 {offsets = [0, 1], sizes = [8, 1], strides = [1, 1]} : vector<8x8xf32> to vector<8x1xf32>
    %61 = vector.broadcast %60 : vector<8x1xf32> to vector<8x128xf32>
    %62 = vector.broadcast %3 : vector<1x128xf32> to vector<8x128xf32>
    %63 = arith.mulf %61, %62 : vector<8x128xf32>
    %64 = vector.broadcast %5 : vector<1x128xf32> to vector<8x128xf32>
    %65 = arith.addf %63, %64 : vector<8x128xf32>
    %cst_38 = arith.constant dense<0.000000e+00> : vector<8x128xf32>
    %66 = tpu.matmul %49, %10, %cst_38 {dimension_numbers = #tpu.dot_dimension_numbers<[1], [0], [0], [1], [0, 0, 1, 1], [], []>} : vector<8x32xf32>, vector<32x128xf32>, vector<8x128xf32> -> vector<8x128xf32>
    %67 = arith.addf %65, %66 : vector<8x128xf32>
    %68 = math.tanh %67 : vector<8x128xf32>
    %69 = arith.negf %67 : vector<8x128xf32>
    %70 = math.exp %69 : vector<8x128xf32>
    %cst_39 = arith.constant 1.000000e+00 : f32
    %71 = vector.broadcast %cst_39 : f32 to vector<8x128xf32>
    %72 = arith.addf %71, %70 : vector<8x128xf32>
    %73 = arith.divf %71, %72 : vector<8x128xf32>
    %74 = arith.select %19, %68, %73 : vector<8x128xi1>, vector<8x128xf32>
    %75 = vector.extract_strided_slice %74 {offsets = [0, 0], sizes = [8, 32], strides = [1, 1]} : vector<8x128xf32> to vector<8x32xf32>
    %76 = vector.extract_strided_slice %74 {offsets = [0, 32], sizes = [8, 32], strides = [1, 1]} : vector<8x128xf32> to vector<8x32xf32>
    %77 = vector.extract_strided_slice %74 {offsets = [0, 64], sizes = [8, 32], strides = [1, 1]} : vector<8x128xf32> to vector<8x32xf32>
    %78 = vector.extract_strided_slice %74 {offsets = [0, 96], sizes = [8, 32], strides = [1, 1]} : vector<8x128xf32> to vector<8x32xf32>
    %79 = arith.mulf %76, %47 : vector<8x32xf32>
    %80 = arith.mulf %75, %77 : vector<8x32xf32>
    %81 = arith.addf %79, %80 : vector<8x32xf32>
    %82 = math.tanh %81 : vector<8x32xf32>
    %83 = arith.mulf %78, %82 : vector<8x32xf32>
    %84 = vector.shape_cast %83 : vector<8x32xf32> to vector<8x1x32xf32>
    %c0_40 = arith.constant 0 : index
    %c1 = arith.constant 1 : index
    %c0_41 = arith.constant 0 : index
    %85 = vector.load %arg16[%c0_40, %c1, %c0_41] : memref<8x8x32xf32, #tpu.memory_space<vmem>>, vector<8x1x32xf32>
    tpu.vector_store %arg16[%c0_40, %c1, %c0_41], %84 {strides = array<i32>} : memref<8x8x32xf32, #tpu.memory_space<vmem>>, vector<8x1x32xf32>,
    %c2_i32 = arith.constant 2 : i32
    %86 = vector.broadcast %c2_i32 : i32 to vector<8x1xi32>
    %87 = arith.cmpi eq, %1, %86 : vector<8x1xi32>
    %88 = vector.shape_cast %87 : vector<8x1xi1> to vector<8x1xi1>
    %89 = vector.broadcast %88 : vector<8x1xi1> to vector<8x32xi1>
    %90 = arith.select %89, %83, %56 : vector<8x32xi1>, vector<8x32xf32>
    %91 = vector.shape_cast %87 : vector<8x1xi1> to vector<8x1xi1>
    %92 = vector.broadcast %91 : vector<8x1xi1> to vector<8x32xi1>
    %93 = arith.select %92, %81, %59 : vector<8x32xi1>, vector<8x32xf32>
    %94 = vector.extract_strided_slice %0 {offsets = [0, 2], sizes = [8, 1], strides = [1, 1]} : vector<8x8xf32> to vector<8x1xf32>
    %95 = vector.broadcast %94 : vector<8x1xf32> to vector<8x128xf32>
    %96 = vector.broadcast %3 : vector<1x128xf32> to vector<8x128xf32>
    %97 = arith.mulf %95, %96 : vector<8x128xf32>
    %98 = vector.broadcast %5 : vector<1x128xf32> to vector<8x128xf32>
    %99 = arith.addf %97, %98 : vector<8x128xf32>
    %cst_42 = arith.constant dense<0.000000e+00> : vector<8x128xf32>
    %100 = tpu.matmul %83, %10, %cst_42 {dimension_numbers = #tpu.dot_dimension_numbers<[1], [0], [0], [1], [0, 0, 1, 1], [], []>} : vector<8x32xf32>, vector<32x128xf32>, vector<8x128xf32> -> vector<8x128xf32>
    %101 = arith.addf %99, %100 : vector<8x128xf32>
    %102 = math.tanh %101 : vector<8x128xf32>
    %103 = arith.negf %101 : vector<8x128xf32>
    %104 = math.exp %103 : vector<8x128xf32>
    %cst_43 = arith.constant 1.000000e+00 : f32
    %105 = vector.broadcast %cst_43 : f32 to vector<8x128xf32>
    %106 = arith.addf %105, %104 : vector<8x128xf32>
    %107 = arith.divf %105, %106 : vector<8x128xf32>
    %108 = arith.select %19, %102, %107 : vector<8x128xi1>, vector<8x128xf32>
    %109 = vector.extract_strided_slice %108 {offsets = [0, 0], sizes = [8, 32], strides = [1, 1]} : vector<8x128xf32> to vector<8x32xf32>
    %110 = vector.extract_strided_slice %108 {offsets = [0, 32], sizes = [8, 32], strides = [1, 1]} : vector<8x128xf32> to vector<8x32xf32>
    %111 = vector.extract_strided_slice %108 {offsets = [0, 64], sizes = [8, 32], strides = [1, 1]} : vector<8x128xf32> to vector<8x32xf32>
    %112 = vector.extract_strided_slice %108 {offsets = [0, 96], sizes = [8, 32], strides = [1, 1]} : vector<8x128xf32> to vector<8x32xf32>
    %113 = arith.mulf %110, %81 : vector<8x32xf32>
    %114 = arith.mulf %109, %111 : vector<8x32xf32>
    %115 = arith.addf %113, %114 : vector<8x32xf32>
    %116 = math.tanh %115 : vector<8x32xf32>
    %117 = arith.mulf %112, %116 : vector<8x32xf32>
    %118 = vector.shape_cast %117 : vector<8x32xf32> to vector<8x1x32xf32>
    %c0_44 = arith.constant 0 : index
    %c2 = arith.constant 2 : index
    %c0_45 = arith.constant 0 : index
    %119 = vector.load %arg16[%c0_44, %c2, %c0_45] : memref<8x8x32xf32, #tpu.memory_space<vmem>>, vector<8x1x32xf32>
    tpu.vector_store %arg16[%c0_44, %c2, %c0_45], %118 {strides = array<i32>} : memref<8x8x32xf32, #tpu.memory_space<vmem>>, vector<8x1x32xf32>,
    %c3_i32 = arith.constant 3 : i32
    %120 = vector.broadcast %c3_i32 : i32 to vector<8x1xi32>
    %121 = arith.cmpi eq, %1, %120 : vector<8x1xi32>
    %122 = vector.shape_cast %121 : vector<8x1xi1> to vector<8x1xi1>
    %123 = vector.broadcast %122 : vector<8x1xi1> to vector<8x32xi1>
    %124 = arith.select %123, %117, %90 : vector<8x32xi1>, vector<8x32xf32>
    %125 = vector.shape_cast %121 : vector<8x1xi1> to vector<8x1xi1>
    %126 = vector.broadcast %125 : vector<8x1xi1> to vector<8x32xi1>
    %127 = arith.select %126, %115, %93 : vector<8x32xi1>, vector<8x32xf32>
    %128 = vector.extract_strided_slice %0 {offsets = [0, 3], sizes = [8, 1], strides = [1, 1]} : vector<8x8xf32> to vector<8x1xf32>
    %129 = vector.broadcast %128 : vector<8x1xf32> to vector<8x128xf32>
    %130 = vector.broadcast %3 : vector<1x128xf32> to vector<8x128xf32>
    %131 = arith.mulf %129, %130 : vector<8x128xf32>
    %132 = vector.broadcast %5 : vector<1x128xf32> to vector<8x128xf32>
    %133 = arith.addf %131, %132 : vector<8x128xf32>
    %cst_46 = arith.constant dense<0.000000e+00> : vector<8x128xf32>
    %134 = tpu.matmul %117, %10, %cst_46 {dimension_numbers = #tpu.dot_dimension_numbers<[1], [0], [0], [1], [0, 0, 1, 1], [], []>} : vector<8x32xf32>, vector<32x128xf32>, vector<8x128xf32> -> vector<8x128xf32>
    %135 = arith.addf %133, %134 : vector<8x128xf32>
    %136 = math.tanh %135 : vector<8x128xf32>
    %137 = arith.negf %135 : vector<8x128xf32>
    %138 = math.exp %137 : vector<8x128xf32>
    %cst_47 = arith.constant 1.000000e+00 : f32
    %139 = vector.broadcast %cst_47 : f32 to vector<8x128xf32>
    %140 = arith.addf %139, %138 : vector<8x128xf32>
    %141 = arith.divf %139, %140 : vector<8x128xf32>
    %142 = arith.select %19, %136, %141 : vector<8x128xi1>, vector<8x128xf32>
    %143 = vector.extract_strided_slice %142 {offsets = [0, 0], sizes = [8, 32], strides = [1, 1]} : vector<8x128xf32> to vector<8x32xf32>
    %144 = vector.extract_strided_slice %142 {offsets = [0, 32], sizes = [8, 32], strides = [1, 1]} : vector<8x128xf32> to vector<8x32xf32>
    %145 = vector.extract_strided_slice %142 {offsets = [0, 64], sizes = [8, 32], strides = [1, 1]} : vector<8x128xf32> to vector<8x32xf32>
    %146 = vector.extract_strided_slice %142 {offsets = [0, 96], sizes = [8, 32], strides = [1, 1]} : vector<8x128xf32> to vector<8x32xf32>
    %147 = arith.mulf %144, %115 : vector<8x32xf32>
    %148 = arith.mulf %143, %145 : vector<8x32xf32>
    %149 = arith.addf %147, %148 : vector<8x32xf32>
    %150 = math.tanh %149 : vector<8x32xf32>
    %151 = arith.mulf %146, %150 : vector<8x32xf32>
    %152 = vector.shape_cast %151 : vector<8x32xf32> to vector<8x1x32xf32>
    %c0_48 = arith.constant 0 : index
    %c3 = arith.constant 3 : index
    %c0_49 = arith.constant 0 : index
    %153 = vector.load %arg16[%c0_48, %c3, %c0_49] : memref<8x8x32xf32, #tpu.memory_space<vmem>>, vector<8x1x32xf32>
    tpu.vector_store %arg16[%c0_48, %c3, %c0_49], %152 {strides = array<i32>} : memref<8x8x32xf32, #tpu.memory_space<vmem>>, vector<8x1x32xf32>,
    %c4_i32 = arith.constant 4 : i32
    %154 = vector.broadcast %c4_i32 : i32 to vector<8x1xi32>
    %155 = arith.cmpi eq, %1, %154 : vector<8x1xi32>
    %156 = vector.shape_cast %155 : vector<8x1xi1> to vector<8x1xi1>
    %157 = vector.broadcast %156 : vector<8x1xi1> to vector<8x32xi1>
    %158 = arith.select %157, %151, %124 : vector<8x32xi1>, vector<8x32xf32>
    %159 = vector.shape_cast %155 : vector<8x1xi1> to vector<8x1xi1>
    %160 = vector.broadcast %159 : vector<8x1xi1> to vector<8x32xi1>
    %161 = arith.select %160, %149, %127 : vector<8x32xi1>, vector<8x32xf32>
    %162 = vector.extract_strided_slice %0 {offsets = [0, 4], sizes = [8, 1], strides = [1, 1]} : vector<8x8xf32> to vector<8x1xf32>
    %163 = vector.broadcast %162 : vector<8x1xf32> to vector<8x128xf32>
    %164 = vector.broadcast %3 : vector<1x128xf32> to vector<8x128xf32>
    %165 = arith.mulf %163, %164 : vector<8x128xf32>
    %166 = vector.broadcast %5 : vector<1x128xf32> to vector<8x128xf32>
    %167 = arith.addf %165, %166 : vector<8x128xf32>
    %cst_50 = arith.constant dense<0.000000e+00> : vector<8x128xf32>
    %168 = tpu.matmul %151, %10, %cst_50 {dimension_numbers = #tpu.dot_dimension_numbers<[1], [0], [0], [1], [0, 0, 1, 1], [], []>} : vector<8x32xf32>, vector<32x128xf32>, vector<8x128xf32> -> vector<8x128xf32>
    %169 = arith.addf %167, %168 : vector<8x128xf32>
    %170 = math.tanh %169 : vector<8x128xf32>
    %171 = arith.negf %169 : vector<8x128xf32>
    %172 = math.exp %171 : vector<8x128xf32>
    %cst_51 = arith.constant 1.000000e+00 : f32
    %173 = vector.broadcast %cst_51 : f32 to vector<8x128xf32>
    %174 = arith.addf %173, %172 : vector<8x128xf32>
    %175 = arith.divf %173, %174 : vector<8x128xf32>
    %176 = arith.select %19, %170, %175 : vector<8x128xi1>, vector<8x128xf32>
    %177 = vector.extract_strided_slice %176 {offsets = [0, 0], sizes = [8, 32], strides = [1, 1]} : vector<8x128xf32> to vector<8x32xf32>
    %178 = vector.extract_strided_slice %176 {offsets = [0, 32], sizes = [8, 32], strides = [1, 1]} : vector<8x128xf32> to vector<8x32xf32>
    %179 = vector.extract_strided_slice %176 {offsets = [0, 64], sizes = [8, 32], strides = [1, 1]} : vector<8x128xf32> to vector<8x32xf32>
    %180 = vector.extract_strided_slice %176 {offsets = [0, 96], sizes = [8, 32], strides = [1, 1]} : vector<8x128xf32> to vector<8x32xf32>
    %181 = arith.mulf %178, %149 : vector<8x32xf32>
    %182 = arith.mulf %177, %179 : vector<8x32xf32>
    %183 = arith.addf %181, %182 : vector<8x32xf32>
    %184 = math.tanh %183 : vector<8x32xf32>
    %185 = arith.mulf %180, %184 : vector<8x32xf32>
    %186 = vector.shape_cast %185 : vector<8x32xf32> to vector<8x1x32xf32>
    %c0_52 = arith.constant 0 : index
    %c4 = arith.constant 4 : index
    %c0_53 = arith.constant 0 : index
    %187 = vector.load %arg16[%c0_52, %c4, %c0_53] : memref<8x8x32xf32, #tpu.memory_space<vmem>>, vector<8x1x32xf32>
    tpu.vector_store %arg16[%c0_52, %c4, %c0_53], %186 {strides = array<i32>} : memref<8x8x32xf32, #tpu.memory_space<vmem>>, vector<8x1x32xf32>,
    %c5_i32 = arith.constant 5 : i32
    %188 = vector.broadcast %c5_i32 : i32 to vector<8x1xi32>
    %189 = arith.cmpi eq, %1, %188 : vector<8x1xi32>
    %190 = vector.shape_cast %189 : vector<8x1xi1> to vector<8x1xi1>
    %191 = vector.broadcast %190 : vector<8x1xi1> to vector<8x32xi1>
    %192 = arith.select %191, %185, %158 : vector<8x32xi1>, vector<8x32xf32>
    %193 = vector.shape_cast %189 : vector<8x1xi1> to vector<8x1xi1>
    %194 = vector.broadcast %193 : vector<8x1xi1> to vector<8x32xi1>
    %195 = arith.select %194, %183, %161 : vector<8x32xi1>, vector<8x32xf32>
    %196 = vector.extract_strided_slice %0 {offsets = [0, 5], sizes = [8, 1], strides = [1, 1]} : vector<8x8xf32> to vector<8x1xf32>
    %197 = vector.broadcast %196 : vector<8x1xf32> to vector<8x128xf32>
    %198 = vector.broadcast %3 : vector<1x128xf32> to vector<8x128xf32>
    %199 = arith.mulf %197, %198 : vector<8x128xf32>
    %200 = vector.broadcast %5 : vector<1x128xf32> to vector<8x128xf32>
    %201 = arith.addf %199, %200 : vector<8x128xf32>
    %cst_54 = arith.constant dense<0.000000e+00> : vector<8x128xf32>
    %202 = tpu.matmul %185, %10, %cst_54 {dimension_numbers = #tpu.dot_dimension_numbers<[1], [0], [0], [1], [0, 0, 1, 1], [], []>} : vector<8x32xf32>, vector<32x128xf32>, vector<8x128xf32> -> vector<8x128xf32>
    %203 = arith.addf %201, %202 : vector<8x128xf32>
    %204 = math.tanh %203 : vector<8x128xf32>
    %205 = arith.negf %203 : vector<8x128xf32>
    %206 = math.exp %205 : vector<8x128xf32>
    %cst_55 = arith.constant 1.000000e+00 : f32
    %207 = vector.broadcast %cst_55 : f32 to vector<8x128xf32>
    %208 = arith.addf %207, %206 : vector<8x128xf32>
    %209 = arith.divf %207, %208 : vector<8x128xf32>
    %210 = arith.select %19, %204, %209 : vector<8x128xi1>, vector<8x128xf32>
    %211 = vector.extract_strided_slice %210 {offsets = [0, 0], sizes = [8, 32], strides = [1, 1]} : vector<8x128xf32> to vector<8x32xf32>
    %212 = vector.extract_strided_slice %210 {offsets = [0, 32], sizes = [8, 32], strides = [1, 1]} : vector<8x128xf32> to vector<8x32xf32>
    %213 = vector.extract_strided_slice %210 {offsets = [0, 64], sizes = [8, 32], strides = [1, 1]} : vector<8x128xf32> to vector<8x32xf32>
    %214 = vector.extract_strided_slice %210 {offsets = [0, 96], sizes = [8, 32], strides = [1, 1]} : vector<8x128xf32> to vector<8x32xf32>
    %215 = arith.mulf %212, %183 : vector<8x32xf32>
    %216 = arith.mulf %211, %213 : vector<8x32xf32>
    %217 = arith.addf %215, %216 : vector<8x32xf32>
    %218 = math.tanh %217 : vector<8x32xf32>
    %219 = arith.mulf %214, %218 : vector<8x32xf32>
    %220 = vector.shape_cast %219 : vector<8x32xf32> to vector<8x1x32xf32>
    %c0_56 = arith.constant 0 : index
    %c5 = arith.constant 5 : index
    %c0_57 = arith.constant 0 : index
    %221 = vector.load %arg16[%c0_56, %c5, %c0_57] : memref<8x8x32xf32, #tpu.memory_space<vmem>>, vector<8x1x32xf32>
    tpu.vector_store %arg16[%c0_56, %c5, %c0_57], %220 {strides = array<i32>} : memref<8x8x32xf32, #tpu.memory_space<vmem>>, vector<8x1x32xf32>,
    %c6_i32 = arith.constant 6 : i32
    %222 = vector.broadcast %c6_i32 : i32 to vector<8x1xi32>
    %223 = arith.cmpi eq, %1, %222 : vector<8x1xi32>
    %224 = vector.shape_cast %223 : vector<8x1xi1> to vector<8x1xi1>
    %225 = vector.broadcast %224 : vector<8x1xi1> to vector<8x32xi1>
    %226 = arith.select %225, %219, %192 : vector<8x32xi1>, vector<8x32xf32>
    %227 = vector.shape_cast %223 : vector<8x1xi1> to vector<8x1xi1>
    %228 = vector.broadcast %227 : vector<8x1xi1> to vector<8x32xi1>
    %229 = arith.select %228, %217, %195 : vector<8x32xi1>, vector<8x32xf32>
    %230 = vector.extract_strided_slice %0 {offsets = [0, 6], sizes = [8, 1], strides = [1, 1]} : vector<8x8xf32> to vector<8x1xf32>
    %231 = vector.broadcast %230 : vector<8x1xf32> to vector<8x128xf32>
    %232 = vector.broadcast %3 : vector<1x128xf32> to vector<8x128xf32>
    %233 = arith.mulf %231, %232 : vector<8x128xf32>
    %234 = vector.broadcast %5 : vector<1x128xf32> to vector<8x128xf32>
    %235 = arith.addf %233, %234 : vector<8x128xf32>
    %cst_58 = arith.constant dense<0.000000e+00> : vector<8x128xf32>
    %236 = tpu.matmul %219, %10, %cst_58 {dimension_numbers = #tpu.dot_dimension_numbers<[1], [0], [0], [1], [0, 0, 1, 1], [], []>} : vector<8x32xf32>, vector<32x128xf32>, vector<8x128xf32> -> vector<8x128xf32>
    %237 = arith.addf %235, %236 : vector<8x128xf32>
    %238 = math.tanh %237 : vector<8x128xf32>
    %239 = arith.negf %237 : vector<8x128xf32>
    %240 = math.exp %239 : vector<8x128xf32>
    %cst_59 = arith.constant 1.000000e+00 : f32
    %241 = vector.broadcast %cst_59 : f32 to vector<8x128xf32>
    %242 = arith.addf %241, %240 : vector<8x128xf32>
    %243 = arith.divf %241, %242 : vector<8x128xf32>
    %244 = arith.select %19, %238, %243 : vector<8x128xi1>, vector<8x128xf32>
    %245 = vector.extract_strided_slice %244 {offsets = [0, 0], sizes = [8, 32], strides = [1, 1]} : vector<8x128xf32> to vector<8x32xf32>
    %246 = vector.extract_strided_slice %244 {offsets = [0, 32], sizes = [8, 32], strides = [1, 1]} : vector<8x128xf32> to vector<8x32xf32>
    %247 = vector.extract_strided_slice %244 {offsets = [0, 64], sizes = [8, 32], strides = [1, 1]} : vector<8x128xf32> to vector<8x32xf32>
    %248 = vector.extract_strided_slice %244 {offsets = [0, 96], sizes = [8, 32], strides = [1, 1]} : vector<8x128xf32> to vector<8x32xf32>
    %249 = arith.mulf %246, %217 : vector<8x32xf32>
    %250 = arith.mulf %245, %247 : vector<8x32xf32>
    %251 = arith.addf %249, %250 : vector<8x32xf32>
    %252 = math.tanh %251 : vector<8x32xf32>
    %253 = arith.mulf %248, %252 : vector<8x32xf32>
    %254 = vector.shape_cast %253 : vector<8x32xf32> to vector<8x1x32xf32>
    %c0_60 = arith.constant 0 : index
    %c6_61 = arith.constant 6 : index
    %c0_62 = arith.constant 0 : index
    %255 = vector.load %arg16[%c0_60, %c6_61, %c0_62] : memref<8x8x32xf32, #tpu.memory_space<vmem>>, vector<8x1x32xf32>
    tpu.vector_store %arg16[%c0_60, %c6_61, %c0_62], %254 {strides = array<i32>} : memref<8x8x32xf32, #tpu.memory_space<vmem>>, vector<8x1x32xf32>,
    %c7_i32 = arith.constant 7 : i32
    %256 = vector.broadcast %c7_i32 : i32 to vector<8x1xi32>
    %257 = arith.cmpi eq, %1, %256 : vector<8x1xi32>
    %258 = vector.shape_cast %257 : vector<8x1xi1> to vector<8x1xi1>
    %259 = vector.broadcast %258 : vector<8x1xi1> to vector<8x32xi1>
    %260 = arith.select %259, %253, %226 : vector<8x32xi1>, vector<8x32xf32>
    %261 = vector.shape_cast %257 : vector<8x1xi1> to vector<8x1xi1>
    %262 = vector.broadcast %261 : vector<8x1xi1> to vector<8x32xi1>
    %263 = arith.select %262, %251, %229 : vector<8x32xi1>, vector<8x32xf32>
    %264 = vector.extract_strided_slice %0 {offsets = [0, 7], sizes = [8, 1], strides = [1, 1]} : vector<8x8xf32> to vector<8x1xf32>
    %265 = vector.broadcast %264 : vector<8x1xf32> to vector<8x128xf32>
    %266 = vector.broadcast %3 : vector<1x128xf32> to vector<8x128xf32>
    %267 = arith.mulf %265, %266 : vector<8x128xf32>
    %268 = vector.broadcast %5 : vector<1x128xf32> to vector<8x128xf32>
    %269 = arith.addf %267, %268 : vector<8x128xf32>
    %cst_63 = arith.constant dense<0.000000e+00> : vector<8x128xf32>
    %270 = tpu.matmul %253, %10, %cst_63 {dimension_numbers = #tpu.dot_dimension_numbers<[1], [0], [0], [1], [0, 0, 1, 1], [], []>} : vector<8x32xf32>, vector<32x128xf32>, vector<8x128xf32> -> vector<8x128xf32>
    %271 = arith.addf %269, %270 : vector<8x128xf32>
    %272 = math.tanh %271 : vector<8x128xf32>
    %273 = arith.negf %271 : vector<8x128xf32>
    %274 = math.exp %273 : vector<8x128xf32>
    %cst_64 = arith.constant 1.000000e+00 : f32
    %275 = vector.broadcast %cst_64 : f32 to vector<8x128xf32>
    %276 = arith.addf %275, %274 : vector<8x128xf32>
    %277 = arith.divf %275, %276 : vector<8x128xf32>
    %278 = arith.select %19, %272, %277 : vector<8x128xi1>, vector<8x128xf32>
    %279 = vector.extract_strided_slice %278 {offsets = [0, 0], sizes = [8, 32], strides = [1, 1]} : vector<8x128xf32> to vector<8x32xf32>
    %280 = vector.extract_strided_slice %278 {offsets = [0, 32], sizes = [8, 32], strides = [1, 1]} : vector<8x128xf32> to vector<8x32xf32>
    %281 = vector.extract_strided_slice %278 {offsets = [0, 64], sizes = [8, 32], strides = [1, 1]} : vector<8x128xf32> to vector<8x32xf32>
    %282 = vector.extract_strided_slice %278 {offsets = [0, 96], sizes = [8, 32], strides = [1, 1]} : vector<8x128xf32> to vector<8x32xf32>
    %283 = arith.mulf %280, %251 : vector<8x32xf32>
    %284 = arith.mulf %279, %281 : vector<8x32xf32>
    %285 = arith.addf %283, %284 : vector<8x32xf32>
    %286 = math.tanh %285 : vector<8x32xf32>
    %287 = arith.mulf %282, %286 : vector<8x32xf32>
    %288 = vector.shape_cast %287 : vector<8x32xf32> to vector<8x1x32xf32>
    %c0_65 = arith.constant 0 : index
    %c7 = arith.constant 7 : index
    %c0_66 = arith.constant 0 : index
    %289 = vector.load %arg16[%c0_65, %c7, %c0_66] : memref<8x8x32xf32, #tpu.memory_space<vmem>>, vector<8x1x32xf32>
    tpu.vector_store %arg16[%c0_65, %c7, %c0_66], %288 {strides = array<i32>} : memref<8x8x32xf32, #tpu.memory_space<vmem>>, vector<8x1x32xf32>,
    %c8_i32 = arith.constant 8 : i32
    %290 = vector.broadcast %c8_i32 : i32 to vector<8x1xi32>
    %291 = arith.cmpi eq, %1, %290 : vector<8x1xi32>
    %292 = vector.shape_cast %291 : vector<8x1xi1> to vector<8x1xi1>
    %293 = vector.broadcast %292 : vector<8x1xi1> to vector<8x32xi1>
    %294 = arith.select %293, %287, %260 : vector<8x32xi1>, vector<8x32xf32>
    %295 = vector.shape_cast %291 : vector<8x1xi1> to vector<8x1xi1>
    %296 = vector.broadcast %295 : vector<8x1xi1> to vector<8x32xi1>
    %297 = arith.select %296, %285, %263 : vector<8x32xi1>, vector<8x32xf32>
    %298 = vector.extract_strided_slice %2 {offsets = [0, 0], sizes = [8, 1], strides = [1, 1]} : vector<8x6xf32> to vector<8x1xf32>
    %299 = vector.broadcast %298 : vector<8x1xf32> to vector<8x128xf32>
    %300 = vector.broadcast %4 : vector<1x128xf32> to vector<8x128xf32>
    %301 = arith.mulf %299, %300 : vector<8x128xf32>
    %302 = vector.broadcast %6 : vector<1x128xf32> to vector<8x128xf32>
    %303 = arith.addf %301, %302 : vector<8x128xf32>
    %cst_67 = arith.constant dense<0.000000e+00> : vector<8x128xf32>
    %304 = tpu.matmul %294, %11, %cst_67 {dimension_numbers = #tpu.dot_dimension_numbers<[1], [0], [0], [1], [0, 0, 1, 1], [], []>} : vector<8x32xf32>, vector<32x128xf32>, vector<8x128xf32> -> vector<8x128xf32>
    %305 = arith.addf %303, %304 : vector<8x128xf32>
    %306 = math.tanh %305 : vector<8x128xf32>
    %307 = arith.negf %305 : vector<8x128xf32>
    %308 = math.exp %307 : vector<8x128xf32>
    %cst_68 = arith.constant 1.000000e+00 : f32
    %309 = vector.broadcast %cst_68 : f32 to vector<8x128xf32>
    %310 = arith.addf %309, %308 : vector<8x128xf32>
    %311 = arith.divf %309, %310 : vector<8x128xf32>
    %312 = arith.select %19, %306, %311 : vector<8x128xi1>, vector<8x128xf32>
    %313 = vector.extract_strided_slice %312 {offsets = [0, 0], sizes = [8, 32], strides = [1, 1]} : vector<8x128xf32> to vector<8x32xf32>
    %314 = vector.extract_strided_slice %312 {offsets = [0, 32], sizes = [8, 32], strides = [1, 1]} : vector<8x128xf32> to vector<8x32xf32>
    %315 = vector.extract_strided_slice %312 {offsets = [0, 64], sizes = [8, 32], strides = [1, 1]} : vector<8x128xf32> to vector<8x32xf32>
    %316 = vector.extract_strided_slice %312 {offsets = [0, 96], sizes = [8, 32], strides = [1, 1]} : vector<8x128xf32> to vector<8x32xf32>
    %317 = arith.mulf %314, %297 : vector<8x32xf32>
    %318 = arith.mulf %313, %315 : vector<8x32xf32>
    %319 = arith.addf %317, %318 : vector<8x32xf32>
    %320 = math.tanh %319 : vector<8x32xf32>
    %321 = arith.mulf %316, %320 : vector<8x32xf32>
    %322 = vector.shape_cast %321 : vector<8x32xf32> to vector<8x1x32xf32>
    %c0_69 = arith.constant 0 : index
    %c0_70 = arith.constant 0 : index
    %c0_71 = arith.constant 0 : index
    %323 = vector.load %arg17[%c0_69, %c0_70, %c0_71] : memref<8x8x32xf32, #tpu.memory_space<vmem>>, vector<8x1x32xf32>
    tpu.vector_store %arg17[%c0_69, %c0_70, %c0_71], %322 {strides = array<i32>} : memref<8x8x32xf32, #tpu.memory_space<vmem>>, vector<8x1x32xf32>,
    %324 = vector.extract_strided_slice %2 {offsets = [0, 1], sizes = [8, 1], strides = [1, 1]} : vector<8x6xf32> to vector<8x1xf32>
    %325 = vector.broadcast %324 : vector<8x1xf32> to vector<8x128xf32>
    %326 = vector.broadcast %4 : vector<1x128xf32> to vector<8x128xf32>
    %327 = arith.mulf %325, %326 : vector<8x128xf32>
    %328 = vector.broadcast %6 : vector<1x128xf32> to vector<8x128xf32>
    %329 = arith.addf %327, %328 : vector<8x128xf32>
    %cst_72 = arith.constant dense<0.000000e+00> : vector<8x128xf32>
    %330 = tpu.matmul %321, %11, %cst_72 {dimension_numbers = #tpu.dot_dimension_numbers<[1], [0], [0], [1], [0, 0, 1, 1], [], []>} : vector<8x32xf32>, vector<32x128xf32>, vector<8x128xf32> -> vector<8x128xf32>
    %331 = arith.addf %329, %330 : vector<8x128xf32>
    %332 = math.tanh %331 : vector<8x128xf32>
    %333 = arith.negf %331 : vector<8x128xf32>
    %334 = math.exp %333 : vector<8x128xf32>
    %cst_73 = arith.constant 1.000000e+00 : f32
    %335 = vector.broadcast %cst_73 : f32 to vector<8x128xf32>
    %336 = arith.addf %335, %334 : vector<8x128xf32>
    %337 = arith.divf %335, %336 : vector<8x128xf32>
    %338 = arith.select %19, %332, %337 : vector<8x128xi1>, vector<8x128xf32>
    %339 = vector.extract_strided_slice %338 {offsets = [0, 0], sizes = [8, 32], strides = [1, 1]} : vector<8x128xf32> to vector<8x32xf32>
    %340 = vector.extract_strided_slice %338 {offsets = [0, 32], sizes = [8, 32], strides = [1, 1]} : vector<8x128xf32> to vector<8x32xf32>
    %341 = vector.extract_strided_slice %338 {offsets = [0, 64], sizes = [8, 32], strides = [1, 1]} : vector<8x128xf32> to vector<8x32xf32>
    %342 = vector.extract_strided_slice %338 {offsets = [0, 96], sizes = [8, 32], strides = [1, 1]} : vector<8x128xf32> to vector<8x32xf32>
    %343 = arith.mulf %340, %319 : vector<8x32xf32>
    %344 = arith.mulf %339, %341 : vector<8x32xf32>
    %345 = arith.addf %343, %344 : vector<8x32xf32>
    %346 = math.tanh %345 : vector<8x32xf32>
    %347 = arith.mulf %342, %346 : vector<8x32xf32>
    %348 = vector.shape_cast %347 : vector<8x32xf32> to vector<8x1x32xf32>
    %c0_74 = arith.constant 0 : index
    %c1_75 = arith.constant 1 : index
    %c0_76 = arith.constant 0 : index
    %349 = vector.load %arg17[%c0_74, %c1_75, %c0_76] : memref<8x8x32xf32, #tpu.memory_space<vmem>>, vector<8x1x32xf32>
    tpu.vector_store %arg17[%c0_74, %c1_75, %c0_76], %348 {strides = array<i32>} : memref<8x8x32xf32, #tpu.memory_space<vmem>>, vector<8x1x32xf32>,
    %350 = vector.extract_strided_slice %2 {offsets = [0, 2], sizes = [8, 1], strides = [1, 1]} : vector<8x6xf32> to vector<8x1xf32>
    %351 = vector.broadcast %350 : vector<8x1xf32> to vector<8x128xf32>
    %352 = vector.broadcast %4 : vector<1x128xf32> to vector<8x128xf32>
    %353 = arith.mulf %351, %352 : vector<8x128xf32>
    %354 = vector.broadcast %6 : vector<1x128xf32> to vector<8x128xf32>
    %355 = arith.addf %353, %354 : vector<8x128xf32>
    %cst_77 = arith.constant dense<0.000000e+00> : vector<8x128xf32>
    %356 = tpu.matmul %347, %11, %cst_77 {dimension_numbers = #tpu.dot_dimension_numbers<[1], [0], [0], [1], [0, 0, 1, 1], [], []>} : vector<8x32xf32>, vector<32x128xf32>, vector<8x128xf32> -> vector<8x128xf32>
    %357 = arith.addf %355, %356 : vector<8x128xf32>
    %358 = math.tanh %357 : vector<8x128xf32>
    %359 = arith.negf %357 : vector<8x128xf32>
    %360 = math.exp %359 : vector<8x128xf32>
    %cst_78 = arith.constant 1.000000e+00 : f32
    %361 = vector.broadcast %cst_78 : f32 to vector<8x128xf32>
    %362 = arith.addf %361, %360 : vector<8x128xf32>
    %363 = arith.divf %361, %362 : vector<8x128xf32>
    %364 = arith.select %19, %358, %363 : vector<8x128xi1>, vector<8x128xf32>
    %365 = vector.extract_strided_slice %364 {offsets = [0, 0], sizes = [8, 32], strides = [1, 1]} : vector<8x128xf32> to vector<8x32xf32>
    %366 = vector.extract_strided_slice %364 {offsets = [0, 32], sizes = [8, 32], strides = [1, 1]} : vector<8x128xf32> to vector<8x32xf32>
    %367 = vector.extract_strided_slice %364 {offsets = [0, 64], sizes = [8, 32], strides = [1, 1]} : vector<8x128xf32> to vector<8x32xf32>
    %368 = vector.extract_strided_slice %364 {offsets = [0, 96], sizes = [8, 32], strides = [1, 1]} : vector<8x128xf32> to vector<8x32xf32>
    %369 = arith.mulf %366, %345 : vector<8x32xf32>
    %370 = arith.mulf %365, %367 : vector<8x32xf32>
    %371 = arith.addf %369, %370 : vector<8x32xf32>
    %372 = math.tanh %371 : vector<8x32xf32>
    %373 = arith.mulf %368, %372 : vector<8x32xf32>
    %374 = vector.shape_cast %373 : vector<8x32xf32> to vector<8x1x32xf32>
    %c0_79 = arith.constant 0 : index
    %c2_80 = arith.constant 2 : index
    %c0_81 = arith.constant 0 : index
    %375 = vector.load %arg17[%c0_79, %c2_80, %c0_81] : memref<8x8x32xf32, #tpu.memory_space<vmem>>, vector<8x1x32xf32>
    tpu.vector_store %arg17[%c0_79, %c2_80, %c0_81], %374 {strides = array<i32>} : memref<8x8x32xf32, #tpu.memory_space<vmem>>, vector<8x1x32xf32>,
    %376 = vector.extract_strided_slice %2 {offsets = [0, 3], sizes = [8, 1], strides = [1, 1]} : vector<8x6xf32> to vector<8x1xf32>
    %377 = vector.broadcast %376 : vector<8x1xf32> to vector<8x128xf32>
    %378 = vector.broadcast %4 : vector<1x128xf32> to vector<8x128xf32>
    %379 = arith.mulf %377, %378 : vector<8x128xf32>
    %380 = vector.broadcast %6 : vector<1x128xf32> to vector<8x128xf32>
    %381 = arith.addf %379, %380 : vector<8x128xf32>
    %cst_82 = arith.constant dense<0.000000e+00> : vector<8x128xf32>
    %382 = tpu.matmul %373, %11, %cst_82 {dimension_numbers = #tpu.dot_dimension_numbers<[1], [0], [0], [1], [0, 0, 1, 1], [], []>} : vector<8x32xf32>, vector<32x128xf32>, vector<8x128xf32> -> vector<8x128xf32>
    %383 = arith.addf %381, %382 : vector<8x128xf32>
    %384 = math.tanh %383 : vector<8x128xf32>
    %385 = arith.negf %383 : vector<8x128xf32>
    %386 = math.exp %385 : vector<8x128xf32>
    %cst_83 = arith.constant 1.000000e+00 : f32
    %387 = vector.broadcast %cst_83 : f32 to vector<8x128xf32>
    %388 = arith.addf %387, %386 : vector<8x128xf32>
    %389 = arith.divf %387, %388 : vector<8x128xf32>
    %390 = arith.select %19, %384, %389 : vector<8x128xi1>, vector<8x128xf32>
    %391 = vector.extract_strided_slice %390 {offsets = [0, 0], sizes = [8, 32], strides = [1, 1]} : vector<8x128xf32> to vector<8x32xf32>
    %392 = vector.extract_strided_slice %390 {offsets = [0, 32], sizes = [8, 32], strides = [1, 1]} : vector<8x128xf32> to vector<8x32xf32>
    %393 = vector.extract_strided_slice %390 {offsets = [0, 64], sizes = [8, 32], strides = [1, 1]} : vector<8x128xf32> to vector<8x32xf32>
    %394 = vector.extract_strided_slice %390 {offsets = [0, 96], sizes = [8, 32], strides = [1, 1]} : vector<8x128xf32> to vector<8x32xf32>
    %395 = arith.mulf %392, %371 : vector<8x32xf32>
    %396 = arith.mulf %391, %393 : vector<8x32xf32>
    %397 = arith.addf %395, %396 : vector<8x32xf32>
    %398 = math.tanh %397 : vector<8x32xf32>
    %399 = arith.mulf %394, %398 : vector<8x32xf32>
    %400 = vector.shape_cast %399 : vector<8x32xf32> to vector<8x1x32xf32>
    %c0_84 = arith.constant 0 : index
    %c3_85 = arith.constant 3 : index
    %c0_86 = arith.constant 0 : index
    %401 = vector.load %arg17[%c0_84, %c3_85, %c0_86] : memref<8x8x32xf32, #tpu.memory_space<vmem>>, vector<8x1x32xf32>
    tpu.vector_store %arg17[%c0_84, %c3_85, %c0_86], %400 {strides = array<i32>} : memref<8x8x32xf32, #tpu.memory_space<vmem>>, vector<8x1x32xf32>,
    %402 = vector.extract_strided_slice %2 {offsets = [0, 4], sizes = [8, 1], strides = [1, 1]} : vector<8x6xf32> to vector<8x1xf32>
    %403 = vector.broadcast %402 : vector<8x1xf32> to vector<8x128xf32>
    %404 = vector.broadcast %4 : vector<1x128xf32> to vector<8x128xf32>
    %405 = arith.mulf %403, %404 : vector<8x128xf32>
    %406 = vector.broadcast %6 : vector<1x128xf32> to vector<8x128xf32>
    %407 = arith.addf %405, %406 : vector<8x128xf32>
    %cst_87 = arith.constant dense<0.000000e+00> : vector<8x128xf32>
    %408 = tpu.matmul %399, %11, %cst_87 {dimension_numbers = #tpu.dot_dimension_numbers<[1], [0], [0], [1], [0, 0, 1, 1], [], []>} : vector<8x32xf32>, vector<32x128xf32>, vector<8x128xf32> -> vector<8x128xf32>
    %409 = arith.addf %407, %408 : vector<8x128xf32>
    %410 = math.tanh %409 : vector<8x128xf32>
    %411 = arith.negf %409 : vector<8x128xf32>
    %412 = math.exp %411 : vector<8x128xf32>
    %cst_88 = arith.constant 1.000000e+00 : f32
    %413 = vector.broadcast %cst_88 : f32 to vector<8x128xf32>
    %414 = arith.addf %413, %412 : vector<8x128xf32>
    %415 = arith.divf %413, %414 : vector<8x128xf32>
    %416 = arith.select %19, %410, %415 : vector<8x128xi1>, vector<8x128xf32>
    %417 = vector.extract_strided_slice %416 {offsets = [0, 0], sizes = [8, 32], strides = [1, 1]} : vector<8x128xf32> to vector<8x32xf32>
    %418 = vector.extract_strided_slice %416 {offsets = [0, 32], sizes = [8, 32], strides = [1, 1]} : vector<8x128xf32> to vector<8x32xf32>
    %419 = vector.extract_strided_slice %416 {offsets = [0, 64], sizes = [8, 32], strides = [1, 1]} : vector<8x128xf32> to vector<8x32xf32>
    %420 = vector.extract_strided_slice %416 {offsets = [0, 96], sizes = [8, 32], strides = [1, 1]} : vector<8x128xf32> to vector<8x32xf32>
    %421 = arith.mulf %418, %397 : vector<8x32xf32>
    %422 = arith.mulf %417, %419 : vector<8x32xf32>
    %423 = arith.addf %421, %422 : vector<8x32xf32>
    %424 = math.tanh %423 : vector<8x32xf32>
    %425 = arith.mulf %420, %424 : vector<8x32xf32>
    %426 = vector.shape_cast %425 : vector<8x32xf32> to vector<8x1x32xf32>
    %c0_89 = arith.constant 0 : index
    %c4_90 = arith.constant 4 : index
    %c0_91 = arith.constant 0 : index
    %427 = vector.load %arg17[%c0_89, %c4_90, %c0_91] : memref<8x8x32xf32, #tpu.memory_space<vmem>>, vector<8x1x32xf32>
    tpu.vector_store %arg17[%c0_89, %c4_90, %c0_91], %426 {strides = array<i32>} : memref<8x8x32xf32, #tpu.memory_space<vmem>>, vector<8x1x32xf32>,
    %428 = vector.extract_strided_slice %2 {offsets = [0, 5], sizes = [8, 1], strides = [1, 1]} : vector<8x6xf32> to vector<8x1xf32>
    %429 = vector.broadcast %428 : vector<8x1xf32> to vector<8x128xf32>
    %430 = vector.broadcast %4 : vector<1x128xf32> to vector<8x128xf32>
    %431 = arith.mulf %429, %430 : vector<8x128xf32>
    %432 = vector.broadcast %6 : vector<1x128xf32> to vector<8x128xf32>
    %433 = arith.addf %431, %432 : vector<8x128xf32>
    %cst_92 = arith.constant dense<0.000000e+00> : vector<8x128xf32>
    %434 = tpu.matmul %425, %11, %cst_92 {dimension_numbers = #tpu.dot_dimension_numbers<[1], [0], [0], [1], [0, 0, 1, 1], [], []>} : vector<8x32xf32>, vector<32x128xf32>, vector<8x128xf32> -> vector<8x128xf32>
    %435 = arith.addf %433, %434 : vector<8x128xf32>
    %436 = math.tanh %435 : vector<8x128xf32>
    %437 = arith.negf %435 : vector<8x128xf32>
    %438 = math.exp %437 : vector<8x128xf32>
    %cst_93 = arith.constant 1.000000e+00 : f32
    %439 = vector.broadcast %cst_93 : f32 to vector<8x128xf32>
    %440 = arith.addf %439, %438 : vector<8x128xf32>
    %441 = arith.divf %439, %440 : vector<8x128xf32>
    %442 = arith.select %19, %436, %441 : vector<8x128xi1>, vector<8x128xf32>
    %443 = vector.extract_strided_slice %442 {offsets = [0, 0], sizes = [8, 32], strides = [1, 1]} : vector<8x128xf32> to vector<8x32xf32>
    %444 = vector.extract_strided_slice %442 {offsets = [0, 32], sizes = [8, 32], strides = [1, 1]} : vector<8x128xf32> to vector<8x32xf32>
    %445 = vector.extract_strided_slice %442 {offsets = [0, 64], sizes = [8, 32], strides = [1, 1]} : vector<8x128xf32> to vector<8x32xf32>
    %446 = vector.extract_strided_slice %442 {offsets = [0, 96], sizes = [8, 32], strides = [1, 1]} : vector<8x128xf32> to vector<8x32xf32>
    %447 = arith.mulf %444, %423 : vector<8x32xf32>
    %448 = arith.mulf %443, %445 : vector<8x32xf32>
    %449 = arith.addf %447, %448 : vector<8x32xf32>
    %450 = math.tanh %449 : vector<8x32xf32>
    %451 = arith.mulf %446, %450 : vector<8x32xf32>
    %452 = vector.shape_cast %451 : vector<8x32xf32> to vector<8x1x32xf32>
    %c0_94 = arith.constant 0 : index
    %c5_95 = arith.constant 5 : index
    %c0_96 = arith.constant 0 : index
    %453 = vector.load %arg17[%c0_94, %c5_95, %c0_96] : memref<8x8x32xf32, #tpu.memory_space<vmem>>, vector<8x1x32xf32>
    tpu.vector_store %arg17[%c0_94, %c5_95, %c0_96], %452 {strides = array<i32>} : memref<8x8x32xf32, #tpu.memory_space<vmem>>, vector<8x1x32xf32>,
    %c0_97 = arith.constant 0 : index
    %c0_98 = arith.constant 0 : index
    %c0_99 = arith.constant 0 : index
    %454 = vector.load %arg16[%c0_97, %c0_98, %c0_99] : memref<8x8x32xf32, #tpu.memory_space<vmem>>, vector<8x8x32xf32>
    %455 = vector.shape_cast %454 : vector<8x8x32xf32> to vector<64x32xf32>
    %c0_100 = arith.constant 0 : index
    %c0_101 = arith.constant 0 : index
    %c0_102 = arith.constant 0 : index
    %456 = vector.load %arg17[%c0_100, %c0_101, %c0_102] : memref<8x8x32xf32, #tpu.memory_space<vmem>>, vector<8x8x32xf32>
    %457 = vector.shape_cast %456 : vector<8x8x32xf32> to vector<64x32xf32>
    %cst_103 = arith.constant dense<0.000000e+00> : vector<64x32xf32>
    %458 = tpu.matmul %455, %12, %cst_103 {dimension_numbers = #tpu.dot_dimension_numbers<[1], [0], [0], [1], [0, 0, 1, 1], [], []>} : vector<64x32xf32>, vector<32x32xf32>, vector<64x32xf32> -> vector<64x32xf32>
    %459 = vector.broadcast %7 : vector<1x32xf32> to vector<64x32xf32>
    %460 = arith.addf %458, %459 : vector<64x32xf32>
    %461 = vector.shape_cast %460 : vector<64x32xf32> to vector<8x8x32xf32>
    %cst_104 = arith.constant dense<0.000000e+00> : vector<64x32xf32>
    %462 = tpu.matmul %457, %13, %cst_104 {dimension_numbers = #tpu.dot_dimension_numbers<[1], [0], [0], [1], [0, 0, 1, 1], [], []>} : vector<64x32xf32>, vector<32x32xf32>, vector<64x32xf32> -> vector<64x32xf32>
    %463 = vector.broadcast %8 : vector<1x32xf32> to vector<64x32xf32>
    %464 = arith.addf %462, %463 : vector<64x32xf32>
    %465 = vector.shape_cast %464 : vector<64x32xf32> to vector<8x8x32xf32>
    %466 = tpu.iota {dimensions = array<i32: 1>} : vector<8x8xi32>
    %cst_105 = arith.constant 0.000000e+00 : f32
    %467 = vector.broadcast %cst_105 : f32 to vector<8x8xf32>
    %468 = arith.cmpf one, %0, %467 : vector<8x8xf32>
    %c0_i32 = arith.constant 0 : i32
    %469 = vector.broadcast %c0_i32 : i32 to vector<8x8xi32>
    %470 = arith.cmpi eq, %466, %469 : vector<8x8xi32>
    %471 = arith.ori %468, %470 : vector<8x8xi1>
    %cst_106 = arith.constant 0.000000e+00 : f32
    %cst_107 = arith.constant -1.000000e+03 : f32
    %472 = vector.broadcast %cst_106 : f32 to vector<8x8xf32>
    %473 = vector.broadcast %cst_107 : f32 to vector<8x8xf32>
    %474 = arith.select %471, %472, %473 : vector<8x8xi1>, vector<8x8xf32>
    %475 = vector.shape_cast %9 : vector<1x32xf32> to vector<1x1x1x32xf32>
    %476 = vector.extract_strided_slice %465 {offsets = [0, 0, 0], sizes = [8, 6, 32], strides = [1, 1, 1]} : vector<8x8x32xf32> to vector<8x6x32xf32>
    %477 = vector.shape_cast %461 : vector<8x8x32xf32> to vector<8x1x8x32xf32>
    %478 = vector.shape_cast %476 : vector<8x6x32xf32> to vector<8x6x1x32xf32>
    %479 = vector.broadcast %477 : vector<8x1x8x32xf32> to vector<8x6x8x32xf32>
    %480 = vector.broadcast %478 : vector<8x6x1x32xf32> to vector<8x6x8x32xf32>
    %481 = arith.addf %479, %480 : vector<8x6x8x32xf32>
    %482 = math.tanh %481 : vector<8x6x8x32xf32>
    %483 = vector.broadcast %475 : vector<1x1x1x32xf32> to vector<8x6x8x32xf32>
    %484 = arith.mulf %482, %483 : vector<8x6x8x32xf32>
    %cst_108 = arith.constant dense<0.000000e+00> : vector<8x6x8xf32>
    %485 = vector.multi_reduction <add>, %484, %cst_108 [3] : vector<8x6x8x32xf32> to vector<8x6x8xf32>
    %486 = vector.shape_cast %474 : vector<8x8xf32> to vector<8x1x8xf32>
    %487 = vector.broadcast %486 : vector<8x1x8xf32> to vector<8x6x8xf32>
    %488 = arith.addf %485, %487 : vector<8x6x8xf32>
    %cst_109 = arith.constant dense<0xFF800000> : vector<8x6xf32>
    %489 = vector.multi_reduction <maximumf>, %488, %cst_109 [2] : vector<8x6x8xf32> to vector<8x6xf32>
    %490 = vector.shape_cast %489 : vector<8x6xf32> to vector<8x6x1xf32>
    %491 = vector.broadcast %490 : vector<8x6x1xf32> to vector<8x6x8xf32>
    %492 = arith.subf %488, %491 : vector<8x6x8xf32>
    %493 = math.exp %492 : vector<8x6x8xf32>
    %cst_110 = arith.constant dense<0.000000e+00> : vector<8x6xf32>
    %494 = vector.multi_reduction <add>, %493, %cst_110 [2] : vector<8x6x8xf32> to vector<8x6xf32>
    %495 = vector.shape_cast %494 : vector<8x6xf32> to vector<8x6x1xf32>
    %496 = vector.broadcast %495 : vector<8x6x1xf32> to vector<8x6x8xf32>
    %497 = arith.divf %493, %496 : vector<8x6x8xf32>
    %c0_111 = arith.constant 0 : index
    %c0_112 = arith.constant 0 : index
    %c0_113 = arith.constant 0 : index
    %498 = vector.load %arg15[%c0_111, %c0_112, %c0_113] : memref<8x6x8xf32, #tpu.memory_space<vmem>>, vector<8x6x8xf32>
    tpu.vector_store %arg15[%c0_111, %c0_112, %c0_113], %497 {strides = array<i32>} : memref<8x6x8xf32, #tpu.memory_space<vmem>>, vector<8x6x8xf32>,
    return
  }
  func.func @transform_0(%arg0: i32) -> (i32, i32) {
    %c0_i32 = arith.constant 0 : i32
    %c0_i32_0 = arith.constant 0 : i32
    return %arg0, %c0_i32 : i32, i32
  }
  func.func @transform_1(%arg0: i32) -> (i32, i32) {
    %c0_i32 = arith.constant 0 : i32
    %c0_i32_0 = arith.constant 0 : i32
    return %arg0, %c0_i32 : i32, i32
  }
  func.func @transform_2(%arg0: i32) -> (i32, i32) {
    %c0_i32 = arith.constant 0 : i32
    %c0_i32_0 = arith.constant 0 : i32
    return %arg0, %c0_i32 : i32, i32
  }
  func.func @transform_3(%arg0: i32) -> (i32, i32) {
    %c0_i32 = arith.constant 0 : i32
    %c0_i32_0 = arith.constant 0 : i32
    %c0_i32_1 = arith.constant 0 : i32
    return %c0_i32, %c0_i32_0 : i32, i32
  }
  func.func @transform_4(%arg0: i32) -> (i32, i32) {
    %c0_i32 = arith.constant 0 : i32
    %c0_i32_0 = arith.constant 0 : i32
    %c0_i32_1 = arith.constant 0 : i32
    return %c0_i32, %c0_i32_0 : i32, i32
  }
  func.func @transform_5(%arg0: i32) -> (i32, i32) {
    %c0_i32 = arith.constant 0 : i32
    %c0_i32_0 = arith.constant 0 : i32
    %c0_i32_1 = arith.constant 0 : i32
    return %c0_i32, %c0_i32_0 : i32, i32
  }
  func.func @transform_6(%arg0: i32) -> (i32, i32) {
    %c0_i32 = arith.constant 0 : i32
    %c0_i32_0 = arith.constant 0 : i32
    %c0_i32_1 = arith.constant 0 : i32
    return %c0_i32, %c0_i32_0 : i32, i32
  }
  func.func @transform_7(%arg0: i32) -> (i32, i32) {
    %c0_i32 = arith.constant 0 : i32
    %c0_i32_0 = arith.constant 0 : i32
    %c0_i32_1 = arith.constant 0 : i32
    return %c0_i32, %c0_i32_0 : i32, i32
  }
  func.func @transform_8(%arg0: i32) -> (i32, i32) {
    %c0_i32 = arith.constant 0 : i32
    %c0_i32_0 = arith.constant 0 : i32
    %c0_i32_1 = arith.constant 0 : i32
    return %c0_i32, %c0_i32_0 : i32, i32
  }
  func.func @transform_9(%arg0: i32) -> (i32, i32) {
    %c0_i32 = arith.constant 0 : i32
    %c0_i32_0 = arith.constant 0 : i32
    %c0_i32_1 = arith.constant 0 : i32
    return %c0_i32, %c0_i32_0 : i32, i32
  }
  func.func @transform_10(%arg0: i32) -> (i32, i32) {
    %c0_i32 = arith.constant 0 : i32
    %c0_i32_0 = arith.constant 0 : i32
    %c0_i32_1 = arith.constant 0 : i32
    return %c0_i32, %c0_i32_0 : i32, i32
  }
  func.func @transform_11(%arg0: i32) -> (i32, i32) {
    %c0_i32 = arith.constant 0 : i32
    %c0_i32_0 = arith.constant 0 : i32
    %c0_i32_1 = arith.constant 0 : i32
    return %c0_i32, %c0_i32_0 : i32, i32
  }
  func.func @transform_12(%arg0: i32) -> (i32, i32) {
    %c0_i32 = arith.constant 0 : i32
    %c0_i32_0 = arith.constant 0 : i32
    %c0_i32_1 = arith.constant 0 : i32
    return %c0_i32, %c0_i32_0 : i32, i32
  }
  func.func @transform_13(%arg0: i32) -> (i32, i32) {
    %c0_i32 = arith.constant 0 : i32
    %c0_i32_0 = arith.constant 0 : i32
    %c0_i32_1 = arith.constant 0 : i32
    return %c0_i32, %c0_i32_0 : i32, i32
  }
  func.func @transform_14(%arg0: i32) -> (i32, i32, i32) {
    %c0_i32 = arith.constant 0 : i32
    %c0_i32_0 = arith.constant 0 : i32
    %c0_i32_1 = arith.constant 0 : i32
    return %arg0, %c0_i32, %c0_i32_0 : i32, i32, i32
  }
}

</mosaic_0001>

<bundles_post_ra>
// kernel: tpu_custom_call.1
= control target key start
LH: loop header
LB: loop body
LE: loop exit
PB: predicated region body
PF: predicated region fallthrough
CT: control target
= control target key end

     0   :  { %19 = vsyncpa [#allocation5], 0  ;;  %s8443_s0 = inlined_call_operand.vmem [shape: f32[16,8], index: 0, kind: input, shape index: {}]   ;;  %s8444_s1 = inlined_call_operand.vmem [shape: s32[16,1], index: 1, kind: input, shape index: {}]   ;;  %s8445_s2 = inlined_call_operand.vmem [shape: f32[16,6], index: 2, kind: input, shape index: {}]   ;;  %s8446_s3 = inlined_call_operand.vmem [shape: f32[1,128], index: 3, kind: input, shape index: {}]   ;;  %s8447_s4 = inlined_call_operand.vmem [shape: f32[32,128], index: 4, kind: input, shape index: {}]   ;;  %s8448_s5 = inlined_call_operand.vmem [shape: f32[1,128], index: 5, kind: input, shape index: {}]   ;;  %s8449_s6 = inlined_call_operand.vmem [shape: f32[1,128], index: 6, kind: input, shape index: {}]   ;;  %s8450_s7 = inlined_call_operand.vmem [shape: f32[32,128], index: 7, kind: input, shape index: {}]   ;;  %s8451_s8 = inlined_call_operand.vmem [shape: f32[1,128], index: 8, kind: input, shape index: {}]   ;;  %s8452_s9 = inlined_call_operand.hbm [shape: f32[32,32], index: 9, kind: input, shape index: {}]   ;;  %s8453_s10 = inlined_call_operand.vmem [shape: f32[1,32], index: 10, kind: input, shape index: {}]   ;;  %s8454_s11 = inlined_call_operand.hbm [shape: f32[32,32], index: 11, kind: input, shape index: {}]   ;;  %s8455_s12 = inlined_call_operand.vmem [shape: f32[1,32], index: 12, kind: input, shape index: {}]   ;;  %s8456_s13 = inlined_call_operand.vmem [shape: f32[1,32], index: 13, kind: input, shape index: {}]   ;;  %s8457_s14 = inlined_call_operand.vmem [shape: f32[16,6,8], index: 14, kind: output, shape index: {}]  }
   0x1   :  { %20 = vsyncpa [#allocation7], 0  ;;  %s5833_s29 = smov 0  }
   0x2 LB: > { %s395_s16 = sshll.u32 %s8452_s9, 4  ;;  %s5842_s17 = sadd.s32 4294967295, %s5740_s29   ;;  %s5740_s29 = sphi %s5833_s29, %s26_s29   ;;  %s396_s16 = int_to_ptr.hbm [resolvable:$true] %s395_s16 }
   0x3   : > { %p5105_p0 = scmp.ge.s32.totalorder %s5740_s29, 1  ;;  %p366_p1 = scmp.lt.s32.totalorder %s5740_s29, 3 }
   0x4   : > { %p5185_p2 = scmp.eq.s32.totalorder %s5842_s17, 0  ;;  %s5742_s19 = smov [#allocation4]  }
   0x5   : > { %p5847_p3 = pnand %p5105_p0, %p366_p1  ;;  %s397_s20 = sshll.u32 %s5742_s19, 4  ;;  %s398_s20 = int_to_ptr.vmem [resolvable:$true] %s397_s20 }
   0x6   : > { %s412_s23 = sshll.u32 %s8454_s11, 4  ;;  %s5743_s24 = smov [#allocation6]   ;;  %s413_s23 = int_to_ptr.hbm [resolvable:$true] %s412_s23 }
   0x7   : > { %p5178_p4 = pneg %p5847_p3  ;;  %s414_s25 = sshll.u32 %s5743_s24, 4  ;;  %s415_s25 = int_to_ptr.vmem [resolvable:$true] %s414_s25 }
   0x8   : > { %s5744_s26 = smov 128   ;;  %s5745_s27 = smov 8  }
   0x9   : > { %p5179_p5 = pnand %p5185_p2, %p5178_p4  ;;  %457 = sbr.rel (%p5847_p3) target bundleno = 9570 (0x2562), region = 76 }
   0xb   : > { %5181 = dma.hbm_to_vmem [thread:$0]  (!%p5179_p5), %s396_s16, 512, %s398_s20, [#allocation5], %s5744_s26, %s5744_s26, %s5745_s27  }
   0xc   : > { %5184 = dma.hbm_to_vmem [thread:$0]  (!%p5179_p5), %s413_s23, 512, %s415_s25, [#allocation7], %s5744_s26, %s5744_s26, %s5745_s27  }
   0xe   : > { %5731 = dma.done.wait (%p5185_p2), [#allocation5], 512  }
   0xf   : > { %5733 = vsyncadd (%p5185_p2), [#allocation5], 4294966784 }
  0x10   : > { %5735 = dma.done.wait (%p5185_p2), [#allocation7], 512  }
  0x11   : > { %5737 = vsyncadd (%p5185_p2), [#allocation7], 4294966784  ;;  %p516_p6 = scmp.lt.s32.totalorder %s5842_s17, 1  ;;  %v5746_v0 = vmov 0   ;;  %v547_v1 = vld [vmem:[%s8447_s4 + $0x18] sm:$0xff]  ;;  %v546_v2 = vld [vmem:[%s8447_s4 + $0x10] sm:$0xff]  ;;  %v560_v17 = vlaneseq }
  0x12   : > { %5213 = vset.pattern.permute.xlu0 %v5746_v0  ;;  %603 = vmatpush.msra.mxu0 %v547_v1  ;;  %v545_v4 = vld [vmem:[%s8447_s4 + $0x8] sm:$0xff]  ;;  %v544_v5 = vld [vmem:[%s8447_s4] sm:$0xff]  ;;  %v5747_v6 = vmov 0.0   ;;  %s5748_s19 = smov 64   ;;  %s5749_s20 = smov 32   ;;  %v5750_v40 = vmov 1  }
  0x13   : > { %s517_s28 = scalar_select %p516_p6, %s5842_s17, 1  ;;  %729 = vmatpush.msra.mxu1 %v547_v1  ;;  %854 = vmatpush.msra.mxu2 %v547_v1  ;;  %v5899_v7 = vld [vmem:[%s8446_s3] ss:$0 sm:$0xff]  ;;  %v5909_v19 = vand.u32 127, %v560_v17  ;;  %vm587_vm7 = vcmask 261120  }
  0x14   : > { %604 = vmatpush.msra.mxu0 %v546_v2  ;;  %979 = vmatpush.msra.mxu3 %v547_v1  ;;  %v5905_v10 = vld [vmem:[%s8448_s5] ss:$0 sm:$0xff]  ;;  %s5115_s24 = sshll.u32 %s5842_s17, 3 }
  0x15   : > { %s5871_s30 = sshll.u32 %s517_s28, 3  ;;  %730 = vmatpush.msra.mxu1 %v546_v2  ;;  %855 = vmatpush.msra.mxu2 %v546_v2  ;;  %8532 = vst [vmem:[#allocation10_spill] sm:$0xff] %v5909_v19  ;;  %vm562_vm0 = vcmp.ge.s32.totalorder %v5909_v19, 64  ;;  %vm563_vm1 = vcmp.lt.s32.totalorder %v5909_v19, 96  ;;  %p8258_p7 = scmp.lt.s32.totalorder %s5115_s24, 15 }
  0x16   : > { %s5877_s18 = scalar_lea.vmem %s8443_s0, %s5871_s30  ;;  %605 = vmatpush.msra.mxu0 %v545_v4  ;;  %980 = vmatpush.msra.mxu3 %v546_v2  ;;  %vm5913_vm3 = vmand %vm562_vm0, %vm563_vm1  ;;  %s523_s23 = scalar_lea.vmem %s8444_s1, %s5871_s30 }
  0x17   : > { %v5886_v3 = vld [vmem:[%s5877_s18] sm:$0xff]  ;;  %731 = vmatpush.msra.mxu1 %v545_v4  ;;  %856 = vmatpush.msra.mxu2 %v545_v4  ;;  %s6080_s26 = scalar_lea.vmem %s8445_s2, %s5871_s30  ;;  %s8739_s24 = smov (!%p8258_p7, %s5115_s24), 15 }
  0x18   : > { %576 = vperm.xlu0 %5213, %v5886_v3   ;;  %606 = vmatpush.msra.mxu0 %v544_v5  ;;  %s5116_s17 = sshll.u32 %s8739_s24, 3 }
  0x19   : > { %732 = vmatpush.msra.mxu1 %v544_v5  ;;  %607 = vmatmul.f32.vlgmr.msra.gmra.mxu0 %v5747_v6  ;;  %s8332_s28 = scalar_lea.vmem %s8457_s14, %s5116_s17 }
  0x1a   : > { %857 = vmatpush.msra.mxu2 %v544_v5  ;;  %981 = vmatpush.msra.mxu3 %v545_v4 }
  0x1b   : > { %1104 = vmatpush.msrb.mxu0 %v547_v1  ;;  %1229 = vmatpush.msrb.mxu1 %v547_v1 }
  0x1c   : > { %1354 = vmatpush.msrb.mxu2 %v547_v1  ;;  %982 = vmatpush.msra.mxu3 %v544_v5 }
  0x1d   : > { %1105 = vmatpush.msrb.mxu0 %v546_v2  ;;  %1230 = vmatpush.msrb.mxu1 %v546_v2 }
  0x1e   : > { %1355 = vmatpush.msrb.mxu2 %v546_v2  ;;  %1479 = vmatpush.msrb.mxu3 %v547_v1 }
  0x1f   : > { %1106 = vmatpush.msrb.mxu0 %v545_v4  ;;  %1231 = vmatpush.msrb.mxu1 %v545_v4 }
  0x20   : > { %1356 = vmatpush.msrb.mxu2 %v545_v4  ;;  %1480 = vmatpush.msrb.mxu3 %v546_v2 }
  0x21   : > { %1107 = vmatpush.msrb.mxu0 %v544_v5  ;;  %1232 = vmatpush.msrb.mxu1 %v544_v5 }
  0x22   : > { %1357 = vmatpush.msrb.mxu2 %v544_v5  ;;  %1481 = vmatpush.msrb.mxu3 %v545_v4 }
  0x23   : > { %5214 = vset.pattern.permute.xlu2 %v5750_v40 }
  0x24   : > { %1482 = vmatpush.msrb.mxu3 %v544_v5 }
  0x8a   : > { %v577_v8 = vpop.permute.xlu0 %576 }
  0x8b   : > { %v582_v9 = vmul.f32 %v5899_v7, %v577_v8 }
  0x8d   : > { %v586_v11 = vadd.f32 %v5905_v10, %v582_v9 }
  0x96   : > { %v608_v12 = vpop.f32.mrf.mxu0 }
  0x97   : > { %v611_v13 = vadd.f32 %v608_v12, %v586_v11  ;;  %v5751_v11 = vmov 2  }
  0x98   : > { %5215 = vset.pattern.permute.xlu1 %v5751_v11 }
  0x99   : > { %v5117_v14 = vmul.f32 -1.442695, %v611_v13 }
  0x9b   : > { %5262 = vpow2.f32 %v5117_v14 }
  0xa1   : > { %v5263_v15 = vpop.eup %5262 }
  0xa2   : > { %v616_v16 = vadd.f32 1.0, %v5263_v15 }
  0xa4   : > { %5264 = vrcp.f32 %v616_v16  ;;  %v628_v22 = vand.u32 2147483648, %v616_v16  ;;  %v626_v24 = vand.u32 2147483647, %v616_v16  ;;  %vm622_vm4 = vweird.f32 %v616_v16 }
  0xa5   : > { %5266 = vtanh.f32 %v611_v13 }
  0xa6   : > { %v629_v27 = vor.u32 1.1754944e-38, %v628_v22  ;;  %vm627_vm6 = vcmp.eq.f32.partialorder %v626_v24, 8.507059e+37 }
  0xaa   : > { %v5265_v18 = vpop.eup %5264 }
  0xab   : > { %v618_v20 = vmul.f32 %v5265_v18, %v616_v16  ;;  %vm623_vm2 = vweird.f32 %v5265_v18  ;;  %v5267_v29 = vpop.eup %5266 }
  0xac   : > { %vm624_vm5 = vmor %vm622_vm4, %vm623_vm2 }
  0xad   : > { %v619_v21 = vsub.f32 1.0, %v618_v20 }
  0xaf   : > { %v620_v23 = vmul.f32 %v5265_v18, %v619_v21 }
  0xb1   : > { %v621_v26 = vadd.f32 %v5265_v18, %v620_v23 }
  0xb3   : > { %v625_v28 = vsel %vm624_vm5, %v5265_v18, %v621_v26 }
  0xb4   : > { %v630_v30 = vsel %vm627_vm6, %v629_v27, %v625_v28 }
  0xb5   : > { %v632_v31 = vsel %vm5913_vm3, %v5267_v29, %v630_v30 }
  0xb6   : > { %635 = vrot.lane.b32.xlu0 %v632_v31, %s5748_s19  ;;  %v633_v34 = vmul.f32 0.0, %v632_v31 }
 0x128   : > { %v636_v32 = vpop.permute.xlu0 %635 }
 0x129   : > { %v638_v33 = vmul.f32 %v636_v32, %v632_v31 }
 0x12b   : > { %640 = vrot.lane.b32.xlu1 %v638_v33, %s5749_s20 }
 0x19d   : > { %v641_v35 = vpop.permute.xlu1 %640 }
 0x19e   : > { %v5921_v36 = vadd.f32 %v641_v35, %v633_v34 }
 0x1a0   : > { %5268 = vtanh.f32 %v5921_v36 }
 0x1a6   : > { %v5269_v37 = vpop.eup %5268 }
 0x1a7   : > { %646 = vrot.lane.b32.xlu1 %v5269_v37, %s5748_s19 }
 0x219   : > { %v647_v38 = vpop.permute.xlu1 %646 }
 0x21a   : > { %v5925_v39 = vmul.f32 %v647_v38, %v632_v31 }
 0x21c   : > { %713 = vrot.lane.b32.xlu2 %v5925_v39, %s5749_s20 }
 0x224   : > { %708 = vperm.xlu2 %5214, %v5886_v3  }
 0x22c   : > { %5222 = vset.pattern.permute.xlu2 %v5746_v0 }
 0x276   : > { %v714_v41 = vpop.permute.xlu2 %713 }
 0x277   : > { %5118 = vmatmul.msk.f32.vlgmr.msra.gmra.mxu1 %vm587_vm7, %v714_v41 }
 0x27e   : > { %v709_v42 = vpop.permute.xlu2 %708 }
 0x27f   : > { %v711_v43 = vmul.f32 %v5899_v7, %v709_v42 }
 0x281   : > { %v712_v44 = vadd.f32 %v5905_v10, %v711_v43 }
 0x2f4   : > { %v734_v45 = vpop.f32.mrf.mxu1 }
 0x2f5   : > { %v737_v46 = vadd.f32 %v734_v45, %v712_v44 }
 0x2f7   : > { %v5119_v47 = vmul.f32 -1.442695, %v737_v46 }
 0x2f9   : > { %5270 = vpow2.f32 %v5119_v47  ;;  %v5752_v47 = vmov 3  }
 0x2fa   : > { %5216 = vset.pattern.permute.xlu0 %v5752_v47 }
 0x2ff   : > { %v5271_v48 = vpop.eup %5270 }
 0x300   : > { %v742_v49 = vadd.f32 1.0, %v5271_v48 }
 0x302   : > { %5272 = vrcp.f32 %v742_v49  ;;  %v754_v53 = vand.u32 2147483648, %v742_v49  ;;  %v752_v55 = vand.u32 2147483647, %v742_v49  ;;  %vm748_vm9 = vweird.f32 %v742_v49 }
 0x303   : > { %5274 = vtanh.f32 %v737_v46 }
 0x304   : > { %v755_v57 = vor.u32 1.1754944e-38, %v754_v53  ;;  %vm753_vm11 = vcmp.eq.f32.partialorder %v752_v55, 8.507059e+37 }
 0x308   : > { %v5273_v50 = vpop.eup %5272 }
 0x309   : > { %v744_v51 = vmul.f32 %v5273_v50, %v742_v49  ;;  %vm749_vm8 = vweird.f32 %v5273_v50  ;;  %v5275_v59 = vpop.eup %5274 }
 0x30a   : > { %vm750_vm10 = vmor %vm748_vm9, %vm749_vm8 }
 0x30b   : > { %v745_v52 = vsub.f32 1.0, %v744_v51 }
 0x30d   : > { %v746_v54 = vmul.f32 %v5273_v50, %v745_v52 }
 0x30f   : > { %v747_v56 = vadd.f32 %v5273_v50, %v746_v54 }
 0x311   : > { %v751_v58 = vsel %vm750_vm10, %v5273_v50, %v747_v56 }
 0x312   : > { %v756_v60 = vsel %vm753_vm11, %v755_v57, %v751_v58 }
 0x313   : > { %v758_v61 = vsel %vm5913_vm3, %v5275_v59, %v756_v60 }
 0x314   : > { %761 = vrot.lane.b32.xlu0 %v758_v61, %s5748_s19  ;;  %v759_v1 = vmul.f32 %v758_v61, %v5921_v36 }
 0x386   : > { %v762_v62 = vpop.permute.xlu0 %761 }
 0x387   : > { %v764_v63 = vmul.f32 %v762_v62, %v758_v61 }
 0x389   : > { %766 = vrot.lane.b32.xlu1 %v764_v63, %s5749_s20 }
 0x391   : > { %833 = vperm.xlu1 %5215, %v5886_v3  }
 0x399   : > { %5221 = vset.pattern.permute.xlu1 %v5746_v0 }
 0x3fb   : > { %v767_v2 = vpop.permute.xlu1 %766 }
 0x3fc   : > { %v5940_v4 = vadd.f32 %v767_v2, %v759_v1 }
 0x3fe   : > { %5276 = vtanh.f32 %v5940_v4 }
 0x403   : > { %v834_v13 = vpop.permute.xlu1 %833 }
 0x404   : > { %v5277_v5 = vpop.eup %5276  ;;  %v836_v14 = vmul.f32 %v5899_v7, %v834_v13 }
 0x405   : > { %772 = vrot.lane.b32.xlu2 %v5277_v5, %s5748_s19 }
 0x406   : > { %v837_v15 = vadd.f32 %v5905_v10, %v836_v14 }
 0x45f   : > { %v773_v8 = vpop.permute.xlu2 %772 }
 0x460   : > { %v5944_v9 = vmul.f32 %v773_v8, %v758_v61 }
 0x462   : > { %838 = vrot.lane.b32.xlu0 %v5944_v9, %s5749_s20 }
 0x4d4   : > { %v839_v12 = vpop.permute.xlu0 %838 }
 0x4d5   : > { %5120 = vmatmul.msk.f32.vlgmr.msra.gmra.mxu2 %vm587_vm7, %v839_v12 }
 0x558   : > { %v859_v16 = vpop.f32.mrf.mxu2 }
 0x559   : > { %v862_v18 = vadd.f32 %v859_v16, %v837_v15 }
 0x55b   : > { %v5121_v20 = vmul.f32 -1.442695, %v862_v18 }
 0x55d   : > { %5278 = vpow2.f32 %v5121_v20 }
 0x563   : > { %v5279_v21 = vpop.eup %5278 }
 0x564   : > { %v867_v22 = vadd.f32 1.0, %v5279_v21 }
 0x566   : > { %5280 = vrcp.f32 %v867_v22  ;;  %v879_v27 = vand.u32 2147483648, %v867_v22  ;;  %v877_v29 = vand.u32 2147483647, %v867_v22  ;;  %vm873_vm13 = vweird.f32 %v867_v22 }
 0x567   : > { %5282 = vtanh.f32 %v862_v18 }
 0x568   : > { %v880_v31 = vor.u32 1.1754944e-38, %v879_v27  ;;  %vm878_vm15 = vcmp.eq.f32.partialorder %v877_v29, 8.507059e+37 }
 0x56c   : > { %v5281_v23 = vpop.eup %5280 }
 0x56d   : > { %v869_v24 = vmul.f32 %v5281_v23, %v867_v22  ;;  %vm874_vm12 = vweird.f32 %v5281_v23  ;;  %v5283_v33 = vpop.eup %5282 }
 0x56e   : > { %vm875_vm14 = vmor %vm873_vm13, %vm874_vm12 }
 0x56f   : > { %v870_v26 = vsub.f32 1.0, %v869_v24 }
 0x571   : > { %v871_v28 = vmul.f32 %v5281_v23, %v870_v26 }
 0x573   : > { %v872_v30 = vadd.f32 %v5281_v23, %v871_v28 }
 0x575   : > { %v876_v32 = vsel %vm875_vm14, %v5281_v23, %v872_v30  ;;  %v5753_v23 = vmov 4  }
 0x576   : > { %v881_v34 = vsel %vm878_vm15, %v880_v31, %v876_v32 }
 0x577   : > { %v883_v35 = vsel %vm5913_vm3, %v5283_v33, %v881_v34 }
 0x578   : > { %886 = vrot.lane.b32.xlu2 %v883_v35, %s5748_s19  ;;  %v884_v41 = vmul.f32 %v883_v35, %v5940_v4 }
 0x5d2   : > { %v887_v37 = vpop.permute.xlu2 %886 }
 0x5d3   : > { %v889_v38 = vmul.f32 %v887_v37, %v883_v35 }
 0x5d5   : > { %891 = vrot.lane.b32.xlu0 %v889_v38, %s5749_s20 }
 0x5dd   : > { %958 = vperm.xlu0 %5216, %v5886_v3  }
 0x5e5   : > { %5217 = vset.pattern.permute.xlu0 %v5753_v23 }
 0x5e6   : > { %1083 = vperm.xlu0 %5217, %v5886_v3  }
 0x647   : > { %v892_v42 = vpop.permute.xlu0 %891 }
 0x648   : > { %v5959_v43 = vadd.f32 %v892_v42, %v884_v41 }
 0x64a   : > { %5284 = vtanh.f32 %v5959_v43 }
 0x64f   : > { %v959_v49 = vpop.permute.xlu0 %958 }
 0x650   : > { %v5285_v44 = vpop.eup %5284  ;;  %v961_v50 = vmul.f32 %v5899_v7, %v959_v49 }
 0x651   : > { %897 = vrot.lane.b32.xlu1 %v5285_v44, %s5748_s19 }
 0x652   : > { %v962_v51 = vadd.f32 %v5905_v10, %v961_v50 }
 0x658   : > { %v1084_v26 = vpop.permute.xlu0 %1083 }
 0x659   : > { %v1086_v27 = vmul.f32 %v5899_v7, %v1084_v26 }
 0x65b   : > { %v1087_v28 = vadd.f32 %v5905_v10, %v1086_v27 }
 0x6c3   : > { %v898_v45 = vpop.permute.xlu1 %897 }
 0x6c4   : > { %v5963_v46 = vmul.f32 %v898_v45, %v883_v35 }
 0x6c6   : > { %963 = vrot.lane.b32.xlu2 %v5963_v46, %s5749_s20 }
 0x720   : > { %v964_v48 = vpop.permute.xlu2 %963 }
 0x721   : > { %5122 = vmatmul.msk.f32.vlgmr.msra.gmra.mxu3 %vm587_vm7, %v964_v48 }
 0x7a4   : > { %v984_v52 = vpop.f32.mrf.mxu3 }
 0x7a5   : > { %v987_v53 = vadd.f32 %v984_v52, %v962_v51 }
 0x7a7   : > { %v5123_v54 = vmul.f32 -1.442695, %v987_v53 }
 0x7a9   : > { %5286 = vpow2.f32 %v5123_v54 }
 0x7af   : > { %v5287_v55 = vpop.eup %5286 }
 0x7b0   : > { %v992_v56 = vadd.f32 1.0, %v5287_v55 }
 0x7b2   : > { %5288 = vrcp.f32 %v992_v56  ;;  %v1004_v60 = vand.u32 2147483648, %v992_v56  ;;  %v1002_v62 = vand.u32 2147483647, %v992_v56  ;;  %vm998_vm1 = vweird.f32 %v992_v56 }
 0x7b3   : > { %5290 = vtanh.f32 %v987_v53 }
 0x7b4   : > { %v1005_v1 = vor.u32 1.1754944e-38, %v1004_v60  ;;  %vm1003_vm4 = vcmp.eq.f32.partialorder %v1002_v62, 8.507059e+37  ;;  %v5754_v60 = vmov 5  }
 0x7b5   : > { %5218 = vset.pattern.permute.xlu0 %v5754_v60 }
 0x7b6   : > { %1208 = vperm.xlu0 %5218, %v5886_v3  }
 0x7b8   : > { %v5289_v57 = vpop.eup %5288 }
 0x7b9   : > { %v994_v58 = vmul.f32 %v5289_v57, %v992_v56  ;;  %vm999_vm0 = vweird.f32 %v5289_v57  ;;  %v5291_v5 = vpop.eup %5290 }
 0x7ba   : > { %vm1000_vm2 = vmor %vm998_vm1, %vm999_vm0 }
 0x7bb   : > { %v995_v59 = vsub.f32 1.0, %v994_v58 }
 0x7bd   : > { %v996_v61 = vmul.f32 %v5289_v57, %v995_v59 }
 0x7bf   : > { %v997_v63 = vadd.f32 %v5289_v57, %v996_v61 }
 0x7c1   : > { %v1001_v2 = vsel %vm1000_vm2, %v5289_v57, %v997_v63 }
 0x7c2   : > { %v1006_v8 = vsel %vm1003_vm4, %v1005_v1, %v1001_v2 }
 0x7c3   : > { %v1008_v12 = vsel %vm5913_vm3, %v5291_v5, %v1006_v8 }
 0x7c4   : > { %1011 = vrot.lane.b32.xlu1 %v1008_v12, %s5748_s19  ;;  %v1009_v15 = vmul.f32 %v1008_v12, %v5959_v43 }
 0x828   : > { %v1209_v62 = vpop.permute.xlu0 %1208 }
 0x829   : > { %v1211_v63 = vmul.f32 %v5899_v7, %v1209_v62 }
 0x82b   : > { %v1212_v1 = vadd.f32 %v5905_v10, %v1211_v63 }
 0x836   : > { %v1012_v13 = vpop.permute.xlu1 %1011 }
 0x837   : > { %v1014_v14 = vmul.f32 %v1012_v13, %v1008_v12 }
 0x839   : > { %1016 = vrot.lane.b32.xlu2 %v1014_v14, %s5749_s20 }
 0x893   : > { %v1017_v16 = vpop.permute.xlu2 %1016 }
 0x894   : > { %v5977_v18 = vadd.f32 %v1017_v16, %v1009_v15 }
 0x896   : > { %5292 = vtanh.f32 %v5977_v18 }
 0x89c   : > { %v5293_v20 = vpop.eup %5292 }
 0x89d   : > { %1022 = vrot.lane.b32.xlu1 %v5293_v20, %s5748_s19 }
 0x90f   : > { %v1023_v21 = vpop.permute.xlu1 %1022 }
 0x910   : > { %v5981_v22 = vmul.f32 %v1023_v21, %v1008_v12 }
 0x912   : > { %1088 = vrot.lane.b32.xlu2 %v5981_v22, %s5749_s20 }
 0x96c   : > { %v1089_v24 = vpop.permute.xlu2 %1088 }
 0x96d   : > { %5124 = vmatmul.msk.f32.vlgmr.msrb.gmra.mxu0 %vm587_vm7, %v1089_v24 }
 0x9ea   : > { %v1109_v29 = vpop.f32.mrf.mxu0 }
 0x9eb   : > { %v1112_v30 = vadd.f32 %v1109_v29, %v1087_v28 }
 0x9ed   : > { %v5125_v31 = vmul.f32 -1.442695, %v1112_v30 }
 0x9ef   : > { %5294 = vpow2.f32 %v5125_v31 }
 0x9f5   : > { %v5295_v32 = vpop.eup %5294 }
 0x9f6   : > { %v1117_v33 = vadd.f32 1.0, %v5295_v32 }
 0x9f8   : > { %5296 = vrcp.f32 %v1117_v33  ;;  %v1129_v38 = vand.u32 2147483648, %v1117_v33  ;;  %v1127_v42 = vand.u32 2147483647, %v1117_v33  ;;  %vm1123_vm6 = vweird.f32 %v1117_v33 }
 0x9f9   : > { %5298 = vtanh.f32 %v1112_v30 }
 0x9fa   : > { %v1130_v45 = vor.u32 1.1754944e-38, %v1129_v38  ;;  %vm1128_vm9 = vcmp.eq.f32.partialorder %v1127_v42, 8.507059e+37 }
 0x9fe   : > { %v5297_v34 = vpop.eup %5296 }
 0x9ff   : > { %v1119_v35 = vmul.f32 %v5297_v34, %v1117_v33  ;;  %vm1124_vm5 = vweird.f32 %v5297_v34  ;;  %v5299_v49 = vpop.eup %5298 }
 0xa00   : > { %vm1125_vm8 = vmor %vm1123_vm6, %vm1124_vm5 }
 0xa01   : > { %v1120_v37 = vsub.f32 1.0, %v1119_v35 }
 0xa03   : > { %v1121_v41 = vmul.f32 %v5297_v34, %v1120_v37 }
 0xa05   : > { %v1122_v44 = vadd.f32 %v5297_v34, %v1121_v41 }
 0xa07   : > { %v1126_v48 = vsel %vm1125_vm8, %v5297_v34, %v1122_v44  ;;  %v5755_v44 = vmov 6  }
 0xa08   : > { %v1131_v50 = vsel %vm1128_vm9, %v1130_v45, %v1126_v48  ;;  %5219 = vset.pattern.permute.xlu0 %v5755_v44 }
 0xa09   : > { %v1133_v51 = vsel %vm5913_vm3, %v5299_v49, %v1131_v50  ;;  %1333 = vperm.xlu0 %5219, %v5886_v3  }
 0xa0a   : > { %1136 = vrot.lane.b32.xlu1 %v1133_v51, %s5748_s19  ;;  %v1134_v54 = vmul.f32 %v1133_v51, %v5977_v18 }
 0xa7b   : > { %v1334_v48 = vpop.permute.xlu0 %1333 }
 0xa7c   : > { %v1137_v52 = vpop.permute.xlu1 %1136  ;;  %v1336_v49 = vmul.f32 %v5899_v7, %v1334_v48 }
 0xa7d   : > { %v1139_v53 = vmul.f32 %v1137_v52, %v1133_v51 }
 0xa7e   : > { %v1337_v50 = vadd.f32 %v5905_v10, %v1336_v49 }
 0xa7f   : > { %1141 = vrot.lane.b32.xlu2 %v1139_v53, %s5749_s20 }
 0xad9   : > { %v1142_v55 = vpop.permute.xlu2 %1141 }
 0xada   : > { %v5995_v56 = vadd.f32 %v1142_v55, %v1134_v54 }
 0xadc   : > { %5300 = vtanh.f32 %v5995_v56 }
 0xae2   : > { %v5301_v57 = vpop.eup %5300 }
 0xae3   : > { %1147 = vrot.lane.b32.xlu1 %v5301_v57, %s5748_s19 }
 0xb55   : > { %v1148_v58 = vpop.permute.xlu1 %1147 }
 0xb56   : > { %v5999_v59 = vmul.f32 %v1148_v58, %v1133_v51 }
 0xb58   : > { %1213 = vrot.lane.b32.xlu2 %v5999_v59, %s5749_s20 }
 0xbb2   : > { %v1214_v61 = vpop.permute.xlu2 %1213 }
 0xbb3   : > { %5126 = vmatmul.msk.f32.vlgmr.msrb.gmra.mxu1 %vm587_vm7, %v1214_v61 }
 0xc30   : > { %v1234_v2 = vpop.f32.mrf.mxu1 }
 0xc31   : > { %v1237_v5 = vadd.f32 %v1234_v2, %v1212_v1 }
 0xc33   : > { %v5127_v8 = vmul.f32 -1.442695, %v1237_v5 }
 0xc35   : > { %5302 = vpow2.f32 %v5127_v8 }
 0xc3b   : > { %v5303_v12 = vpop.eup %5302 }
 0xc3c   : > { %v1242_v13 = vadd.f32 1.0, %v5303_v12 }
 0xc3e   : > { %5304 = vrcp.f32 %v1242_v13  ;;  %v1254_v20 = vand.u32 2147483648, %v1242_v13  ;;  %v1252_v24 = vand.u32 2147483647, %v1242_v13  ;;  %vm1248_vm11 = vweird.f32 %v1242_v13 }
 0xc3f   : > { %5306 = vtanh.f32 %v1237_v5 }
 0xc40   : > { %v1255_v27 = vor.u32 1.1754944e-38, %v1254_v20  ;;  %vm1253_vm13 = vcmp.eq.f32.partialorder %v1252_v24, 8.507059e+37 }
 0xc44   : > { %v5305_v14 = vpop.eup %5304 }
 0xc45   : > { %v1244_v15 = vmul.f32 %v5305_v14, %v1242_v13  ;;  %vm1249_vm10 = vweird.f32 %v5305_v14  ;;  %v5307_v29 = vpop.eup %5306 }
 0xc46   : > { %vm1250_vm12 = vmor %vm1248_vm11, %vm1249_vm10 }
 0xc47   : > { %v1245_v16 = vsub.f32 1.0, %v1244_v15 }
 0xc49   : > { %v1246_v21 = vmul.f32 %v5305_v14, %v1245_v16 }
 0xc4b   : > { %v1247_v26 = vadd.f32 %v5305_v14, %v1246_v21 }
 0xc4d   : > { %v1251_v28 = vsel %vm1250_vm12, %v5305_v14, %v1247_v26 }
 0xc4e   : > { %v1256_v30 = vsel %vm1253_vm13, %v1255_v27, %v1251_v28 }
 0xc4f   : > { %v1258_v31 = vsel %vm5913_vm3, %v5307_v29, %v1256_v30  ;;  %v5756_v29 = vmov 7  }
 0xc50   : > { %1261 = vrot.lane.b32.xlu1 %v1258_v31, %s5748_s19  ;;  %v1259_v34 = vmul.f32 %v1258_v31, %v5995_v56  ;;  %5220 = vset.pattern.permute.xlu0 %v5756_v29 }
 0xc51   : > { %1458 = vperm.xlu0 %5220, %v5886_v3  }
 0xc59   : > { %5223 = vset.pattern.permute.xlu0 %v5746_v0 }
 0xcc2   : > { %v1262_v32 = vpop.permute.xlu1 %1261 }
 0xcc3   : > { %v1264_v33 = vmul.f32 %v1262_v32, %v1258_v31 }
 0xcc5   : > { %1266 = vrot.lane.b32.xlu2 %v1264_v33, %s5749_s20 }
 0xd1f   : > { %v1267_v35 = vpop.permute.xlu2 %1266 }
 0xd20   : > { %v6013_v37 = vadd.f32 %v1267_v35, %v1259_v34 }
 0xd22   : > { %5308 = vtanh.f32 %v6013_v37 }
 0xd28   : > { %v5309_v38 = vpop.eup %5308 }
 0xd29   : > { %1272 = vrot.lane.b32.xlu1 %v5309_v38, %s5748_s19 }
 0xd9b   : > { %v1273_v41 = vpop.permute.xlu1 %1272 }
 0xd9c   : > { %v6017_v42 = vmul.f32 %v1273_v41, %v1258_v31  ;;  %v1459_v31 = vpop.permute.xlu0 %1458  ;;  %v535_v41 = vld [vmem:[%s523_s23] sm:$0xff] }
 0xd9d   : > { %v1461_v32 = vmul.f32 %v5899_v7, %v1459_v31  ;;  %vm949_vm2 = vcmp.eq.s32.totalorder %v535_v41, 3  ;;  %vm699_vm9 = vcmp.eq.s32.totalorder %v535_v41, 1  ;;  %vm1074_vm10 = vcmp.eq.s32.totalorder %v535_v41, 4 }
 0xd9e   : > { %1338 = vrot.lane.b32.xlu2 %v6017_v42, %s5749_s20  ;;  %v950_v3 = vsel %vm949_vm2, 1, %v5746_v0  ;;  %vm1324_vm11 = vcmp.eq.s32.totalorder %v535_v41, 6  ;;  %vm1574_vm12 = vcmp.eq.s32.totalorder %v535_v41, 8  ;;  %vm824_vm13 = vcmp.eq.s32.totalorder %v535_v41, 2 }
 0xd9f   : > { %v1462_v33 = vadd.f32 %v5905_v10, %v1461_v32  ;;  %952 = vperm.xlu0 %5223, %v950_v3  }
 0xdf8   : > { %v1339_v45 = vpop.permute.xlu2 %1338 }
 0xdf9   : > { %5128 = vmatmul.msk.f32.vlgmr.msrb.gmra.mxu2 %vm587_vm7, %v1339_v45 }
 0xe7c   : > { %v1359_v51 = vpop.f32.mrf.mxu2 }
 0xe7d   : > { %v1362_v52 = vadd.f32 %v1359_v51, %v1337_v50 }
 0xe7f   : > { %v5129_v53 = vmul.f32 -1.442695, %v1362_v52 }
 0xe81   : > { %5310 = vpow2.f32 %v5129_v53 }
 0xe87   : > { %v5311_v54 = vpop.eup %5310 }
 0xe88   : > { %v1367_v55 = vadd.f32 1.0, %v5311_v54 }
 0xe8a   : > { %5312 = vrcp.f32 %v1367_v55  ;;  %v1379_v62 = vand.u32 2147483648, %v1367_v55  ;;  %v1377_v1 = vand.u32 2147483647, %v1367_v55  ;;  %vm1373_vm15 = vweird.f32 %v1367_v55 }
 0xe8b   : > { %5314 = vtanh.f32 %v1362_v52 }
 0xe8c   : > { %v1380_v5 = vor.u32 1.1754944e-38, %v1379_v62  ;;  %vm1378_vm1 = vcmp.eq.f32.partialorder %v1377_v1, 8.507059e+37  ;;  %v1075_v62 = vsel %vm1074_vm10, 1, %v5746_v0  ;;  %v1575_v1 = vsel %vm1574_vm12, 1, %v5746_v0 }
 0xe90   : > { %v5313_v57 = vpop.eup %5312 }
 0xe91   : > { %v1369_v58 = vmul.f32 %v5313_v57, %v1367_v55  ;;  %vm1374_vm14 = vweird.f32 %v5313_v57  ;;  %v5315_v12 = vpop.eup %5314 }
 0xe92   : > { %vm1375_vm0 = vmor %vm1373_vm15, %vm1374_vm14  ;;  %vm1199_vm14 = vcmp.eq.s32.totalorder %v535_v41, 5  ;;  %vm1449_vm15 = vcmp.eq.s32.totalorder %v535_v41, 7  ;;  %v551_v41 = vld [vmem:[%s8450_s7 + $0x18] sm:$0xff] }
 0xe93   : > { %v1370_v61 = vsub.f32 1.0, %v1369_v58  ;;  %1612 = vmatpush.msra.mxu0 %v551_v41  ;;  %1729 = vmatpush.msra.mxu1 %v551_v41 }
 0xe94   : > { %1846 = vmatpush.msra.mxu2 %v551_v41  ;;  %1963 = vmatpush.msra.mxu3 %v551_v41 }
 0xe95   : > { %v1371_v63 = vmul.f32 %v5313_v57, %v1370_v61  ;;  %v700_v61 = vsel %vm699_vm9, 1, %v5746_v0 }
 0xe97   : > { %v1372_v2 = vadd.f32 %v5313_v57, %v1371_v63  ;;  %v1325_v63 = vsel %vm1324_vm11, 1, %v5746_v0 }
 0xe99   : > { %v1376_v8 = vsel %vm1375_vm0, %v5313_v57, %v1372_v2 }
 0xe9a   : > { %v1381_v13 = vsel %vm1378_vm1, %v1380_v5, %v1376_v8  ;;  %v825_v8 = vsel %vm824_vm13, 1, %v5746_v0 }
 0xe9b   : > { %v1383_v14 = vsel %vm5913_vm3, %v5315_v12, %v1381_v13  ;;  %v1200_v12 = vsel %vm1199_vm14, 1, %v5746_v0  ;;  %v1450_v13 = vsel %vm1449_vm15, 1, %v5746_v0 }
 0xe9c   : > { %1386 = vrot.lane.b32.xlu1 %v1383_v14, %s5748_s19  ;;  %v1384_v20 = vmul.f32 %v1383_v14, %v6013_v37 }
 0xf0e   : > { %v1387_v15 = vpop.permute.xlu1 %1386 }
 0xf0f   : > { %v1389_v16 = vmul.f32 %v1387_v15, %v1383_v14 }
 0xf11   : > { %1391 = vrot.lane.b32.xlu2 %v1389_v16, %s5749_s20 }
 0xf6b   : > { %v1392_v21 = vpop.permute.xlu2 %1391 }
 0xf6c   : > { %v6030_v24 = vadd.f32 %v1392_v21, %v1384_v20  ;;  %v953_v21 = vpop.permute.xlu0 %952 }
 0xf6d   : > { %vm954_vm1 = vcmp.eq.s32.totalorder %v953_v21, 1 }
 0xf6e   : > { %5316 = vtanh.f32 %v6030_v24 }
 0xf74   : > { %v5317_v26 = vpop.eup %5316 }
 0xf75   : > { %1397 = vrot.lane.b32.xlu1 %v5317_v26, %s5748_s19 }
 0xfe7   : > { %v1398_v27 = vpop.permute.xlu1 %1397 }
 0xfe8   : > { %v6034_v28 = vmul.f32 %v1398_v27, %v1383_v14 }
 0xfea   : > { %1463 = vrot.lane.b32.xlu2 %v6034_v28, %s5749_s20 }
0x1044   : > { %v1464_v30 = vpop.permute.xlu2 %1463 }
0x1045   : > { %5130 = vmatmul.msk.f32.vlgmr.msrb.gmra.mxu3 %vm587_vm7, %v1464_v30 }
0x10c8   : > { %v1484_v34 = vpop.f32.mrf.mxu3 }
0x10c9   : > { %v1487_v35 = vadd.f32 %v1484_v34, %v1462_v33 }
0x10cb   : > { %v5131_v38 = vmul.f32 -1.442695, %v1487_v35 }
0x10cd   : > { %5318 = vpow2.f32 %v5131_v38 }
0x10d3   : > { %v5319_v44 = vpop.eup %5318 }
0x10d4   : > { %v1492_v45 = vadd.f32 1.0, %v5319_v44 }
0x10d6   : > { %5320 = vrcp.f32 %v1492_v45  ;;  %v1504_v10 = vand.u32 2147483648, %v1492_v45  ;;  %v1502_v51 = vand.u32 2147483647, %v1492_v45  ;;  %vm1498_vm5 = vweird.f32 %v1492_v45 }
0x10d7   : > { %5322 = vtanh.f32 %v1487_v35 }
0x10d8   : > { %v1505_v53 = vor.u32 1.1754944e-38, %v1504_v10  ;;  %vm1503_vm8 = vcmp.eq.f32.partialorder %v1502_v51, 8.507059e+37 }
0x10dc   : > { %v5321_v48 = vpop.eup %5320 }
0x10dd   : > { %v1494_v7 = vmul.f32 %v5321_v48, %v1492_v45  ;;  %vm1499_vm4 = vweird.f32 %v5321_v48  ;;  %v5323_v55 = vpop.eup %5322 }
0x10de   : > { %vm1500_vm6 = vmor %vm1498_vm5, %vm1499_vm4 }
0x10df   : > { %v1495_v49 = vsub.f32 1.0, %v1494_v7 }
0x10e1   : > { %v1496_v50 = vmul.f32 %v5321_v48, %v1495_v49 }
0x10e3   : > { %v1497_v52 = vadd.f32 %v5321_v48, %v1496_v50 }
0x10e5   : > { %v1501_v54 = vsel %vm1500_vm6, %v5321_v48, %v1497_v52 }
0x10e6   : > { %v1506_v57 = vsel %vm1503_vm8, %v1505_v53, %v1501_v54  ;;  %v6131_v54 = vld [vmem:[%s8449_s6] ss:$0 sm:$0xff] }
0x10e7   : > { %v6050_v58 = vsel %vm5913_vm3, %v5323_v55, %v1506_v57 }
0x10e8   : > { %1511 = vrot.lane.b32.xlu1 %v6050_v58, %s5748_s19  ;;  %v1509_v14 = vmul.f32 %v6050_v58, %v6030_v24 }
0x10f0   : > { %702 = vperm.xlu1 %5221, %v700_v61  }
0x10f8   : > { %1077 = vperm.xlu1 %5221, %v1075_v62  }
0x1100   : > { %1327 = vperm.xlu1 %5221, %v1325_v63  }
0x1108   : > { %1577 = vperm.xlu1 %5221, %v1575_v1  }
0x1110   : > { %5225 = vset.pattern.permute.xlu1 %v5751_v11 }
0x115a   : > { %v1512_v2 = vpop.permute.xlu1 %1511 }
0x115b   : > { %v1514_v5 = vmul.f32 %v1512_v2, %v6050_v58 }
0x115d   : > { %1516 = vrot.lane.b32.xlu2 %v1514_v5, %s5749_s20 }
0x1162   : > { %v703_v11 = vpop.permute.xlu1 %702 }
0x1163   : > { %vm704_vm0 = vcmp.eq.s32.totalorder %v703_v11, 1 }
0x1164   : > { %v706_v29 = vsel %vm704_vm0, %v5921_v36, 0.0  ;;  %v6083_v36 = vld [vmem:[%s6080_s26] sm:$0xff]  ;;  %v705_v3 = vsel %vm704_vm0, %v5925_v39, 0.0 }
0x1165   : > { %827 = vperm.xlu2 %5222, %v825_v8  }
0x116a   : > { %v1078_v20 = vpop.permute.xlu1 %1077 }
0x116b   : > { %vm1079_vm4 = vcmp.eq.s32.totalorder %v1078_v20, 1 }
0x116d   : > { %1202 = vperm.xlu2 %5222, %v1200_v12  }
0x1172   : > { %v1328_v31 = vpop.permute.xlu1 %1327 }
0x1173   : > { %vm1329_vm5 = vcmp.eq.s32.totalorder %v1328_v31, 1 }
0x1175   : > { %1452 = vperm.xlu2 %5222, %v1450_v13  }
0x117d   : > { %5224 = vset.pattern.permute.xlu2 %v5750_v40 }
0x11b7   : > { %v1517_v15 = vpop.permute.xlu2 %1516 }
0x11b8   : > { %v1519_v16 = vadd.f32 %v1517_v15, %v1509_v14 }
0x11ba   : > { %5324 = vtanh.f32 %v1519_v16 }
0x11bf   : > { %v828_v26 = vpop.permute.xlu2 %827 }
0x11c0   : > { %v5325_v27 = vpop.eup %5324  ;;  %vm829_vm2 = vcmp.eq.s32.totalorder %v828_v26, 1 }
0x11c1   : > { %v831_v40 = vsel %vm829_vm2, %v5940_v4, %v706_v29  ;;  %1522 = vrot.lane.b32.xlu0 %v5325_v27, %s5748_s19  ;;  %v830_v44 = vsel %vm829_vm2, %v5944_v9, %v705_v3 }
0x11c2   : > { %v956_v30 = vsel %vm954_vm1, %v5959_v43, %v831_v40  ;;  %v955_v45 = vsel %vm954_vm1, %v5963_v46, %v830_v44 }
0x11c3   : > { %v1081_v32 = vsel %vm1079_vm4, %v5977_v18, %v956_v30  ;;  %v1578_v18 = vpop.permute.xlu1 %1577  ;;  %v1080_v48 = vsel %vm1079_vm4, %v5981_v22, %v955_v45 }
0x11c4   : > { %vm1579_vm8 = vcmp.eq.s32.totalorder %v1578_v18, 1 }
0x11c7   : > { %v1203_v33 = vpop.permute.xlu2 %1202 }
0x11c8   : > { %vm1204_vm6 = vcmp.eq.s32.totalorder %v1203_v33, 1 }
0x11c9   : > { %v1206_v4 = vsel %vm1204_vm6, %v5995_v56, %v1081_v32  ;;  %1584 = vperm.xlu0 %5223, %v6083_v36   ;;  %v550_v56 = vld [vmem:[%s8450_s7 + $0x10] sm:$0xff]  ;;  %v1205_v7 = vsel %vm1204_vm6, %v5999_v59, %v1080_v48 }
0x11ca   : > { %v1331_v43 = vsel %vm1329_vm5, %v6013_v37, %v1206_v4  ;;  %v549_v37 = vld [vmem:[%s8450_s7 + $0x8] sm:$0xff]  ;;  %1613 = vmatpush.msra.mxu0 %v550_v56  ;;  %1730 = vmatpush.msra.mxu1 %v550_v56  ;;  %v1330_v10 = vsel %vm1329_vm5, %v6017_v42, %v1205_v7 }
0x11cb   : > { %1847 = vmatpush.msra.mxu2 %v550_v56  ;;  %1964 = vmatpush.msra.mxu3 %v550_v56 }
0x11cc   : > { %1614 = vmatpush.msra.mxu0 %v549_v37  ;;  %1731 = vmatpush.msra.mxu1 %v549_v37 }
0x11cd   : > { %1848 = vmatpush.msra.mxu2 %v549_v37  ;;  %1965 = vmatpush.msra.mxu3 %v549_v37 }
0x11cf   : > { %v1453_v34 = vpop.permute.xlu2 %1452 }
0x11d0   : > { %vm1454_vm9 = vcmp.eq.s32.totalorder %v1453_v34, 1 }
0x11d1   : > { %v1456_v35 = vsel %vm1454_vm9, %v6030_v24, %v1331_v43  ;;  %v548_v24 = vld [vmem:[%s8450_s7] sm:$0xff]  ;;  %v1455_v51 = vsel %vm1454_vm9, %v6034_v28, %v1330_v10 }
0x11d2   : > { %v6093_v38 = vsel %vm1579_vm8, %v1519_v16, %v1456_v35  ;;  %1615 = vmatpush.msra.mxu0 %v548_v24  ;;  %1732 = vmatpush.msra.mxu1 %v548_v24 }
0x11d3   : > { %1849 = vmatpush.msra.mxu2 %v548_v24  ;;  %1966 = vmatpush.msra.mxu3 %v548_v24 }
0x11d4   : > { %2080 = vmatpush.msrb.mxu0 %v551_v41  ;;  %2197 = vmatpush.msrb.mxu1 %v551_v41 }
0x11d6   : > { %2081 = vmatpush.msrb.mxu0 %v550_v56  ;;  %2198 = vmatpush.msrb.mxu1 %v550_v56 }
0x11d8   : > { %2082 = vmatpush.msrb.mxu0 %v549_v37  ;;  %2199 = vmatpush.msrb.mxu1 %v549_v37 }
0x11da   : > { %2083 = vmatpush.msrb.mxu0 %v548_v24  ;;  %2200 = vmatpush.msrb.mxu1 %v548_v24 }
0x1233   : > { %v1523_v49 = vpop.permute.xlu0 %1522 }
0x1234   : > { %v6120_v50 = vmul.f32 %v1523_v49, %v6050_v58  ;;  %v6137_v58 = vld [vmem:[%s8451_s8] ss:$0 sm:$0xff] }
0x1236   : > { %v1580_v52 = vsel %vm1579_vm8, %v6120_v50, %v1455_v51  ;;  %vm690_vm8 = vcmask 253952  }
0x1237   : > { %1596 = vrot.lane.b32.xlu2 %v1580_v52, %s5749_s20 }
0x123b   : > { %v1585_v55 = vpop.permute.xlu0 %1584 }
0x123c   : > { %v1590_v57 = vmul.f32 %v6131_v54, %v1585_v55 }
0x123e   : > { %v1594_v61 = vadd.f32 %v6137_v58, %v1590_v57 }
0x1291   : > { %v1597_v53 = vpop.permute.xlu2 %1596 }
0x1292   : > { %5132 = vmatmul.msk.f32.vlgmr.msra.gmra.mxu0 %vm587_vm7, %v1597_v53 }
0x130f   : > { %v1617_v62 = vpop.f32.mrf.mxu0 }
0x1310   : > { %v1620_v63 = vadd.f32 %v1617_v62, %v1594_v61 }
0x1312   : > { %v5133_v1 = vmul.f32 -1.442695, %v1620_v63 }
0x1314   : > { %5326 = vpow2.f32 %v5133_v1 }
0x131a   : > { %v5327_v2 = vpop.eup %5326 }
0x131b   : > { %v1625_v5 = vadd.f32 1.0, %v5327_v2 }
0x131d   : > { %5328 = vrcp.f32 %v1625_v5  ;;  %v1637_v11 = vand.u32 2147483648, %v1625_v5  ;;  %v1635_v15 = vand.u32 2147483647, %v1625_v5  ;;  %vm1631_vm11 = vweird.f32 %v1625_v5 }
0x131e   : > { %5330 = vtanh.f32 %v1620_v63 }
0x131f   : > { %v1638_v20 = vor.u32 1.1754944e-38, %v1637_v11  ;;  %vm1636_vm13 = vcmp.eq.f32.partialorder %v1635_v15, 8.507059e+37 }
0x1323   : > { %v5329_v8 = vpop.eup %5328 }
0x1324   : > { %v1627_v12 = vmul.f32 %v5329_v8, %v1625_v5  ;;  %vm1632_vm10 = vweird.f32 %v5329_v8  ;;  %v5331_v26 = vpop.eup %5330 }
0x1325   : > { %vm1633_vm12 = vmor %vm1631_vm11, %vm1632_vm10 }
0x1326   : > { %v1628_v13 = vsub.f32 1.0, %v1627_v12 }
0x1328   : > { %v1629_v14 = vmul.f32 %v5329_v8, %v1628_v13 }
0x132a   : > { %v1630_v16 = vadd.f32 %v5329_v8, %v1629_v14 }
0x132c   : > { %v1634_v21 = vsel %vm1633_vm12, %v5329_v8, %v1630_v16 }
0x132d   : > { %v1639_v27 = vsel %vm1636_vm13, %v1638_v20, %v1634_v21 }
0x132e   : > { %v1641_v29 = vsel %vm5913_vm3, %v5331_v26, %v1639_v27 }
0x132f   : > { %1644 = vrot.lane.b32.xlu1 %v1641_v29, %s5748_s19  ;;  %v1642_v31 = vmul.f32 %v1641_v29, %v6093_v38 }
0x13a1   : > { %v1645_v40 = vpop.permute.xlu1 %1644 }
0x13a2   : > { %v1647_v30 = vmul.f32 %v1645_v40, %v1641_v29 }
0x13a4   : > { %1649 = vrot.lane.b32.xlu2 %v1647_v30, %s5749_s20 }
0x13ac   : > { %1708 = vperm.xlu2 %5224, %v6083_v36  }
0x13b4   : > { %5228 = vset.pattern.permute.xlu2 %v5754_v60 }
0x13fe   : > { %v1650_v32 = vpop.permute.xlu2 %1649 }
0x13ff   : > { %v1652_v33 = vadd.f32 %v1650_v32, %v1642_v31 }
0x1401   : > { %5332 = vtanh.f32 %v1652_v33 }
0x1406   : > { %v1709_v35 = vpop.permute.xlu2 %1708 }
0x1407   : > { %v5333_v4 = vpop.eup %5332  ;;  %v1711_v60 = vmul.f32 %v6131_v54, %v1709_v35 }
0x1408   : > { %1655 = vrot.lane.b32.xlu0 %v5333_v4, %s5748_s19 }
0x1409   : > { %v1712_v38 = vadd.f32 %v6137_v58, %v1711_v60  ;;  %v658_v60 = vperm.slane %v5925_v39, 0 }
0x147a   : > { %v1656_v43 = vpop.permute.xlu0 %1655 }
0x147b   : > { %v6148_v18 = vmul.f32 %v1656_v43, %v1641_v29 }
0x147d   : > { %1713 = vrot.lane.b32.xlu1 %v6148_v18, %s5749_s20 }
0x14ef   : > { %v1714_v34 = vpop.permute.xlu1 %1713 }
0x14f0   : > { %5134 = vmatmul.msk.f32.vlgmr.msra.gmra.mxu1 %vm587_vm7, %v1714_v34 }
0x156d   : > { %v1734_v41 = vpop.f32.mrf.mxu1 }
0x156e   : > { %v1737_v56 = vadd.f32 %v1734_v41, %v1712_v38  ;;  %v653_v38 = vrot.slane %v5925_v39, 3 }
0x1570   : > { %v5135_v37 = vmul.f32 -1.442695, %v1737_v56  ;;  %v661_v41 = vperm.slane %v653_v38, 0 }
0x1572   : > { %5334 = vpow2.f32 %v5135_v37 }
0x1578   : > { %v5335_v24 = vpop.eup %5334 }
0x1579   : > { %v1742_v3 = vadd.f32 1.0, %v5335_v24  ;;  %v777_v24 = vrot.slane %v5944_v9, 1 }
0x157b   : > { %5336 = vrcp.f32 %v1742_v3  ;;  %v1754_v7 = vand.u32 2147483648, %v1742_v3  ;;  %v1752_v10 = vand.u32 2147483647, %v1742_v3  ;;  %vm1748_vm15 = vweird.f32 %v1742_v3 }
0x157c   : > { %5338 = vtanh.f32 %v1737_v56  ;;  %v656_v56 = vrot.slane %v5925_v39, 6 }
0x157d   : > { %v1755_v52 = vor.u32 1.1754944e-38, %v1754_v7  ;;  %vm1753_vm1 = vcmp.eq.f32.partialorder %v1752_v10, 8.507059e+37 }
0x157e   : > { %v664_v37 = vperm.slane %v656_v56, 0  ;;  %v1403_v56 = vrot.slane %v6034_v28, 2 }
0x1581   : > { %v5337_v44 = vpop.eup %5336 }
0x1582   : > { %v1744_v45 = vmul.f32 %v5337_v44, %v1742_v3  ;;  %vm1749_vm14 = vweird.f32 %v5337_v44  ;;  %v5339_v55 = vpop.eup %5338  ;;  %v785_v3 = vperm.slane %v777_v24, 0 }
0x1583   : > { %vm1750_vm0 = vmor %vm1748_vm15, %vm1749_vm14 }
0x1584   : > { %v1745_v48 = vsub.f32 1.0, %v1744_v45 }
0x1586   : > { %v1746_v49 = vmul.f32 %v5337_v44, %v1745_v48  ;;  %v782_v48 = vrot.slane %v5944_v9, 6 }
0x1588   : > { %v1747_v51 = vadd.f32 %v5337_v44, %v1746_v49  ;;  %v790_v7 = vperm.slane %v782_v48, 0  ;;  %v902_v49 = vrot.slane %v5963_v46, 1  ;;  %v1408_v48 = vrot.slane %v6034_v28, 7 }
0x158a   : > { %v1751_v53 = vsel %vm1750_vm0, %v5337_v44, %v1747_v51  ;;  %v780_v44 = vrot.slane %v5944_v9, 4  ;;  %v910_v10 = vperm.slane %v902_v49, 0  ;;  %v905_v51 = vrot.slane %v5963_v46, 4 }
0x158b   : > { %v1756_v57 = vsel %vm1753_vm1, %v1755_v52, %v1751_v53  ;;  %v908_v53 = vrot.slane %v5963_v46, 7 }
0x158c   : > { %v1758_v61 = vsel %vm5913_vm3, %v5339_v55, %v1756_v57  ;;  %v788_v45 = vperm.slane %v780_v44, 0  ;;  %v913_v52 = vperm.slane %v905_v51, 0  ;;  %v1028_v57 = vrot.slane %v5981_v22, 2 }
0x158d   : > { %1761 = vrot.lane.b32.xlu0 %v1758_v61, %s5748_s19  ;;  %v1759_v1 = vmul.f32 %v1758_v61, %v1652_v33  ;;  %v916_v55 = vperm.slane %v908_v53, 0  ;;  %v1531_v53 = vrot.slane %v6120_v50, 5 }
0x15ff   : > { %v1762_v62 = vpop.permute.xlu0 %1761 }
0x1600   : > { %v1764_v63 = vmul.f32 %v1762_v62, %v1758_v61  ;;  %v1031_v62 = vrot.slane %v5981_v22, 5 }
0x1602   : > { %1766 = vrot.lane.b32.xlu1 %v1764_v63, %s5749_s20  ;;  %v1039_v63 = vperm.slane %v1031_v62, 0 }
0x160a   : > { %1825 = vperm.xlu1 %5225, %v6083_v36  }
0x1612   : > { %5226 = vset.pattern.permute.xlu1 %v5752_v47 }
0x1674   : > { %v1767_v2 = vpop.permute.xlu1 %1766 }
0x1675   : > { %v6161_v5 = vadd.f32 %v1767_v2, %v1759_v1 }
0x1677   : > { %5340 = vtanh.f32 %v6161_v5 }
0x167c   : > { %v1826_v14 = vpop.permute.xlu1 %1825 }
0x167d   : > { %v5341_v8 = vpop.eup %5340  ;;  %v1828_v47 = vmul.f32 %v6131_v54, %v1826_v14  ;;  %v1154_v14 = vrot.slane %v5999_v59, 3 }
0x167e   : > { %1772 = vrot.lane.b32.xlu2 %v5341_v8, %s5748_s19  ;;  %v1159_v8 = vperm.slane %v5999_v59, 0 }
0x167f   : > { %v1829_v15 = vadd.f32 %v6137_v58, %v1828_v47 }
0x16d8   : > { %v1773_v12 = vpop.permute.xlu2 %1772 }
0x16d9   : > { %v6165_v13 = vmul.f32 %v1773_v12, %v1758_v61  ;;  %v1036_v61 = vperm.slane %v1028_v57, 0  ;;  %v651_v12 = vrot.slane %v5925_v39, 1 }
0x16db   : > { %1830 = vrot.lane.b32.xlu0 %v6165_v13, %s5749_s20  ;;  %v659_v47 = vperm.slane %v651_v12, 0 }
0x174d   : > { %v1831_v11 = vpop.permute.xlu0 %1830 }
0x174e   : > { %5136 = vmatmul.msk.f32.vlgmr.msra.gmra.mxu2 %vm587_vm7, %v1831_v11 }
0x17d1   : > { %v1851_v16 = vpop.f32.mrf.mxu2 }
0x17d2   : > { %v1854_v20 = vadd.f32 %v1851_v16, %v1829_v15  ;;  %v1162_v15 = vperm.slane %v1154_v14, 0  ;;  %v654_v16 = vrot.slane %v5925_v39, 4  ;;  %v1777_v14 = vrot.slane %v6165_v13, 1 }
0x17d4   : > { %v5137_v21 = vmul.f32 -1.442695, %v1854_v20 }
0x17d6   : > { %5342 = vpow2.f32 %v5137_v21  ;;  %v1157_v21 = vrot.slane %v5999_v59, 6 }
0x17dc   : > { %v5343_v26 = vpop.eup %5342 }
0x17dd   : > { %v1859_v27 = vadd.f32 1.0, %v5343_v26  ;;  %v662_v26 = vperm.slane %v654_v16, 0 }
0x17df   : > { %5344 = vrcp.f32 %v1859_v27  ;;  %v1871_v31 = vand.u32 2147483648, %v1859_v27  ;;  %v1869_v33 = vand.u32 2147483647, %v1859_v27  ;;  %vm1865_vm4 = vweird.f32 %v1859_v27 }
0x17e0   : > { %5346 = vtanh.f32 %v1854_v20 }
0x17e1   : > { %v1872_v54 = vor.u32 1.1754944e-38, %v1871_v31  ;;  %vm1870_vm6 = vcmp.eq.f32.partialorder %v1869_v33, 8.507059e+37  ;;  %v778_v33 = vrot.slane %v5944_v9, 2 }
0x17e5   : > { %v5345_v29 = vpop.eup %5344 }
0x17e6   : > { %v1861_v40 = vmul.f32 %v5345_v29, %v1859_v27  ;;  %vm1866_vm2 = vweird.f32 %v5345_v29  ;;  %v5347_v43 = vpop.eup %5346  ;;  %v1165_v27 = vperm.slane %v1157_v21, 0 }
0x17e7   : > { %vm1867_vm5 = vmor %vm1865_vm4, %vm1866_vm2  ;;  %vm2445_vm2 = vcmp.eq.s32.totalorder %v5909_v19, 0 }
0x17e8   : > { %v1862_v30 = vsub.f32 1.0, %v1861_v40 }
0x17ea   : > { %v1863_v32 = vmul.f32 %v5345_v29, %v1862_v30  ;;  %v1277_v30 = vrot.slane %v6017_v42, 1 }
0x17ec   : > { %v1864_v4 = vadd.f32 %v5345_v29, %v1863_v32  ;;  %v1285_v32 = vperm.slane %v1277_v30, 0  ;;  %v1782_v30 = vrot.slane %v6165_v13, 6 }
0x17ee   : > { %v1868_v58 = vsel %vm1867_vm5, %v5345_v29, %v1864_v4  ;;  %v657_v29 = vrot.slane %v5925_v39, 7 }
0x17ef   : > { %v1873_v34 = vsel %vm1870_vm6, %v1872_v54, %v1868_v58  ;;  %v1280_v54 = vrot.slane %v6017_v42, 4  ;;  %v786_v58 = vperm.slane %v778_v33, 0 }
0x17f0   : > { %v6174_v35 = vsel %vm5913_vm3, %v5347_v43, %v1873_v34  ;;  %v665_v31 = vperm.slane %v657_v29, 0 }
0x17f1   : > { %1878 = vrot.lane.b32.xlu2 %v6174_v35, %s5748_s19  ;;  %v1288_v43 = vperm.slane %v1280_v54, 0 }
0x17f9   : > { %666 = vrot.lane.b32.xlu2 %v658_v60, %s5749_s20  ;;  %v1283_v60 = vrot.slane %v6017_v42, 7 }
0x17fb   : > { %v1291_v38 = vperm.slane %v1283_v60, 0 }
0x1801   : > { %672 = vrot.lane.b32.xlu2 %v661_v41, %s5749_s20 }
0x1809   : > { %678 = vrot.lane.b32.xlu2 %v664_v37, %s5749_s20  ;;  %v1411_v37 = vperm.slane %v1403_v56, 0 }
0x1811   : > { %794 = vrot.lane.b32.xlu2 %v785_v3, %s5749_s20  ;;  %v1406_v3 = vrot.slane %v6034_v28, 5 }
0x1813   : > { %v1414_v44 = vperm.slane %v1406_v3, 0  ;;  %v781_v3 = vrot.slane %v5944_v9, 5 }
0x1819   : > { %800 = vrot.lane.b32.xlu2 %v788_v45, %s5749_s20 }
0x1821   : > { %804 = vrot.lane.b32.xlu2 %v790_v7, %s5749_s20  ;;  %v1416_v7 = vperm.slane %v1408_v48, 0  ;;  %v909_v48 = vperm.slane %v5963_v46, 0 }
0x1829   : > { %919 = vrot.lane.b32.xlu2 %v910_v10, %s5749_s20  ;;  %v1528_v10 = vrot.slane %v6120_v50, 2 }
0x182b   : > { %v1536_v51 = vperm.slane %v1528_v10, 0 }
0x1831   : > { %925 = vrot.lane.b32.xlu2 %v913_v52, %s5749_s20 }
0x1839   : > { %931 = vrot.lane.b32.xlu2 %v916_v55, %s5749_s20  ;;  %v1539_v55 = vperm.slane %v1531_v53, 0 }
0x1841   : > { %1046 = vrot.lane.b32.xlu2 %v1036_v61, %s5749_s20  ;;  %v1667_v61 = vperm.slane %v6148_v18, 0 }
0x1849   : > { %1052 = vrot.lane.b32.xlu2 %v1039_v63, %s5749_s20  ;;  %v1662_v63 = vrot.slane %v6148_v18, 3 }
0x184b   : > { %v1879_v1 = vpop.permute.xlu2 %1878 }
0x184c   : > { %v1881_v2 = vmul.f32 %v1879_v1, %v6174_v35  ;;  %v1670_v1 = vperm.slane %v1662_v63, 0  ;;  %v1030_v63 = vrot.slane %v5981_v22, 4 }
0x184e   : > { %1883 = vrot.lane.b32.xlu0 %v1881_v2, %s5749_s20 }
0x1851   : > { %1167 = vrot.lane.b32.xlu2 %v1159_v8, %s5749_s20  ;;  %v1665_v8 = vrot.slane %v6148_v18, 6 }
0x1853   : > { %v667_v11 = vpop.permute.xlu2 %666  ;;  %v1673_v12 = vperm.slane %v1665_v8, 0  ;;  %v1033_v8 = vrot.slane %v5981_v22, 7 }
0x1854   : > { %691 = vst.msk [vmem:[#allocation2] sm:$0x1] %vm690_vm8, %v667_v11 }
0x1856   : > { %668 = vrot.lane.b32.xlu0 %v659_v47, %s5749_s20  ;;  %v1876_v47 = vmul.f32 %v6174_v35, %v6161_v5 }
0x1859   : > { %1173 = vrot.lane.b32.xlu2 %v1162_v15, %s5749_s20  ;;  %v1785_v15 = vperm.slane %v1777_v14, 0  ;;  %v1153_v14 = vrot.slane %v5999_v59, 2 }
0x185b   : > { %v673_v20 = vpop.permute.xlu2 %672 }
0x185c   : > { %694 = vst.msk [vmem:[#allocation2 + $0x18] sm:$0x1] %vm690_vm8, %v673_v20 }
0x185e   : > { %674 = vrot.lane.b32.xlu0 %v662_v26, %s5749_s20  ;;  %v1780_v26 = vrot.slane %v6165_v13, 4 }
0x1861   : > { %1179 = vrot.lane.b32.xlu2 %v1165_v27, %s5749_s20  ;;  %v1788_v27 = vperm.slane %v1780_v26, 0  ;;  %v1284_v26 = vperm.slane %v6017_v42, 0 }
0x1863   : > { %v679_v40 = vpop.permute.xlu2 %678 }
0x1864   : > { %697 = vst.msk [vmem:[#allocation2 + $0x30] sm:$0x1] %vm690_vm8, %v679_v40 }
0x1866   : > { %680 = vrot.lane.b32.xlu0 %v665_v31, %s5749_s20  ;;  %v652_v31 = vrot.slane %v5925_v39, 2 }
0x1869   : > { %1294 = vrot.lane.b32.xlu2 %v1285_v32, %s5749_s20  ;;  %v1790_v32 = vperm.slane %v1782_v30, 0 }
0x186b   : > { %v795_v4 = vpop.permute.xlu2 %794 }
0x186c   : > { %817 = vst.msk [vmem:[#allocation2 + $0x9] sm:$0x1] %vm690_vm8, %v795_v4  ;;  %v660_v4 = vperm.slane %v652_v31, 0 }
0x186e   : > { %796 = vrot.lane.b32.xlu0 %v786_v58, %s5749_s20  ;;  %v655_v58 = vrot.slane %v5925_v39, 5  ;;  %v779_v39 = vrot.slane %v5944_v9, 3 }
0x1871   : > { %1300 = vrot.lane.b32.xlu2 %v1288_v43, %s5749_s20 }
0x1873   : > { %v801_v34 = vpop.permute.xlu2 %800 }
0x1874   : > { %820 = vst.msk [vmem:[#allocation2 + $0x21] sm:$0x1] %vm690_vm8, %v801_v34  ;;  %v663_v34 = vperm.slane %v655_v58, 0 }
0x1879   : > { %1306 = vrot.lane.b32.xlu2 %v1291_v38, %s5749_s20 }
0x187b   : > { %v805_v41 = vpop.permute.xlu2 %804 }
0x187c   : > { %822 = vst.msk [vmem:[#allocation2 + $0x31] sm:$0x1] %vm690_vm8, %v805_v41  ;;  %v784_v41 = vperm.slane %v5944_v9, 0 }
0x1881   : > { %1421 = vrot.lane.b32.xlu2 %v1411_v37, %s5749_s20  ;;  %v787_v37 = vperm.slane %v779_v39, 0 }
0x1883   : > { %v920_v24 = vpop.permute.xlu2 %919 }
0x1884   : > { %942 = vst.msk [vmem:[#allocation2 + $0xa] sm:$0x1] %vm690_vm8, %v920_v24 }
0x1889   : > { %1427 = vrot.lane.b32.xlu2 %v1414_v44, %s5749_s20  ;;  %v789_v44 = vperm.slane %v781_v3, 0  ;;  %v1405_v3 = vrot.slane %v6034_v28, 4 }
0x188b   : > { %v926_v45 = vpop.permute.xlu2 %925 }
0x188c   : > { %945 = vst.msk [vmem:[#allocation2 + $0x22] sm:$0x1] %vm690_vm8, %v926_v45 }
0x1891   : > { %1431 = vrot.lane.b32.xlu2 %v1416_v7, %s5749_s20 }
0x1893   : > { %v932_v49 = vpop.permute.xlu2 %931 }
0x1894   : > { %948 = vst.msk [vmem:[#allocation2 + $0x3a] sm:$0x1] %vm690_vm8, %v932_v49  ;;  %v904_v49 = vrot.slane %v5963_v46, 3 }
0x1896   : > { %v912_v10 = vperm.slane %v904_v49, 0 }
0x1899   : > { %1546 = vrot.lane.b32.xlu2 %v1536_v51, %s5749_s20 }
0x189b   : > { %v1047_v52 = vpop.permute.xlu2 %1046 }
0x189c   : > { %1068 = vst.msk [vmem:[#allocation2 + $0x13] sm:$0x1] %vm690_vm8, %v1047_v52  ;;  %v907_v52 = vrot.slane %v5963_v46, 6 }
0x189e   : > { %v915_v53 = vperm.slane %v907_v52, 0 }
0x18a1   : > { %1552 = vrot.lane.b32.xlu2 %v1539_v55, %s5749_s20 }
0x18a3   : > { %v1053_v57 = vpop.permute.xlu2 %1052 }
0x18a4   : > { %1071 = vst.msk [vmem:[#allocation2 + $0x2b] sm:$0x1] %vm690_vm8, %v1053_v57  ;;  %v1027_v57 = vrot.slane %v5981_v22, 1 }
0x18a9   : > { %1675 = vrot.lane.b32.xlu2 %v1667_v61, %s5749_s20  ;;  %v1035_v61 = vperm.slane %v1027_v57, 0  ;;  %v1530_v57 = vrot.slane %v6120_v50, 4 }
0x18ab   : > { %v1168_v62 = vpop.permute.xlu2 %1167 }
0x18ac   : > { %1191 = vst.msk [vmem:[#allocation2 + $0x4] sm:$0x1] %vm690_vm8, %v1168_v62 }
0x18b1   : > { %1681 = vrot.lane.b32.xlu2 %v1670_v1, %s5749_s20  ;;  %v1038_v1 = vperm.slane %v1030_v63, 0 }
0x18b3   : > { %v1174_v2 = vpop.permute.xlu2 %1173 }
0x18b4   : > { %1194 = vst.msk [vmem:[#allocation2 + $0x1c] sm:$0x1] %vm690_vm8, %v1174_v2 }
0x18b9   : > { %1687 = vrot.lane.b32.xlu2 %v1673_v12, %s5749_s20  ;;  %v1041_v12 = vperm.slane %v1033_v8, 0 }
0x18bb   : > { %v1180_v11 = vpop.permute.xlu2 %1179 }
0x18bc   : > { %1197 = vst.msk [vmem:[#allocation2 + $0x34] sm:$0x1] %vm690_vm8, %v1180_v11 }
0x18c0   : > { %v1884_v16 = vpop.permute.xlu0 %1883 }
0x18c1   : > { %v6255_v20 = vadd.f32 %v1884_v16, %v1876_v47  ;;  %1794 = vrot.lane.b32.xlu2 %v1785_v15, %s5749_s20  ;;  %v1161_v47 = vperm.slane %v1153_v14, 0  ;;  %v1156_v16 = vrot.slane %v5999_v59, 5 }
0x18c3   : > { %5348 = vtanh.f32 %v6255_v20  ;;  %v1295_v21 = vpop.permute.xlu2 %1294 }
0x18c4   : > { %1317 = vst.msk [vmem:[#allocation2 + $0xd] sm:$0x1] %vm690_vm8, %v1295_v21  ;;  %v1164_v21 = vperm.slane %v1156_v16, 0  ;;  %v1664_v16 = vrot.slane %v6148_v18, 5 }
0x18c8   : > { %v669_v29 = vpop.permute.xlu0 %668 }
0x18c9   : > { %v5349_v40 = vpop.eup %5348  ;;  %692 = vst.msk [vmem:[#allocation2 + $0x8] sm:$0x1] %vm690_vm8, %v669_v29  ;;  %1800 = vrot.lane.b32.xlu2 %v1788_v27, %s5749_s20  ;;  %v1279_v29 = vrot.slane %v6017_v42, 3 }
0x18ca   : > { %1889 = vrot.lane.b32.xlu1 %v5349_v40, %s5748_s19 }
0x18cb   : > { %v1301_v5 = vpop.permute.xlu2 %1300  ;;  %v1287_v30 = vperm.slane %v1279_v29, 0 }
0x18cc   : > { %1320 = vst.msk [vmem:[#allocation2 + $0x25] sm:$0x1] %vm690_vm8, %v1301_v5 }
0x18d0   : > { %v675_v33 = vpop.permute.xlu0 %674 }
0x18d1   : > { %695 = vst.msk [vmem:[#allocation2 + $0x20] sm:$0x1] %vm690_vm8, %v675_v33  ;;  %1804 = vrot.lane.b32.xlu2 %v1790_v32, %s5749_s20  ;;  %v783_v32 = vrot.slane %v5944_v9, 7 }
0x18d2   : > { %670 = vrot.lane.b32.xlu1 %v660_v4, %s5749_s20  ;;  %v1282_v4 = vrot.slane %v6017_v42, 6 }
0x18d3   : > { %v1307_v54 = vpop.permute.xlu2 %1306 }
0x18d4   : > { %1323 = vst.msk [vmem:[#allocation2 + $0x3d] sm:$0x1] %vm690_vm8, %v1307_v54  ;;  %v1290_v58 = vperm.slane %v1282_v4, 0 }
0x18d8   : > { %v681_v43 = vpop.permute.xlu0 %680 }
0x18d9   : > { %698 = vst.msk [vmem:[#allocation2 + $0x38] sm:$0x1] %vm690_vm8, %v681_v43 }
0x18da   : > { %676 = vrot.lane.b32.xlu1 %v663_v34, %s5749_s20  ;;  %v903_v34 = vrot.slane %v5963_v46, 2 }
0x18db   : > { %v1422_v60 = vpop.permute.xlu2 %1421 }
0x18dc   : > { %1443 = vst.msk [vmem:[#allocation2 + $0x16] sm:$0x1] %vm690_vm8, %v1422_v60  ;;  %v1402_v60 = vrot.slane %v6034_v28, 1 }
0x18e0   : > { %v797_v38 = vpop.permute.xlu0 %796 }
0x18e1   : > { %818 = vst.msk [vmem:[#allocation2 + $0x11] sm:$0x1] %vm690_vm8, %v797_v38  ;;  %v911_v38 = vperm.slane %v903_v34, 0  ;;  %v1404_v34 = vrot.slane %v6034_v28, 3 }
0x18e2   : > { %792 = vrot.lane.b32.xlu1 %v784_v41, %s5749_s20 }
0x18e3   : > { %v1428_v56 = vpop.permute.xlu2 %1427 }
0x18e4   : > { %1446 = vst.msk [vmem:[#allocation2 + $0x2e] sm:$0x1] %vm690_vm8, %v1428_v56  ;;  %v1410_v56 = vperm.slane %v1402_v60, 0 }
0x18ea   : > { %798 = vrot.lane.b32.xlu1 %v787_v37, %s5749_s20  ;;  %v906_v37 = vrot.slane %v5963_v46, 5  ;;  %v1034_v46 = vperm.slane %v5981_v22, 0 }
0x18eb   : > { %v1432_v24 = vpop.permute.xlu2 %1431 }
0x18ec   : > { %1448 = vst.msk [vmem:[#allocation2 + $0x3e] sm:$0x1] %vm690_vm8, %v1432_v24 }
0x18f2   : > { %802 = vrot.lane.b32.xlu1 %v789_v44, %s5749_s20  ;;  %v914_v44 = vperm.slane %v906_v37, 0 }
0x18f3   : > { %v1547_v45 = vpop.permute.xlu2 %1546 }
0x18f4   : > { %1568 = vst.msk [vmem:[#allocation2 + $0x17] sm:$0x1] %vm690_vm8, %v1547_v45  ;;  %v1413_v45 = vperm.slane %v1405_v3, 0 }
0x18fa   : > { %917 = vrot.lane.b32.xlu1 %v909_v48, %s5749_s20 }
0x18fb   : > { %v1553_v7 = vpop.permute.xlu2 %1552 }
0x18fc   : > { %1571 = vst.msk [vmem:[#allocation2 + $0x2f] sm:$0x1] %vm690_vm8, %v1553_v7  ;;  %v1029_v7 = vrot.slane %v5981_v22, 3 }
0x1902   : > { %923 = vrot.lane.b32.xlu1 %v912_v10, %s5749_s20  ;;  %v1527_v10 = vrot.slane %v6120_v50, 1 }
0x1903   : > { %v1676_v51 = vpop.permute.xlu2 %1675 }
0x1904   : > { %1699 = vst.msk [vmem:[#allocation3] sm:$0x1] %vm690_vm8, %v1676_v51  ;;  %v1037_v51 = vperm.slane %v1029_v7, 0  ;;  %v1535_v52 = vperm.slane %v1527_v10, 0  ;;  %v1529_v10 = vrot.slane %v6120_v50, 3 }
0x190a   : > { %929 = vrot.lane.b32.xlu1 %v915_v53, %s5749_s20  ;;  %v1032_v53 = vrot.slane %v5981_v22, 6  ;;  %v1533_v22 = vrot.slane %v6120_v50, 7 }
0x190b   : > { %v1682_v55 = vpop.permute.xlu2 %1681 }
0x190c   : > { %1702 = vst.msk [vmem:[#allocation3 + $0x18] sm:$0x1] %vm690_vm8, %v1682_v55 }
0x1912   : > { %1044 = vrot.lane.b32.xlu1 %v1035_v61, %s5749_s20  ;;  %v1538_v61 = vperm.slane %v1530_v57, 0 }
0x1913   : > { %v1688_v62 = vpop.permute.xlu2 %1687 }
0x1914   : > { %1705 = vst.msk [vmem:[#allocation3 + $0x30] sm:$0x1] %vm690_vm8, %v1688_v62  ;;  %v1152_v62 = vrot.slane %v5999_v59, 1 }
0x191a   : > { %1050 = vrot.lane.b32.xlu1 %v1038_v1, %s5749_s20  ;;  %v1160_v1 = vperm.slane %v1152_v62, 0  ;;  %v1660_v62 = vrot.slane %v6148_v18, 1 }
0x191b   : > { %v1795_v2 = vpop.permute.xlu2 %1794 }
0x191c   : > { %1817 = vst.msk [vmem:[#allocation3 + $0x9] sm:$0x1] %vm690_vm8, %v1795_v2  ;;  %v1155_v2 = vrot.slane %v5999_v59, 4 }
0x1922   : > { %1056 = vrot.lane.b32.xlu1 %v1041_v12, %s5749_s20  ;;  %v1661_v12 = vrot.slane %v6148_v18, 2 }
0x1923   : > { %v1801_v11 = vpop.permute.xlu2 %1800 }
0x1924   : > { %1820 = vst.msk [vmem:[#allocation3 + $0x21] sm:$0x1] %vm690_vm8, %v1801_v11  ;;  %v1163_v11 = vperm.slane %v1155_v2, 0  ;;  %v1669_v14 = vperm.slane %v1661_v12, 0  ;;  %v1666_v12 = vrot.slane %v6148_v18, 7 }
0x192a   : > { %1171 = vrot.lane.b32.xlu1 %v1161_v47, %s5749_s20  ;;  %v1158_v47 = vrot.slane %v5999_v59, 7  ;;  %v1784_v59 = vperm.slane %v6165_v13, 0 }
0x192b   : > { %v1805_v15 = vpop.permute.xlu2 %1804 }
0x192c   : > { %1822 = vst.msk [vmem:[#allocation3 + $0x31] sm:$0x1] %vm690_vm8, %v1805_v15 }
0x1932   : > { %1177 = vrot.lane.b32.xlu1 %v1164_v21, %s5749_s20  ;;  %v1166_v21 = vperm.slane %v1158_v47, 0 }
0x193a   : > { %1292 = vrot.lane.b32.xlu1 %v1284_v26, %s5749_s20  ;;  %v1672_v26 = vperm.slane %v1664_v16, 0 }
0x193c   : > { %v1890_v27 = vpop.permute.xlu1 %1889 }
0x193d   : > { %v6312_v40 = vmul.f32 %v1890_v27, %v6174_v35  ;;  %v791_v35 = vperm.slane %v783_v32, 0  ;;  %v1278_v27 = vrot.slane %v6017_v42, 2  ;;  %v1779_v32 = vrot.slane %v6165_v13, 3 }
0x193f   : > { %1947 = vrot.lane.b32.xlu0 %v6312_v40, %s5749_s20  ;;  %v1894_v5 = vrot.slane %v6312_v40, 1  ;;  %v1897_v54 = vrot.slane %v6312_v40, 4  ;;  %v1900_v41 = vrot.slane %v6312_v40, 7  ;;  %v1787_v4 = vperm.slane %v1779_v32, 0 }
0x1940   : > { %v1896_v37 = vrot.slane %v6312_v40, 3 }
0x1941   : > { %v1902_v31 = vperm.slane %v1894_v5, 0  ;;  %v1905_v43 = vperm.slane %v1897_v54, 0  ;;  %v1908_v39 = vperm.slane %v1900_v41, 0  ;;  %v1286_v5 = vperm.slane %v1278_v27, 0 }
0x1942   : > { %1298 = vrot.lane.b32.xlu1 %v1287_v30, %s5749_s20  ;;  %v1281_v30 = vrot.slane %v6017_v42, 5  ;;  %v1781_v54 = vrot.slane %v6165_v13, 5  ;;  %v1409_v42 = vperm.slane %v6034_v28, 0  ;;  %v1901_v41 = vperm.slane %v6312_v40, 0 }
0x1943   : > { %1911 = vrot.lane.b32.xlu2 %v1902_v31, %s5749_s20 }
0x1944   : > { %v671_v33 = vpop.permute.xlu1 %670 }
0x1945   : > { %693 = vst.msk [vmem:[#allocation2 + $0x10] sm:$0x1] %vm690_vm8, %v671_v33  ;;  %v1289_v33 = vperm.slane %v1281_v30, 0 }
0x1947   : > { %806 = vrot.lane.b32.xlu0 %v791_v35, %s5749_s20 }
0x194a   : > { %1304 = vrot.lane.b32.xlu1 %v1290_v58, %s5749_s20 }
0x194b   : > { %1917 = vrot.lane.b32.xlu2 %v1905_v43, %s5749_s20  ;;  %v1789_v43 = vperm.slane %v1781_v54, 0 }
0x194c   : > { %v677_v9 = vpop.permute.xlu1 %676 }
0x194d   : > { %696 = vst.msk [vmem:[#allocation2 + $0x28] sm:$0x1] %vm690_vm8, %v677_v9 }
0x194f   : > { %921 = vrot.lane.b32.xlu0 %v911_v38, %s5749_s20  ;;  %v1412_v38 = vperm.slane %v1404_v34, 0  ;;  %v552_v34 = vld [vmem:[#allocation4] sm:$0xff] }
0x1952   : > { %1419 = vrot.lane.b32.xlu1 %v1410_v56, %s5749_s20  ;;  %v1407_v56 = vrot.slane %v6034_v28, 6 }
0x1953   : > { %1923 = vrot.lane.b32.xlu2 %v1908_v39, %s5749_s20 }
0x1954   : > { %v793_v24 = vpop.permute.xlu1 %792  ;;  %v1415_v3 = vperm.slane %v1407_v56, 0 }
0x1955   : > { %816 = vst.msk [vmem:[#allocation2 + $0x1] sm:$0x1] %vm690_vm8, %v793_v24 }
0x1957   : > { %927 = vrot.lane.b32.xlu0 %v914_v44, %s5749_s20  ;;  %v1904_v44 = vperm.slane %v1896_v37, 0 }
0x195a   : > { %1425 = vrot.lane.b32.xlu1 %v1413_v45, %s5749_s20 }
0x195c   : > { %v799_v48 = vpop.permute.xlu1 %798 }
0x195d   : > { %819 = vst.msk [vmem:[#allocation2 + $0x19] sm:$0x1] %vm690_vm8, %v799_v48  ;;  %v1899_v48 = vrot.slane %v6312_v40, 6 }
0x195f   : > { %1042 = vrot.lane.b32.xlu0 %v1034_v46, %s5749_s20  ;;  %v1534_v46 = vperm.slane %v6120_v50, 0  ;;  %v1907_v7 = vperm.slane %v1899_v48, 0 }
0x1962   : > { %1942 = vperm.xlu1 %5226, %v6083_v36   ;;  %v1040_v36 = vperm.slane %v1032_v53, 0 }
0x1964   : > { %v803_v49 = vpop.permute.xlu1 %802 }
0x1965   : > { %821 = vst.msk [vmem:[#allocation2 + $0x29] sm:$0x1] %vm690_vm8, %v803_v49 }
0x1967   : > { %1048 = vrot.lane.b32.xlu0 %v1037_v51, %s5749_s20 }
0x196a   : > { %1544 = vrot.lane.b32.xlu1 %v1535_v52, %s5749_s20  ;;  %v1537_v52 = vperm.slane %v1529_v10, 0 }
0x196b   : > { %5227 = vset.pattern.permute.xlu1 %v5753_v23  ;;  %v1541_v23 = vperm.slane %v1533_v22, 0  ;;  %v1668_v22 = vperm.slane %v1660_v62, 0 }
0x196c   : > { %v918_v55 = vpop.permute.xlu1 %917 }
0x196d   : > { %941 = vst.msk [vmem:[#allocation2 + $0x2] sm:$0x1] %vm690_vm8, %v918_v55  ;;  %v1532_v55 = vrot.slane %v6120_v50, 6 }
0x196f   : > { %1054 = vrot.lane.b32.xlu0 %v1040_v36, %s5749_s20  ;;  %v1540_v36 = vperm.slane %v1532_v55, 0 }
0x1972   : > { %1550 = vrot.lane.b32.xlu1 %v1538_v61, %s5749_s20 }
0x1974   : > { %v924_v63 = vpop.permute.xlu1 %923 }
0x1975   : > { %944 = vst.msk [vmem:[#allocation2 + $0x1a] sm:$0x1] %vm690_vm8, %v924_v63 }
0x1977   : > { %1169 = vrot.lane.b32.xlu0 %v1160_v1, %s5749_s20  ;;  %v1663_v1 = vrot.slane %v6148_v18, 4 }
0x1979   : > { %v1671_v2 = vperm.slane %v1663_v1, 0 }
0x197a   : > { %1556 = vrot.lane.b32.xlu1 %v1541_v23, %s5749_s20 }
0x197c   : > { %v930_v8 = vpop.permute.xlu1 %929 }
0x197d   : > { %947 = vst.msk [vmem:[#allocation2 + $0x32] sm:$0x1] %vm690_vm8, %v930_v8 }
0x197f   : > { %1175 = vrot.lane.b32.xlu0 %v1163_v11, %s5749_s20 }
0x1982   : > { %1679 = vrot.lane.b32.xlu1 %v1669_v14, %s5749_s20  ;;  %v1674_v14 = vperm.slane %v1666_v12, 0 }
0x1984   : > { %v1045_v15 = vpop.permute.xlu1 %1044 }
0x1985   : > { %1067 = vst.msk [vmem:[#allocation2 + $0xb] sm:$0x1] %vm690_vm8, %v1045_v15  ;;  %v1778_v15 = vrot.slane %v6165_v13, 2 }
0x1987   : > { %1181 = vrot.lane.b32.xlu0 %v1166_v21, %s5749_s20  ;;  %v1786_v21 = vperm.slane %v1778_v15, 0 }
0x198a   : > { %1685 = vrot.lane.b32.xlu1 %v1672_v26, %s5749_s20 }
0x198c   : > { %v1051_v29 = vpop.permute.xlu1 %1050 }
0x198d   : > { %1070 = vst.msk [vmem:[#allocation2 + $0x23] sm:$0x1] %vm690_vm8, %v1051_v29 }
0x198f   : > { %1296 = vrot.lane.b32.xlu0 %v1286_v5, %s5749_s20 }
0x1992   : > { %1792 = vrot.lane.b32.xlu1 %v1784_v59, %s5749_s20 }
0x1994   : > { %v1057_v31 = vpop.permute.xlu1 %1056 }
0x1995   : > { %1073 = vst.msk [vmem:[#allocation2 + $0x3b] sm:$0x1] %vm690_vm8, %v1057_v31 }
0x1997   : > { %1302 = vrot.lane.b32.xlu0 %v1289_v33, %s5749_s20 }
0x199a   : > { %1798 = vrot.lane.b32.xlu1 %v1787_v4, %s5749_s20 }
0x199c   : > { %v1172_v35 = vpop.permute.xlu1 %1171 }
0x199d   : > { %1193 = vst.msk [vmem:[#allocation2 + $0x14] sm:$0x1] %vm690_vm8, %v1172_v35  ;;  %v1912_v58 = vpop.permute.xlu2 %1911  ;;  %v555_v35 = vld [vmem:[#allocation4 + $0x18] sm:$0xff] }
0x199e   : > { %1934 = vst.msk [vmem:[#allocation3 + $0xa] sm:$0x1] %vm690_vm8, %v1912_v58  ;;  %5162 = vmatpush.msrb.mxu2 %v555_v35  ;;  %2347 = vmatpush.msra.mxu0 %v555_v35  ;;  %v554_v58 = vld [vmem:[#allocation4 + $0x10] sm:$0xff]  ;;  %v6488_v35 = vld [vmem:[%s6080_s26] sm:$0xff] }
0x199f   : > { %1417 = vrot.lane.b32.xlu0 %v1409_v42, %s5749_s20  ;;  %v553_v42 = vld [vmem:[#allocation4 + $0x8] sm:$0xff] }
0x19a0   : > { %5163 = vmatpush.msrb.mxu2 %v554_v58  ;;  %2348 = vmatpush.msra.mxu0 %v554_v58 }
0x19a2   : > { %1802 = vrot.lane.b32.xlu1 %v1789_v43, %s5749_s20  ;;  %5164 = vmatpush.msrb.mxu2 %v553_v42 }
0x19a3   : > { %2349 = vmatpush.msra.mxu0 %v553_v42 }
0x19a4   : > { %v1178_v9 = vpop.permute.xlu1 %1177  ;;  %5165 = vmatpush.msrb.mxu2 %v552_v34 }
0x19a5   : > { %1196 = vst.msk [vmem:[#allocation2 + $0x2c] sm:$0x1] %vm690_vm8, %v1178_v9  ;;  %v1918_v60 = vpop.permute.xlu2 %1917  ;;  %2350 = vmatpush.msra.mxu0 %v552_v34 }
0x19a6   : > { %1937 = vst.msk [vmem:[#allocation3 + $0x22] sm:$0x1] %vm690_vm8, %v1918_v60 }
0x19a7   : > { %1423 = vrot.lane.b32.xlu0 %v1412_v38, %s5749_s20 }
0x19aa   : > { %1909 = vrot.lane.b32.xlu1 %v1901_v41, %s5749_s20 }
0x19ac   : > { %v1293_v39 = vpop.permute.xlu1 %1292 }
0x19ad   : > { %1316 = vst.msk [vmem:[#allocation2 + $0x5] sm:$0x1] %vm690_vm8, %v1293_v39  ;;  %v1924_v24 = vpop.permute.xlu2 %1923  ;;  %v6448_v39 = vld [vmem:[%s8449_s6] ss:$0 sm:$0xff] }
0x19ae   : > { %1940 = vst.msk [vmem:[#allocation3 + $0x3a] sm:$0x1] %vm690_vm8, %v1924_v24 }
0x19af   : > { %1429 = vrot.lane.b32.xlu0 %v1415_v3, %s5749_s20  ;;  %v6456_v3 = vld [vmem:[%s8451_s8] ss:$0 sm:$0xff] }
0x19b1   : > { %v1948_v45 = vpop.permute.xlu0 %1947 }
0x19b2   : > { %1915 = vrot.lane.b32.xlu1 %v1904_v44, %s5749_s20  ;;  %5138 = vmatmul.msk.f32.vlgmr.msra.gmra.mxu3 %vm587_vm7, %v1948_v45 }
0x19b4   : > { %v1299_v28 = vpop.permute.xlu1 %1298 }
0x19b5   : > { %1319 = vst.msk [vmem:[#allocation2 + $0x1d] sm:$0x1] %vm690_vm8, %v1299_v28 }
0x19b7   : > { %1542 = vrot.lane.b32.xlu0 %v1534_v46, %s5749_s20 }
0x19b9   : > { %v807_v49 = vpop.permute.xlu0 %806 }
0x19ba   : > { %823 = vst.msk [vmem:[#allocation2 + $0x39] sm:$0x1] %vm690_vm8, %v807_v49  ;;  %1921 = vrot.lane.b32.xlu1 %v1907_v7, %s5749_s20 }
0x19bc   : > { %v1305_v51 = vpop.permute.xlu1 %1304 }
0x19bd   : > { %1322 = vst.msk [vmem:[#allocation2 + $0x35] sm:$0x1] %vm690_vm8, %v1305_v51 }
0x19bf   : > { %1548 = vrot.lane.b32.xlu0 %v1537_v52, %s5749_s20 }
0x19c1   : > { %v922_v53 = vpop.permute.xlu0 %921 }
0x19c2   : > { %943 = vst.msk [vmem:[#allocation2 + $0x12] sm:$0x1] %vm690_vm8, %v922_v53 }
0x19c4   : > { %v1420_v57 = vpop.permute.xlu1 %1419 }
0x19c5   : > { %1442 = vst.msk [vmem:[#allocation2 + $0xe] sm:$0x1] %vm690_vm8, %v1420_v57 }
0x19c7   : > { %1554 = vrot.lane.b32.xlu0 %v1540_v36, %s5749_s20 }
0x19c9   : > { %v928_v61 = vpop.permute.xlu0 %927 }
0x19ca   : > { %946 = vst.msk [vmem:[#allocation2 + $0x2a] sm:$0x1] %vm690_vm8, %v928_v61 }
0x19cc   : > { %v1426_v63 = vpop.permute.xlu1 %1425 }
0x19cd   : > { %1445 = vst.msk [vmem:[#allocation2 + $0x26] sm:$0x1] %vm690_vm8, %v1426_v63 }
0x19cf   : > { %1677 = vrot.lane.b32.xlu0 %v1668_v22, %s5749_s20 }
0x19d1   : > { %v1043_v50 = vpop.permute.xlu0 %1042 }
0x19d2   : > { %1066 = vst.msk [vmem:[#allocation2 + $0x3] sm:$0x1] %vm690_vm8, %v1043_v50 }
0x19d4   : > { %v6416_v23 = vpop.permute.xlu1 %1942 }
0x19d5   : > { %v1945_v37 = vmul.f32 %v6448_v39, %v6416_v23 }
0x19d7   : > { %1683 = vrot.lane.b32.xlu0 %v1671_v2, %s5749_s20  ;;  %v1946_v44 = vadd.f32 %v6456_v3, %v1945_v37 }
0x19d9   : > { %v1049_v8 = vpop.permute.xlu0 %1048 }
0x19da   : > { %1069 = vst.msk [vmem:[#allocation2 + $0x1b] sm:$0x1] %vm690_vm8, %v1049_v8 }
0x19dc   : > { %v1545_v11 = vpop.permute.xlu1 %1544 }
0x19dd   : > { %1567 = vst.msk [vmem:[#allocation2 + $0xf] sm:$0x1] %vm690_vm8, %v1545_v11 }
0x19df   : > { %1689 = vrot.lane.b32.xlu0 %v1674_v14, %s5749_s20 }
0x19e1   : > { %v1055_v47 = vpop.permute.xlu0 %1054 }
0x19e2   : > { %1072 = vst.msk [vmem:[#allocation2 + $0x33] sm:$0x1] %vm690_vm8, %v1055_v47  ;;  %v1783_v47 = vrot.slane %v6165_v13, 7 }
0x19e4   : > { %v1551_v16 = vpop.permute.xlu1 %1550 }
0x19e5   : > { %1570 = vst.msk [vmem:[#allocation2 + $0x27] sm:$0x1] %vm690_vm8, %v1551_v16 }
0x19e7   : > { %1796 = vrot.lane.b32.xlu0 %v1786_v21, %s5749_s20  ;;  %v1791_v21 = vperm.slane %v1783_v47, 0 }
0x19e9   : > { %v1170_v18 = vpop.permute.xlu0 %1169 }
0x19ea   : > { %1192 = vst.msk [vmem:[#allocation2 + $0xc] sm:$0x1] %vm690_vm8, %v1170_v18  ;;  %v1895_v18 = vrot.slane %v6312_v40, 2 }
0x19ec   : > { %v1557_v26 = vpop.permute.xlu1 %1556 }
0x19ed   : > { %1573 = vst.msk [vmem:[#allocation2 + $0x3f] sm:$0x1] %vm690_vm8, %v1557_v26  ;;  %v1903_v26 = vperm.slane %v1895_v18, 0 }
0x19f1   : > { %v1176_v27 = vpop.permute.xlu0 %1175 }
0x19f2   : > { %1195 = vst.msk [vmem:[#allocation2 + $0x24] sm:$0x1] %vm690_vm8, %v1176_v27  ;;  %v1898_v27 = vrot.slane %v6312_v40, 5 }
0x19f4   : > { %v1680_v29 = vpop.permute.xlu1 %1679 }
0x19f5   : > { %1701 = vst.msk [vmem:[#allocation3 + $0x10] sm:$0x1] %vm690_vm8, %v1680_v29  ;;  %v1906_v29 = vperm.slane %v1898_v27, 0 }
0x19f9   : > { %v1182_v5 = vpop.permute.xlu0 %1181  ;;  %v2296_v52 = vld [vmem:[#allocation2 + $0x20] sm:$0xff] }
0x19fa   : > { %1198 = vst.msk [vmem:[#allocation2 + $0x3c] sm:$0x1] %vm690_vm8, %v1182_v5 }
0x19fc   : > { %v1686_v59 = vpop.permute.xlu1 %1685 }
0x19fd   : > { %1704 = vst.msk [vmem:[#allocation3 + $0x28] sm:$0x1] %vm690_vm8, %v1686_v59 }
0x1a01   : > { %v1297_v30 = vpop.permute.xlu0 %1296  ;;  %v2299_v16 = vld [vmem:[#allocation2 + $0x38] sm:$0xff] }
0x1a02   : > { %1318 = vst.msk [vmem:[#allocation2 + $0x15] sm:$0x1] %vm690_vm8, %v1297_v30 }
0x1a04   : > { %v1793_v31 = vpop.permute.xlu1 %1792 }
0x1a05   : > { %1816 = vst.msk [vmem:[#allocation3 + $0x1] sm:$0x1] %vm690_vm8, %v1793_v31 }
0x1a09   : > { %v1303_v32 = vpop.permute.xlu0 %1302 }
0x1a0a   : > { %1321 = vst.msk [vmem:[#allocation2 + $0x2d] sm:$0x1] %vm690_vm8, %v1303_v32 }
0x1a0c   : > { %v1799_v33 = vpop.permute.xlu1 %1798 }
0x1a0d   : > { %1819 = vst.msk [vmem:[#allocation3 + $0x19] sm:$0x1] %vm690_vm8, %v1799_v33 }
0x1a11   : > { %v1418_v4 = vpop.permute.xlu0 %1417  ;;  %v2297_v57 = vld [vmem:[#allocation2 + $0x28] sm:$0xff] }
0x1a12   : > { %1441 = vst.msk [vmem:[#allocation2 + $0x6] sm:$0x1] %vm690_vm8, %v1418_v4 }
0x1a14   : > { %v1803_v54 = vpop.permute.xlu1 %1802 }
0x1a15   : > { %1821 = vst.msk [vmem:[#allocation3 + $0x29] sm:$0x1] %vm690_vm8, %v1803_v54 }
0x1a19   : > { %v1424_v43 = vpop.permute.xlu0 %1423 }
0x1a1a   : > { %1444 = vst.msk [vmem:[#allocation2 + $0x1e] sm:$0x1] %vm690_vm8, %v1424_v43 }
0x1a1c   : > { %v1910_v9 = vpop.permute.xlu1 %1909 }
0x1a1d   : > { %1933 = vst.msk [vmem:[#allocation3 + $0x2] sm:$0x1] %vm690_vm8, %v1910_v9 }
0x1a21   : > { %v1430_v60 = vpop.permute.xlu0 %1429 }
0x1a22   : > { %1447 = vst.msk [vmem:[#allocation2 + $0x36] sm:$0x1] %vm690_vm8, %v1430_v60 }
0x1a24   : > { %v1916_v38 = vpop.permute.xlu1 %1915 }
0x1a25   : > { %1936 = vst.msk [vmem:[#allocation3 + $0x1a] sm:$0x1] %vm690_vm8, %v1916_v38 }
0x1a29   : > { %v1543_v41 = vpop.permute.xlu0 %1542 }
0x1a2a   : > { %1566 = vst.msk [vmem:[#allocation2 + $0x7] sm:$0x1] %vm690_vm8, %v1543_v41 }
0x1a2c   : > { %v1922_v56 = vpop.permute.xlu1 %1921 }
0x1a2d   : > { %1939 = vst.msk [vmem:[#allocation3 + $0x32] sm:$0x1] %vm690_vm8, %v1922_v56 }
0x1a31   : > { %v1549_v24 = vpop.permute.xlu0 %1548 }
0x1a32   : > { %1569 = vst.msk [vmem:[#allocation2 + $0x1f] sm:$0x1] %vm690_vm8, %v1549_v24 }
0x1a35   : > { %v1968_v45 = vpop.f32.mrf.mxu3 }
0x1a36   : > { %v1971_v28 = vadd.f32 %v1968_v45, %v1946_v44 }
0x1a38   : > { %v5139_v48 = vmul.f32 -1.442695, %v1971_v28 }
0x1a39   : > { %v1555_v46 = vpop.permute.xlu0 %1554  ;;  %v2295_v7 = vld [vmem:[#allocation2 + $0x18] sm:$0xff] }
0x1a3a   : > { %5350 = vpow2.f32 %v5139_v48  ;;  %1572 = vst.msk [vmem:[#allocation2 + $0x37] sm:$0x1] %vm690_vm8, %v1555_v46  ;;  %5147 = vmatmul.msk.f32.vlgmr.msrb.gmra.mxu2 %vm587_vm7, %v2295_v7 }
0x1a40   : > { %v5351_v49 = vpop.eup %5350 }
0x1a41   : > { %v1976_v10 = vadd.f32 1.0, %v5351_v49  ;;  %v1678_v51 = vpop.permute.xlu0 %1677  ;;  %v2298_v23 = vld [vmem:[#allocation2 + $0x30] sm:$0xff]  ;;  %v2292_v49 = vld [vmem:[#allocation2] sm:$0xff] }
0x1a42   : > { %1700 = vst.msk [vmem:[#allocation3 + $0x8] sm:$0x1] %vm690_vm8, %v1678_v51  ;;  %5148 = vmatmul.msk.f32.gmra.mxu2 %vm587_vm7, %v2296_v52  ;;  %v2293_v51 = vld [vmem:[#allocation2 + $0x8] sm:$0xff] }
0x1a43   : > { %5352 = vrcp.f32 %v1976_v10  ;;  %v1988_v62 = vand.u32 2147483648, %v1976_v10  ;;  %v1986_v22 = vand.u32 2147483647, %v1976_v10  ;;  %vm1982_vm10 = vweird.f32 %v1976_v10 }
0x1a44   : > { %5354 = vtanh.f32 %v1971_v28 }
0x1a45   : > { %v1989_v2 = vor.u32 1.1754944e-38, %v1988_v62  ;;  %vm1987_vm12 = vcmp.eq.f32.partialorder %v1986_v22, 8.507059e+37 }
0x1a49   : > { %v5353_v53 = vpop.eup %5352  ;;  %v1684_v55 = vpop.permute.xlu0 %1683 }
0x1a4a   : > { %1703 = vst.msk [vmem:[#allocation3 + $0x20] sm:$0x1] %vm690_vm8, %v1684_v55  ;;  %5149 = vmatmul.msk.f32.gmra.mxu2 %vm587_vm7, %v2297_v57  ;;  %v1978_v36 = vmul.f32 %v5353_v53, %v1976_v10  ;;  %vm1983_vm9 = vweird.f32 %v5353_v53  ;;  %v5355_v12 = vpop.eup %5354  ;;  %v2294_v55 = vld [vmem:[#allocation2 + $0x10] sm:$0xff] }
0x1a4b   : > { %vm1984_vm11 = vmor %vm1982_vm10, %vm1983_vm9 }
0x1a4c   : > { %v1979_v61 = vsub.f32 1.0, %v1978_v36 }
0x1a4e   : > { %v1980_v63 = vmul.f32 %v5353_v53, %v1979_v61 }
0x1a50   : > { %v1981_v50 = vadd.f32 %v5353_v53, %v1980_v63 }
0x1a51   : > { %v1690_v1 = vpop.permute.xlu0 %1689 }
0x1a52   : > { %1706 = vst.msk [vmem:[#allocation3 + $0x38] sm:$0x1] %vm690_vm8, %v1690_v1  ;;  %5150 = vmatmul.msk.f32.gmra.mxu2 %vm587_vm7, %v2298_v23  ;;  %v1985_v8 = vsel %vm1984_vm11, %v5353_v53, %v1981_v50  ;;  %vm8524_vm11 = vcmask 1043459  }
0x1a53   : > { %v1990_v11 = vsel %vm1987_vm12, %v1989_v2, %v1985_v8  ;;  %vm8518_vm12 = vcmask 1044484  }
0x1a54   : > { %v1992_v14 = vsel %vm5913_vm3, %v5355_v12, %v1990_v11 }
0x1a55   : > { %1995 = vrot.lane.b32.xlu0 %v1992_v14, %s5748_s19  ;;  %v1993_v32 = vmul.f32 %v1992_v14, %v6255_v20 }
0x1a59   : > { %v1797_v15 = vpop.permute.xlu0 %1796 }
0x1a5a   : > { %1818 = vst.msk [vmem:[#allocation3 + $0x11] sm:$0x1] %vm690_vm8, %v1797_v15  ;;  %5151 = vmatmul.msk.f32.gmra.mxu2 %vm587_vm7, %v2299_v16 }
0x1a5d   : > { %1806 = vrot.lane.b32.xlu0 %v1791_v21, %s5749_s20 }
0x1a65   : > { %1913 = vrot.lane.b32.xlu0 %v1903_v26, %s5749_s20 }
0x1a6d   : > { %1919 = vrot.lane.b32.xlu0 %v1906_v29, %s5749_s20 }
0x1ac7   : > { %v1996_v13 = vpop.permute.xlu0 %1995 }
0x1ac8   : > { %v1998_v5 = vmul.f32 %v1996_v13, %v1992_v14 }
0x1aca   : > { %2000 = vrot.lane.b32.xlu0 %v1998_v5, %s5749_s20 }
0x1acf   : > { %v1807_v59 = vpop.permute.xlu0 %1806 }
0x1ad0   : > { %1823 = vst.msk [vmem:[#allocation3 + $0x39] sm:$0x1] %vm690_vm8, %v1807_v59 }
0x1ad7   : > { %v1914_v30 = vpop.permute.xlu0 %1913 }
0x1ad8   : > { %1935 = vst.msk [vmem:[#allocation3 + $0x12] sm:$0x1] %vm690_vm8, %v1914_v30 }
0x1adf   : > { %v1920_v31 = vpop.permute.xlu0 %1919 }
0x1ae0   : > { %1938 = vst.msk [vmem:[#allocation3 + $0x2a] sm:$0x1] %vm690_vm8, %v1920_v31  ;;  %v2900_v31 = vshrl.u32 %v560_v17, 7 }
0x1ae2   : > { %5235 = vset.pattern.permute.xlu0 %v2900_v31 }
0x1b3c   : > { %v2001_v40 = vpop.permute.xlu0 %2000 }
0x1b3d   : > { %v6483_v33 = vadd.f32 %v2001_v40, %v1993_v32  ;;  %v5665_v32 = vld [vmem:[%s5877_s18] sm:$0xff] }
0x1b3e   : > { %vm2444_vm1 = vcmp.ne.f32.partialorder %v5665_v32, 0.0 }
0x1b3f   : > { %5356 = vtanh.f32 %v6483_v33  ;;  %vm2446_vm4 = vmor %vm2444_vm1, %vm2445_vm2 }
0x1b45   : > { %v5357_v4 = vpop.eup %5356 }
0x1b46   : > { %2006 = vrot.lane.b32.xlu1 %v5357_v4, %s5748_s19 }
0x1b4e   : > { %2059 = vperm.xlu1 %5227, %v6488_v35  }
0x1b56   : > { %5241 = vset.pattern.permute.xlu1 %v2900_v31 }
0x1bb8   : > { %v2007_v54 = vpop.permute.xlu1 %2006 }
0x1bb9   : > { %v2009_v58 = vmul.f32 %v2007_v54, %v1992_v14 }
0x1bbb   : > { %2064 = vrot.lane.b32.xlu2 %v2009_v58, %s5749_s20  ;;  %v2012_v42 = vrot.slane %v2009_v58, 2  ;;  %v2011_v43 = vrot.slane %v2009_v58, 1  ;;  %v2018_v9 = vperm.slane %v2009_v58, 0  ;;  %v2015_v60 = vrot.slane %v2009_v58, 5 }
0x1bbc   : > { %v2014_v38 = vrot.slane %v2009_v58, 4  ;;  %v2013_v37 = vrot.slane %v2009_v58, 3  ;;  %v2017_v44 = vrot.slane %v2009_v58, 7  ;;  %v2016_v28 = vrot.slane %v2009_v58, 6 }
0x1bbd   : > { %v2020_v34 = vperm.slane %v2012_v42, 0  ;;  %v2019_v20 = vperm.slane %v2011_v43, 0  ;;  %v2023_v41 = vperm.slane %v2015_v60, 0  ;;  %v5757_v58 = vmov -1000.0  }
0x1bbe   : > { %v2022_v56 = vperm.slane %v2014_v38, 0  ;;  %v2021_v24 = vperm.slane %v2013_v37, 0  ;;  %v2025_v45 = vperm.slane %v2017_v44, 0  ;;  %v2024_v48 = vperm.slane %v2016_v28, 0 }
0x1bbf   : > { %2030 = vrot.lane.b32.xlu1 %v2020_v34, %s5749_s20  ;;  %2028 = vrot.lane.b32.xlu0 %v2019_v20, %s5749_s20  ;;  %v2447_v42 = vsel %vm2446_vm4, 0.0, %v5757_v58 }
0x1bc0   : > { %v2060_v52 = vpop.permute.xlu1 %2059  ;;  %v2887_v43 = vrot.slane %v2447_v42, 4  ;;  %v2888_v34 = vrot.slane %v2447_v42, 5  ;;  %v2891_v38 = vperm.slane %v2447_v42, 0  ;;  %v2889_v37 = vrot.slane %v2447_v42, 6 }
0x1bc1   : > { %v2062_v22 = vmul.f32 %v6448_v39, %v2060_v52 }
0x1bc2   : > { %v2895_v20 = vperm.slane %v2887_v43, 0  ;;  %v2896_v17 = vperm.slane %v2888_v34, 0  ;;  %v2897_v44 = vperm.slane %v2889_v37, 0 }
0x1bc3   : > { %2026 = vrot.lane.b32.xlu2 %v2018_v9, %s5749_s20  ;;  %v2063_v50 = vadd.f32 %v6456_v3, %v2062_v22 }
0x1bc4   : > { %v5242_v9 = vpack.i.bf16 %v2896_v17, %v2895_v20 }
0x1bc7   : > { %2036 = vrot.lane.b32.xlu1 %v2023_v41, %s5749_s20  ;;  %2034 = vrot.lane.b32.xlu0 %v2022_v56, %s5749_s20 }
0x1bcb   : > { %2032 = vrot.lane.b32.xlu2 %v2021_v24, %s5749_s20  ;;  %v2890_v24 = vrot.slane %v2447_v42, 7 }
0x1bcf   : > { %2040 = vrot.lane.b32.xlu0 %v2025_v45, %s5749_s20  ;;  %v2898_v45 = vperm.slane %v2890_v24, 0 }
0x1bd1   : > { %v5247_v28 = vpack.i.bf16 %v2898_v45, %v2897_v44 }
0x1bd3   : > { %2038 = vrot.lane.b32.xlu2 %v2024_v48, %s5749_s20  ;;  %v2885_v48 = vrot.slane %v2447_v42, 2 }
0x1c15   : > { %v2065_v46 = vpop.permute.xlu2 %2064 }
0x1c16   : > { %5140 = vmatmul.msk.f32.vlgmr.msrb.gmra.mxu0 %vm587_vm7, %v2065_v46  ;;  %v2886_v46 = vrot.slane %v2447_v42, 3 }
0x1c18   : > { %v2894_v52 = vperm.slane %v2886_v46, 0 }
0x1c1d   : > { %v2027_v7 = vpop.permute.xlu2 %2026 }
0x1c1e   : > { %2050 = vst.msk [vmem:[#allocation3 + $0x3] sm:$0x1] %vm690_vm8, %v2027_v7  ;;  %5144 = vmatmul.msk.f32.vlgmr.msra.gmra.mxu0 %vm587_vm7, %v2292_v49 }
0x1c25   : > { %v2033_v10 = vpop.permute.xlu2 %2032 }
0x1c26   : > { %2053 = vst.msk [vmem:[#allocation3 + $0x1b] sm:$0x1] %vm690_vm8, %v2033_v10  ;;  %5145 = vmatmul.msk.f32.gmra.mxu0 %vm587_vm7, %v2293_v51  ;;  %v2893_v51 = vperm.slane %v2885_v48, 0 }
0x1c2d   : > { %v2039_v53 = vpop.permute.xlu2 %2038 }
0x1c2e   : > { %2056 = vst.msk [vmem:[#allocation3 + $0x33] sm:$0x1] %vm690_vm8, %v2039_v53  ;;  %5146 = vmatmul.msk.f32.gmra.mxu0 %vm587_vm7, %v2294_v55 }
0x1c31   : > { %v2029_v57 = vpop.permute.xlu0 %2028  ;;  %v2031_v36 = vpop.permute.xlu1 %2030 }
0x1c32   : > { %2051 = vst.msk [vmem:[#allocation3 + $0xb] sm:$0x1] %vm690_vm8, %v2029_v57  ;;  %v5236_v57 = vpack.i.bf16 %v2894_v52, %v2893_v51 }
0x1c33   : > { %2052 = vst.msk [vmem:[#allocation3 + $0x13] sm:$0x1] %vm690_vm8, %v2031_v36 }
0x1c39   : > { %v2035_v61 = vpop.permute.xlu0 %2034  ;;  %v2037_v62 = vpop.permute.xlu1 %2036 }
0x1c3a   : > { %2054 = vst.msk [vmem:[#allocation3 + $0x23] sm:$0x1] %vm690_vm8, %v2035_v61 }
0x1c3b   : > { %2055 = vst.msk [vmem:[#allocation3 + $0x2b] sm:$0x1] %vm690_vm8, %v2037_v62 }
0x1c41   : > { %v2041_v63 = vpop.permute.xlu0 %2040 }
0x1c42   : > { %2057 = vst.msk [vmem:[#allocation3 + $0x3b] sm:$0x1] %vm690_vm8, %v2041_v63 }
0x1c93   : > { %v2085_v1 = vpop.f32.mrf.mxu0 }
0x1c94   : > { %v2088_v23 = vadd.f32 %v2085_v1, %v2063_v50 }
0x1c96   : > { %v5141_v2 = vmul.f32 -1.442695, %v2088_v23 }
0x1c98   : > { %5358 = vpow2.f32 %v5141_v2 }
0x1c9e   : > { %v5359_v8 = vpop.eup %5358 }
0x1c9f   : > { %v2093_v12 = vadd.f32 1.0, %v5359_v8 }
0x1ca1   : > { %5360 = vrcp.f32 %v2093_v12  ;;  %v2105_v15 = vand.u32 2147483648, %v2093_v12  ;;  %v2103_v21 = vand.u32 2147483647, %v2093_v12  ;;  %vm2099_vm14 = vweird.f32 %v2093_v12 }
0x1ca2   : > { %5362 = vtanh.f32 %v2088_v23 }
0x1ca3   : > { %v2106_v26 = vor.u32 1.1754944e-38, %v2105_v15  ;;  %vm2104_vm0 = vcmp.eq.f32.partialorder %v2103_v21, 8.507059e+37 }
0x1ca7   : > { %v5361_v11 = vpop.eup %5360 }
0x1ca8   : > { %v2095_v14 = vmul.f32 %v5361_v11, %v2093_v12  ;;  %vm2100_vm13 = vweird.f32 %v5361_v11  ;;  %v5363_v29 = vpop.eup %5362 }
0x1ca9   : > { %vm2101_vm15 = vmor %vm2099_vm14, %vm2100_vm13  ;;  %vm8512_vm13 = vcmask 1045509   ;;  %vm8507_vm14 = vcmask 62464  }
0x1caa   : > { %v2096_v47 = vsub.f32 1.0, %v2095_v14 }
0x1cac   : > { %v2097_v16 = vmul.f32 %v5361_v11, %v2096_v47 }
0x1cae   : > { %v2098_v18 = vadd.f32 %v5361_v11, %v2097_v16 }
0x1cb0   : > { %v2102_v27 = vsel %vm2101_vm15, %v5361_v11, %v2098_v18 }
0x1cb1   : > { %v2107_v13 = vsel %vm2104_vm0, %v2106_v26, %v2102_v27 }
0x1cb2   : > { %v2109_v5 = vsel %vm5913_vm3, %v5363_v29, %v2107_v13 }
0x1cb3   : > { %2112 = vrot.lane.b32.xlu0 %v2109_v5, %s5748_s19  ;;  %v2110_v40 = vmul.f32 %v2109_v5, %v6483_v33  ;;  %v2884_v33 = vrot.slane %v2447_v42, 1 }
0x1cb5   : > { %v2892_v41 = vperm.slane %v2884_v33, 0 }
0x1cb7   : > { %v5230_v56 = vpack.i.bf16 %v2892_v41, %v2891_v38 }
0x1d25   : > { %v2113_v59 = vpop.permute.xlu0 %2112 }
0x1d26   : > { %v2115_v30 = vmul.f32 %v2113_v59, %v2109_v5 }
0x1d28   : > { %2117 = vrot.lane.b32.xlu1 %v2115_v30, %s5749_s20 }
0x1d30   : > { %5243 = vperm.xlu1 %5241, %v5242_v9  }
0x1d38   : > { %5252 = vset.pattern.permute.xlu1 %v5746_v0 }
0x1d9a   : > { %v2118_v4 = vpop.permute.xlu1 %2117 }
0x1d9b   : > { %v6522_v54 = vadd.f32 %v2118_v4, %v2110_v40 }
0x1d9d   : > { %5364 = vtanh.f32 %v6522_v54 }
0x1da2   : > { %v6545_v16 = vpop.permute.xlu1 %5243 }
0x1da3   : > { %v5365_v60 = vpop.eup %5364 }
0x1da4   : > { %2123 = vrot.lane.b32.xlu2 %v5365_v60, %s5748_s19 }
0x1dac   : > { %2176 = vperm.xlu2 %5228, %v6488_v35  }
0x1db4   : > { %5229 = vset.pattern.permute.xlu2 %v2900_v31 }
0x1dbc   : > { %5231 = vperm.xlu2 %5229, %v5230_v56  }
0x1dc4   : > { %5248 = vperm.xlu2 %5229, %v5247_v28  }
0x1dcc   : > { %5253 = vset.pattern.permute.xlu2 %v5746_v0 }
0x1dfe   : > { %v2124_v7 = vpop.permute.xlu2 %2123 }
0x1dff   : > { %v2126_v49 = vmul.f32 %v2124_v7, %v2109_v5 }
0x1e01   : > { %2181 = vrot.lane.b32.xlu0 %v2126_v49, %s5749_s20  ;;  %v2128_v35 = vrot.slane %v2126_v49, 1  ;;  %v2129_v10 = vrot.slane %v2126_v49, 2  ;;  %v2131_v36 = vrot.slane %v2126_v49, 4  ;;  %v2132_v61 = vrot.slane %v2126_v49, 5 }
0x1e02   : > { %v2135_v22 = vperm.slane %v2126_v49, 0  ;;  %v2134_v50 = vrot.slane %v2126_v49, 7  ;;  %v2130_v23 = vrot.slane %v2126_v49, 3  ;;  %v2133_v8 = vrot.slane %v2126_v49, 6 }
0x1e03   : > { %v2136_v53 = vperm.slane %v2128_v35, 0  ;;  %v2137_v55 = vperm.slane %v2129_v10, 0  ;;  %v2139_v62 = vperm.slane %v2131_v36, 0  ;;  %v2140_v63 = vperm.slane %v2132_v61, 0 }
0x1e04   : > { %v2142_v1 = vperm.slane %v2134_v50, 0  ;;  %v2138_v2 = vperm.slane %v2130_v23, 0  ;;  %v2141_v12 = vperm.slane %v2133_v8, 0  ;;  %v559_v50 = vld [vmem:[#allocation6 + $0x18] sm:$0xff]  ;;  %v557_v23 = vld [vmem:[#allocation6 + $0x8] sm:$0xff] }
0x1e05   : > { %2145 = vrot.lane.b32.xlu1 %v2136_v53, %s5749_s20  ;;  %2147 = vrot.lane.b32.xlu2 %v2137_v55, %s5749_s20 }
0x1e06   : > { %v2177_v11 = vpop.permute.xlu2 %2176  ;;  %2415 = vmatpush.msra.mxu1 %v559_v50  ;;  %5166 = vmatpush.msrb.mxu3 %v559_v50 }
0x1e07   : > { %v2179_v30 = vmul.f32 %v6448_v39, %v2177_v11 }
0x1e09   : > { %5237 = vperm.xlu0 %5235, %v5236_v57   ;;  %v2180_v31 = vadd.f32 %v6456_v3, %v2179_v30 }
0x1e0d   : > { %2151 = vrot.lane.b32.xlu1 %v2139_v62, %s5749_s20  ;;  %2153 = vrot.lane.b32.xlu2 %v2140_v63, %s5749_s20 }
0x1e11   : > { %2143 = vrot.lane.b32.xlu0 %v2135_v22, %s5749_s20 }
0x1e12   : > { %5254 = vset.pattern.permute.xlu0 %v5746_v0 }
0x1e15   : > { %2157 = vrot.lane.b32.xlu1 %v2142_v1, %s5749_s20  ;;  %v558_v1 = vld [vmem:[#allocation6 + $0x10] sm:$0xff] }
0x1e16   : > { %v6539_v14 = vpop.permute.xlu2 %5231  ;;  %2416 = vmatpush.msra.mxu1 %v558_v1  ;;  %5167 = vmatpush.msrb.mxu3 %v558_v1 }
0x1e18   : > { %2417 = vmatpush.msra.mxu1 %v557_v23  ;;  %5168 = vmatpush.msrb.mxu3 %v557_v23 }
0x1e19   : > { %2149 = vrot.lane.b32.xlu0 %v2138_v2, %s5749_s20  ;;  %v556_v2 = vld [vmem:[#allocation6] sm:$0xff] }
0x1e1a   : > { %2418 = vmatpush.msra.mxu1 %v556_v2  ;;  %5169 = vmatpush.msrb.mxu3 %v556_v2 }
0x1e1e   : > { %v6541_v47 = vpop.permute.xlu2 %5248 }
0x1e21   : > { %2155 = vrot.lane.b32.xlu0 %v2141_v12, %s5749_s20 }
0x1e5f   : > { %v2148_v15 = vpop.permute.xlu2 %2147 }
0x1e60   : > { %2169 = vst.msk [vmem:[#allocation3 + $0x14] sm:$0x1] %vm690_vm8, %v2148_v15 }
0x1e67   : > { %v2154_v0 = vpop.permute.xlu2 %2153 }
0x1e68   : > { %2172 = vst.msk [vmem:[#allocation3 + $0x2c] sm:$0x1] %vm690_vm8, %v2154_v0 }
0x1e73   : > { %v2182_v21 = vpop.permute.xlu0 %2181 }
0x1e74   : > { %5142 = vmatmul.msk.f32.vlgmr.msrb.gmra.mxu1 %vm587_vm7, %v2182_v21 }
0x1e77   : > { %v2146_v18 = vpop.permute.xlu1 %2145 }
0x1e78   : > { %2168 = vst.msk [vmem:[#allocation3 + $0xc] sm:$0x1] %vm690_vm8, %v2146_v18 }
0x1e7b   : > { %v6549_v26 = vpop.permute.xlu0 %5237 }
0x1e7f   : > { %v2152_v27 = vpop.permute.xlu1 %2151 }
0x1e80   : > { %2171 = vst.msk [vmem:[#allocation3 + $0x24] sm:$0x1] %vm690_vm8, %v2152_v27 }
0x1e83   : > { %v2144_v29 = vpop.permute.xlu0 %2143 }
0x1e84   : > { %2167 = vst.msk [vmem:[#allocation3 + $0x4] sm:$0x1] %vm690_vm8, %v2144_v29 }
0x1e87   : > { %v2158_v13 = vpop.permute.xlu1 %2157 }
0x1e88   : > { %2174 = vst.msk [vmem:[#allocation3 + $0x3c] sm:$0x1] %vm690_vm8, %v2158_v13 }
0x1e8b   : > { %v2150_v5 = vpop.permute.xlu0 %2149 }
0x1e8c   : > { %2170 = vst.msk [vmem:[#allocation3 + $0x1c] sm:$0x1] %vm690_vm8, %v2150_v5 }
0x1e93   : > { %v2156_v59 = vpop.permute.xlu0 %2155 }
0x1e94   : > { %2173 = vst.msk [vmem:[#allocation3 + $0x34] sm:$0x1] %vm690_vm8, %v2156_v59 }
0x1ef1   : > { %v2202_v32 = vpop.f32.mrf.mxu1 }
0x1ef2   : > { %v2205_v40 = vadd.f32 %v2202_v32, %v2180_v31 }
0x1ef4   : > { %v5143_v4 = vmul.f32 -1.442695, %v2205_v40 }
0x1ef6   : > { %5366 = vpow2.f32 %v5143_v4  ;;  %v2352_v4 = vpop.f32.mrf.mxu0 }
0x1efc   : > { %v5367_v58 = vpop.eup %5366 }
0x1efd   : > { %v2210_v42 = vadd.f32 1.0, %v5367_v58  ;;  %v6604_v58 = vld [vmem:[%s8453_s10] ss:$0 sm:$0xff] }
0x1eff   : > { %5368 = vrcp.f32 %v2210_v42  ;;  %v2222_v17 = vand.u32 2147483648, %v2210_v42  ;;  %v2220_v60 = vand.u32 2147483647, %v2210_v42  ;;  %vm2216_vm6 = vweird.f32 %v2210_v42 }
0x1f00   : > { %5370 = vtanh.f32 %v2205_v40  ;;  %v6599_v40 = vld [vmem:[%s8455_s12] ss:$0 sm:$0xff] }
0x1f01   : > { %v2223_v39 = vor.u32 1.1754944e-38, %v2222_v17  ;;  %vm2221_vm10 = vcmp.eq.f32.partialorder %v2220_v60, 8.507059e+37 }
0x1f05   : > { %v5369_v43 = vpop.eup %5368 }
0x1f06   : > { %v2212_v34 = vmul.f32 %v5369_v43, %v2210_v42  ;;  %vm2217_vm5 = vweird.f32 %v5369_v43  ;;  %v5371_v38 = vpop.eup %5370 }
0x1f07   : > { %vm2218_vm9 = vmor %vm2216_vm6, %vm2217_vm5 }
0x1f08   : > { %v2213_v20 = vsub.f32 1.0, %v2212_v34  ;;  %v2353_v34 = vadd.f32 %v6604_v58, %v2352_v4 }
0x1f0a   : > { %v2214_v9 = vmul.f32 %v5369_v43, %v2213_v20 }
0x1f0c   : > { %v2215_v33 = vadd.f32 %v5369_v43, %v2214_v9 }
0x1f0e   : > { %v2219_v3 = vsel %vm2218_vm9, %v5369_v43, %v2215_v33 }
0x1f0f   : > { %v2224_v41 = vsel %vm2221_vm10, %v2223_v39, %v2219_v3 }
0x1f10   : > { %v2226_v56 = vsel %vm5913_vm3, %v5371_v38, %v2224_v41  ;;  %vm565_vm3 = vcmask 254976  }
0x1f11   : > { %2229 = vrot.lane.b32.xlu1 %v2226_v56, %s5748_s19  ;;  %v2227_v44 = vmul.f32 %v2226_v56, %v6522_v54  ;;  %566 = vst.msk [vmem:[#allocation3 + $0x6] sm:$0x3] %vm565_vm3, %v5747_v6 }
0x1f12   : > { %567 = vst.msk [vmem:[#allocation3 + $0xe] sm:$0x3] %vm565_vm3, %v5747_v6 }
0x1f13   : > { %568 = vst.msk [vmem:[#allocation3 + $0x16] sm:$0x3] %vm565_vm3, %v5747_v6 }
0x1f14   : > { %569 = vst.msk [vmem:[#allocation3 + $0x1e] sm:$0x3] %vm565_vm3, %v5747_v6 }
0x1f15   : > { %570 = vst.msk [vmem:[#allocation3 + $0x26] sm:$0x3] %vm565_vm3, %v5747_v6 }
0x1f16   : > { %571 = vst.msk [vmem:[#allocation3 + $0x2e] sm:$0x3] %vm565_vm3, %v5747_v6 }
0x1f17   : > { %572 = vst.msk [vmem:[#allocation3 + $0x36] sm:$0x3] %vm565_vm3, %v5747_v6 }
0x1f18   : > { %573 = vst.msk [vmem:[#allocation3 + $0x3e] sm:$0x3] %vm565_vm3, %v5747_v6 }
0x1f83   : > { %v2230_v37 = vpop.permute.xlu1 %2229 }
0x1f84   : > { %v2232_v24 = vmul.f32 %v2230_v37, %v2226_v56 }
0x1f86   : > { %2234 = vrot.lane.b32.xlu2 %v2232_v24, %s5749_s20 }
0x1fe0   : > { %v2235_v45 = vpop.permute.xlu2 %2234 }
0x1fe1   : > { %v2237_v28 = vadd.f32 %v2235_v45, %v2227_v44 }
0x1fe3   : > { %5372 = vtanh.f32 %v2237_v28 }
0x1fe9   : > { %v5373_v48 = vpop.eup %5372 }
0x1fea   : > { %2240 = vrot.lane.b32.xlu0 %v5373_v48, %s5748_s19 }
0x205c   : > { %v2241_v46 = vpop.permute.xlu0 %2240 }
0x205d   : > { %v2243_v7 = vmul.f32 %v2241_v46, %v2226_v56 }
0x205f   : > { %v2252_v49 = vperm.slane %v2243_v7, 0  ;;  %v2246_v35 = vrot.slane %v2243_v7, 2  ;;  %v2245_v25 = vrot.slane %v2243_v7, 1  ;;  %v2247_v54 = vrot.slane %v2243_v7, 3 }
0x2060   : > { %v2249_v52 = vrot.slane %v2243_v7, 5  ;;  %v2248_v53 = vrot.slane %v2243_v7, 4  ;;  %v2250_v61 = vrot.slane %v2243_v7, 6  ;;  %v2251_v62 = vrot.slane %v2243_v7, 7 }
0x2061   : > { %2260 = vrot.lane.b32.xlu1 %v2252_v49, %s5749_s20  ;;  %v2254_v10 = vperm.slane %v2246_v35, 0  ;;  %v2253_v51 = vperm.slane %v2245_v25, 0  ;;  %v2255_v55 = vperm.slane %v2247_v54, 0  ;;  %v2355_v49 = vpop.f32.mrf.mxu0  ;;  %v6614_v35 = vld [vmem:[%s8456_s13] ss:$0 sm:$0xff] }
0x2062   : > { %v2257_v57 = vperm.slane %v2249_v52, 0  ;;  %v2256_v36 = vperm.slane %v2248_v53, 0  ;;  %v2258_v63 = vperm.slane %v2250_v61, 0  ;;  %v2259_v22 = vperm.slane %v2251_v62, 0 }
0x2063   : > { %2264 = vrot.lane.b32.xlu0 %v2254_v10, %s5749_s20  ;;  %2262 = vrot.lane.b32.xlu2 %v2253_v51, %s5749_s20  ;;  %v6619_v52 = vadd.f32 %v6604_v58, %v2355_v49 }
0x2069   : > { %2266 = vrot.lane.b32.xlu1 %v2255_v55, %s5749_s20 }
0x206b   : > { %2270 = vrot.lane.b32.xlu0 %v2257_v57, %s5749_s20  ;;  %2268 = vrot.lane.b32.xlu2 %v2256_v36, %s5749_s20 }
0x2071   : > { %2272 = vrot.lane.b32.xlu1 %v2258_v63, %s5749_s20 }
0x2073   : > { %2274 = vrot.lane.b32.xlu2 %v2259_v22, %s5749_s20 }
0x20bd   : > { %v2263_v8 = vpop.permute.xlu2 %2262 }
0x20be   : > { %2285 = vst.msk [vmem:[#allocation3 + $0xd] sm:$0x1] %vm690_vm8, %v2263_v8 }
0x20c5   : > { %v2269_v12 = vpop.permute.xlu2 %2268  ;;  %v2301_v29 = vld [vmem:[#allocation3 + $0x8] sm:$0xff] }
0x20c6   : > { %2288 = vst.msk [vmem:[#allocation3 + $0x25] sm:$0x1] %vm690_vm8, %v2269_v12 }
0x20cd   : > { %v2275_v11 = vpop.permute.xlu2 %2274  ;;  %v2304_v59 = vld [vmem:[#allocation3 + $0x20] sm:$0xff] }
0x20ce   : > { %2291 = vst.msk [vmem:[#allocation3 + $0x3d] sm:$0x1] %vm690_vm8, %v2275_v11 }
0x20d3   : > { %v2261_v6 = vpop.permute.xlu1 %2260 }
0x20d4   : > { %2284 = vst.msk [vmem:[#allocation3 + $0x5] sm:$0x1] %vm690_vm8, %v2261_v6 }
0x20d5   : > { %v2265_v15 = vpop.permute.xlu0 %2264  ;;  %v2307_v32 = vld [vmem:[#allocation3 + $0x38] sm:$0xff] }
0x20d6   : > { %2286 = vst.msk [vmem:[#allocation3 + $0x15] sm:$0x1] %vm690_vm8, %v2265_v15 }
0x20db   : > { %v2267_v0 = vpop.permute.xlu1 %2266  ;;  %v2300_v21 = vld [vmem:[#allocation3] sm:$0xff] }
0x20dc   : > { %2287 = vst.msk [vmem:[#allocation3 + $0x1d] sm:$0x1] %vm690_vm8, %v2267_v0  ;;  %5152 = vmatmul.msk.f32.vlgmr.msra.gmra.mxu1 %vm587_vm7, %v2300_v21 }
0x20dd   : > { %v2271_v18 = vpop.permute.xlu0 %2270  ;;  %v2302_v5 = vld [vmem:[#allocation3 + $0x10] sm:$0xff] }
0x20de   : > { %2289 = vst.msk [vmem:[#allocation3 + $0x2d] sm:$0x1] %vm690_vm8, %v2271_v18 }
0x20e3   : > { %v2273_v27 = vpop.permute.xlu1 %2272  ;;  %v2303_v13 = vld [vmem:[#allocation3 + $0x18] sm:$0xff] }
0x20e4   : > { %2290 = vst.msk [vmem:[#allocation3 + $0x35] sm:$0x1] %vm690_vm8, %v2273_v27  ;;  %5153 = vmatmul.msk.f32.gmra.mxu1 %vm587_vm7, %v2301_v29  ;;  %5155 = vmatmul.msk.f32.vlgmr.msrb.gmra.mxu3 %vm587_vm7, %v2303_v13  ;;  %vm8525_vm8 = vcmask 1042434  }
0x20e5   : > { %v2305_v30 = vld [vmem:[#allocation3 + $0x28] sm:$0xff] }
0x20eb   : > { %v2306_v31 = vld [vmem:[#allocation3 + $0x30] sm:$0xff] }
0x20ec   : > { %5154 = vmatmul.msk.f32.gmra.mxu1 %vm587_vm7, %v2302_v5  ;;  %5156 = vmatmul.msk.f32.gmra.mxu3 %vm587_vm7, %v2304_v59  ;;  %v2361_v5 = vpop.f32.mrf.mxu2 }
0x20f4   : > { %5157 = vmatmul.msk.f32.gmra.mxu3 %vm587_vm7, %v2305_v30 }
0x20fc   : > { %5158 = vmatmul.msk.f32.gmra.mxu3 %vm587_vm7, %v2306_v31 }
0x2104   : > { %5159 = vmatmul.msk.f32.gmra.mxu3 %vm587_vm7, %v2307_v32 }
0x2159   : > { %v2420_v42 = vpop.f32.mrf.mxu1 }
0x215a   : > { %v2421_v43 = vadd.f32 %v6599_v40, %v2420_v42 }
0x215c   : > { %v2496_v20 = vperm.slane %v2421_v43, 0  ;;  %v2456_v17 = vrot.slane %v2421_v43, 1  ;;  %v2457_v9 = vrot.slane %v2421_v43, 2  ;;  %v2459_v60 = vrot.slane %v2421_v43, 4 }
0x215d   : > { %v2460_v33 = vrot.slane %v2421_v43, 5  ;;  %v2458_v39 = vrot.slane %v2421_v43, 3  ;;  %v2362_v43 = vadd.f32 %v6604_v58, %v2361_v5 }
0x215e   : > { %v2592_v3 = vadd.f32 %v2496_v20, %v2353_v34  ;;  %v2497_v38 = vperm.slane %v2456_v17, 0  ;;  %v2498_v41 = vperm.slane %v2457_v9, 0  ;;  %v2500_v56 = vperm.slane %v2459_v60, 0 }
0x215f   : > { %v2501_v37 = vperm.slane %v2460_v33, 0  ;;  %v2499_v24 = vperm.slane %v2458_v39, 0 }
0x2160   : > { %5374 = vtanh.f32 %v2592_v3  ;;  %v2593_v44 = vadd.f32 %v2497_v38, %v2353_v34  ;;  %v2594_v45 = vadd.f32 %v2498_v41, %v2353_v34  ;;  %v2596_v28 = vadd.f32 %v2500_v56, %v2353_v34 }
0x2161   : > { %v2423_v48 = vpop.f32.mrf.mxu1  ;;  %v2597_v7 = vadd.f32 %v2501_v37, %v2353_v34  ;;  %v2595_v25 = vadd.f32 %v2499_v24, %v2353_v34 }
0x2162   : > { %v6609_v46 = vadd.f32 %v6599_v40, %v2423_v48  ;;  %5376 = vtanh.f32 %v2593_v44 }
0x2163   : > { %5378 = vtanh.f32 %v2594_v45 }
0x2164   : > { %5380 = vtanh.f32 %v2596_v28  ;;  %v2461_v10 = vrot.slane %v6609_v46, 1  ;;  %v2462_v51 = vrot.slane %v6609_v46, 2  ;;  %v2502_v36 = vperm.slane %v6609_v46, 0 }
0x2165   : > { %5382 = vtanh.f32 %v2597_v7  ;;  %v2464_v22 = vrot.slane %v6609_v46, 4  ;;  %v2465_v11 = vrot.slane %v6609_v46, 5  ;;  %v2463_v39 = vrot.slane %v6609_v46, 3 }
0x2166   : > { %v5375_v54 = vpop.eup %5374  ;;  %v2503_v53 = vperm.slane %v2461_v10, 0  ;;  %v2504_v55 = vperm.slane %v2462_v51, 0  ;;  %5384 = vtanh.f32 %v2595_v25  ;;  %v2598_v0 = vadd.f32 %v2502_v36, %v6619_v52 }
0x2167   : > { %v2691_v57 = vmul.f32 %v5375_v54, %v6614_v35  ;;  %v2429_v62 = vpop.f32.mrf.mxu3  ;;  %v2506_v27 = vperm.slane %v2464_v22, 0  ;;  %v2507_v59 = vperm.slane %v2465_v11, 0  ;;  %v2505_v45 = vperm.slane %v2463_v39, 0 }
0x2168   : > { %v5377_v61 = vpop.eup %5376  ;;  %v2599_v63 = vadd.f32 %v2503_v53, %v6619_v52  ;;  %v2600_v12 = vadd.f32 %v2504_v55, %v6619_v52  ;;  %v6631_v6 = vadd.f32 %v6599_v40, %v2429_v62 }
0x2169   : > { %v5379_v50 = vpop.eup %5378  ;;  %v2739_v1 = vsel %vm587_vm7, %v2691_v57, 0.0  ;;  %v2692_v23 = vmul.f32 %v5377_v61, %v6614_v35  ;;  %v2602_v4 = vadd.f32 %v2506_v27, %v6619_v52  ;;  %v2603_v17 = vadd.f32 %v2507_v59, %v6619_v52  ;;  %v2426_v7 = vpop.f32.mrf.mxu1 }
0x216a   : > { %v5381_v2 = vpop.eup %5380  ;;  %2740 = vadd.xlane.f32.xlu0 %v2739_v1  ;;  %v2693_v8 = vmul.f32 %v5379_v50, %v6614_v35  ;;  %5386 = vtanh.f32 %v2599_v63  ;;  %v2514_v31 = vperm.slane %v6631_v6, 0  ;;  %v2471_v42 = vrot.slane %v6631_v6, 1 }
0x216b   : > { %v2742_v15 = vsel %vm587_vm7, %v2692_v23, 0.0  ;;  %v5383_v21 = vpop.eup %5382  ;;  %v2695_v13 = vmul.f32 %v5381_v2, %v6614_v35  ;;  %5388 = vtanh.f32 %v2600_v12  ;;  %v2472_v9 = vrot.slane %v6631_v6, 2 }
0x216c   : > { %2743 = vadd.xlane.f32.xlu1 %v2742_v15  ;;  %v2745_v18 = vsel %vm587_vm7, %v2693_v8, 0.0  ;;  %v5385_v29 = vpop.eup %5384  ;;  %v2696_v30 = vmul.f32 %v5383_v21, %v6614_v35  ;;  %5390 = vtanh.f32 %v2598_v0  ;;  %v2610_v33 = vadd.f32 %v2514_v31, %v2362_v43  ;;  %v2358_v0 = vpop.f32.mrf.mxu0 }
0x216d   : > { %2746 = vadd.xlane.f32.xlu2 %v2745_v18  ;;  %v2694_v32 = vmul.f32 %v5385_v29, %v6614_v35  ;;  %v2751_v34 = vsel %vm587_vm7, %v2695_v13, 0.0  ;;  %5392 = vtanh.f32 %v2602_v4  ;;  %v2515_v41 = vperm.slane %v2471_v42, 0 }
0x216e   : > { %v2754_v60 = vsel %vm587_vm7, %v2696_v30, 0.0  ;;  %5394 = vtanh.f32 %v2603_v17  ;;  %v2516_v24 = vperm.slane %v2472_v9, 0  ;;  %v2474_v46 = vrot.slane %v6631_v6, 4 }
0x216f   : > { %v2748_v38 = vsel %vm587_vm7, %v2694_v32, 0.0  ;;  %5396 = vtanh.f32 %v2610_v33  ;;  %v2611_v48 = vadd.f32 %v2515_v41, %v2362_v43  ;;  %v2475_v51 = vrot.slane %v6631_v6, 5  ;;  %v2432_v42 = vpop.f32.mrf.mxu3 }
0x2170   : > { %v5387_v20 = vpop.eup %5386  ;;  %v2612_v10 = vadd.f32 %v2516_v24, %v2362_v43  ;;  %v2601_v53 = vadd.f32 %v2505_v45, %v6619_v52  ;;  %v2473_v55 = vrot.slane %v6631_v6, 3  ;;  %v6659_v36 = vadd.f32 %v6599_v40, %v2426_v7  ;;  %v2364_v45 = vpop.f32.mrf.mxu2 }
0x2171   : > { %v5389_v3 = vpop.eup %5388  ;;  %v2698_v37 = vmul.f32 %v5387_v20, %v6614_v35  ;;  %5398 = vtanh.f32 %v2611_v48  ;;  %v2518_v62 = vperm.slane %v2474_v46, 0  ;;  %v2519_v50 = vperm.slane %v2475_v51, 0 }
0x2172   : > { %2752 = vadd.xlane.f32.xlu0 %v2751_v34  ;;  %v5391_v56 = vpop.eup %5390  ;;  %v2699_v44 = vmul.f32 %v5389_v3, %v6614_v35  ;;  %5400 = vtanh.f32 %v2612_v10  ;;  %v2517_v52 = vperm.slane %v2473_v55, 0  ;;  %v2466_v8 = vrot.slane %v6659_v36, 1 }
0x2173   : > { %v2697_v28 = vmul.f32 %v5391_v56, %v6614_v35  ;;  %v2760_v49 = vsel %vm587_vm7, %v2698_v37, 0.0  ;;  %v5393_v25 = vpop.eup %5392  ;;  %5402 = vtanh.f32 %v2601_v53  ;;  %v2614_v2 = vadd.f32 %v2518_v62, %v2362_v43 }
0x2174   : > { %2755 = vadd.xlane.f32.xlu1 %v2754_v60  ;;  %v2763_v54 = vsel %vm587_vm7, %v2699_v44, 0.0  ;;  %v5395_v57 = vpop.eup %5394  ;;  %v2701_v22 = vmul.f32 %v5393_v25, %v6614_v35  ;;  %v2615_v6 = vadd.f32 %v2519_v50, %v2362_v43  ;;  %v2467_v15 = vrot.slane %v6659_v36, 2 }
0x2175   : > { %2749 = vadd.xlane.f32.xlu2 %v2748_v38  ;;  %v2757_v61 = vsel %vm587_vm7, %v2697_v28, 0.0  ;;  %v5397_v63 = vpop.eup %5396  ;;  %v2702_v1 = vmul.f32 %v5395_v57, %v6614_v35  ;;  %v2613_v18 = vadd.f32 %v2517_v52, %v2362_v43  ;;  %5404 = vtanh.f32 %v2614_v2 }
0x2176   : > { %v2709_v23 = vmul.f32 %v5397_v63, %v6614_v35  ;;  %v2769_v12 = vsel %vm587_vm7, %v2701_v22, 0.0  ;;  %v2509_v13 = vperm.slane %v2466_v8, 0  ;;  %v6672_v30 = vadd.f32 %v6604_v58, %v2358_v0 }
0x2177   : > { %v5399_v11 = vpop.eup %5398  ;;  %v2772_v21 = vsel %vm587_vm7, %v2702_v1, 0.0  ;;  %5406 = vtanh.f32 %v2615_v6  ;;  %v2510_v31 = vperm.slane %v2467_v15, 0  ;;  %v2508_v4 = vperm.slane %v6659_v36, 0  ;;  %v2435_v6 = vpop.f32.mrf.mxu3 }
0x2178   : > { %v5401_v27 = vpop.eup %5400  ;;  %v2793_v29 = vsel %vm587_vm7, %v2709_v23, 0.0  ;;  %v2710_v59 = vmul.f32 %v5399_v11, %v6614_v35  ;;  %5408 = vtanh.f32 %v2613_v18  ;;  %v2605_v34 = vadd.f32 %v2509_v13, %v6672_v30 }
0x2179   : > { %v5403_v5 = vpop.eup %5402  ;;  %v2711_v32 = vmul.f32 %v5401_v27, %v6614_v35  ;;  %v2469_v20 = vrot.slane %v6659_v36, 4  ;;  %v2606_v60 = vadd.f32 %v2510_v31, %v6672_v30  ;;  %v2470_v33 = vrot.slane %v6659_v36, 5 }
0x217a   : > { %2761 = vadd.xlane.f32.xlu0 %v2760_v49  ;;  %v2700_v43 = vmul.f32 %v5403_v5, %v6614_v35  ;;  %v2796_v17 = vsel %vm587_vm7, %v2710_v59, 0.0  ;;  %v6683_v39 = vadd.f32 %v6599_v40, %v2432_v42  ;;  %v2604_v38 = vadd.f32 %v2508_v4, %v6672_v30 }
0x217b   : > { %v5405_v9 = vpop.eup %5404  ;;  %v2799_v3 = vsel %vm587_vm7, %v2711_v32, 0.0  ;;  %5410 = vtanh.f32 %v2605_v34  ;;  %v2512_v37 = vperm.slane %v2469_v20, 0  ;;  %v2513_v28 = vperm.slane %v2470_v33, 0 }
0x217c   : > { %2764 = vadd.xlane.f32.xlu1 %v2763_v54  ;;  %v2766_v56 = vsel %vm587_vm7, %v2700_v43, 0.0  ;;  %v2713_v44 = vmul.f32 %v5405_v9, %v6614_v35  ;;  %5412 = vtanh.f32 %v2606_v60  ;;  %v2520_v46 = vperm.slane %v6683_v39, 0 }
0x217d   : > { %2758 = vadd.xlane.f32.xlu2 %v2757_v61  ;;  %v5407_v41 = vpop.eup %5406  ;;  %5414 = vtanh.f32 %v2604_v38  ;;  %v2608_v49 = vadd.f32 %v2512_v37, %v6672_v30  ;;  %v2476_v25 = vrot.slane %v6683_v39, 1  ;;  %v2365_v10 = vadd.f32 %v6604_v58, %v2364_v45  ;;  %v2367_v38 = vpop.f32.mrf.mxu2 }
0x217e   : > { %v5409_v24 = vpop.eup %5408  ;;  %v2714_v48 = vmul.f32 %v5407_v41, %v6614_v35  ;;  %v2805_v51 = vsel %vm587_vm7, %v2713_v44, 0.0  ;;  %v2609_v53 = vadd.f32 %v2513_v28, %v6672_v30  ;;  %v2477_v55 = vrot.slane %v6683_v39, 2 }
0x217f   : > { %v2712_v7 = vmul.f32 %v5409_v24, %v6614_v35  ;;  %v2616_v61 = vadd.f32 %v2520_v46, %v2365_v10  ;;  %v2468_v62 = vrot.slane %v6659_v36, 3  ;;  %5416 = vtanh.f32 %v2608_v49 }
0x2180   : > { %v2808_v57 = vsel %vm587_vm7, %v2714_v48, 0.0  ;;  %v2521_v50 = vperm.slane %v2476_v25, 0  ;;  %5418 = vtanh.f32 %v2609_v53  ;;  %v2522_v23 = vperm.slane %v2477_v55, 0 }
0x2181   : > { %v5411_v54 = vpop.eup %5410  ;;  %v2802_v22 = vsel %vm587_vm7, %v2712_v7, 0.0  ;;  %5420 = vtanh.f32 %v2616_v61  ;;  %v2511_v8 = vperm.slane %v2468_v62, 0  ;;  %v2479_v36 = vrot.slane %v6683_v39, 4 }
0x2182   : > { %2770 = vadd.xlane.f32.xlu0 %v2769_v12  ;;  %v5413_v63 = vpop.eup %5412  ;;  %v2704_v52 = vmul.f32 %v5411_v54, %v6614_v35  ;;  %v2617_v11 = vadd.f32 %v2521_v50, %v2365_v10  ;;  %v2480_v18 = vrot.slane %v6683_v39, 5  ;;  %v2478_v13 = vrot.slane %v6683_v39, 3  ;;  %v2438_v54 = vpop.f32.mrf.mxu3 }
0x2183   : > { %v5415_v1 = vpop.eup %5414  ;;  %v2705_v2 = vmul.f32 %v5413_v63, %v6614_v35  ;;  %v6711_v59 = vadd.f32 %v6599_v40, %v2435_v6  ;;  %v2524_v32 = vperm.slane %v2479_v36, 0  ;;  %v2368_v48 = vadd.f32 %v6604_v58, %v2367_v38 }
0x2184   : > { %2773 = vadd.xlane.f32.xlu1 %v2772_v21  ;;  %v2703_v12 = vmul.f32 %v5415_v1, %v6614_v35  ;;  %v2778_v15 = vsel %vm587_vm7, %v2704_v52, 0.0  ;;  %v2618_v21 = vadd.f32 %v2522_v23, %v2365_v10  ;;  %5422 = vtanh.f32 %v2617_v11 }
0x2185   : > { %2794 = vadd.xlane.f32.xlu2 %v2793_v29  ;;  %v5417_v0 = vpop.eup %5416  ;;  %v2781_v27 = vsel %vm587_vm7, %v2705_v2, 0.0  ;;  %v2607_v29 = vadd.f32 %v2511_v8, %v6672_v30  ;;  %v2525_v43 = vperm.slane %v2480_v18, 0  ;;  %v2523_v30 = vperm.slane %v2478_v13, 0  ;;  %v2370_v13 = vpop.f32.mrf.mxu2 }
0x2186   : > { %v5419_v5 = vpop.eup %5418  ;;  %v2775_v31 = vsel %vm587_vm7, %v2703_v12, 0.0  ;;  %v2707_v42 = vmul.f32 %v5417_v0, %v6614_v35  ;;  %5424 = vtanh.f32 %v2618_v21  ;;  %v2481_v9 = vrot.slane %v6711_v59, 1 }
0x2187   : > { %v5421_v4 = vpop.eup %5420  ;;  %v2708_v34 = vmul.f32 %v5419_v5, %v6614_v35  ;;  %5426 = vtanh.f32 %v2607_v29  ;;  %v2621_v39 = vadd.f32 %v2525_v43, %v2365_v10  ;;  %v2526_v49 = vperm.slane %v6711_v59, 0 }
0x2188   : > { %v2715_v20 = vmul.f32 %v5421_v4, %v6614_v35  ;;  %v2787_v60 = vsel %vm587_vm7, %v2707_v42, 0.0  ;;  %v2527_v44 = vperm.slane %v2481_v9, 0  ;;  %v2485_v61 = vrot.slane %v6711_v59, 5 }
0x2189   : > { %v2790_v41 = vsel %vm587_vm7, %v2708_v34, 0.0  ;;  %v2622_v63 = vadd.f32 %v2526_v49, %v2368_v48  ;;  %v6733_v1 = vadd.f32 %v6599_v40, %v2438_v54  ;;  %v2371_v34 = vadd.f32 %v6604_v58, %v2370_v13 }
0x218a   : > { %2797 = vadd.xlane.f32.xlu0 %v2796_v17  ;;  %v2620_v17 = vadd.f32 %v2524_v32, %v2365_v10  ;;  %v5423_v33 = vpop.eup %5422  ;;  %v2811_v24 = vsel %vm587_vm7, %v2715_v20, 0.0  ;;  %v2531_v12 = vperm.slane %v2485_v61, 0 }
0x218b   : > { %v2716_v28 = vmul.f32 %v5423_v33, %v6614_v35  ;;  %v2486_v0 = vrot.slane %v6733_v1, 1  ;;  %v2487_v29 = vrot.slane %v6733_v1, 2  ;;  %v2489_v33 = vrot.slane %v6733_v1, 4 }
0x218c   : > { %2800 = vadd.xlane.f32.xlu1 %v2799_v3  ;;  %v2482_v3 = vrot.slane %v6711_v59, 2  ;;  %v5425_v37 = vpop.eup %5424  ;;  %5428 = vtanh.f32 %v2620_v17  ;;  %v2532_v17 = vperm.slane %v6733_v1, 0 }
0x218d   : > { %2767 = vadd.xlane.f32.xlu2 %v2766_v56  ;;  %v2619_v56 = vadd.f32 %v2523_v30, %v2365_v10  ;;  %v5427_v45 = vpop.eup %5426  ;;  %5430 = vtanh.f32 %v2621_v39  ;;  %v2717_v7 = vmul.f32 %v5425_v37, %v6614_v35  ;;  %v2623_v10 = vadd.f32 %v2527_v44, %v2368_v48  ;;  %v2441_v39 = vpop.f32.mrf.mxu3 }
0x218e   : > { %v2528_v46 = vperm.slane %v2482_v3, 0  ;;  %v2706_v25 = vmul.f32 %v5427_v45, %v6614_v35  ;;  %v2814_v53 = vsel %vm587_vm7, %v2716_v28, 0.0  ;;  %v2533_v4 = vperm.slane %v2486_v0, 0 }
0x218f   : > { %5432 = vtanh.f32 %v2619_v56  ;;  %v2817_v62 = vsel %vm587_vm7, %v2717_v7, 0.0  ;;  %v2534_v30 = vperm.slane %v2487_v29, 0  ;;  %v2490_v56 = vrot.slane %v6733_v1, 5 }
0x2190   : > { %v2784_v52 = vsel %vm587_vm7, %v2706_v25, 0.0  ;;  %5434 = vtanh.f32 %v2623_v10  ;;  %v2488_v44 = vrot.slane %v6733_v1, 3  ;;  %v2442_v28 = vadd.f32 %v6599_v40, %v2441_v39 }
0x2191   : > { %v2537_v25 = vperm.slane %v2490_v56, 0 }
0x2192   : > { %2806 = vadd.xlane.f32.xlu0 %v2805_v51  ;;  %v2484_v51 = vrot.slane %v6711_v59, 4  ;;  %v5429_v55 = vpop.eup %5428  ;;  %v2495_v13 = vrot.slane %v2442_v28, 5 }
0x2193   : > { %v5431_v50 = vpop.eup %5430  ;;  %v2719_v8 = vmul.f32 %v5429_v55, %v6614_v35  ;;  %v2491_v55 = vrot.slane %v2442_v28, 1  ;;  %v2633_v61 = vadd.f32 %v2537_v25, %v2371_v34 }
0x2194   : > { %2809 = vadd.xlane.f32.xlu1 %v2808_v57  ;;  %v2624_v57 = vadd.f32 %v2528_v46, %v2368_v48  ;;  %v2530_v23 = vperm.slane %v2484_v51, 0  ;;  %v2720_v11 = vmul.f32 %v5431_v50, %v6614_v35  ;;  %v2536_v46 = vperm.slane %v2489_v33, 0 }
0x2195   : > { %2803 = vadd.xlane.f32.xlu2 %v2802_v22  ;;  %v2483_v22 = vrot.slane %v6711_v59, 3  ;;  %v5433_v2 = vpop.eup %5432  ;;  %v2823_v21 = vsel %vm587_vm7, %v2719_v8, 0.0  ;;  %v2535_v51 = vperm.slane %v2488_v44, 0 }
0x2196   : > { %5436 = vtanh.f32 %v2624_v57  ;;  %v2718_v6 = vmul.f32 %v5433_v2, %v6614_v35  ;;  %v5435_v18 = vpop.eup %5434  ;;  %v2826_v5 = vsel %vm587_vm7, %v2720_v11, 0.0 }
0x2197   : > { %5438 = vtanh.f32 %v2622_v63  ;;  %v2529_v36 = vperm.slane %v2483_v22, 0  ;;  %v2722_v43 = vmul.f32 %v5435_v18, %v6614_v35  ;;  %v2373_v63 = vpop.f32.mrf.mxu2  ;;  %v2631_v50 = vadd.f32 %v2535_v51, %v2371_v34 }
0x2198   : > { %v2820_v32 = vsel %vm587_vm7, %v2718_v6, 0.0  ;;  %v2538_v6 = vperm.slane %v2442_v28, 0 }
0x2199   : > { %v2625_v59 = vadd.f32 %v2529_v36, %v2368_v48  ;;  %v2832_v3 = vsel %vm587_vm7, %v2722_v43, 0.0 }
0x219a   : > { %2779 = vadd.xlane.f32.xlu0 %v2778_v15  ;;  %v2626_v15 = vadd.f32 %v2530_v23, %v2368_v48  ;;  %v2539_v23 = vperm.slane %v2491_v55, 0 }
0x219c   : > { %2782 = vadd.xlane.f32.xlu1 %v2781_v27  ;;  %v2627_v27 = vadd.f32 %v2531_v12, %v2368_v48  ;;  %5440 = vtanh.f32 %v2626_v15  ;;  %v2374_v12 = vadd.f32 %v6604_v58, %v2373_v63  ;;  %v2493_v58 = vrot.slane %v2442_v28, 3 }
0x219d   : > { %2776 = vadd.xlane.f32.xlu2 %v2775_v31  ;;  %v5437_v31 = vpop.eup %5436 }
0x219e   : > { %v5439_v42 = vpop.eup %5438  ;;  %5442 = vtanh.f32 %v2627_v27  ;;  %v2723_v20 = vmul.f32 %v5437_v31, %v6614_v35  ;;  %v2635_v0 = vadd.f32 %v2539_v23, %v2374_v12 }
0x219f   : > { %5444 = vtanh.f32 %v2625_v59  ;;  %v2721_v9 = vmul.f32 %v5439_v42, %v6614_v35  ;;  %v2634_v59 = vadd.f32 %v2538_v6, %v2374_v12 }
0x21a0   : > { %v2835_v37 = vsel %vm587_vm7, %v2723_v20, 0.0  ;;  %v2541_v20 = vperm.slane %v2493_v58, 0 }
0x21a1   : > { %v2829_v48 = vsel %vm587_vm7, %v2721_v9, 0.0 }
0x21a2   : > { %2788 = vadd.xlane.f32.xlu0 %v2787_v60  ;;  %v2629_v60 = vadd.f32 %v2533_v4, %v2371_v34  ;;  %v5441_v38 = vpop.eup %5440 }
0x21a3   : > { %v2725_v49 = vmul.f32 %v5441_v38, %v6614_v35  ;;  %v2637_v38 = vadd.f32 %v2541_v20, %v2374_v12  ;;  %v5239_v20 = vunpack.i.l.bf16 %v6549_v26 }
0x21a4   : > { %2791 = vadd.xlane.f32.xlu1 %v2790_v41  ;;  %v2630_v41 = vadd.f32 %v2534_v30, %v2371_v34  ;;  %v5443_v45 = vpop.eup %5442  ;;  %5446 = vtanh.f32 %v2629_v60 }
0x21a5   : > { %2812 = vadd.xlane.f32.xlu2 %v2811_v24  ;;  %v2628_v24 = vadd.f32 %v2532_v17, %v2371_v34  ;;  %v5445_v7 = vpop.eup %5444  ;;  %v2726_v10 = vmul.f32 %v5443_v45, %v6614_v35  ;;  %v2841_v40 = vsel %vm587_vm7, %v2725_v49, 0.0 }
0x21a6   : > { %5448 = vtanh.f32 %v2630_v41  ;;  %v2724_v54 = vmul.f32 %v5445_v7, %v6614_v35 }
0x21a7   : > { %5450 = vtanh.f32 %v2628_v24  ;;  %v2844_v22 = vsel %vm587_vm7, %v2726_v10, 0.0 }
0x21aa   : > { %2815 = vadd.xlane.f32.xlu0 %v2814_v53  ;;  %v2632_v53 = vadd.f32 %v2536_v46, %v2371_v34  ;;  %v5447_v57 = vpop.eup %5446  ;;  %v2543_v34 = vperm.slane %v2495_v13, 0 }
0x21ab   : > { %v2728_v8 = vmul.f32 %v5447_v57, %v6614_v35 }
0x21ac   : > { %2818 = vadd.xlane.f32.xlu1 %v2817_v62  ;;  %v2492_v62 = vrot.slane %v2442_v28, 2  ;;  %v5449_v1 = vpop.eup %5448  ;;  %5452 = vtanh.f32 %v2632_v53  ;;  %v2639_v39 = vadd.f32 %v2543_v34, %v2374_v12 }
0x21ad   : > { %2785 = vadd.xlane.f32.xlu2 %v2784_v52  ;;  %v2838_v52 = vsel %vm587_vm7, %v2724_v54, 0.0  ;;  %v5451_v2 = vpop.eup %5450  ;;  %5454 = vtanh.f32 %v2633_v61  ;;  %v2729_v36 = vmul.f32 %v5449_v1, %v6614_v35  ;;  %v2850_v18 = vsel %vm587_vm7, %v2728_v8, 0.0 }
0x21ae   : > { %v2540_v11 = vperm.slane %v2492_v62, 0  ;;  %5456 = vtanh.f32 %v2631_v50  ;;  %v2727_v15 = vmul.f32 %v5451_v2, %v6614_v35  ;;  %v5233_v2 = vunpack.i.l.bf16 %v6539_v14 }
0x21af   : > { %5458 = vtanh.f32 %v2635_v0 }
0x21b0   : > { %v2636_v29 = vadd.f32 %v2540_v11, %v2374_v12 }
0x21b2   : > { %2824 = vadd.xlane.f32.xlu0 %v2823_v21  ;;  %v2494_v21 = vrot.slane %v2442_v28, 4  ;;  %v5453_v27 = vpop.eup %5452  ;;  %5460 = vtanh.f32 %v2636_v29  ;;  %v5234_v29 = vunpack.i.h.bf16 %v6539_v14 }
0x21b3   : > { %v5455_v31 = vpop.eup %5454  ;;  %v2731_v43 = vmul.f32 %v5453_v27, %v6614_v35  ;;  %5462 = vtanh.f32 %v2634_v59 }
0x21b4   : > { %2827 = vadd.xlane.f32.xlu1 %v2826_v5  ;;  %v2853_v5 = vsel %vm587_vm7, %v2729_v36, 0.0  ;;  %v2542_v4 = vperm.slane %v2494_v21, 0  ;;  %v5457_v42 = vpop.eup %5456  ;;  %v2732_v30 = vmul.f32 %v5455_v31, %v6614_v35  ;;  %v5240_v36 = vunpack.i.h.bf16 %v6549_v26 }
0x21b5   : > { %2821 = vadd.xlane.f32.xlu2 %v2820_v32  ;;  %v2847_v32 = vsel %vm587_vm7, %v2727_v15, 0.0  ;;  %v2730_v17 = vmul.f32 %v5457_v42, %v6614_v35  ;;  %v2859_v60 = vsel %vm587_vm7, %v2731_v43, 0.0  ;;  %v5459_v33 = vpop.eup %5458 }
0x21b6   : > { %v2638_v9 = vadd.f32 %v2542_v4, %v2374_v12  ;;  %v2734_v24 = vmul.f32 %v5459_v33, %v6614_v35 }
0x21b7   : > { %v2856_v56 = vsel %vm587_vm7, %v2730_v17, 0.0 }
0x21b8   : > { %v5461_v41 = vpop.eup %5460  ;;  %5464 = vtanh.f32 %v2638_v9  ;;  %v2868_v28 = vsel %vm587_vm7, %v2734_v24, 0.0 }
0x21b9   : > { %5466 = vtanh.f32 %v2639_v39  ;;  %v2735_v44 = vmul.f32 %v5461_v41, %v6614_v35 }
0x21ba   : > { %2833 = vadd.xlane.f32.xlu0 %v2832_v3  ;;  %v2862_v3 = vsel %vm587_vm7, %v2732_v30, 0.0  ;;  %5468 = vtanh.f32 %v2637_v38  ;;  %v5245_v38 = vunpack.i.l.bf16 %v6545_v16 }
0x21bb   : > { %v2871_v46 = vsel %vm587_vm7, %v2735_v44, 0.0 }
0x21bc   : > { %2836 = vadd.xlane.f32.xlu1 %v2835_v37  ;;  %v5463_v37 = vpop.eup %5462 }
0x21bd   : > { %2830 = vadd.xlane.f32.xlu2 %v2829_v48  ;;  %v2733_v45 = vmul.f32 %v5463_v37, %v6614_v35 }
0x21be   : > { %v5465_v48 = vpop.eup %5464 }
0x21bf   : > { %v5467_v7 = vpop.eup %5466  ;;  %v2865_v49 = vsel %vm587_vm7, %v2733_v45, 0.0  ;;  %v2737_v51 = vmul.f32 %v5465_v48, %v6614_v35 }
0x21c0   : > { %v5469_v25 = vpop.eup %5468  ;;  %v2738_v53 = vmul.f32 %v5467_v7, %v6614_v35 }
0x21c1   : > { %v2877_v57 = vsel %vm587_vm7, %v2737_v51, 0.0 }
0x21c2   : > { %2842 = vadd.xlane.f32.xlu0 %v2841_v40  ;;  %v2736_v40 = vmul.f32 %v5469_v25, %v6614_v35  ;;  %v2880_v61 = vsel %vm587_vm7, %v2738_v53, 0.0 }
0x21c4   : > { %2845 = vadd.xlane.f32.xlu1 %v2844_v22  ;;  %v2874_v62 = vsel %vm587_vm7, %v2736_v40, 0.0  ;;  %vm8526_vm7 = vcmask 1041409  }
0x21c5   : > { %2839 = vadd.xlane.f32.xlu2 %v2838_v52 }
0x21ca   : > { %2851 = vadd.xlane.f32.xlu0 %v2850_v18 }
0x21cc   : > { %2854 = vadd.xlane.f32.xlu1 %v2853_v5 }
0x21cd   : > { %2848 = vadd.xlane.f32.xlu2 %v2847_v32 }
0x21d2   : > { %2860 = vadd.xlane.f32.xlu0 %v2859_v60 }
0x21d4   : > { %2863 = vadd.xlane.f32.xlu1 %v2862_v3 }
0x21d5   : > { %2857 = vadd.xlane.f32.xlu2 %v2856_v56 }
0x21da   : > { %2869 = vadd.xlane.f32.xlu0 %v2868_v28 }
0x21dc   : > { %2872 = vadd.xlane.f32.xlu1 %v2871_v46 }
0x21dd   : > { %2866 = vadd.xlane.f32.xlu2 %v2865_v49  ;;  %v2741_v10 = vpop.xlane.xlu0 %2740 }
0x21de   : > { %v6792_v6 = vadd.f32 %v5233_v2, %v2741_v10 }
0x21df   : > { %v2744_v54 = vpop.xlane.xlu1 %2743 }
0x21e0   : > { %v2747_v55 = vpop.xlane.xlu2 %2746  ;;  %v6794_v15 = vadd.f32 %v5233_v2, %v2744_v54 }
0x21e1   : > { %v6802_v13 = vadd.f32 %v5233_v2, %v2747_v55  ;;  %v5246_v55 = vunpack.i.h.bf16 %v6545_v16 }
0x21e2   : > { %2878 = vadd.xlane.f32.xlu0 %v2877_v57 }
0x21e4   : > { %2881 = vadd.xlane.f32.xlu1 %v2880_v61 }
0x21e5   : > { %2875 = vadd.xlane.f32.xlu2 %v2874_v62  ;;  %v2753_v63 = vpop.xlane.xlu0 %2752 }
0x21e6   : > { %v6788_v8 = vadd.f32 %v5233_v2, %v2753_v63 }
0x21e7   : > { %v2756_v22 = vpop.xlane.xlu1 %2755 }
0x21e8   : > { %v2750_v50 = vpop.xlane.xlu2 %2749  ;;  %v6811_v4 = vadd.f32 %v5233_v2, %v2756_v22 }
0x21e9   : > { %v6804_v5 = vadd.f32 %v5233_v2, %v2750_v50  ;;  %v5250_v2 = vunpack.i.l.bf16 %v6541_v47 }
0x21ed   : > { %v2762_v1 = vpop.xlane.xlu0 %2761 }
0x21ee   : > { %v6821_v17 = vadd.f32 %v5234_v29, %v2762_v1 }
0x21ef   : > { %v2765_v52 = vpop.xlane.xlu1 %2764 }
0x21f0   : > { %v2759_v23 = vpop.xlane.xlu2 %2758  ;;  %v6823_v9 = vadd.f32 %v5234_v29, %v2765_v52 }
0x21f1   : > { %v6813_v42 = vadd.f32 %v5234_v29, %v2759_v23 }
0x21f5   : > { %v2771_v35 = vpop.xlane.xlu0 %2770 }
0x21f6   : > { %3064 = vperm.xlu0 %5254, %v6788_v8   ;;  %v6831_v41 = vadd.f32 %v5234_v29, %v2771_v35 }
0x21f7   : > { %v2774_v12 = vpop.xlane.xlu1 %2773 }
0x21f8   : > { %v2795_v11 = vpop.xlane.xlu2 %2794  ;;  %v6833_v26 = vadd.f32 %v5234_v29, %v2774_v12 }
0x21f9   : > { %v6796_v0 = vadd.f32 %v5240_v36, %v2795_v11 }
0x21fd   : > { %3055 = vperm.xlu2 %5253, %v6794_v15   ;;  %v2798_v21 = vpop.xlane.xlu0 %2797  ;;  %3052 = vperm.xlu1 %5252, %v6792_v6  }
0x21fe   : > { %3106 = vperm.xlu0 %5254, %v6796_v0   ;;  %v6840_v45 = vadd.f32 %v5240_v36, %v2798_v21 }
0x21ff   : > { %v2801_v18 = vpop.xlane.xlu1 %2800 }
0x2200   : > { %v2768_v27 = vpop.xlane.xlu2 %2767  ;;  %v6842_v28 = vadd.f32 %v5240_v36, %v2801_v18 }
0x2201   : > { %v6806_v59 = vadd.f32 %v5234_v29, %v2768_v27 }
0x2205   : > { %3061 = vperm.xlu2 %5253, %v6804_v5   ;;  %v2807_v58 = vpop.xlane.xlu0 %2806  ;;  %3058 = vperm.xlu1 %5252, %v6802_v13  }
0x2206   : > { %3079 = vperm.xlu0 %5254, %v6806_v59   ;;  %v6849_v49 = vadd.f32 %v5240_v36, %v2807_v58 }
0x2207   : > { %v2810_v31 = vpop.xlane.xlu1 %2809 }
0x2208   : > { %v2804_v32 = vpop.xlane.xlu2 %2803  ;;  %v6851_v25 = vadd.f32 %v5240_v36, %v2810_v31 }
0x2209   : > { %v6815_v14 = vadd.f32 %v5240_v36, %v2804_v32 }
0x220d   : > { %3070 = vperm.xlu2 %5253, %v6813_v42   ;;  %v2780_v43 = vpop.xlane.xlu0 %2779  ;;  %3067 = vperm.xlu1 %5252, %v6811_v4  }
0x220e   : > { %3115 = vperm.xlu0 %5254, %v6815_v14   ;;  %v6859_v40 = vadd.f32 %v5239_v20, %v2780_v43  ;;  %v5251_v43 = vunpack.i.h.bf16 %v6541_v47 }
0x220f   : > { %v2783_v34 = vpop.xlane.xlu1 %2782 }
0x2210   : > { %v2777_v30 = vpop.xlane.xlu2 %2776  ;;  %v6861_v57 = vadd.f32 %v5239_v20, %v2783_v34 }
0x2211   : > { %v6825_v60 = vadd.f32 %v5239_v20, %v2777_v30 }
0x2215   : > { %3076 = vperm.xlu2 %5253, %v6823_v9   ;;  %v2789_v33 = vpop.xlane.xlu0 %2788  ;;  %3073 = vperm.xlu1 %5252, %v6821_v17  }
0x2216   : > { %3088 = vperm.xlu0 %5254, %v6825_v60   ;;  %v6868_v50 = vadd.f32 %v5239_v20, %v2789_v33 }
0x2217   : > { %v2792_v39 = vpop.xlane.xlu1 %2791 }
0x2218   : > { %v2813_v3 = vpop.xlane.xlu2 %2812  ;;  %v6870_v1 = vadd.f32 %v5239_v20, %v2792_v39 }
0x2219   : > { %v6835_v56 = vadd.f32 %v5245_v38, %v2813_v3 }
0x221d   : > { %3085 = vperm.xlu2 %5253, %v6833_v26   ;;  %v2816_v37 = vpop.xlane.xlu0 %2815  ;;  %3082 = vperm.xlu1 %5252, %v6831_v41  }
0x221e   : > { %3124 = vperm.xlu0 %5254, %v6835_v56   ;;  %v6878_v35 = vadd.f32 %v5245_v38, %v2816_v37 }
0x221f   : > { %v2819_v44 = vpop.xlane.xlu1 %2818 }
0x2220   : > { %v2786_v24 = vpop.xlane.xlu2 %2785  ;;  %v6880_v12 = vadd.f32 %v5245_v38, %v2819_v44 }
0x2221   : > { %v6844_v48 = vadd.f32 %v5239_v20, %v2786_v24 }
0x2225   : > { %3112 = vperm.xlu2 %5253, %v6842_v28   ;;  %3109 = vperm.xlu1 %5252, %v6840_v45   ;;  %v2825_v46 = vpop.xlane.xlu0 %2824 }
0x2226   : > { %3097 = vperm.xlu0 %5254, %v6844_v48   ;;  %v6887_v27 = vadd.f32 %v5245_v38, %v2825_v46 }
0x2227   : > { %v2828_v10 = vpop.xlane.xlu1 %2827 }
0x2228   : > { %v2822_v7 = vpop.xlane.xlu2 %2821  ;;  %v6889_v29 = vadd.f32 %v5245_v38, %v2828_v10 }
0x2229   : > { %v6853_v51 = vadd.f32 %v5245_v38, %v2822_v7 }
0x222d   : > { %3121 = vperm.xlu2 %5253, %v6851_v25   ;;  %3118 = vperm.xlu1 %5252, %v6849_v49   ;;  %v2834_v54 = vpop.xlane.xlu0 %2833 }
0x222e   : > { %3133 = vperm.xlu0 %5254, %v6853_v51   ;;  %v6897_v34 = vadd.f32 %v5246_v55, %v2834_v54 }
0x222f   : > { %v2837_v62 = vpop.xlane.xlu1 %2836 }
0x2230   : > { %v2831_v53 = vpop.xlane.xlu2 %2830  ;;  %v6899_v30 = vadd.f32 %v5246_v55, %v2837_v62 }
0x2231   : > { %v6863_v61 = vadd.f32 %v5246_v55, %v2831_v53 }
0x2235   : > { %3094 = vperm.xlu2 %5253, %v6861_v57   ;;  %3091 = vperm.xlu1 %5252, %v6859_v40   ;;  %v2843_v22 = vpop.xlane.xlu0 %2842 }
0x2236   : > { %3142 = vperm.xlu0 %5254, %v6863_v61   ;;  %v6906_v38 = vadd.f32 %v5246_v55, %v2843_v22 }
0x2237   : > { %v2846_v52 = vpop.xlane.xlu1 %2845 }
0x2238   : > { %v2840_v63 = vpop.xlane.xlu2 %2839  ;;  %v6908_v37 = vadd.f32 %v5246_v55, %v2846_v52 }
0x2239   : > { %v6872_v16 = vadd.f32 %v5246_v55, %v2840_v63 }
0x223d   : > { %3103 = vperm.xlu2 %5253, %v6870_v1   ;;  %3100 = vperm.xlu1 %5252, %v6868_v50   ;;  %v2852_v11 = vpop.xlane.xlu0 %2851 }
0x223e   : > { %3151 = vperm.xlu0 %5254, %v6872_v16   ;;  %v6915_v7 = vadd.f32 %v5250_v2, %v2852_v11 }
0x223f   : > { %v2855_v18 = vpop.xlane.xlu1 %2854 }
0x2240   : > { %v2849_v23 = vpop.xlane.xlu2 %2848  ;;  %v6917_v10 = vadd.f32 %v5250_v2, %v2855_v18 }
0x2241   : > { %v6882_v36 = vadd.f32 %v5250_v2, %v2849_v23 }
0x2245   : > { %3130 = vperm.xlu2 %5253, %v6880_v12   ;;  %3127 = vperm.xlu1 %5252, %v6878_v35   ;;  %v2861_v31 = vpop.xlane.xlu0 %2860 }
0x2246   : > { %3160 = vperm.xlu0 %5254, %v6882_v36   ;;  %v6921_v62 = vadd.f32 %v5250_v2, %v2861_v31 }
0x2247   : > { %v2864_v20 = vpop.xlane.xlu1 %2863 }
0x2248   : > { %v2858_v21 = vpop.xlane.xlu2 %2857  ;;  %8538 = vst [vmem:[#allocation14_spill] sm:$0xff] %v6921_v62  ;;  %v6923_v63 = vadd.f32 %v5250_v2, %v2864_v20 }
0x2249   : > { %v6891_v58 = vadd.f32 %v5250_v2, %v2858_v21 }
0x224a   : > { %8539 = vst [vmem:[#allocation15_spill] sm:$0xff] %v6923_v63 }
0x224b   : > { %8535 = vst [vmem:[#allocation11_spill] sm:$0xff] %v6891_v58 }
0x224d   : > { %3139 = vperm.xlu2 %5253, %v6889_v29   ;;  %3136 = vperm.xlu1 %5252, %v6887_v27   ;;  %v2870_v39 = vpop.xlane.xlu0 %2869 }
0x224e   : > { %3169 = vperm.xlu0 %5254, %v6891_v58   ;;  %v6927_v23 = vadd.f32 %v5251_v43, %v2870_v39 }
0x224f   : > { %v2873_v24 = vpop.xlane.xlu1 %2872 }
0x2250   : > { %v2867_v32 = vpop.xlane.xlu2 %2866  ;;  %8540 = vst [vmem:[#allocation16_spill] sm:$0xff] %v6927_v23  ;;  %v6929_v11 = vadd.f32 %v5251_v43, %v2873_v24 }
0x2251   : > { %v6901_v33 = vadd.f32 %v5251_v43, %v2867_v32 }
0x2252   : > { %8541 = vst [vmem:[#allocation17_spill] sm:$0xff] %v6929_v11 }
0x2253   : > { %8536 = vst [vmem:[#allocation12_spill] sm:$0xff] %v6901_v33 }
0x2255   : > { %3148 = vperm.xlu2 %5253, %v6899_v30   ;;  %3145 = vperm.xlu1 %5252, %v6897_v34   ;;  %v2879_v46 = vpop.xlane.xlu0 %2878 }
0x2256   : > { %3178 = vperm.xlu0 %5254, %v6901_v33  }
0x2257   : > { %v2882_v54 = vpop.xlane.xlu1 %2881 }
0x2258   : > { %v2876_v3 = vpop.xlane.xlu2 %2875  ;;  %v6938_v39 = vadd.f32 %v5251_v43, %v2882_v54 }
0x2259   : > { %v6910_v47 = vadd.f32 %v5251_v43, %v2876_v3  ;;  %v6936_v3 = vadd.f32 %v5251_v43, %v2879_v46 }
0x225a   : > { %8543 = vst [vmem:[#allocation19_spill] sm:$0xff] %v6938_v39 }
0x225b   : > { %8537 = vst [vmem:[#allocation13_spill] sm:$0xff] %v6910_v47 }
0x225c   : > { %8542 = vst [vmem:[#allocation18_spill] sm:$0xff] %v6936_v3 }
0x225d   : > { %3157 = vperm.xlu2 %5253, %v6908_v37   ;;  %3154 = vperm.xlu1 %5252, %v6906_v38  }
0x225e   : > { %3187 = vperm.xlu0 %5254, %v6910_v47  }
0x2260   : > { %v3056_v44 = vpop.permute.xlu2 %3055 }
0x2261   : > { %v3196_v20 = vperm.slane %v3056_v44, %v5909_v19 }
0x2265   : > { %3166 = vperm.xlu2 %5253, %v6917_v10   ;;  %3163 = vperm.xlu1 %5252, %v6915_v7  }
0x2268   : > { %v3062_v53 = vpop.permute.xlu2 %3061  ;;  %v3065_v55 = vpop.permute.xlu0 %3064 }
0x2269   : > { %v3199_v43 = vperm.slane %v3065_v55, %v5909_v19 }
0x226d   : > { %3175 = vperm.xlu2 %5253, %v6923_v63   ;;  %3172 = vperm.xlu1 %5252, %v6921_v62  }
0x226f   : > { %v3053_v22 = vpop.permute.xlu1 %3052 }
0x2270   : > { %v3071_v52 = vpop.permute.xlu2 %3070  ;;  %v3107_v21 = vpop.permute.xlu0 %3106  ;;  %v3195_v31 = vperm.slane %v3053_v22, %v5909_v19  ;;  %v3198_v22 = vperm.slane %v3062_v53, %v5909_v19 }
0x2272   : > { %v3244_v24 = vsel %vm8526_vm7, %v3196_v20, %v3195_v31 }
0x2275   : > { %3184 = vperm.xlu2 %5253, %v6929_v11   ;;  %3181 = vperm.xlu1 %5252, %v6927_v23  }
0x2277   : > { %v3059_v18 = vpop.permute.xlu1 %3058 }
0x2278   : > { %v3077_v2 = vpop.permute.xlu2 %3076  ;;  %v3197_v32 = vperm.slane %v3059_v18, %v5909_v19  ;;  %v3080_v11 = vpop.permute.xlu0 %3079 }
0x227a   : > { %v3246_v47 = vsel %vm8525_vm8, %v3197_v32, %v3244_v24 }
0x227b   : > { %v3248_v46 = vsel %vm8524_vm11, %v3198_v22, %v3246_v47  ;;  %v3201_v22 = vperm.slane %v3071_v52, %v5909_v19  ;;  %v3204_v52 = vperm.slane %v3080_v11, %v5909_v19 }
0x227c   : > { %v3250_v54 = vsel %vm8518_vm12, %v3199_v43, %v3248_v46 }
0x227d   : > { %3193 = vperm.xlu2 %5253, %v6938_v39   ;;  %3190 = vperm.xlu1 %5252, %v6936_v3  }
0x227f   : > { %v3068_v18 = vpop.permute.xlu1 %3067 }
0x2280   : > { %v3086_v23 = vpop.permute.xlu2 %3085  ;;  %v3200_v44 = vperm.slane %v3068_v18, %v5909_v19  ;;  %v3116_v53 = vpop.permute.xlu0 %3115 }
0x2282   : > { %v3252_v31 = vsel %vm8512_vm13, %v3200_v44, %v3250_v54  ;;  %v3213_v44 = vperm.slane %v3107_v21, %v5909_v19  ;;  %v3203_v54 = vperm.slane %v3077_v2, %v5909_v19 }
0x2283   : > { %v3297_v20 = vsel %vm8507_vm14, %v3252_v31, -inf }
0x2287   : > { %v3074_v32 = vpop.permute.xlu1 %3073 }
0x2288   : > { %v3113_v24 = vpop.permute.xlu2 %3112  ;;  %3298 = vmax.xlane.f32.xlu0 %v3297_v20  ;;  %v3089_v18 = vpop.permute.xlu0 %3088  ;;  %v3202_v47 = vperm.slane %v3074_v32, %v5909_v19 }
0x2289   : > { %v3215_v20 = vperm.slane %v3113_v24, %v5909_v19  ;;  %v3206_v24 = vperm.slane %v3086_v23, %v5909_v19 }
0x228a   : > { %v3253_v43 = vsel %vm8526_vm7, %v3202_v47, %v3201_v22 }
0x228b   : > { %v3254_v63 = vsel %vm8525_vm8, %v3203_v54, %v3253_v43 }
0x228c   : > { %v3255_v47 = vsel %vm8524_vm11, %v3204_v52, %v3254_v63 }
0x228f   : > { %v3083_v39 = vpop.permute.xlu1 %3082 }
0x2290   : > { %v3122_v3 = vpop.permute.xlu2 %3121  ;;  %v3205_v32 = vperm.slane %v3083_v39, %v5909_v19  ;;  %v3125_v62 = vpop.permute.xlu0 %3124 }
0x2297   : > { %v3110_v55 = vpop.permute.xlu1 %3109 }
0x2298   : > { %v3095_v33 = vpop.permute.xlu2 %3094  ;;  %v3214_v46 = vperm.slane %v3110_v55, %v5909_v19  ;;  %v3216_v55 = vperm.slane %v3116_v53, %v5909_v19  ;;  %v3098_v63 = vpop.permute.xlu0 %3097 }
0x2299   : > { %v3209_v52 = vperm.slane %v3095_v33, %v5909_v19 }
0x229a   : > { %v3263_v31 = vsel %vm8526_vm7, %v3214_v46, %v3213_v44  ;;  %v3256_v46 = vsel %vm8518_vm12, %v3205_v32, %v3255_v47  ;;  %v3218_v44 = vperm.slane %v3122_v3, %v5909_v19  ;;  %v3207_v3 = vperm.slane %v3089_v18, %v5909_v19 }
0x229b   : > { %v3264_v58 = vsel %vm8525_vm8, %v3215_v20, %v3263_v31  ;;  %v3257_v53 = vsel %vm8512_vm13, %v3206_v24, %v3256_v46 }
0x229c   : > { %v3265_v39 = vsel %vm8524_vm11, %v3216_v55, %v3264_v58  ;;  %v3300_v31 = vsel %vm8507_vm14, %v3257_v53, -inf }
0x229f   : > { %v3119_v21 = vpop.permute.xlu1 %3118 }
0x22a0   : > { %v3104_v22 = vpop.permute.xlu2 %3103  ;;  %v3217_v2 = vperm.slane %v3119_v21, %v5909_v19  ;;  %v3210_v21 = vperm.slane %v3098_v63, %v5909_v19 }
0x22a1   : > { %v3212_v24 = vperm.slane %v3104_v22, %v5909_v19 }
0x22a2   : > { %v3266_v11 = vsel %vm8518_vm12, %v3217_v2, %v3265_v39  ;;  %v3134_v2 = vpop.permute.xlu0 %3133 }
0x22a3   : > { %v3267_v43 = vsel %vm8512_vm13, %v3218_v44, %v3266_v11 }
0x22a4   : > { %v3306_v54 = vsel %vm8507_vm14, %v3267_v43, -inf }
0x22a5   : > { %3307 = vmax.xlane.f32.xlu0 %v3306_v54  ;;  %v3219_v54 = vperm.slane %v3125_v62, %v5909_v19 }
0x22a7   : > { %3301 = vmax.xlane.f32.xlu1 %v3300_v31  ;;  %v3092_v20 = vpop.permute.xlu1 %3091 }
0x22a8   : > { %v3131_v32 = vpop.permute.xlu2 %3130  ;;  %v3208_v23 = vperm.slane %v3092_v20, %v5909_v19 }
0x22a9   : > { %v3221_v22 = vperm.slane %v3131_v32, %v5909_v19 }
0x22aa   : > { %v3258_v58 = vsel %vm8526_vm7, %v3208_v23, %v3207_v3  ;;  %v3143_v63 = vpop.permute.xlu0 %3142  ;;  %v3222_v3 = vperm.slane %v3134_v2, %v5909_v19 }
0x22ab   : > { %v3259_v55 = vsel %vm8525_vm8, %v3209_v52, %v3258_v58  ;;  %v3225_v2 = vperm.slane %v3143_v63, %v5909_v19 }
0x22ac   : > { %v3260_v44 = vsel %vm8524_vm11, %v3210_v21, %v3259_v55 }
0x22af   : > { %v3101_v47 = vpop.permute.xlu1 %3100 }
0x22b0   : > { %v3211_v46 = vperm.slane %v3101_v47, %v5909_v19  ;;  %v3140_v39 = vpop.permute.xlu2 %3139 }
0x22b1   : > { %v3224_v55 = vperm.slane %v3140_v39, %v5909_v19 }
0x22b2   : > { %v3261_v11 = vsel %vm8518_vm12, %v3211_v46, %v3260_v44  ;;  %v3152_v46 = vpop.permute.xlu0 %3151 }
0x22b3   : > { %v3262_v18 = vsel %vm8512_vm13, %v3212_v24, %v3261_v11 }
0x22b4   : > { %v3303_v43 = vsel %vm8507_vm14, %v3262_v18, -inf }
0x22b5   : > { %3304 = vmax.xlane.f32.xlu2 %v3303_v43 }
0x22b7   : > { %v3128_v33 = vpop.permute.xlu1 %3127 }
0x22b8   : > { %v3220_v53 = vperm.slane %v3128_v33, %v5909_v19  ;;  %v3149_v20 = vpop.permute.xlu2 %3148 }
0x22b9   : > { %v3227_v39 = vperm.slane %v3149_v20, %v5909_v19 }
0x22ba   : > { %v3268_v31 = vsel %vm8526_vm7, %v3220_v53, %v3219_v54  ;;  %v3161_v43 = vpop.permute.xlu0 %3160  ;;  %v3228_v53 = vperm.slane %v3152_v46, %v5909_v19 }
0x22bb   : > { %v3269_v23 = vsel %vm8525_vm8, %v3221_v22, %v3268_v31 }
0x22bc   : > { %v3270_v21 = vsel %vm8524_vm11, %v3222_v3, %v3269_v23 }
0x22bf   : > { %v3137_v58 = vpop.permute.xlu1 %3136 }
0x22c0   : > { %v3223_v52 = vperm.slane %v3137_v58, %v5909_v19  ;;  %v3158_v32 = vpop.permute.xlu2 %3157 }
0x22c1   : > { %v3230_v23 = vperm.slane %v3158_v32, %v5909_v19 }
0x22c2   : > { %v3271_v47 = vsel %vm8518_vm12, %v3223_v52, %v3270_v21 }
0x22c3   : > { %v3272_v62 = vsel %vm8512_vm13, %v3224_v55, %v3271_v47  ;;  %v3170_v55 = vpop.permute.xlu0 %3169  ;;  %v3231_v47 = vperm.slane %v3161_v43, %v5909_v19 }
0x22c4   : > { %v3309_v24 = vsel %vm8507_vm14, %v3272_v62, -inf }
0x22c5   : > { %3310 = vmax.xlane.f32.xlu1 %v3309_v24 }
0x22c7   : > { %v3146_v44 = vpop.permute.xlu1 %3145 }
0x22c8   : > { %v3226_v11 = vperm.slane %v3146_v44, %v5909_v19  ;;  %v3167_v31 = vpop.permute.xlu2 %3166  ;;  %v3234_v44 = vperm.slane %v3170_v55, %v5909_v19 }
0x22c9   : > { %v3233_v24 = vperm.slane %v3167_v31, %v5909_v19 }
0x22ca   : > { %v3273_v18 = vsel %vm8526_vm7, %v3226_v11, %v3225_v2 }
0x22cb   : > { %v3274_v33 = vsel %vm8525_vm8, %v3227_v39, %v3273_v18 }
0x22cc   : > { %v3275_v3 = vsel %vm8524_vm11, %v3228_v53, %v3274_v33  ;;  %v3179_v33 = vpop.permute.xlu0 %3178 }
0x22cf   : > { %v3155_v54 = vpop.permute.xlu1 %3154 }
0x22d0   : > { %v3229_v22 = vperm.slane %v3155_v54, %v5909_v19  ;;  %v3176_v62 = vpop.permute.xlu2 %3175 }
0x22d1   : > { %v3236_v18 = vperm.slane %v3176_v62, %v5909_v19 }
0x22d2   : > { %v3276_v58 = vsel %vm8518_vm12, %v3229_v22, %v3275_v3  ;;  %v3237_v3 = vperm.slane %v3179_v33, %v5909_v19 }
0x22d3   : > { %v3277_v63 = vsel %vm8512_vm13, %v3230_v23, %v3276_v58 }
0x22d4   : > { %v3312_v52 = vsel %vm8507_vm14, %v3277_v63, -inf  ;;  %v3188_v63 = vpop.permute.xlu0 %3187 }
0x22d5   : > { %3313 = vmax.xlane.f32.xlu2 %v3312_v52 }
0x22d7   : > { %v3164_v20 = vpop.permute.xlu1 %3163 }
0x22d8   : > { %v3232_v21 = vperm.slane %v3164_v20, %v5909_v19  ;;  %v3185_v54 = vpop.permute.xlu2 %3184 }
0x22d9   : > { %v3239_v52 = vperm.slane %v3185_v54, %v5909_v19 }
0x22da   : > { %v3278_v46 = vsel %vm8526_vm7, %v3232_v21, %v3231_v47  ;;  %v3240_v21 = vperm.slane %v3188_v63, %v5909_v19 }
0x22db   : > { %v3279_v32 = vsel %vm8525_vm8, %v3233_v24, %v3278_v46 }
0x22dc   : > { %v3280_v39 = vsel %vm8524_vm11, %v3234_v44, %v3279_v32 }
0x22df   : > { %v3173_v11 = vpop.permute.xlu1 %3172 }
0x22e0   : > { %v3235_v2 = vperm.slane %v3173_v11, %v5909_v19  ;;  %v3194_v20 = vpop.permute.xlu2 %3193 }
0x22e1   : > { %v3242_v46 = vperm.slane %v3194_v20, %v5909_v19 }
0x22e2   : > { %v3281_v53 = vsel %vm8518_vm12, %v3235_v2, %v3280_v39 }
0x22e3   : > { %v3282_v43 = vsel %vm8512_vm13, %v3236_v18, %v3281_v53 }
0x22e4   : > { %v3315_v22 = vsel %vm8507_vm14, %v3282_v43, -inf }
0x22e5   : > { %3316 = vmax.xlane.f32.xlu0 %v3315_v22 }
0x22e7   : > { %v3182_v31 = vpop.permute.xlu1 %3181 }
0x22e8   : > { %v3238_v23 = vperm.slane %v3182_v31, %v5909_v19 }
0x22ea   : > { %v3283_v58 = vsel %vm8526_vm7, %v3238_v23, %v3237_v3 }
0x22eb   : > { %v3284_v55 = vsel %vm8525_vm8, %v3239_v52, %v3283_v58 }
0x22ec   : > { %v3285_v24 = vsel %vm8524_vm11, %v3240_v21, %v3284_v55 }
0x22ef   : > { %v3191_v47 = vpop.permute.xlu1 %3190 }
0x22f0   : > { %v3241_v62 = vperm.slane %v3191_v47, %v5909_v19 }
0x22f2   : > { %v3286_v32 = vsel %vm8518_vm12, %v3241_v62, %v3285_v24 }
0x22f3   : > { %v3287_v44 = vsel %vm8512_vm13, %v3242_v46, %v3286_v32 }
0x22f4   : > { %v3318_v11 = vsel %vm8507_vm14, %v3287_v44, -inf }
0x22f5   : > { %3319 = vmax.xlane.f32.xlu1 %v3318_v11 }
0x22fb   : > { %v3299_v2 = vpop.xlane.xlu0 %3298 }
0x22fc   : > { %v3329_v18 = vperm.slane %v3299_v2, 0  ;;  %v3330_v39 = vperm.slane %v3299_v2, 1  ;;  %v3331_v33 = vperm.slane %v3299_v2, 2  ;;  %v3333_v53 = vperm.slane %v3299_v2, 4 }
0x22fd   : > { %v3332_v22 = vperm.slane %v3299_v2, 3  ;;  %v3334_v63 = vperm.slane %v3299_v2, 5 }
0x22fe   : > { %v3425_v43 = vsub.f32 %v6792_v6, %v3329_v18  ;;  %v3426_v54 = vsub.f32 %v6794_v15, %v3330_v39  ;;  %v3427_v31 = vsub.f32 %v6802_v13, %v3331_v33  ;;  %v3429_v58 = vsub.f32 %v6788_v8, %v3333_v53 }
0x22ff   : > { %v3428_v52 = vsub.f32 %v6804_v5, %v3332_v22  ;;  %v3430_v21 = vsub.f32 %v6811_v4, %v3334_v63 }
0x2300   : > { %v3473_v23 = vmul.f32 1.442695, %v3425_v43  ;;  %v3475_v3 = vmul.f32 1.442695, %v3426_v54  ;;  %v3477_v20 = vmul.f32 1.442695, %v3427_v31 }
0x2301   : > { %v3481_v55 = vmul.f32 1.442695, %v3429_v58  ;;  %v3479_v6 = vmul.f32 1.442695, %v3428_v52  ;;  %v3483_v8 = vmul.f32 1.442695, %v3430_v21 }
0x2302   : > { %5470 = vpow2.f32 %v3473_v23 }
0x2303   : > { %5472 = vpow2.f32 %v3475_v3 }
0x2304   : > { %5474 = vpow2.f32 %v3477_v20 }
0x2305   : > { %5476 = vpow2.f32 %v3481_v55 }
0x2306   : > { %5478 = vpow2.f32 %v3479_v6 }
0x2307   : > { %5480 = vpow2.f32 %v3483_v8 }
0x2308   : > { %v7041_v47 = vpop.eup %5470 }
0x2309   : > { %v7043_v15 = vpop.eup %5472  ;;  %3618 = vperm.xlu2 %5253, %v7041_v47  }
0x230a   : > { %3621 = vperm.xlu0 %5254, %v7043_v15   ;;  %v7047_v13 = vpop.eup %5474 }
0x230b   : > { %v7050_v5 = vpop.eup %5476 }
0x230c   : > { %v7052_v4 = vpop.eup %5478 }
0x230d   : > { %v7056_v62 = vpop.eup %5480 }
0x230e   : > { %3624 = vperm.xlu1 %5252, %v7047_v13  }
0x2311   : > { %3630 = vperm.xlu2 %5253, %v7050_v5  }
0x2312   : > { %3627 = vperm.xlu0 %5254, %v7052_v4  }
0x2316   : > { %3633 = vperm.xlu1 %5252, %v7056_v62  }
0x2318   : > { %v3308_v23 = vpop.xlane.xlu0 %3307 }
0x2319   : > { %v3347_v58 = vperm.slane %v3308_v23, 0  ;;  %v3348_v63 = vperm.slane %v3308_v23, 1  ;;  %v3349_v20 = vperm.slane %v3308_v23, 2  ;;  %v3350_v8 = vperm.slane %v3308_v23, 3 }
0x231a   : > { %v3302_v46 = vpop.xlane.xlu1 %3301 }
0x231b   : > { %v3335_v24 = vperm.slane %v3302_v46, 0  ;;  %v3336_v32 = vperm.slane %v3302_v46, 1  ;;  %v3337_v11 = vperm.slane %v3302_v46, 2  ;;  %v3338_v18 = vperm.slane %v3302_v46, 3 }
0x231c   : > { %v3339_v53 = vperm.slane %v3302_v46, 4  ;;  %v3340_v54 = vperm.slane %v3302_v46, 5  ;;  %v3445_v6 = vsub.f32 %v6842_v28, %v3349_v20 }
0x231d   : > { %v3431_v44 = vsub.f32 %v6813_v42, %v3335_v24  ;;  %v3432_v2 = vsub.f32 %v6821_v17, %v3336_v32  ;;  %v3433_v39 = vsub.f32 %v6823_v9, %v3337_v11  ;;  %v3434_v31 = vsub.f32 %v6806_v59, %v3338_v18 }
0x231e   : > { %v3435_v3 = vsub.f32 %v6831_v41, %v3339_v53  ;;  %v3436_v42 = vsub.f32 %v6833_v26, %v3340_v54  ;;  %v3443_v41 = vsub.f32 %v6796_v0, %v3347_v58  ;;  %v3444_v26 = vsub.f32 %v6840_v45, %v3348_v63 }
0x231f   : > { %v3485_v33 = vmul.f32 1.442695, %v3431_v44  ;;  %v3487_v43 = vmul.f32 1.442695, %v3432_v2  ;;  %v3489_v22 = vmul.f32 1.442695, %v3433_v39  ;;  %v3446_v45 = vsub.f32 %v6815_v14, %v3350_v8 }
0x2320   : > { %v3491_v17 = vmul.f32 1.442695, %v3434_v31  ;;  %v3493_v52 = vmul.f32 1.442695, %v3435_v3  ;;  %v3495_v55 = vmul.f32 1.442695, %v3436_v42 }
0x2321   : > { %5482 = vpow2.f32 %v3485_v33  ;;  %v3509_v46 = vmul.f32 1.442695, %v3443_v41  ;;  %v3351_v24 = vperm.slane %v3308_v23, 4  ;;  %v3511_v32 = vmul.f32 1.442695, %v3444_v26 }
0x2322   : > { %5484 = vpow2.f32 %v3487_v43  ;;  %v3352_v11 = vperm.slane %v3308_v23, 5  ;;  %v3513_v2 = vmul.f32 1.442695, %v3445_v6  ;;  %v3515_v53 = vmul.f32 1.442695, %v3446_v45 }
0x2323   : > { %5486 = vpow2.f32 %v3489_v22  ;;  %v3447_v28 = vsub.f32 %v6849_v49, %v3351_v24 }
0x2324   : > { %5488 = vpow2.f32 %v3491_v17  ;;  %v3448_v33 = vsub.f32 %v6851_v25, %v3352_v11 }
0x2325   : > { %5490 = vpow2.f32 %v3493_v52  ;;  %v3517_v54 = vmul.f32 1.442695, %v3447_v28 }
0x2326   : > { %5492 = vpow2.f32 %v3495_v55  ;;  %v3519_v23 = vmul.f32 1.442695, %v3448_v33 }
0x2327   : > { %v7065_v9 = vpop.eup %5482  ;;  %5494 = vpow2.f32 %v3509_v46 }
0x2328   : > { %v7067_v21 = vpop.eup %5484  ;;  %3636 = vperm.xlu0 %5254, %v7065_v9   ;;  %5496 = vpow2.f32 %v3511_v32  ;;  %v3305_v39 = vpop.xlane.xlu2 %3304 }
0x2329   : > { %v7070_v59 = vpop.eup %5486  ;;  %3639 = vperm.xlu2 %5253, %v7067_v21   ;;  %5498 = vpow2.f32 %v3513_v2  ;;  %v3341_v43 = vperm.slane %v3305_v39, 0  ;;  %v3342_v22 = vperm.slane %v3305_v39, 1  ;;  %v3343_v14 = vperm.slane %v3305_v39, 2 }
0x232a   : > { %3642 = vperm.xlu1 %5252, %v7070_v59   ;;  %v7077_v44 = vpop.eup %5488  ;;  %5500 = vpow2.f32 %v3515_v53  ;;  %v3344_v17 = vperm.slane %v3305_v39, 3  ;;  %v3345_v52 = vperm.slane %v3305_v39, 4  ;;  %v3346_v41 = vperm.slane %v3305_v39, 5 }
0x232b   : > { %v7079_v0 = vpop.eup %5490  ;;  %v3437_v42 = vsub.f32 %v6825_v60, %v3341_v43  ;;  %5502 = vpow2.f32 %v3517_v54  ;;  %v3438_v25 = vsub.f32 %v6859_v40, %v3342_v22  ;;  %v3439_v58 = vsub.f32 %v6861_v57, %v3343_v14 }
0x232c   : > { %v7082_v18 = vpop.eup %5492  ;;  %5504 = vpow2.f32 %v3519_v23  ;;  %v3440_v40 = vsub.f32 %v6844_v48, %v3344_v17  ;;  %v3441_v57 = vsub.f32 %v6868_v50, %v3345_v52  ;;  %v3442_v46 = vsub.f32 %v6870_v1, %v3346_v41 }
0x232d   : > { %8544 = vst [vmem:[#allocation20_spill] sm:$0xff] %v7082_v18  ;;  %v7089_v31 = vpop.eup %5494  ;;  %v3497_v63 = vmul.f32 1.442695, %v3437_v42  ;;  %v3499_v20 = vmul.f32 1.442695, %v3438_v25 }
0x232e   : > { %8545 = vst [vmem:[#allocation21_spill] sm:$0xff] %v7089_v31  ;;  %v7091_v3 = vpop.eup %5496  ;;  %v3501_v26 = vmul.f32 1.442695, %v3439_v58  ;;  %v3503_v24 = vmul.f32 1.442695, %v3440_v40 }
0x232f   : > { %8546 = vst [vmem:[#allocation22_spill] sm:$0xff] %v7091_v3  ;;  %v7094_v49 = vpop.eup %5498  ;;  %5506 = vpow2.f32 %v3497_v63  ;;  %v3505_v11 = vmul.f32 1.442695, %v3441_v57  ;;  %v3507_v28 = vmul.f32 1.442695, %v3442_v46 }
0x2330   : > { %3645 = vperm.xlu0 %5254, %v7077_v44   ;;  %8547 = vst [vmem:[#allocation23_spill] sm:$0xff] %v7094_v49  ;;  %v7101_v55 = vpop.eup %5500  ;;  %5508 = vpow2.f32 %v3499_v20 }
0x2331   : > { %3648 = vperm.xlu2 %5253, %v7079_v0   ;;  %8548 = vst [vmem:[#allocation24_spill] sm:$0xff] %v7101_v55  ;;  %v7103_v6 = vpop.eup %5502  ;;  %5510 = vpow2.f32 %v3501_v26 }
0x2332   : > { %3651 = vperm.xlu1 %5252, %v7082_v18   ;;  %8549 = vst [vmem:[#allocation25_spill] sm:$0xff] %v7103_v6  ;;  %v7106_v60 = vpop.eup %5504  ;;  %5512 = vpow2.f32 %v3503_v24 }
0x2333   : > { %8550 = vst [vmem:[#allocation26_spill] sm:$0xff] %v7106_v60  ;;  %5514 = vpow2.f32 %v3505_v11 }
0x2334   : > { %5516 = vpow2.f32 %v3507_v28 }
0x2335   : > { %v7113_v45 = vpop.eup %5506 }
0x2336   : > { %8551 = vst [vmem:[#allocation27_spill] sm:$0xff] %v7113_v45  ;;  %v7115_v39 = vpop.eup %5508 }
0x2337   : > { %8552 = vst [vmem:[#allocation28_spill] sm:$0xff] %v7115_v39  ;;  %v7118_v50 = vpop.eup %5510 }
0x2338   : > { %3672 = vperm.xlu0 %5254, %v7089_v31   ;;  %v3311_v8 = vpop.xlane.xlu1 %3310  ;;  %8553 = vst [vmem:[#allocation29_spill] sm:$0xff] %v7118_v50  ;;  %v7125_v14 = vpop.eup %5512 }
0x2339   : > { %3675 = vperm.xlu2 %5253, %v7091_v3   ;;  %v3353_v32 = vperm.slane %v3311_v8, 0  ;;  %v3354_v2 = vperm.slane %v3311_v8, 1  ;;  %v3355_v48 = vperm.slane %v3311_v8, 2  ;;  %v3356_v43 = vperm.slane %v3311_v8, 3  ;;  %8554 = vst [vmem:[#allocation30_spill] sm:$0xff] %v7125_v14  ;;  %v7127_v58 = vpop.eup %5514 }
0x233a   : > { %3678 = vperm.xlu1 %5252, %v7094_v49   ;;  %v3357_v22 = vperm.slane %v3311_v8, 4  ;;  %v3358_v42 = vperm.slane %v3311_v8, 5  ;;  %8555 = vst [vmem:[#allocation31_spill] sm:$0xff] %v7127_v58 }
0x233b   : > { %v3449_v33 = vsub.f32 %v6835_v56, %v3353_v32  ;;  %v3450_v1 = vsub.f32 %v6878_v35, %v3354_v2  ;;  %v3451_v53 = vsub.f32 %v6880_v12, %v3355_v48  ;;  %v7130_v56 = vpop.eup %5516  ;;  %v3452_v35 = vsub.f32 %v6853_v51, %v3356_v43 }
0x233c   : > { %8556 = vst [vmem:[#allocation32_spill] sm:$0xff] %v7130_v56  ;;  %v3453_v12 = vsub.f32 %v6887_v27, %v3357_v22  ;;  %v3454_v63 = vsub.f32 %v6889_v29, %v3358_v42 }
0x233d   : > { %v3521_v54 = vmul.f32 1.442695, %v3449_v33  ;;  %v3523_v23 = vmul.f32 1.442695, %v3450_v1  ;;  %v3525_v25 = vmul.f32 1.442695, %v3451_v53 }
0x233e   : > { %v3527_v52 = vmul.f32 1.442695, %v3452_v35  ;;  %v3529_v41 = vmul.f32 1.442695, %v3453_v12  ;;  %v3531_v57 = vmul.f32 1.442695, %v3454_v63 }
0x233f   : > { %5518 = vpow2.f32 %v3521_v54 }
0x2340   : > { %3681 = vperm.xlu0 %5254, %v7101_v55   ;;  %5520 = vpow2.f32 %v3523_v23 }
0x2341   : > { %3684 = vperm.xlu2 %5253, %v7103_v6   ;;  %5522 = vpow2.f32 %v3525_v25 }
0x2342   : > { %3687 = vperm.xlu1 %5252, %v7106_v60   ;;  %5524 = vpow2.f32 %v3527_v52 }
0x2343   : > { %5526 = vpow2.f32 %v3529_v41 }
0x2344   : > { %5528 = vpow2.f32 %v3531_v57 }
0x2345   : > { %v7137_v40 = vpop.eup %5518 }
0x2346   : > { %8557 = vst [vmem:[#allocation33_spill] sm:$0xff] %v7137_v40  ;;  %v7139_v8 = vpop.eup %5520 }
0x2347   : > { %8558 = vst [vmem:[#allocation34_spill] sm:$0xff] %v7139_v8  ;;  %v7142_v27 = vpop.eup %5522 }
0x2348   : > { %3654 = vperm.xlu0 %5254, %v7113_v45   ;;  %v3314_v17 = vpop.xlane.xlu2 %3313  ;;  %8559 = vst [vmem:[#allocation35_spill] sm:$0xff] %v7142_v27  ;;  %v7149_v48 = vpop.eup %5524 }
0x2349   : > { %3657 = vperm.xlu2 %5253, %v7115_v39   ;;  %v3359_v20 = vperm.slane %v3314_v17, 0  ;;  %v3360_v26 = vperm.slane %v3314_v17, 1  ;;  %v3361_v51 = vperm.slane %v3314_v17, 2  ;;  %v3362_v32 = vperm.slane %v3314_v17, 3  ;;  %8560 = vst [vmem:[#allocation36_spill] sm:$0xff] %v7149_v48  ;;  %v7151_v53 = vpop.eup %5526 }
0x234a   : > { %3660 = vperm.xlu1 %5252, %v7118_v50   ;;  %v3363_v2 = vperm.slane %v3314_v17, 4  ;;  %v3364_v33 = vperm.slane %v3314_v17, 5  ;;  %8561 = vst [vmem:[#allocation37_spill] sm:$0xff] %v7151_v53 }
0x234b   : > { %v3455_v46 = vsub.f32 %v6863_v61, %v3359_v20  ;;  %v3456_v29 = vsub.f32 %v6897_v34, %v3360_v26  ;;  %v3457_v24 = vsub.f32 %v6899_v30, %v3361_v51  ;;  %v7154_v61 = vpop.eup %5528  ;;  %v3458_v34 = vsub.f32 %v6872_v16, %v3362_v32 }
0x234c   : > { %8562 = vst [vmem:[#allocation38_spill] sm:$0xff] %v7154_v61  ;;  %v3459_v30 = vsub.f32 %v6906_v38, %v3363_v2  ;;  %v3460_v54 = vsub.f32 %v6908_v37, %v3364_v33  ;;  %v8571_v33 = vld [vmem:[#allocation15_spill] sm:$0xff] }
0x234d   : > { %v3533_v11 = vmul.f32 1.442695, %v3455_v46  ;;  %v3535_v28 = vmul.f32 1.442695, %v3456_v29  ;;  %v3537_v1 = vmul.f32 1.442695, %v3457_v24 }
0x234e   : > { %v3539_v22 = vmul.f32 1.442695, %v3458_v34  ;;  %v3541_v42 = vmul.f32 1.442695, %v3459_v30  ;;  %v3543_v12 = vmul.f32 1.442695, %v3460_v54 }
0x234f   : > { %5530 = vpow2.f32 %v3533_v11 }
0x2350   : > { %3663 = vperm.xlu0 %5254, %v7125_v14   ;;  %5532 = vpow2.f32 %v3535_v28 }
0x2351   : > { %3666 = vperm.xlu2 %5253, %v7127_v58   ;;  %5534 = vpow2.f32 %v3537_v1 }
0x2352   : > { %3669 = vperm.xlu1 %5252, %v7130_v56   ;;  %5536 = vpow2.f32 %v3539_v22 }
0x2353   : > { %5538 = vpow2.f32 %v3541_v42 }
0x2354   : > { %5540 = vpow2.f32 %v3543_v12 }
0x2355   : > { %v7161_v35 = vpop.eup %5530 }
0x2356   : > { %8563 = vst [vmem:[#allocation39_spill] sm:$0xff] %v7161_v35  ;;  %v7163_v17 = vpop.eup %5532 }
0x2357   : > { %8564 = vst [vmem:[#allocation40_spill] sm:$0xff] %v7163_v17  ;;  %v7166_v38 = vpop.eup %5534 }
0x2358   : > { %3690 = vperm.xlu0 %5254, %v7137_v40   ;;  %v3317_v43 = vpop.xlane.xlu0 %3316  ;;  %8565 = vst [vmem:[#allocation41_spill] sm:$0xff] %v7166_v38  ;;  %v7173_v51 = vpop.eup %5536 }
0x2359   : > { %3693 = vperm.xlu2 %5253, %v7139_v8   ;;  %v3365_v23 = vperm.slane %v3317_v43, 0  ;;  %v3366_v25 = vperm.slane %v3317_v43, 1  ;;  %v3367_v16 = vperm.slane %v3317_v43, 2  ;;  %v3368_v20 = vperm.slane %v3317_v43, 3  ;;  %8566 = vst [vmem:[#allocation42_spill] sm:$0xff] %v7173_v51  ;;  %v7175_v24 = vpop.eup %5538 }
0x235a   : > { %3696 = vperm.xlu1 %5252, %v7142_v27   ;;  %v3369_v26 = vperm.slane %v3317_v43, 4  ;;  %v3370_v46 = vperm.slane %v3317_v43, 5  ;;  %8567 = vst [vmem:[#allocation43_spill] sm:$0xff] %v7175_v24 }
0x235b   : > { %v3461_v63 = vsub.f32 %v6882_v36, %v3365_v23  ;;  %v3462_v37 = vsub.f32 %v6915_v7, %v3366_v25  ;;  %v3463_v52 = vsub.f32 %v6917_v10, %v3367_v16  ;;  %v7178_v36 = vpop.eup %5540  ;;  %v8569_v7 = vld [vmem:[#allocation11_spill] sm:$0xff]  ;;  %v8570_v10 = vld [vmem:[#allocation14_spill] sm:$0xff]  ;;  %v8575_v16 = vld [vmem:[#allocation12_spill] sm:$0xff] }
0x235c   : > { %8568 = vst [vmem:[#allocation44_spill] sm:$0xff] %v7178_v36  ;;  %v3464_v32 = vsub.f32 %v8569_v7, %v3368_v20  ;;  %v3465_v2 = vsub.f32 %v8570_v10, %v3369_v26  ;;  %v3466_v1 = vsub.f32 %v8571_v33, %v3370_v46  ;;  %v8577_v20 = vld [vmem:[#allocation17_spill] sm:$0xff] }
0x235d   : > { %v3545_v41 = vmul.f32 1.442695, %v3461_v63  ;;  %v3547_v57 = vmul.f32 1.442695, %v3462_v37  ;;  %v3549_v29 = vmul.f32 1.442695, %v3463_v52 }
0x235e   : > { %v3551_v34 = vmul.f32 1.442695, %v3464_v32  ;;  %v3553_v43 = vmul.f32 1.442695, %v3465_v2  ;;  %v3555_v23 = vmul.f32 1.442695, %v3466_v1 }
0x235f   : > { %5542 = vpow2.f32 %v3545_v41  ;;  %v8576_v37 = vld [vmem:[#allocation16_spill] sm:$0xff] }
0x2360   : > { %3699 = vperm.xlu0 %5254, %v7149_v48   ;;  %5544 = vpow2.f32 %v3547_v57 }
0x2361   : > { %3702 = vperm.xlu2 %5253, %v7151_v53   ;;  %5546 = vpow2.f32 %v3549_v29 }
0x2362   : > { %3705 = vperm.xlu1 %5252, %v7154_v61   ;;  %5548 = vpow2.f32 %v3551_v34  ;;  %v8581_v34 = vld [vmem:[#allocation13_spill] sm:$0xff] }
0x2363   : > { %v7181_v11 = vpop.permute.xlu2 %3618  ;;  %5550 = vpow2.f32 %v3553_v43  ;;  %v8582_v43 = vld [vmem:[#allocation18_spill] sm:$0xff] }
0x2364   : > { %5552 = vpow2.f32 %v3555_v23  ;;  %v8583_v23 = vld [vmem:[#allocation19_spill] sm:$0xff] }
0x2365   : > { %v7187_v22 = vpop.eup %5542 }
0x2366   : > { %8572 = vst [vmem:[#allocation11_spill] sm:$0xff] %v7187_v22  ;;  %v7189_v25 = vpop.eup %5544 }
0x2367   : > { %8573 = vst [vmem:[#allocation14_spill] sm:$0xff] %v7189_v25  ;;  %v7192_v12 = vpop.eup %5546 }
0x2368   : > { %3708 = vperm.xlu0 %5254, %v7161_v35   ;;  %v3320_v28 = vpop.xlane.xlu1 %3319  ;;  %8574 = vst [vmem:[#allocation15_spill] sm:$0xff] %v7192_v12  ;;  %v7201_v32 = vpop.eup %5548 }
0x2369   : > { %3711 = vperm.xlu2 %5253, %v7163_v17   ;;  %v3371_v30 = vperm.slane %v3320_v28, 0  ;;  %v3372_v54 = vperm.slane %v3320_v28, 1  ;;  %v3373_v42 = vperm.slane %v3320_v28, 2  ;;  %v3374_v57 = vperm.slane %v3320_v28, 3  ;;  %8578 = vst [vmem:[#allocation12_spill] sm:$0xff] %v7201_v32  ;;  %v7203_v33 = vpop.eup %5550 }
0x236a   : > { %3714 = vperm.xlu1 %5252, %v7166_v38   ;;  %v3375_v29 = vperm.slane %v3320_v28, 4  ;;  %v3376_v10 = vperm.slane %v3320_v28, 5  ;;  %8579 = vst [vmem:[#allocation16_spill] sm:$0xff] %v7203_v33  ;;  %v7206_v1 = vpop.eup %5552 }
0x236b   : > { %v3467_v63 = vsub.f32 %v8575_v16, %v3371_v30  ;;  %v3468_v52 = vsub.f32 %v8576_v37, %v3372_v54  ;;  %v3469_v41 = vsub.f32 %v8577_v20, %v3373_v42  ;;  %v7199_v26 = vpop.permute.xlu2 %3630  ;;  %8580 = vst [vmem:[#allocation17_spill] sm:$0xff] %v7206_v1  ;;  %v3470_v30 = vsub.f32 %v8581_v34, %v3374_v57 }
0x236c   : > { %v3471_v54 = vsub.f32 %v8582_v43, %v3375_v29  ;;  %v3472_v42 = vsub.f32 %v8583_v23, %v3376_v10 }
0x236d   : > { %v3557_v46 = vmul.f32 1.442695, %v3467_v63  ;;  %v3559_v7 = vmul.f32 1.442695, %v3468_v52  ;;  %v3561_v2 = vmul.f32 1.442695, %v3469_v41 }
0x236e   : > { %v3563_v16 = vmul.f32 1.442695, %v3470_v30  ;;  %v3565_v63 = vmul.f32 1.442695, %v3471_v54  ;;  %v3567_v52 = vmul.f32 1.442695, %v3472_v42 }
0x236f   : > { %5554 = vpow2.f32 %v3557_v46 }
0x2370   : > { %3717 = vperm.xlu0 %5254, %v7173_v51   ;;  %5556 = vpow2.f32 %v3559_v7 }
0x2371   : > { %3720 = vperm.xlu2 %5253, %v7175_v24   ;;  %5558 = vpow2.f32 %v3561_v2 }
0x2372   : > { %3723 = vperm.xlu1 %5252, %v7178_v36   ;;  %5560 = vpow2.f32 %v3563_v16 }
0x2373   : > { %5562 = vpow2.f32 %v3565_v63 }
0x2374   : > { %5564 = vpow2.f32 %v3567_v52 }
0x2375   : > { %v7213_v37 = vpop.eup %5554 }
0x2376   : > { %8584 = vst [vmem:[#allocation13_spill] sm:$0xff] %v7213_v37  ;;  %v7215_v20 = vpop.eup %5556 }
0x2377   : > { %8585 = vst [vmem:[#allocation18_spill] sm:$0xff] %v7215_v20  ;;  %v7218_v57 = vpop.eup %5558 }
0x2378   : > { %3726 = vperm.xlu0 %5254, %v7187_v22   ;;  %8586 = vst [vmem:[#allocation19_spill] sm:$0xff] %v7218_v57  ;;  %v7222_v7 = vpop.eup %5560  ;;  %v3761_v22 = vperm.slane %v7181_v11, %v5909_v19 }
0x2379   : > { %3729 = vperm.xlu2 %5253, %v7189_v25   ;;  %8587 = vst [vmem:[#allocation45_spill] sm:$0xff] %v7222_v7  ;;  %v7224_v10 = vpop.eup %5562 }
0x237a   : > { %3732 = vperm.xlu1 %5252, %v7192_v12   ;;  %8588 = vst [vmem:[#allocation46_spill] sm:$0xff] %v7224_v10  ;;  %v7227_v2 = vpop.eup %5564 }
0x237b   : > { %8589 = vst [vmem:[#allocation47_spill] sm:$0xff] %v7227_v2 }
0x237c   : > { %v3622_v41 = vpop.permute.xlu0 %3621 }
0x2380   : > { %3735 = vperm.xlu0 %5254, %v7201_v32   ;;  %v3625_v46 = vpop.permute.xlu1 %3624 }
0x2381   : > { %3738 = vperm.xlu2 %5253, %v7203_v33  }
0x2382   : > { %3741 = vperm.xlu1 %5252, %v7206_v1  }
0x2383   : > { %v3640_v28 = vpop.permute.xlu2 %3639 }
0x2384   : > { %v3628_v34 = vpop.permute.xlu0 %3627 }
0x2385   : > { %v3764_v25 = vperm.slane %v3628_v34, %v5909_v19 }
0x2388   : > { %3744 = vperm.xlu0 %5254, %v7213_v37   ;;  %v3634_v43 = vpop.permute.xlu1 %3633  ;;  %v3763_v37 = vperm.slane %v3625_v46, %v5909_v19 }
0x2389   : > { %3747 = vperm.xlu2 %5253, %v7215_v20   ;;  %v3768_v20 = vperm.slane %v3640_v28, %v5909_v19  ;;  %v3766_v12 = vperm.slane %v3634_v43, %v5909_v19 }
0x238a   : > { %3750 = vperm.xlu1 %5252, %v7218_v57  }
0x238b   : > { %v3649_v29 = vpop.permute.xlu2 %3648 }
0x2390   : > { %3753 = vperm.xlu0 %5254, %v7222_v7  }
0x2391   : > { %3756 = vperm.xlu2 %5253, %v7224_v10   ;;  %v3762_v10 = vperm.slane %v3622_v41, %v5909_v19 }
0x2392   : > { %3759 = vperm.xlu1 %5252, %v7227_v2  }
0x2393   : > { %v3676_v30 = vpop.permute.xlu2 %3675  ;;  %v3809_v28 = vsel %vm8526_vm7, %v3762_v10, %v3761_v22 }
0x2394   : > { %v3780_v11 = vperm.slane %v3676_v30, %v5909_v19 }
0x239a   : > { %v3637_v54 = vpop.permute.xlu0 %3636 }
0x239b   : > { %v3685_v42 = vpop.permute.xlu2 %3684  ;;  %v3767_v1 = vperm.slane %v3637_v54, %v5909_v19 }
0x239c   : > { %v3643_v23 = vpop.permute.xlu1 %3642 }
0x239d   : > { %v3769_v7 = vperm.slane %v3643_v23, %v5909_v19  ;;  %v3814_v32 = vsel %vm8526_vm7, %v3768_v20, %v3767_v1  ;;  %v3810_v1 = vsel %vm8525_vm8, %v3763_v37, %v3809_v28  ;;  %v3771_v20 = vperm.slane %v3649_v29, %v5909_v19 }
0x239e   : > { %v3811_v46 = vsel %vm8524_vm11, %v3764_v25, %v3810_v1 }
0x239f   : > { %v3815_v54 = vsel %vm8525_vm8, %v3769_v7, %v3814_v32  ;;  %v3765_v32 = vperm.slane %v7199_v26, %v5909_v19 }
0x23a1   : > { %v3812_v25 = vsel %vm8518_vm12, %v3765_v32, %v3811_v46 }
0x23a2   : > { %v3646_v16 = vpop.permute.xlu0 %3645  ;;  %v3813_v30 = vsel %vm8512_vm13, %v3766_v12, %v3812_v25 }
0x23a3   : > { %v3658_v52 = vpop.permute.xlu2 %3657  ;;  %v3770_v2 = vperm.slane %v3646_v16, %v5909_v19 }
0x23a4   : > { %v3652_v63 = vpop.permute.xlu1 %3651 }
0x23a5   : > { %v3816_v23 = vsel %vm8524_vm11, %v3770_v2, %v3815_v54 }
0x23a6   : > { %v3817_v7 = vsel %vm8518_vm12, %v3771_v20, %v3816_v23 }
0x23aa   : > { %v3673_v57 = vpop.permute.xlu0 %3672 }
0x23ab   : > { %v3779_v41 = vperm.slane %v3673_v57, %v5909_v19  ;;  %v3667_v16 = vpop.permute.xlu2 %3666  ;;  %v3772_v57 = vperm.slane %v3652_v63, %v5909_v19  ;;  %v3857_v63 = vsel %vm8507_vm14, %v3813_v30, 0.0 }
0x23ac   : > { %v3679_v33 = vpop.permute.xlu1 %3678 }
0x23ad   : > { %v3781_v22 = vperm.slane %v3679_v33, %v5909_v19  ;;  %v3824_v37 = vsel %vm8526_vm7, %v3780_v11, %v3779_v41  ;;  %v3818_v2 = vsel %vm8512_vm13, %v3772_v57, %v3817_v7  ;;  %v3783_v33 = vperm.slane %v3685_v42, %v5909_v19 }
0x23ae   : > { %v3860_v54 = vsel %vm8507_vm14, %v3818_v2, 0.0  ;;  %v3774_v11 = vperm.slane %v3658_v52, %v5909_v19  ;;  %v3777_v57 = vperm.slane %v3667_v16, %v5909_v19 }
0x23af   : > { %v3825_v43 = vsel %vm8525_vm8, %v3781_v22, %v3824_v37 }
0x23b2   : > { %v3682_v34 = vpop.permute.xlu0 %3681 }
0x23b3   : > { %v3782_v29 = vperm.slane %v3682_v34, %v5909_v19  ;;  %v3694_v23 = vpop.permute.xlu2 %3693 }
0x23b4   : > { %v3688_v10 = vpop.permute.xlu1 %3687  ;;  %v3786_v16 = vperm.slane %v3694_v23, %v5909_v19 }
0x23b5   : > { %v3826_v26 = vsel %vm8524_vm11, %v3782_v29, %v3825_v43  ;;  %v3784_v1 = vperm.slane %v3688_v10, %v5909_v19 }
0x23b6   : > { %v3827_v41 = vsel %vm8518_vm12, %v3783_v33, %v3826_v26 }
0x23b7   : > { %v3828_v46 = vsel %vm8512_vm13, %v3784_v1, %v3827_v41 }
0x23b8   : > { %v3866_v32 = vsel %vm8507_vm14, %v3828_v46, 0.0 }
0x23ba   : > { %3861 = vadd.xlane.f32.xlu2 %v3860_v54  ;;  %v3655_v28 = vpop.permute.xlu0 %3654  ;;  %3858 = vadd.xlane.f32.xlu0 %v3857_v63 }
0x23bb   : > { %v3773_v12 = vperm.slane %v3655_v28, %v5909_v19  ;;  %v3703_v10 = vpop.permute.xlu2 %3702 }
0x23bc   : > { %v3661_v20 = vpop.permute.xlu1 %3660 }
0x23bd   : > { %v3775_v42 = vperm.slane %v3661_v20, %v5909_v19  ;;  %v3819_v34 = vsel %vm8526_vm7, %v3774_v11, %v3773_v12  ;;  %v3789_v12 = vperm.slane %v3703_v10, %v5909_v19 }
0x23bf   : > { %v3820_v37 = vsel %vm8525_vm8, %v3775_v42, %v3819_v34 }
0x23c2   : > { %v3664_v22 = vpop.permute.xlu0 %3663  ;;  %3867 = vadd.xlane.f32.xlu0 %v3866_v32 }
0x23c3   : > { %v3776_v7 = vperm.slane %v3664_v22, %v5909_v19  ;;  %v3712_v63 = vpop.permute.xlu2 %3711 }
0x23c4   : > { %v3670_v29 = vpop.permute.xlu1 %3669  ;;  %v3792_v10 = vperm.slane %v3712_v63, %v5909_v19 }
0x23c5   : > { %v3821_v25 = vsel %vm8524_vm11, %v3776_v7, %v3820_v37  ;;  %v3778_v52 = vperm.slane %v3670_v29, %v5909_v19 }
0x23c6   : > { %v3822_v2 = vsel %vm8518_vm12, %v3777_v57, %v3821_v25 }
0x23c7   : > { %v3823_v30 = vsel %vm8512_vm13, %v3778_v52, %v3822_v2 }
0x23c8   : > { %v3863_v43 = vsel %vm8507_vm14, %v3823_v30, 0.0 }
0x23c9   : > { %3864 = vadd.xlane.f32.xlu1 %v3863_v43 }
0x23ca   : > { %v3691_v26 = vpop.permute.xlu0 %3690 }
0x23cb   : > { %v3785_v54 = vperm.slane %v3691_v26, %v5909_v19  ;;  %v3721_v7 = vpop.permute.xlu2 %3720 }
0x23cc   : > { %v3697_v33 = vpop.permute.xlu1 %3696  ;;  %v3795_v26 = vperm.slane %v3721_v7, %v5909_v19 }
0x23cd   : > { %v3787_v28 = vperm.slane %v3697_v33, %v5909_v19  ;;  %v3829_v41 = vsel %vm8526_vm7, %v3786_v16, %v3785_v54 }
0x23cf   : > { %v3830_v46 = vsel %vm8525_vm8, %v3787_v28, %v3829_v41 }
0x23d2   : > { %v3700_v1 = vpop.permute.xlu0 %3699 }
0x23d3   : > { %v3788_v20 = vperm.slane %v3700_v1, %v5909_v19  ;;  %v3730_v30 = vpop.permute.xlu2 %3729 }
0x23d4   : > { %v3706_v11 = vpop.permute.xlu1 %3705 }
0x23d5   : > { %v3831_v42 = vsel %vm8524_vm11, %v3788_v20, %v3830_v46  ;;  %v3790_v34 = vperm.slane %v3706_v11, %v5909_v19 }
0x23d6   : > { %v3832_v32 = vsel %vm8518_vm12, %v3789_v12, %v3831_v42  ;;  %v3798_v42 = vperm.slane %v3730_v30, %v5909_v19 }
0x23d7   : > { %v3833_v23 = vsel %vm8512_vm13, %v3790_v34, %v3832_v32 }
0x23d8   : > { %v3869_v22 = vsel %vm8507_vm14, %v3833_v23, 0.0 }
0x23d9   : > { %3870 = vadd.xlane.f32.xlu2 %v3869_v22 }
0x23da   : > { %v3709_v57 = vpop.permute.xlu0 %3708 }
0x23db   : > { %v3791_v29 = vperm.slane %v3709_v57, %v5909_v19  ;;  %v3739_v46 = vpop.permute.xlu2 %3738 }
0x23dc   : > { %v3715_v37 = vpop.permute.xlu1 %3714  ;;  %v3801_v7 = vperm.slane %v3739_v46, %v5909_v19 }
0x23dd   : > { %v3793_v25 = vperm.slane %v3715_v37, %v5909_v19  ;;  %v3834_v52 = vsel %vm8526_vm7, %v3792_v10, %v3791_v29 }
0x23df   : > { %v3835_v33 = vsel %vm8525_vm8, %v3793_v25, %v3834_v52 }
0x23e2   : > { %v3718_v2 = vpop.permute.xlu0 %3717 }
0x23e3   : > { %v3794_v43 = vperm.slane %v3718_v2, %v5909_v19  ;;  %v3748_v52 = vpop.permute.xlu2 %3747 }
0x23e4   : > { %v3724_v54 = vpop.permute.xlu1 %3723 }
0x23e5   : > { %v3836_v16 = vsel %vm8524_vm11, %v3794_v43, %v3835_v33  ;;  %v3796_v28 = vperm.slane %v3724_v54, %v5909_v19  ;;  %v3804_v54 = vperm.slane %v3748_v52, %v5909_v19 }
0x23e6   : > { %v3837_v41 = vsel %vm8518_vm12, %v3795_v26, %v3836_v16 }
0x23e7   : > { %v3838_v63 = vsel %vm8512_vm13, %v3796_v28, %v3837_v41 }
0x23e8   : > { %v3872_v1 = vsel %vm8507_vm14, %v3838_v63, 0.0 }
0x23e9   : > { %3873 = vadd.xlane.f32.xlu1 %v3872_v1 }
0x23ea   : > { %v3727_v20 = vpop.permute.xlu0 %3726 }
0x23eb   : > { %v3797_v11 = vperm.slane %v3727_v20, %v5909_v19  ;;  %v3757_v28 = vpop.permute.xlu2 %3756 }
0x23ec   : > { %v3733_v12 = vpop.permute.xlu1 %3732  ;;  %v3807_v20 = vperm.slane %v3757_v28, %v5909_v19 }
0x23ed   : > { %v3799_v34 = vperm.slane %v3733_v12, %v5909_v19  ;;  %v3839_v32 = vsel %vm8526_vm7, %v3798_v42, %v3797_v11 }
0x23ef   : > { %v3840_v57 = vsel %vm8525_vm8, %v3799_v34, %v3839_v32 }
0x23f2   : > { %v3736_v23 = vpop.permute.xlu0 %3735 }
0x23f3   : > { %v3800_v22 = vperm.slane %v3736_v23, %v5909_v19 }
0x23f4   : > { %v3742_v37 = vpop.permute.xlu1 %3741 }
0x23f5   : > { %v3841_v29 = vsel %vm8524_vm11, %v3800_v22, %v3840_v57  ;;  %v3802_v10 = vperm.slane %v3742_v37, %v5909_v19 }
0x23f6   : > { %v3842_v25 = vsel %vm8518_vm12, %v3801_v7, %v3841_v29 }
0x23f7   : > { %v3843_v2 = vsel %vm8512_vm13, %v3802_v10, %v3842_v25 }
0x23f8   : > { %v3875_v30 = vsel %vm8507_vm14, %v3843_v2, 0.0 }
0x23f9   : > { %3876 = vadd.xlane.f32.xlu0 %v3875_v30 }
0x23fa   : > { %v3745_v43 = vpop.permute.xlu0 %3744 }
0x23fb   : > { %v3803_v33 = vperm.slane %v3745_v43, %v5909_v19 }
0x23fc   : > { %v3751_v26 = vpop.permute.xlu1 %3750 }
0x23fd   : > { %v3805_v16 = vperm.slane %v3751_v26, %v5909_v19  ;;  %v3844_v41 = vsel %vm8526_vm7, %v3804_v54, %v3803_v33 }
0x23ff   : > { %v3845_v12 = vsel %vm8525_vm8, %v3805_v16, %v3844_v41 }
0x2402   : > { %v3754_v63 = vpop.permute.xlu0 %3753 }
0x2403   : > { %v3806_v1 = vperm.slane %v3754_v63, %v5909_v19 }
0x2404   : > { %v3760_v46 = vpop.permute.xlu1 %3759 }
0x2405   : > { %v3846_v11 = vsel %vm8524_vm11, %v3806_v1, %v3845_v12  ;;  %v3808_v42 = vperm.slane %v3760_v46, %v5909_v19 }
0x2406   : > { %v3847_v34 = vsel %vm8518_vm12, %v3807_v20, %v3846_v11 }
0x2407   : > { %v3848_v32 = vsel %vm8512_vm13, %v3808_v42, %v3847_v34 }
0x2408   : > { %v3878_v23 = vsel %vm8507_vm14, %v3848_v32, 0.0 }
0x2409   : > { %3879 = vadd.xlane.f32.xlu2 %v3878_v23 }
0x242d   : > { %v3862_v22 = vpop.xlane.xlu2 %3861  ;;  %v3859_v7 = vpop.xlane.xlu0 %3858 }
0x242e   : > { %v7329_v57 = vperm.slane %v3862_v22, 0  ;;  %v7331_v37 = vperm.slane %v3862_v22, 1  ;;  %v7333_v29 = vperm.slane %v3862_v22, 2  ;;  %v7335_v10 = vperm.slane %v3862_v22, 3 }
0x242f   : > { %v7337_v25 = vperm.slane %v3859_v7, 0  ;;  %v7339_v52 = vperm.slane %v3859_v7, 1  ;;  %v7341_v2 = vperm.slane %v3862_v22, 4  ;;  %v7344_v30 = vperm.slane %v3862_v22, 5 }
0x2430   : > { %5566 = vrcp.f32 %v7329_v57  ;;  %v7348_v43 = vperm.slane %v3859_v7, 2  ;;  %v7355_v54 = vperm.slane %v3859_v7, 3  ;;  %v7357_v16 = vperm.slane %v3859_v7, 4 }
0x2431   : > { %5568 = vrcp.f32 %v7331_v37  ;;  %v3996_v26 = vand.u32 2147483648, %v7337_v25  ;;  %v4011_v33 = vand.u32 2147483648, %v7339_v52  ;;  %v7359_v28 = vperm.slane %v3859_v7, 5 }
0x2432   : > { %5570 = vrcp.f32 %v7333_v29  ;;  %v3994_v1 = vand.u32 2147483647, %v7337_v25  ;;  %v4009_v20 = vand.u32 2147483647, %v7339_v52  ;;  %v4026_v12 = vand.u32 2147483648, %v7348_v43 }
0x2433   : > { %5572 = vrcp.f32 %v7335_v10  ;;  %v7370_v11 = vor.u32 1.1754944e-38, %v3996_v26  ;;  %v7372_v42 = vor.u32 1.1754944e-38, %v4011_v33  ;;  %v4024_v34 = vand.u32 2147483647, %v7348_v43 }
0x2434   : > { %5574 = vrcp.f32 %v7341_v2  ;;  %v4056_v24 = vand.u32 2147483648, %v7357_v16  ;;  %v7397_v35 = vor.u32 1.1754944e-38, %v4026_v12  ;;  %v4041_v17 = vand.u32 2147483648, %v7355_v54 }
0x2435   : > { %5576 = vrcp.f32 %v7344_v30  ;;  %v3868_v41 = vpop.xlane.xlu0 %3867  ;;  %v4054_v48 = vand.u32 2147483647, %v7357_v16  ;;  %vm3990_vm15 = vweird.f32 %v7337_v25  ;;  %vm4005_vm0 = vweird.f32 %v7339_v52 }
0x2436   : > { %v7361_v63 = vpop.eup %5566  ;;  %5578 = vrcp.f32 %v7337_v25  ;;  %v7378_v23 = vperm.slane %v3868_v41, 0  ;;  %v7380_v22 = vperm.slane %v3868_v41, 1  ;;  %v7382_v7 = vperm.slane %v3868_v41, 2 }
0x2437   : > { %v7367_v46 = vpop.eup %5568  ;;  %5580 = vrcp.f32 %v7339_v52  ;;  %v7387_v26 = vperm.slane %v3868_v41, 3  ;;  %v7389_v33 = vperm.slane %v3868_v41, 4  ;;  %v7395_v36 = vperm.slane %v3868_v41, 5 }
0x2438   : > { %v7375_v32 = vpop.eup %5570  ;;  %5582 = vrcp.f32 %v7348_v43  ;;  %8590 = vst [vmem:[#allocation48_spill] sm:$0xff] %v7378_v23  ;;  %v7404_v53 = vor.u32 1.1754944e-38, %v4056_v24  ;;  %v7411_v12 = vor.u32 1.1754944e-38, %v4041_v17  ;;  %v7425_v58 = vmul.f32 %v7367_v46, %v7331_v37 }
0x2439   : > { %8591 = vst [vmem:[#allocation49_spill] sm:$0xff] %v7380_v22  ;;  %v7384_v51 = vpop.eup %5572  ;;  %5584 = vrcp.f32 %v7355_v54  ;;  %vm4020_vm1 = vweird.f32 %v7348_v43  ;;  %vm7444_vm2 = vcmp.eq.f32.partialorder %v3994_v1, 8.507059e+37  ;;  %vm7450_vm4 = vcmp.eq.f32.partialorder %v4009_v20, 8.507059e+37 }
0x243a   : > { %8592 = vst [vmem:[#allocation50_spill] sm:$0xff] %v7382_v7  ;;  %v7392_v19 = vpop.eup %5574  ;;  %5586 = vrcp.f32 %v7357_v16  ;;  %vm4050_vm5 = vweird.f32 %v7357_v16  ;;  %vm7460_vm10 = vcmp.eq.f32.partialorder %v4024_v34, 8.507059e+37  ;;  %vm4035_vm3 = vweird.f32 %v7355_v54 }
0x243b   : > { %8593 = vst [vmem:[#allocation51_spill] sm:$0xff] %v7387_v26  ;;  %v7400_v38 = vpop.eup %5576  ;;  %5588 = vrcp.f32 %v7359_v28  ;;  %vm7469_vm14 = vcmp.eq.f32.partialorder %v4054_v48, 8.507059e+37 }
0x243c   : > { %8594 = vst [vmem:[#allocation52_spill] sm:$0xff] %v7389_v33  ;;  %v7407_v40 = vpop.eup %5578  ;;  %5590 = vrcp.f32 %v7378_v23  ;;  %v3865_v41 = vpop.xlane.xlu1 %3864 }
0x243d   : > { %8595 = vst [vmem:[#allocation53_spill] sm:$0xff] %v7395_v36  ;;  %v7415_v14 = vpop.eup %5580  ;;  %5592 = vrcp.f32 %v7380_v22  ;;  %v7418_v24 = vperm.slane %v3865_v41, 0  ;;  %v7420_v61 = vperm.slane %v3865_v41, 1  ;;  %v7430_v8 = vperm.slane %v3865_v41, 2 }
0x243e   : > { %v7427_v17 = vpop.eup %5582  ;;  %5594 = vrcp.f32 %v7382_v7  ;;  %v7432_v27 = vperm.slane %v3865_v41, 3  ;;  %v7434_v56 = vperm.slane %v3865_v41, 4  ;;  %v7440_v39 = vperm.slane %v3865_v41, 5 }
0x243f   : > { %8596 = vst [vmem:[#allocation54_spill] sm:$0xff] %v7418_v24  ;;  %v7437_v45 = vpop.eup %5584  ;;  %5596 = vrcp.f32 %v7387_v26  ;;  %v3986_v50 = vmul.f32 %v7407_v40, %v7337_v25  ;;  %v4001_v55 = vmul.f32 %v7415_v14, %v7339_v52  ;;  %vm3991_vm6 = vweird.f32 %v7407_v40 }
0x2440   : > { %8597 = vst [vmem:[#allocation55_spill] sm:$0xff] %v7432_v27  ;;  %v5587_v49 = vpop.eup %5586  ;;  %5598 = vrcp.f32 %v7389_v33  ;;  %vm4006_vm9 = vweird.f32 %v7415_v14  ;;  %v4016_v1 = vmul.f32 %v7427_v17, %v7348_v43  ;;  %vm4021_vm13 = vweird.f32 %v7427_v17  ;;  %vm7495_vm11 = vmor %vm3990_vm15, %vm3991_vm6 }
0x2441   : > { %8598 = vst [vmem:[#allocation56_spill] sm:$0xff] %v7434_v56  ;;  %v7465_v20 = vpop.eup %5588  ;;  %5600 = vrcp.f32 %v7395_v36  ;;  %v3987_v31 = vsub.f32 1.0, %v3986_v50  ;;  %v4002_v26 = vsub.f32 1.0, %v4001_v55  ;;  %v4046_v3 = vmul.f32 %v5587_v49, %v7357_v16  ;;  %vm4007_vm7 = vmor %vm4005_vm0, %vm4006_vm9 }
0x2442   : > { %v7473_v7 = vpop.eup %5590  ;;  %5602 = vrcp.f32 %v7418_v24  ;;  %v4017_v34 = vsub.f32 1.0, %v4016_v1  ;;  %v4031_v23 = vmul.f32 %v7437_v45, %v7355_v54  ;;  %vm4051_vm12 = vweird.f32 %v5587_v49  ;;  %vm4022_vm15 = vmor %vm4020_vm1, %vm4021_vm13 }
0x2443   : > { %8607 = vst [vmem:[#allocation57_spill] sm:$0xff] %v7473_v7  ;;  %v7479_v18 = vpop.eup %5592  ;;  %5604 = vrcp.f32 %v7420_v61  ;;  %v3988_v55 = vmul.f32 %v7407_v40, %v3987_v31  ;;  %v4003_v50 = vmul.f32 %v7415_v14, %v4002_v26  ;;  %v4047_v48 = vsub.f32 1.0, %v4046_v3 }
0x2444   : > { %v7484_v36 = vpop.eup %5594  ;;  %5606 = vrcp.f32 %v7430_v8  ;;  %v4018_v1 = vmul.f32 %v7427_v17, %v4017_v34  ;;  %v4032_v24 = vsub.f32 1.0, %v4031_v23  ;;  %vm4036_vm8 = vweird.f32 %v7437_v45 }
0x2445   : > { %v7488_v7 = vpop.eup %5596  ;;  %v3989_v22 = vadd.f32 %v7407_v40, %v3988_v55  ;;  %v4004_v3 = vadd.f32 %v7415_v14, %v4003_v50  ;;  %v4048_v26 = vmul.f32 %v5587_v49, %v4047_v48  ;;  %5608 = vrcp.f32 %v7432_v27 }
0x2446   : > { %v7501_v34 = vpop.eup %5598  ;;  %v4019_v25 = vadd.f32 %v7427_v17, %v4018_v1  ;;  %v4033_v23 = vmul.f32 %v7437_v45, %v4032_v24  ;;  %v4061_v55 = vmul.f32 %v7465_v20, %v7359_v28  ;;  %5610 = vrcp.f32 %v7434_v56 }
0x2447   : > { %v7512_v50 = vpop.eup %5600  ;;  %v3993_v48 = vsel %vm7495_vm11, %v7407_v40, %v3989_v22  ;;  %v4008_v27 = vsel %vm4007_vm7, %v7415_v14, %v4004_v3  ;;  %v4049_v52 = vadd.f32 %v5587_v49, %v4048_v26  ;;  %vm4052_vm7 = vmor %vm4050_vm5, %vm4051_vm12  ;;  %5612 = vrcp.f32 %v7440_v39 }
0x2448   : > { %v7523_v24 = vpop.eup %5602  ;;  %v3998_v1 = vsel %vm7444_vm2, %v7370_v11, %v3993_v48  ;;  %v4013_v56 = vsel %vm7450_vm4, %v7372_v42, %v4008_v27  ;;  %v4023_v40 = vsel %vm4022_vm15, %v7427_v17, %v4019_v25  ;;  %v4034_v14 = vadd.f32 %v7437_v45, %v4033_v23  ;;  %vm4037_vm11 = vmor %vm4035_vm3, %vm4036_vm8 }
0x2449   : > { %v7536_v43 = vpop.eup %5604  ;;  %v3999_v22 = vmul.f32 %v7041_v47, %v3998_v1  ;;  %v4014_v31 = vmul.f32 %v7043_v15, %v4013_v56  ;;  %v4028_v60 = vsel %vm7460_vm10, %v7397_v35, %v4023_v40  ;;  %v4053_v6 = vsel %vm4052_vm7, %v5587_v49, %v4049_v52 }
0x244a   : > { %v7547_v27 = vpop.eup %5606  ;;  %v4029_v16 = vmul.f32 %v7047_v13, %v4028_v60  ;;  %v4058_v47 = vsel %vm7469_vm14, %v7404_v53, %v4053_v6  ;;  %v4038_v15 = vsel %vm4037_vm11, %v7437_v45, %v4034_v14  ;;  %v4062_v56 = vsub.f32 1.0, %v4061_v55 }
0x244b   : > { %4754 = vperm.xlu1 %5252, %v3999_v22   ;;  %4757 = vperm.xlu0 %5254, %v4014_v31   ;;  %v4059_v49 = vmul.f32 %v7050_v5, %v4058_v47  ;;  %v8610_v35 = vand.u32 2147483647, %v7355_v54  ;;  %vm4065_vm12 = vweird.f32 %v7359_v28  ;;  %v7559_v11 = vpop.eup %5608  ;;  %vm4066_vm13 = vweird.f32 %v7465_v20 }
0x244c   : > { %4760 = vperm.xlu2 %5253, %v4029_v16   ;;  %v4063_v53 = vmul.f32 %v7465_v20, %v4062_v56  ;;  %v3871_v45 = vpop.xlane.xlu2 %3870  ;;  %v4092_v42 = vsub.f32 1.0, %v7425_v58  ;;  %v7565_v33 = vpop.eup %5610  ;;  %v8611_v5 = vand.u32 2147483647, %v7359_v28  ;;  %v8614_v17 = vand.u32 2147483648, %v7359_v28  ;;  %vm4067_vm0 = vmor %vm4065_vm12, %vm4066_vm13 }
0x244d   : > { %vm4040_vm8 = vcmp.eq.f32.partialorder %v8610_v35, 8.507059e+37  ;;  %v7575_v3 = vperm.slane %v3871_v45, 0  ;;  %v7580_v25 = vperm.slane %v3871_v45, 2  ;;  %v7582_v58 = vperm.slane %v3871_v45, 3  ;;  %v7596_v14 = vpop.eup %5612 }
0x244e   : > { %v4043_v13 = vsel %vm4040_vm8, %v7411_v12, %v4038_v15  ;;  %vm7569_vm14 = vcmp.eq.f32.partialorder %v8611_v5, 8.507059e+37  ;;  %v4072_v41 = vor.u32 1.1754944e-38, %v8614_v17  ;;  %v7577_v12 = vperm.slane %v3871_v45, 1 }
0x244f   : > { %v4064_v26 = vadd.f32 %v7465_v20, %v4063_v53  ;;  %v4093_v23 = vmul.f32 %v7367_v46, %v4092_v42  ;;  %v7587_v55 = vperm.slane %v3871_v45, 4  ;;  %5614 = vrcp.f32 %v7575_v3 }
0x2450   : > { %vm4096_vm1 = vweird.f32 %v7367_v46  ;;  %v4099_v48 = vand.u32 2147483647, %v7331_v37  ;;  %vm4095_vm2 = vweird.f32 %v7331_v37  ;;  %v4101_v40 = vand.u32 2147483648, %v7331_v37 }
0x2451   : > { %v4068_v52 = vsel %vm4067_vm0, %v7465_v20, %v4064_v26  ;;  %v4094_v1 = vadd.f32 %v7367_v46, %v4093_v23  ;;  %v4044_v28 = vmul.f32 %v7052_v4, %v4043_v13  ;;  %5616 = vrcp.f32 %v7577_v12  ;;  %vm4097_vm4 = vmor %vm4095_vm2, %vm4096_vm1 }
0x2452   : > { %v4073_v22 = vsel %vm7569_vm14, %v4072_v41, %v4068_v52  ;;  %v4076_v31 = vmul.f32 %v7361_v63, %v7329_v57  ;;  %5618 = vrcp.f32 %v7580_v25  ;;  %v4102_v37 = vor.u32 1.1754944e-38, %v4101_v40 }
0x2453   : > { %v4074_v20 = vmul.f32 %v7056_v62, %v4073_v22  ;;  %v4098_v60 = vsel %vm4097_vm4, %v7367_v46, %v4094_v1  ;;  %4766 = vperm.xlu1 %5252, %v4059_v49   ;;  %4763 = vperm.xlu0 %5254, %v4044_v28   ;;  %v7607_v6 = vperm.slane %v3871_v45, 5  ;;  %5620 = vrcp.f32 %v7582_v58 }
0x2454   : > { %vm4100_vm5 = vcmp.eq.f32.partialorder %v4099_v48, 8.507059e+37  ;;  %v4077_v4 = vsub.f32 1.0, %v4076_v31  ;;  %5622 = vrcp.f32 %v7587_v55  ;;  %v4084_v47 = vand.u32 2147483647, %v7329_v57 }
0x2455   : > { %4769 = vperm.xlu2 %5253, %v4074_v20   ;;  %v4103_v16 = vsel %vm4100_vm5, %v4102_v37, %v4098_v60  ;;  %v4086_v62 = vand.u32 2147483648, %v7329_v57  ;;  %v7613_v15 = vpop.eup %5614  ;;  %vm4080_vm6 = vweird.f32 %v7329_v57  ;;  %vm4081_vm9 = vweird.f32 %v7361_v63 }
0x2456   : > { %v4078_v46 = vmul.f32 %v7361_v63, %v4077_v4  ;;  %v4106_v56 = vmul.f32 %v7375_v32, %v7333_v29  ;;  %v4104_v49 = vmul.f32 %v7067_v21, %v4103_v16  ;;  %vm7621_vm10 = vcmp.eq.f32.partialorder %v4084_v47, 8.507059e+37  ;;  %vm4082_vm15 = vmor %vm4080_vm6, %vm4081_vm9 }
0x2457   : > { %vm4110_vm3 = vweird.f32 %v7333_v29  ;;  %v4114_v13 = vand.u32 2147483647, %v7333_v29  ;;  %v7627_v53 = vpop.eup %5616  ;;  %v4116_v42 = vand.u32 2147483648, %v7333_v29  ;;  %v4136_v5 = vmul.f32 %v7392_v19, %v7341_v2 }
0x2458   : > { %v4079_v45 = vadd.f32 %v7361_v63, %v4078_v46  ;;  %v4107_v57 = vsub.f32 1.0, %v4106_v56  ;;  %v7633_v54 = vpop.eup %5618  ;;  %v4087_v21 = vor.u32 1.1754944e-38, %v4086_v62  ;;  %vm4111_vm7 = vweird.f32 %v7375_v32 }
0x2459   : > { %vm7636_vm11 = vcmp.eq.f32.partialorder %v4114_v13, 8.507059e+37  ;;  %v4144_v41 = vand.u32 2147483647, %v7341_v2  ;;  %v7641_v26 = vpop.eup %5620  ;;  %v4137_v52 = vsub.f32 1.0, %v4136_v5  ;;  %vm4140_vm8 = vweird.f32 %v7341_v2  ;;  %vm4112_vm13 = vmor %vm4110_vm3, %vm4111_vm7 }
0x245a   : > { %v4083_v23 = vsel %vm4082_vm15, %v7361_v63, %v4079_v45  ;;  %v4108_v48 = vmul.f32 %v7375_v32, %v4107_v57  ;;  %v7646_v1 = vpop.eup %5622  ;;  %vm4141_vm12 = vweird.f32 %v7392_v19  ;;  %v4146_v28 = vand.u32 2147483648, %v7341_v2 }
0x245b   : > { %v4088_v40 = vsel %vm7621_vm10, %v4087_v21, %v4083_v23  ;;  %v4121_v22 = vmul.f32 %v7384_v51, %v7335_v10  ;;  %4775 = vperm.xlu1 %5252, %v4104_v49   ;;  %v4117_v20 = vor.u32 1.1754944e-38, %v4116_v42  ;;  %v4138_v60 = vmul.f32 %v7392_v19, %v4137_v52  ;;  %vm4142_vm1 = vmor %vm4140_vm8, %vm4141_vm12 }
0x245c   : > { %v4089_v63 = vmul.f32 %v7065_v9, %v4088_v40  ;;  %v4109_v31 = vadd.f32 %v7375_v32, %v4108_v48  ;;  %vm7661_vm14 = vcmp.eq.f32.partialorder %v4144_v41, 8.507059e+37  ;;  %v4147_v4 = vor.u32 1.1754944e-38, %v4146_v28  ;;  %v3874_v49 = vpop.xlane.xlu1 %3873 }
0x245d   : > { %v4122_v16 = vsub.f32 1.0, %v4121_v22  ;;  %vm4125_vm0 = vweird.f32 %v7335_v10  ;;  %v4139_v47 = vadd.f32 %v7392_v19, %v4138_v60  ;;  %v4131_v62 = vand.u32 2147483648, %v7335_v10 }
0x245e   : > { %4772 = vperm.xlu0 %5254, %v4089_v63   ;;  %v4113_v9 = vsel %vm4112_vm13, %v7375_v32, %v4109_v31  ;;  %v4151_v46 = vmul.f32 %v7400_v38, %v7344_v30  ;;  %vm4126_vm2 = vweird.f32 %v7384_v51  ;;  %v4129_v32 = vand.u32 2147483647, %v7335_v10  ;;  %v8621_v63 = vld [vmem:[#allocation49_spill] sm:$0xff] }
0x245f   : > { %v4118_v29 = vsel %vm7636_vm11, %v4117_v20, %v4113_v9  ;;  %v4123_v56 = vmul.f32 %v7384_v51, %v4122_v16  ;;  %v4143_v13 = vsel %vm4142_vm1, %v7392_v19, %v4139_v47  ;;  %v4132_v45 = vor.u32 1.1754944e-38, %v4131_v62  ;;  %vm4127_vm5 = vmor %vm4125_vm0, %vm4126_vm2  ;;  %v8622_v20 = vld [vmem:[#allocation20_spill] sm:$0xff]  ;;  %v8624_v47 = vld [vmem:[#allocation57_spill] sm:$0xff] }
0x2460   : > { %v4119_v35 = vmul.f32 %v7070_v59, %v4118_v29  ;;  %v4152_v57 = vsub.f32 1.0, %v4151_v46  ;;  %v4148_v42 = vsel %vm7661_vm14, %v4147_v4, %v4143_v13  ;;  %vm4156_vm4 = vweird.f32 %v7400_v38  ;;  %v8623_v9 = vld [vmem:[#allocation48_spill] sm:$0xff] }
0x2461   : > { %v4124_v5 = vadd.f32 %v7384_v51, %v4123_v56  ;;  %v4159_v2 = vand.u32 2147483647, %v7344_v30  ;;  %v4149_v21 = vmul.f32 %v7079_v0, %v4148_v42  ;;  %v4161_v19 = vand.u32 2147483648, %v7344_v30 }
0x2462   : > { %4778 = vperm.xlu2 %5253, %v4119_v35   ;;  %v4153_v59 = vmul.f32 %v7400_v38, %v4152_v57  ;;  %v7692_v17 = vperm.slane %v3874_v49, 0  ;;  %5624 = vrcp.f32 %v7607_v6  ;;  %vm4130_vm6 = vcmp.eq.f32.partialorder %v4129_v32, 8.507059e+37 }
0x2463   : > { %v4128_v41 = vsel %vm4127_vm5, %v7384_v51, %v4124_v5  ;;  %v7696_v23 = vperm.slane %v3874_v49, 1  ;;  %4784 = vperm.xlu1 %5252, %v4149_v21   ;;  %vm4155_vm9 = vweird.f32 %v7344_v30  ;;  %v7700_v10 = vperm.slane %v3874_v49, 2 }
0x2464   : > { %v4133_v48 = vsel %vm4130_vm6, %v4132_v45, %v4128_v41  ;;  %v4154_v0 = vadd.f32 %v7400_v38, %v4153_v59  ;;  %vm4157_vm10 = vmor %vm4155_vm9, %vm4156_vm4  ;;  %vm4160_vm3 = vcmp.eq.f32.partialorder %v4159_v2, 8.507059e+37  ;;  %v4162_v40 = vor.u32 1.1754944e-38, %v4161_v19 }
0x2465   : > { %v4134_v52 = vmul.f32 %v7077_v44, %v4133_v48  ;;  %v7705_v28 = vperm.slane %v3874_v49, 3  ;;  %v7708_v22 = vperm.slane %v3874_v49, 4  ;;  %5626 = vrcp.f32 %v7692_v17 }
0x2466   : > { %v4158_v51 = vsel %vm4157_vm10, %v7400_v38, %v4154_v0  ;;  %v4271_v30 = vmul.f32 %v7479_v18, %v8621_v63  ;;  %5628 = vrcp.f32 %v7696_v23  ;;  %v4279_v44 = vand.u32 2147483647, %v8621_v63  ;;  %v8628_v0 = vld [vmem:[#allocation52_spill] sm:$0xff] }
0x2467   : > { %4781 = vperm.xlu0 %5254, %v4134_v52   ;;  %v4163_v31 = vsel %vm4160_vm3, %v4162_v40, %v4158_v51  ;;  %5630 = vrcp.f32 %v7700_v10  ;;  %v4281_v38 = vand.u32 2147483648, %v8621_v63  ;;  %v7720_v16 = vperm.slane %v3874_v49, 5  ;;  %v8627_v49 = vld [vmem:[#allocation50_spill] sm:$0xff] }
0x2468   : > { %v4164_v60 = vmul.f32 %v8622_v20, %v4163_v31  ;;  %v4272_v37 = vsub.f32 1.0, %v4271_v30  ;;  %v7718_v4 = vpop.eup %5624  ;;  %5632 = vrcp.f32 %v7705_v28  ;;  %vm4275_vm15 = vweird.f32 %v8621_v63 }
0x2469   : > { %v4256_v62 = vmul.f32 %v8624_v47, %v8623_v9  ;;  %5634 = vrcp.f32 %v7708_v22  ;;  %vm4276_vm7 = vweird.f32 %v7479_v18  ;;  %vm7729_vm11 = vcmp.eq.f32.partialorder %v4279_v44, 8.507059e+37 }
0x246a   : > { %4787 = vperm.xlu2 %5253, %v4164_v60   ;;  %v4273_v46 = vmul.f32 %v7479_v18, %v4272_v37  ;;  %vm4260_vm8 = vweird.f32 %v8623_v9  ;;  %v4264_v32 = vand.u32 2147483647, %v8623_v9  ;;  %v4286_v35 = vmul.f32 %v7484_v36, %v8627_v49  ;;  %vm4277_vm13 = vmor %vm4275_vm15, %vm4276_vm7 }
0x246b   : > { %v4257_v56 = vsub.f32 1.0, %v4256_v62  ;;  %v7737_v13 = vpop.eup %5626  ;;  %v4282_v57 = vor.u32 1.1754944e-38, %v4281_v38  ;;  %vm4261_vm12 = vweird.f32 %v8624_v47  ;;  %v4266_v42 = vand.u32 2147483648, %v8623_v9 }
0x246c   : > { %v4274_v45 = vadd.f32 %v7479_v18, %v4273_v46  ;;  %v7742_v5 = vpop.eup %5628  ;;  %v4287_v21 = vsub.f32 1.0, %v4286_v35  ;;  %vm4290_vm14 = vweird.f32 %v8627_v49  ;;  %vm4291_vm0 = vweird.f32 %v7484_v36  ;;  %vm4262_vm2 = vmor %vm4260_vm8, %vm4261_vm12  ;;  %v8631_v35 = vld [vmem:[#allocation21_spill] sm:$0xff] }
0x246d   : > { %v4258_v2 = vmul.f32 %v8624_v47, %v4257_v56  ;;  %v7749_v59 = vpop.eup %5630  ;;  %v4294_v41 = vand.u32 2147483647, %v8627_v49  ;;  %v4296_v48 = vand.u32 2147483648, %v8627_v49  ;;  %v4316_v52 = vmul.f32 %v7501_v34, %v8628_v0  ;;  %vm4292_vm4 = vmor %vm4290_vm14, %vm4291_vm0 }
0x246e   : > { %v4278_v19 = vsel %vm4277_vm13, %v7479_v18, %v4274_v45  ;;  %v7756_v40 = vpop.eup %5632  ;;  %vm4265_vm1 = vcmp.eq.f32.partialorder %v4264_v32, 8.507059e+37  ;;  %v4288_v30 = vmul.f32 %v7484_v36, %v4287_v21  ;;  %v8629_v18 = vld [vmem:[#allocation22_spill] sm:$0xff]  ;;  %v4267_v20 = vor.u32 1.1754944e-38, %v4266_v42  ;;  %v8630_v32 = vld [vmem:[#allocation51_spill] sm:$0xff] }
0x246f   : > { %v4283_v51 = vsel %vm7729_vm11, %v4282_v57, %v4278_v19  ;;  %v4259_v63 = vadd.f32 %v8624_v47, %v4258_v2  ;;  %v7762_v31 = vpop.eup %5634  ;;  %v4297_v60 = vor.u32 1.1754944e-38, %v4296_v48  ;;  %v4317_v37 = vsub.f32 1.0, %v4316_v52  ;;  %v8632_v21 = vld [vmem:[#allocation23_spill] sm:$0xff] }
0x2470   : > { %v4284_v44 = vmul.f32 %v8629_v18, %v4283_v51  ;;  %v4289_v62 = vadd.f32 %v7484_v36, %v4288_v30  ;;  %v4324_v46 = vand.u32 2147483647, %v8628_v0  ;;  %v4326_v29 = vand.u32 2147483648, %v8628_v0  ;;  %v8633_v51 = vld [vmem:[#allocation53_spill] sm:$0xff]  ;;  %v3877_v30 = vpop.xlane.xlu0 %3876 }
0x2471   : > { %v4263_v38 = vsel %vm4262_vm2, %v8624_v47, %v4259_v63  ;;  %v4318_v9 = vmul.f32 %v7501_v34, %v4317_v37  ;;  %vm4321_vm5 = vweird.f32 %v7501_v34  ;;  %v4301_v47 = vmul.f32 %v7488_v7, %v8630_v32 }
0x2472   : > { %4811 = vperm.xlu1 %5252, %v4284_v44   ;;  %v4268_v56 = vsel %vm4265_vm1, %v4267_v20, %v4263_v38  ;;  %v4293_v57 = vsel %vm4292_vm4, %v7484_v36, %v4289_v62  ;;  %vm4295_vm6 = vcmp.eq.f32.partialorder %v4294_v41, 8.507059e+37  ;;  %vm4320_vm9 = vweird.f32 %v8628_v0  ;;  %v8634_v20 = vld [vmem:[#allocation25_spill] sm:$0xff] }
0x2473   : > { %v4269_v45 = vmul.f32 %v8631_v35, %v4268_v56  ;;  %v4298_v42 = vsel %vm4295_vm6, %v4297_v60, %v4293_v57  ;;  %v4319_v2 = vadd.f32 %v7501_v34, %v4318_v9  ;;  %vm4325_vm10 = vcmp.eq.f32.partialorder %v4324_v46, 8.507059e+37  ;;  %vm4322_vm3 = vmor %vm4320_vm9, %vm4321_vm5 }
0x2474   : > { %v4302_v49 = vsub.f32 1.0, %v4301_v47  ;;  %v4299_v19 = vmul.f32 %v8632_v21, %v4298_v42  ;;  %v4327_v48 = vor.u32 1.1754944e-38, %v4326_v29  ;;  %v4311_v52 = vand.u32 2147483648, %v8630_v32 }
0x2475   : > { %4808 = vperm.xlu0 %5254, %v4269_v45   ;;  %v4331_v63 = vmul.f32 %v7512_v50, %v8633_v51  ;;  %v4323_v36 = vsel %vm4322_vm3, %v7501_v34, %v4319_v2  ;;  %vm4306_vm15 = vweird.f32 %v7488_v7  ;;  %v4309_v0 = vand.u32 2147483647, %v8630_v32  ;;  %v8635_v45 = vld [vmem:[#allocation24_spill] sm:$0xff] }
0x2476   : > { %v4303_v41 = vmul.f32 %v7488_v7, %v4302_v49  ;;  %5636 = vrcp.f32 %v7720_v16  ;;  %4814 = vperm.xlu2 %5253, %v4299_v19   ;;  %v4328_v18 = vsel %vm4325_vm10, %v4327_v48, %v4323_v36  ;;  %vm4305_vm7 = vweird.f32 %v8630_v32  ;;  %v8636_v36 = vld [vmem:[#allocation26_spill] sm:$0xff] }
0x2477   : > { %v4332_v44 = vsub.f32 1.0, %v4331_v63  ;;  %v4329_v60 = vmul.f32 %v8634_v20, %v4328_v18  ;;  %v4339_v34 = vand.u32 2147483647, %v8633_v51  ;;  %v4341_v38 = vand.u32 2147483648, %v8633_v51  ;;  %vm4307_vm11 = vmor %vm4305_vm7, %vm4306_vm15 }
0x2478   : > { %v4304_v37 = vadd.f32 %v7488_v7, %v4303_v41  ;;  %v4312_v62 = vor.u32 1.1754944e-38, %v4311_v52  ;;  %vm4336_vm8 = vweird.f32 %v7512_v50  ;;  %v7801_v29 = vperm.slane %v3877_v30, 0 }
0x2479   : > { %v4333_v46 = vmul.f32 %v7512_v50, %v4332_v44  ;;  %vm4310_vm12 = vcmp.eq.f32.partialorder %v4309_v0, 8.507059e+37  ;;  %vm4335_vm13 = vweird.f32 %v8633_v51  ;;  %v7805_v9 = vperm.slane %v3877_v30, 1 }
0x247a   : > { %4820 = vperm.xlu1 %5252, %v4329_v60   ;;  %v4308_v56 = vsel %vm4307_vm11, %v7488_v7, %v4304_v37  ;;  %vm4340_vm14 = vcmp.eq.f32.partialorder %v4339_v34, 8.507059e+37  ;;  %v7808_v35 = vperm.slane %v3877_v30, 2  ;;  %vm4337_vm0 = vmor %vm4335_vm13, %vm4336_vm8  ;;  %v4342_v42 = vor.u32 1.1754944e-38, %v4341_v38  ;;  %v8639_v38 = vld [vmem:[#allocation54_spill] sm:$0xff] }
0x247b   : > { %v4313_v32 = vsel %vm4310_vm12, %v4312_v62, %v4308_v56  ;;  %v4334_v47 = vadd.f32 %v7512_v50, %v4333_v46  ;;  %v7811_v2 = vperm.slane %v3877_v30, 3  ;;  %v4196_v7 = vmul.f32 %v7547_v27, %v7430_v8 }
0x247c   : > { %v4314_v57 = vmul.f32 %v8635_v45, %v4313_v32  ;;  %v7815_v49 = vpop.eup %5636  ;;  %v7818_v19 = vperm.slane %v3877_v30, 4  ;;  %5638 = vrcp.f32 %v7801_v29  ;;  %v4204_v48 = vand.u32 2147483647, %v7430_v8 }
0x247d   : > { %v4338_v21 = vsel %vm4337_vm0, %v7512_v50, %v4334_v47  ;;  %5640 = vrcp.f32 %v7805_v9  ;;  %v4197_v51 = vsub.f32 1.0, %v4196_v7  ;;  %v4206_v63 = vand.u32 2147483648, %v7430_v8 }
0x247e   : > { %4817 = vperm.xlu0 %5254, %v4314_v57   ;;  %v4343_v52 = vsel %vm4340_vm14, %v4342_v42, %v4338_v21  ;;  %v7825_v0 = vperm.slane %v3877_v30, 5  ;;  %5642 = vrcp.f32 %v7808_v35  ;;  %v4181_v50 = vmul.f32 %v7536_v43, %v7420_v61 }
0x247f   : > { %v4344_v41 = vmul.f32 %v8636_v36, %v4343_v52  ;;  %5644 = vrcp.f32 %v7811_v2  ;;  %v4198_v18 = vmul.f32 %v7547_v27, %v4197_v51  ;;  %vm4200_vm1 = vweird.f32 %v7430_v8  ;;  %v8642_v36 = vld [vmem:[#allocation29_spill] sm:$0xff] }
0x2480   : > { %vm4201_vm2 = vweird.f32 %v7547_v27  ;;  %5646 = vrcp.f32 %v7818_v19  ;;  %vm7835_vm4 = vcmp.eq.f32.partialorder %v4204_v48, 8.507059e+37  ;;  %v4182_v30 = vsub.f32 1.0, %v4181_v50 }
0x2481   : > { %4823 = vperm.xlu2 %5253, %v4344_v41   ;;  %v4189_v20 = vand.u32 2147483647, %v7420_v61  ;;  %v4199_v60 = vadd.f32 %v7547_v27, %v4198_v18  ;;  %v4207_v37 = vor.u32 1.1754944e-38, %v4206_v63  ;;  %v4191_v34 = vand.u32 2147483648, %v7420_v61  ;;  %vm4202_vm5 = vmor %vm4200_vm1, %vm4201_vm2 }
0x2482   : > { %v4166_v8 = vmul.f32 %v7523_v24, %v8639_v38  ;;  %v7844_v62 = vpop.eup %5638  ;;  %v4183_v46 = vmul.f32 %v7536_v43, %v4182_v30  ;;  %vm4185_vm6 = vweird.f32 %v7420_v61  ;;  %vm4186_vm9 = vweird.f32 %v7536_v43 }
0x2483   : > { %v4174_v56 = vand.u32 2147483647, %v8639_v38  ;;  %v7850_v32 = vpop.eup %5640  ;;  %v4203_v47 = vsel %vm4202_vm5, %v7547_v27, %v4199_v60  ;;  %vm4170_vm10 = vweird.f32 %v8639_v38  ;;  %v4176_v57 = vand.u32 2147483648, %v8639_v38  ;;  %vm4187_vm15 = vmor %vm4185_vm6, %vm4186_vm9 }
0x2484   : > { %v4167_v45 = vsub.f32 1.0, %v4166_v8  ;;  %v7855_v42 = vpop.eup %5642  ;;  %v4208_v7 = vsel %vm7835_vm4, %v4207_v37, %v4203_v47  ;;  %v4184_v61 = vadd.f32 %v7536_v43, %v4183_v46  ;;  %vm4190_vm3 = vcmp.eq.f32.partialorder %v4189_v20, 8.507059e+37  ;;  %v8643_v37 = vld [vmem:[#allocation56_spill] sm:$0xff] }
0x2485   : > { %v4241_v21 = vmul.f32 %v7596_v14, %v7440_v39  ;;  %v7862_v48 = vpop.eup %5644  ;;  %v4192_v27 = vor.u32 1.1754944e-38, %v4191_v34  ;;  %vm4171_vm7 = vweird.f32 %v7523_v24  ;;  %vm7866_vm11 = vcmp.eq.f32.partialorder %v4174_v56, 8.507059e+37  ;;  %v8644_v8 = vld [vmem:[#allocation28_spill] sm:$0xff] }
0x2486   : > { %v4168_v52 = vmul.f32 %v7523_v24, %v4167_v45  ;;  %v7870_v63 = vpop.eup %5646  ;;  %v4209_v41 = vmul.f32 %v8642_v36, %v4208_v7  ;;  %v4188_v50 = vsel %vm4187_vm15, %v7536_v43, %v4184_v61  ;;  %v4177_v18 = vor.u32 1.1754944e-38, %v4176_v57  ;;  %vm4172_vm8 = vmor %vm4170_vm10, %vm4171_vm7 }
0x2487   : > { %v4242_v44 = vsub.f32 1.0, %v4241_v21  ;;  %v4193_v30 = vsel %vm4190_vm3, %v4192_v27, %v4188_v50  ;;  %v4251_v60 = vand.u32 2147483648, %v7440_v39  ;;  %v4226_v34 = vmul.f32 %v7565_v33, %v8643_v37  ;;  %v8645_v27 = vld [vmem:[#allocation27_spill] sm:$0xff] }
0x2488   : > { %v4169_v20 = vadd.f32 %v7523_v24, %v4168_v52  ;;  %v4194_v46 = vmul.f32 %v8644_v8, %v4193_v30  ;;  %vm4246_vm12 = vweird.f32 %v7596_v14  ;;  %v4249_v43 = vand.u32 2147483647, %v7440_v39 }
0x2489   : > { %4796 = vperm.xlu2 %5253, %v4209_v41   ;;  %v4243_v56 = vmul.f32 %v7596_v14, %v4242_v44  ;;  %vm4245_vm13 = vweird.f32 %v7440_v39  ;;  %v4252_v45 = vor.u32 1.1754944e-38, %v4251_v60  ;;  %v4227_v57 = vsub.f32 1.0, %v4226_v34  ;;  %v8646_v39 = vld [vmem:[#allocation55_spill] sm:$0xff]  ;;  %v3880_v41 = vpop.xlane.xlu2 %3879 }
0x248a   : > { %v4173_v47 = vsel %vm4172_vm8, %v7523_v24, %v4169_v20  ;;  %4793 = vperm.xlu1 %5252, %v4194_v46   ;;  %v4234_v38 = vand.u32 2147483647, %v8643_v37  ;;  %v4236_v21 = vand.u32 2147483648, %v8643_v37  ;;  %vm4247_vm14 = vmor %vm4245_vm13, %vm4246_vm12  ;;  %vm4231_vm0 = vweird.f32 %v7565_v33  ;;  %v8647_v20 = vld [vmem:[#allocation32_spill] sm:$0xff] }
0x248b   : > { %v4178_v7 = vsel %vm7866_vm11, %v4177_v18, %v4173_v47  ;;  %v4244_v61 = vadd.f32 %v7596_v14, %v4243_v56  ;;  %v4228_v36 = vmul.f32 %v7565_v33, %v4227_v57  ;;  %v4211_v24 = vmul.f32 %v7559_v11, %v8646_v39 }
0x248c   : > { %v4179_v52 = vmul.f32 %v8645_v27, %v4178_v7  ;;  %5648 = vrcp.f32 %v7825_v0  ;;  %vm4250_vm1 = vcmp.eq.f32.partialorder %v4249_v43, 8.507059e+37  ;;  %vm4230_vm2 = vweird.f32 %v8643_v37 }
0x248d   : > { %v4248_v51 = vsel %vm4247_vm14, %v7596_v14, %v4244_v61  ;;  %v4229_v18 = vadd.f32 %v7565_v33, %v4228_v36  ;;  %v4212_v44 = vsub.f32 1.0, %v4211_v24  ;;  %v4219_v30 = vand.u32 2147483647, %v8646_v39  ;;  %vm4232_vm4 = vmor %vm4230_vm2, %vm4231_vm0 }
0x248e   : > { %4790 = vperm.xlu0 %5254, %v4179_v52   ;;  %v4253_v50 = vsel %vm4250_vm1, %v4252_v45, %v4248_v51  ;;  %vm4235_vm5 = vcmp.eq.f32.partialorder %v4234_v38, 8.507059e+37  ;;  %v4237_v34 = vor.u32 1.1754944e-38, %v4236_v21  ;;  %v4221_v8 = vand.u32 2147483648, %v8646_v39  ;;  %v8650_v45 = vld [vmem:[#allocation31_spill] sm:$0xff] }
0x248f   : > { %v4254_v60 = vmul.f32 %v8647_v20, %v4253_v50  ;;  %v4233_v14 = vsel %vm4232_vm4, %v7565_v33, %v4229_v18  ;;  %v4213_v46 = vmul.f32 %v7559_v11, %v4212_v44  ;;  %vm4216_vm6 = vweird.f32 %v7559_v11  ;;  %v8651_v44 = vld [vmem:[#allocation30_spill] sm:$0xff] }
0x2490   : > { %v7906_v37 = vperm.slane %v3880_v41, 0  ;;  %v4238_v56 = vsel %vm4235_vm5, %v4237_v34, %v4233_v14  ;;  %vm4215_vm9 = vweird.f32 %v8646_v39  ;;  %vm7909_vm10 = vcmp.eq.f32.partialorder %v4219_v30, 8.507059e+37 }
0x2491   : > { %4805 = vperm.xlu2 %5253, %v4254_v60   ;;  %v7913_v47 = vperm.slane %v3880_v41, 1  ;;  %v4239_v57 = vmul.f32 %v8650_v45, %v4238_v56  ;;  %v4214_v33 = vadd.f32 %v7559_v11, %v4213_v46  ;;  %v4222_v7 = vor.u32 1.1754944e-38, %v4221_v8  ;;  %vm4217_vm3 = vmor %vm4215_vm9, %vm4216_vm6 }
0x2492   : > { %v7917_v61 = vperm.slane %v3880_v41, 2  ;;  %v7919_v38 = vpop.eup %5648  ;;  %v7921_v21 = vperm.slane %v3880_v41, 3  ;;  %v7923_v27 = vperm.slane %v3880_v41, 4  ;;  %v7925_v52 = vperm.slane %v3880_v41, 5 }
0x2493   : > { %v4376_v36 = vmul.f32 %v7633_v54, %v7580_v25  ;;  %4802 = vperm.xlu1 %5252, %v4239_v57   ;;  %v4218_v39 = vsel %vm4217_vm3, %v7559_v11, %v4214_v33  ;;  %5650 = vrcp.f32 %v7906_v37  ;;  %v4384_v24 = vand.u32 2147483647, %v7580_v25 }
0x2494   : > { %v4386_v51 = vand.u32 2147483648, %v7580_v25  ;;  %v4223_v50 = vsel %vm7909_vm10, %v4222_v7, %v4218_v39  ;;  %5652 = vrcp.f32 %v7913_v47  ;;  %v4361_v41 = vmul.f32 %v7627_v53, %v7577_v12 }
0x2495   : > { %v4377_v18 = vsub.f32 1.0, %v4376_v36  ;;  %v4224_v30 = vmul.f32 %v8651_v44, %v4223_v50  ;;  %5654 = vrcp.f32 %v7917_v61  ;;  %vm4380_vm15 = vweird.f32 %v7580_v25 }
0x2496   : > { %vm4381_vm7 = vweird.f32 %v7633_v54  ;;  %5656 = vrcp.f32 %v7921_v21  ;;  %vm7944_vm11 = vcmp.eq.f32.partialorder %v4384_v24, 8.507059e+37  ;;  %v4362_v60 = vsub.f32 1.0, %v4361_v41 }
0x2497   : > { %v4378_v11 = vmul.f32 %v7633_v54, %v4377_v18  ;;  %4799 = vperm.xlu0 %5254, %v4224_v30   ;;  %v4387_v34 = vor.u32 1.1754944e-38, %v4386_v51  ;;  %v4369_v8 = vand.u32 2147483647, %v7577_v12  ;;  %v4371_v14 = vand.u32 2147483648, %v7577_v12  ;;  %vm4382_vm13 = vmor %vm4380_vm15, %vm4381_vm7  ;;  %v8656_v30 = vld [vmem:[#allocation35_spill] sm:$0xff] }
0x2498   : > { %v4346_v46 = vmul.f32 %v7613_v15, %v7575_v3  ;;  %v4363_v43 = vmul.f32 %v7627_v53, %v4362_v60  ;;  %vm4365_vm8 = vweird.f32 %v7577_v12  ;;  %vm4366_vm12 = vweird.f32 %v7627_v53 }
0x2499   : > { %v4379_v56 = vadd.f32 %v7633_v54, %v4378_v11  ;;  %v7956_v45 = vpop.eup %5650  ;;  %vm7962_vm14 = vcmp.eq.f32.partialorder %v4369_v8, 8.507059e+37  ;;  %vm4350_vm0 = vweird.f32 %v7575_v3  ;;  %vm4351_vm1 = vweird.f32 %v7613_v15  ;;  %vm4367_vm2 = vmor %vm4365_vm8, %vm4366_vm12 }
0x249a   : > { %v4347_v33 = vsub.f32 1.0, %v4346_v46  ;;  %v7968_v7 = vpop.eup %5652  ;;  %v4364_v39 = vadd.f32 %v7627_v53, %v4363_v43  ;;  %v4356_v24 = vand.u32 2147483648, %v7575_v3  ;;  %v4421_v25 = vmul.f32 %v7718_v4, %v7607_v6  ;;  %vm4352_vm5 = vmor %vm4350_vm0, %vm4351_vm1 }
0x249b   : > { %v4383_v36 = vsel %vm4382_vm13, %v7633_v54, %v4379_v56  ;;  %v7975_v51 = vpop.eup %5654  ;;  %v4372_v18 = vor.u32 1.1754944e-38, %v4371_v14  ;;  %v4354_v54 = vand.u32 2147483647, %v7575_v3  ;;  %vm4426_vm4 = vweird.f32 %v7718_v4  ;;  %v8657_v14 = vld [vmem:[#allocation34_spill] sm:$0xff] }
0x249c   : > { %v4388_v50 = vsel %vm7944_vm11, %v4387_v34, %v4383_v36  ;;  %v4348_v41 = vmul.f32 %v7613_v15, %v4347_v33  ;;  %v7983_v44 = vpop.eup %5656  ;;  %v4368_v60 = vsel %vm4367_vm2, %v7627_v53, %v4364_v39  ;;  %v4357_v8 = vor.u32 1.1754944e-38, %v4356_v24  ;;  %v8658_v24 = vld [vmem:[#allocation33_spill] sm:$0xff] }
0x249d   : > { %v4389_v11 = vmul.f32 %v8656_v30, %v4388_v50  ;;  %v4422_v46 = vsub.f32 1.0, %v4421_v25  ;;  %v4373_v20 = vsel %vm7962_vm14, %v4372_v18, %v4368_v60  ;;  %v4429_v12 = vand.u32 2147483647, %v7607_v6  ;;  %v8659_v60 = vld [vmem:[#allocation38_spill] sm:$0xff] }
0x249e   : > { %v4349_v34 = vadd.f32 %v7613_v15, %v4348_v41  ;;  %v4374_v56 = vmul.f32 %v8657_v14, %v4373_v20  ;;  %v4431_v43 = vand.u32 2147483648, %v7607_v6  ;;  %v4406_v57 = vmul.f32 %v7646_v1, %v7587_v55 }
0x249f   : > { %4832 = vperm.xlu2 %5253, %v4389_v11   ;;  %v4423_v53 = vmul.f32 %v7718_v4, %v4422_v46  ;;  %5658 = vrcp.f32 %v7923_v27  ;;  %vm4355_vm6 = vcmp.eq.f32.partialorder %v4354_v54, 8.507059e+37  ;;  %vm4425_vm9 = vweird.f32 %v7607_v6 }
0x24a0   : > { %v4353_v33 = vsel %vm4352_vm5, %v7613_v15, %v4349_v34  ;;  %4829 = vperm.xlu1 %5252, %v4374_v56   ;;  %vm4430_vm10 = vcmp.eq.f32.partialorder %v4429_v12, 8.507059e+37  ;;  %v4407_v3 = vsub.f32 1.0, %v4406_v57  ;;  %vm4427_vm3 = vmor %vm4425_vm9, %vm4426_vm4  ;;  %v4432_v50 = vor.u32 1.1754944e-38, %v4431_v43 }
0x24a1   : > { %v4358_v36 = vsel %vm4355_vm6, %v4357_v8, %v4353_v33  ;;  %v4424_v39 = vadd.f32 %v7718_v4, %v4423_v53  ;;  %v4416_v18 = vand.u32 2147483648, %v7587_v55  ;;  %v4391_v15 = vmul.f32 %v7641_v26, %v7582_v58 }
0x24a2   : > { %v4359_v25 = vmul.f32 %v8658_v24, %v4358_v36  ;;  %v4408_v6 = vmul.f32 %v7646_v1, %v4407_v3  ;;  %vm4411_vm15 = vweird.f32 %v7646_v1  ;;  %v4414_v54 = vand.u32 2147483647, %v7587_v55  ;;  %v8660_v36 = vld [vmem:[#allocation37_spill] sm:$0xff] }
0x24a3   : > { %v4428_v41 = vsel %vm4427_vm3, %v7718_v4, %v4424_v39  ;;  %vm4410_vm7 = vweird.f32 %v7587_v55  ;;  %v4392_v11 = vsub.f32 1.0, %v4391_v15  ;;  %vm4395_vm11 = vweird.f32 %v7582_v58 }
0x24a4   : > { %4826 = vperm.xlu0 %5254, %v4359_v25   ;;  %v4433_v30 = vsel %vm4430_vm10, %v4432_v50, %v4428_v41  ;;  %v4409_v46 = vadd.f32 %v7646_v1, %v4408_v6  ;;  %vm4396_vm8 = vweird.f32 %v7641_v26  ;;  %v4401_v4 = vand.u32 2147483648, %v7582_v58  ;;  %vm4412_vm12 = vmor %vm4410_vm7, %vm4411_vm15 }
0x24a5   : > { %v4434_v8 = vmul.f32 %v8659_v60, %v4433_v30  ;;  %v8021_v20 = vpop.eup %5658  ;;  %v4417_v34 = vor.u32 1.1754944e-38, %v4416_v18  ;;  %v4393_v12 = vmul.f32 %v7641_v26, %v4392_v11  ;;  %v4399_v14 = vand.u32 2147483647, %v7582_v58  ;;  %vm4397_vm1 = vmor %vm4395_vm11, %vm4396_vm8 }
0x24a6   : > { %v4466_v55 = vmul.f32 %v7749_v59, %v7700_v10  ;;  %v4413_v56 = vsel %vm4412_vm12, %v7646_v1, %v4409_v46  ;;  %vm4415_vm13 = vcmp.eq.f32.partialorder %v4414_v54, 8.507059e+37  ;;  %vm4470_vm14 = vweird.f32 %v7700_v10  ;;  %v8663_v54 = vld [vmem:[#allocation36_spill] sm:$0xff] }
0x24a7   : > { %4841 = vperm.xlu2 %5253, %v4434_v8   ;;  %v4474_v53 = vand.u32 2147483647, %v7700_v10  ;;  %v4418_v43 = vsel %vm4415_vm13, %v4417_v34, %v4413_v56  ;;  %v4394_v57 = vadd.f32 %v7641_v26, %v4393_v12  ;;  %vm4471_vm0 = vweird.f32 %v7749_v59 }
0x24a8   : > { %v4467_v33 = vsub.f32 1.0, %v4466_v55  ;;  %v4419_v39 = vmul.f32 %v8660_v36, %v4418_v43  ;;  %v4402_v3 = vor.u32 1.1754944e-38, %v4401_v4  ;;  %v4476_v1 = vand.u32 2147483648, %v7700_v10  ;;  %vm4472_vm6 = vmor %vm4470_vm14, %vm4471_vm0 }
0x24a9   : > { %v4451_v24 = vmul.f32 %v7742_v5, %v7696_v23  ;;  %v4398_v25 = vsel %vm4397_vm1, %v7641_v26, %v4394_v57  ;;  %vm4400_vm2 = vcmp.eq.f32.partialorder %v4399_v14, 8.507059e+37  ;;  %vm8042_vm4 = vcmp.eq.f32.partialorder %v4474_v53, 8.507059e+37  ;;  %v8666_v53 = vld [vmem:[#allocation41_spill] sm:$0xff] }
0x24aa   : > { %v4468_v50 = vmul.f32 %v7749_v59, %v4467_v33  ;;  %4838 = vperm.xlu1 %5252, %v4419_v39   ;;  %v4403_v15 = vsel %vm4400_vm2, %v4402_v3, %v4398_v25  ;;  %v4459_v58 = vand.u32 2147483647, %v7696_v23  ;;  %v4461_v6 = vand.u32 2147483648, %v7696_v23  ;;  %v8667_v25 = vld [vmem:[#allocation40_spill] sm:$0xff] }
0x24ab   : > { %v4452_v41 = vsub.f32 1.0, %v4451_v24  ;;  %v4404_v30 = vmul.f32 %v8663_v54, %v4403_v15  ;;  %vm4455_vm5 = vweird.f32 %v7696_v23  ;;  %v4436_v26 = vmul.f32 %v7737_v13, %v7692_v17 }
0x24ac   : > { %v4469_v11 = vadd.f32 %v7749_v59, %v4468_v50  ;;  %v4477_v60 = vor.u32 1.1754944e-38, %v4476_v1  ;;  %vm4456_vm9 = vweird.f32 %v7742_v5  ;;  %vm4440_vm10 = vweird.f32 %v7692_v17 }
0x24ad   : > { %v4453_v8 = vmul.f32 %v7742_v5, %v4452_v41  ;;  %4835 = vperm.xlu0 %5254, %v4404_v30   ;;  %vm8061_vm3 = vcmp.eq.f32.partialorder %v4459_v58, 8.507059e+37  ;;  %v4437_v34 = vsub.f32 1.0, %v4436_v26  ;;  %v4446_v12 = vand.u32 2147483648, %v7692_v17  ;;  %vm4457_vm15 = vmor %vm4455_vm5, %vm4456_vm9 }
0x24ae   : > { %v4473_v46 = vsel %vm4472_vm6, %v7749_v59, %v4469_v11  ;;  %v4462_v55 = vor.u32 1.1754944e-38, %v4461_v6  ;;  %v4511_v56 = vmul.f32 %v7815_v49, %v7720_v16  ;;  %vm4441_vm7 = vweird.f32 %v7737_v13  ;;  %v8668_v11 = vld [vmem:[#allocation39_spill] sm:$0xff] }
0x24af   : > { %v4478_v10 = vsel %vm8042_vm4, %v4477_v60, %v4473_v46  ;;  %v4454_v14 = vadd.f32 %v7742_v5, %v4453_v8  ;;  %v4438_v59 = vmul.f32 %v7737_v13, %v4437_v34  ;;  %v4444_v57 = vand.u32 2147483647, %v7692_v17  ;;  %vm4442_vm8 = vmor %vm4440_vm10, %vm4441_vm7  ;;  %v8106_v34 = vpop.permute.xlu2 %4760 }
0x24b0   : > { %v4479_v43 = vmul.f32 %v8666_v53, %v4478_v10  ;;  %v4447_v36 = vor.u32 1.1754944e-38, %v4446_v12  ;;  %v4512_v39 = vsub.f32 1.0, %v4511_v56  ;;  %vm4515_vm11 = vweird.f32 %v7720_v16  ;;  %v8669_v12 = vld [vmem:[#allocation44_spill] sm:$0xff] }
0x24b1   : > { %v4458_v33 = vsel %vm4457_vm15, %v7742_v5, %v4454_v14  ;;  %v4439_v1 = vadd.f32 %v7737_v13, %v4438_v59  ;;  %v4521_v23 = vand.u32 2147483648, %v7720_v16  ;;  %v4496_v24 = vmul.f32 %v7762_v31, %v7708_v22  ;;  %v8670_v59 = vld [vmem:[#allocation10_spill] sm:$0xff] }
0x24b2   : > { %4850 = vperm.xlu2 %5253, %v4479_v43   ;;  %v4463_v3 = vsel %vm8061_vm3, %v4462_v55, %v4458_v33  ;;  %v4513_v5 = vmul.f32 %v7815_v49, %v4512_v39  ;;  %vm4516_vm12 = vweird.f32 %v7815_v49  ;;  %v4519_v18 = vand.u32 2147483647, %v7720_v16 }
0x24b3   : > { %v4464_v50 = vmul.f32 %v8667_v25, %v4463_v3  ;;  %v4443_v15 = vsel %vm4442_vm8, %v7737_v13, %v4439_v1  ;;  %vm4445_vm13 = vcmp.eq.f32.partialorder %v4444_v57, 8.507059e+37  ;;  %v4522_v41 = vor.u32 1.1754944e-38, %v4521_v23  ;;  %vm4517_vm14 = vmor %vm4515_vm11, %vm4516_vm12 }
0x24b4   : > { %v4497_v58 = vsub.f32 1.0, %v4496_v24  ;;  %v4448_v6 = vsel %vm4445_vm13, %v4447_v36, %v4443_v15  ;;  %v4514_v54 = vadd.f32 %v7815_v49, %v4513_v5  ;;  %v4504_v30 = vand.u32 2147483647, %v7708_v22  ;;  %v8671_v36 = vld [vmem:[#allocation43_spill] sm:$0xff] }
0x24b5   : > { %4847 = vperm.xlu1 %5252, %v4464_v50   ;;  %v4506_v17 = vand.u32 2147483648, %v7708_v22  ;;  %v4449_v26 = vmul.f32 %v8668_v11, %v4448_v6  ;;  %vm4501_vm0 = vweird.f32 %v7762_v31  ;;  %v4481_v13 = vmul.f32 %v7756_v40, %v7705_v28 }
0x24b6   : > { %v4498_v60 = vmul.f32 %v7762_v31, %v4497_v58  ;;  %5660 = vrcp.f32 %v7925_v52  ;;  %v4518_v8 = vsel %vm4517_vm14, %v7815_v49, %v4514_v54  ;;  %vm4520_vm1 = vcmp.eq.f32.partialorder %v4519_v18, 8.507059e+37  ;;  %v8672_v58 = vld [vmem:[#allocation42_spill] sm:$0xff] }
0x24b7   : > { %vm4500_vm2 = vweird.f32 %v7708_v22  ;;  %4844 = vperm.xlu0 %5254, %v4449_v26   ;;  %v4523_v46 = vsel %vm4520_vm1, %v4522_v41, %v4518_v8  ;;  %vm4505_vm4 = vcmp.eq.f32.partialorder %v4504_v30, 8.507059e+37  ;;  %v4482_v16 = vsub.f32 1.0, %v4481_v13 }
0x24b8   : > { %v4499_v4 = vadd.f32 %v7762_v31, %v4498_v60  ;;  %v4524_v10 = vmul.f32 %v8669_v12, %v4523_v46  ;;  %vm4502_vm5 = vmor %vm4500_vm2, %vm4501_vm0  ;;  %v4507_v14 = vor.u32 1.1754944e-38, %v4506_v17  ;;  %v4491_v55 = vand.u32 2147483648, %v7705_v28 }
0x24b9   : > { %v4556_v49 = vmul.f32 %v7855_v42, %v7808_v35  ;;  %v4483_v22 = vmul.f32 %v7756_v40, %v4482_v16  ;;  %vm4486_vm6 = vweird.f32 %v7756_v40  ;;  %v4489_v53 = vand.u32 2147483647, %v7705_v28  ;;  %v8673_v16 = vld [vmem:[#allocation15_spill] sm:$0xff] }
0x24ba   : > { %v4503_v56 = vsel %vm4502_vm5, %v7762_v31, %v4499_v4  ;;  %4859 = vperm.xlu2 %5253, %v4524_v10   ;;  %vm4485_vm9 = vweird.f32 %v7705_v28  ;;  %v4899_v57 = vperm.slane %v8106_v34, %v8670_v59  ;;  %v4492_v1 = vor.u32 1.1754944e-38, %v4491_v55  ;;  %v8147_v4 = vpop.permute.xlu2 %4769  ;;  %v8693_v34 = vld [vmem:[#allocation17_spill] sm:$0xff] }
0x24bb   : > { %v4508_v43 = vsel %vm4505_vm4, %v4507_v14, %v4503_v56  ;;  %v4557_v33 = vsub.f32 1.0, %v4556_v49  ;;  %v4484_v3 = vadd.f32 %v7756_v40, %v4483_v22  ;;  %v4566_v31 = vand.u32 2147483648, %v7808_v35  ;;  %vm4487_vm10 = vmor %vm4485_vm9, %vm4486_vm6 }
0x24bc   : > { %v4509_v39 = vmul.f32 %v8671_v36, %v4508_v43  ;;  %v8122_v23 = vpop.eup %5660  ;;  %vm4561_vm3 = vweird.f32 %v7855_v42  ;;  %v4564_v28 = vand.u32 2147483647, %v7808_v35  ;;  %v4541_v25 = vmul.f32 %v7850_v32, %v7805_v9 }
0x24bd   : > { %v4558_v24 = vmul.f32 %v7855_v42, %v4557_v33  ;;  %v4488_v50 = vsel %vm4487_vm10, %v7756_v40, %v4484_v3  ;;  %vm4490_vm15 = vcmp.eq.f32.partialorder %v4489_v53, 8.507059e+37  ;;  %vm4560_vm7 = vweird.f32 %v7808_v35  ;;  %v8138_v17 = vpop.permute.xlu0 %4757  ;;  %v8140_v35 = vpop.permute.xlu1 %4754 }
0x24be   : > { %4856 = vperm.xlu1 %5252, %v4509_v39   ;;  %vm4545_vm11 = vweird.f32 %v7805_v9  ;;  %v4493_v5 = vsel %vm4490_vm15, %v4492_v1, %v4488_v50  ;;  %v4542_v15 = vsub.f32 1.0, %v4541_v25  ;;  %v4549_v41 = vand.u32 2147483647, %v7805_v9  ;;  %vm4562_vm8 = vmor %vm4560_vm7, %vm4561_vm3 }
0x24bf   : > { %v4559_v18 = vadd.f32 %v7855_v42, %v4558_v24  ;;  %v4494_v6 = vmul.f32 %v8672_v58, %v4493_v5  ;;  %v4567_v54 = vor.u32 1.1754944e-38, %v4566_v31  ;;  %v4551_v30 = vand.u32 2147483648, %v7805_v9 }
0x24c0   : > { %v4526_v40 = vmul.f32 %v7844_v62, %v7801_v29  ;;  %vm4565_vm12 = vcmp.eq.f32.partialorder %v4564_v28, 8.507059e+37  ;;  %v4543_v26 = vmul.f32 %v7850_v32, %v4542_v15  ;;  %vm4546_vm13 = vweird.f32 %v7850_v32 }
0x24c1   : > { %v4563_v11 = vsel %vm4562_vm8, %v7855_v42, %v4559_v18  ;;  %4853 = vperm.xlu0 %5254, %v4494_v6   ;;  %v4534_v8 = vand.u32 2147483647, %v7801_v29  ;;  %v4536_v46 = vand.u32 2147483648, %v7801_v29  ;;  %vm4550_vm14 = vcmp.eq.f32.partialorder %v4549_v41, 8.507059e+37  ;;  %vm4547_vm0 = vmor %vm4545_vm11, %vm4546_vm13  ;;  %v8677_v18 = vld [vmem:[#allocation11_spill] sm:$0xff] }
0x24c2   : > { %v4568_v60 = vsel %vm4565_vm12, %v4567_v54, %v4563_v11  ;;  %v4527_v13 = vsub.f32 1.0, %v4526_v40  ;;  %v4544_v10 = vadd.f32 %v7850_v32, %v4543_v26  ;;  %v4616_v42 = vmul.f32 %v7956_v45, %v7906_v37  ;;  %v8192_v26 = vpop.permute.xlu2 %4778 }
0x24c3   : > { %v4569_v12 = vmul.f32 %v8673_v16, %v4568_v60  ;;  %v4552_v14 = vor.u32 1.1754944e-38, %v4551_v30  ;;  %vm4530_vm1 = vweird.f32 %v7801_v29  ;;  %vm4531_vm2 = vweird.f32 %v7844_v62  ;;  %v8676_v29 = vld [vmem:[#allocation14_spill] sm:$0xff]  ;;  %v8678_v60 = vld [vmem:[#allocation13_spill] sm:$0xff] }
0x24c4   : > { %v4528_v55 = vmul.f32 %v7844_v62, %v4527_v13  ;;  %v4548_v49 = vsel %vm4547_vm0, %v7850_v32, %v4544_v10  ;;  %vm8159_vm4 = vcmp.eq.f32.partialorder %v4534_v8, 8.507059e+37  ;;  %v4537_v22 = vor.u32 1.1754944e-38, %v4536_v46  ;;  %vm4532_vm5 = vmor %vm4530_vm1, %vm4531_vm2 }
0x24c5   : > { %4868 = vperm.xlu2 %5253, %v4569_v12   ;;  %v4617_v53 = vsub.f32 1.0, %v4616_v42  ;;  %v4553_v43 = vsel %vm4550_vm14, %v4552_v14, %v4548_v49  ;;  %v4626_v33 = vand.u32 2147483648, %v7906_v37  ;;  %v4586_v36 = vmul.f32 %v7870_v63, %v7818_v19  ;;  %v8185_v58 = vpop.permute.xlu1 %4766 }
0x24c6   : > { %v4529_v9 = vadd.f32 %v7844_v62, %v4528_v55  ;;  %v4554_v39 = vmul.f32 %v8676_v29, %v4553_v43  ;;  %vm4621_vm6 = vweird.f32 %v7956_v45  ;;  %v4624_v32 = vand.u32 2147483647, %v7906_v37  ;;  %v8679_v55 = vld [vmem:[#allocation16_spill] sm:$0xff] }
0x24c7   : > { %v4618_v3 = vmul.f32 %v7956_v45, %v4617_v53  ;;  %vm4620_vm9 = vweird.f32 %v7906_v37  ;;  %v4627_v31 = vor.u32 1.1754944e-38, %v4626_v33  ;;  %v4587_v24 = vsub.f32 1.0, %v4586_v36  ;;  %v8183_v37 = vpop.permute.xlu0 %4763 }
0x24c8   : > { %v4533_v1 = vsel %vm4532_vm5, %v7844_v62, %v4529_v9  ;;  %4865 = vperm.xlu1 %5252, %v4554_v39   ;;  %v4594_v50 = vand.u32 2147483647, %v7818_v19  ;;  %v4596_v5 = vand.u32 2147483648, %v7818_v19  ;;  %vm4622_vm10 = vmor %vm4620_vm9, %vm4621_vm6  ;;  %vm4591_vm3 = vweird.f32 %v7870_v63 }
0x24c9   : > { %v4538_v28 = vsel %vm8159_vm4, %v4537_v22, %v4533_v1  ;;  %v4619_v25 = vadd.f32 %v7956_v45, %v4618_v3  ;;  %v4588_v41 = vmul.f32 %v7870_v63, %v4587_v24  ;;  %v4571_v62 = vmul.f32 %v7862_v48, %v7811_v2 }
0x24ca   : > { %v4539_v15 = vmul.f32 %v8677_v18, %v4538_v28  ;;  %v4902_v6 = vperm.slane %v8147_v4, %v8670_v59  ;;  %vm4625_vm15 = vcmp.eq.f32.partialorder %v4624_v32, 8.507059e+37  ;;  %vm4590_vm7 = vweird.f32 %v7818_v19 }
0x24cb   : > { %v4623_v54 = vsel %vm4622_vm10, %v7956_v45, %v4619_v25  ;;  %v4589_v40 = vadd.f32 %v7870_v63, %v4588_v41  ;;  %vm4595_vm11 = vcmp.eq.f32.partialorder %v4594_v50, 8.507059e+37  ;;  %v4572_v11 = vsub.f32 1.0, %v4571_v62  ;;  %vm4592_vm8 = vmor %vm4590_vm7, %vm4591_vm3  ;;  %v8681_v41 = vld [vmem:[#allocation45_spill] sm:$0xff] }
0x24cc   : > { %4862 = vperm.xlu0 %5254, %v4539_v15   ;;  %v4628_v30 = vsel %vm4625_vm15, %v4627_v31, %v4623_v54  ;;  %v4597_v8 = vor.u32 1.1754944e-38, %v4596_v5  ;;  %v4581_v46 = vand.u32 2147483648, %v7811_v2  ;;  %v4661_v45 = vmul.f32 %v7983_v44, %v7921_v21  ;;  %v8680_v31 = vld [vmem:[#allocation12_spill] sm:$0xff] }
0x24cd   : > { %v4629_v13 = vmul.f32 %v8678_v60, %v4628_v30  ;;  %v4593_v19 = vsel %vm4592_vm8, %v7870_v63, %v4589_v40  ;;  %v4573_v16 = vmul.f32 %v7862_v48, %v4572_v11  ;;  %vm4576_vm12 = vweird.f32 %v7862_v48  ;;  %v8218_v36 = vpop.permute.xlu1 %4775 }
0x24ce   : > { %v4579_v12 = vand.u32 2147483647, %v7811_v2  ;;  %v4598_v10 = vsel %vm4595_vm11, %v4597_v8, %v4593_v19  ;;  %vm4575_vm13 = vweird.f32 %v7811_v2  ;;  %v4905_v42 = vperm.slane %v8192_v26, %v8670_v59 }
0x24cf   : > { %4880 = vperm.xlu2 %5253, %v4629_v13   ;;  %v4662_v14 = vsub.f32 1.0, %v4661_v45  ;;  %v4599_v49 = vmul.f32 %v8679_v55, %v4598_v10  ;;  %v4574_v56 = vadd.f32 %v7862_v48, %v4573_v16  ;;  %v4582_v22 = vor.u32 1.1754944e-38, %v4581_v46  ;;  %vm4577_vm14 = vmor %vm4575_vm13, %vm4576_vm12  ;;  %v8271_v10 = vpop.permute.xlu2 %4787 }
0x24d0   : > { %v4671_v63 = vand.u32 2147483648, %v7921_v21  ;;  %vm4666_vm0 = vweird.f32 %v7983_v44  ;;  %v4669_v43 = vand.u32 2147483647, %v7921_v21  ;;  %v4646_v2 = vmul.f32 %v7975_v51, %v7917_v61  ;;  %v8222_v1 = vpop.permute.xlu0 %4772 }
0x24d1   : > { %v4663_v53 = vmul.f32 %v7983_v44, %v4662_v14  ;;  %4874 = vperm.xlu1 %5252, %v4599_v49   ;;  %v4578_v9 = vsel %vm4577_vm14, %v7862_v48, %v4574_v56  ;;  %vm4580_vm1 = vcmp.eq.f32.partialorder %v4579_v12, 8.507059e+37  ;;  %vm4665_vm2 = vweird.f32 %v7921_v21 }
0x24d2   : > { %v4654_v33 = vand.u32 2147483647, %v7917_v61  ;;  %v4583_v29 = vsel %vm4580_vm1, %v4582_v22, %v4578_v9  ;;  %v4647_v3 = vsub.f32 1.0, %v4646_v2  ;;  %v4656_v32 = vand.u32 2147483648, %v7917_v61  ;;  %vm4667_vm4 = vmor %vm4665_vm2, %vm4666_vm0 }
0x24d3   : > { %v4664_v39 = vadd.f32 %v7983_v44, %v4663_v53  ;;  %v4584_v24 = vmul.f32 %v8680_v31, %v4583_v29  ;;  %v4672_v48 = vor.u32 1.1754944e-38, %v4671_v63  ;;  %vm4650_vm5 = vweird.f32 %v7917_v61  ;;  %v8689_v53 = vld [vmem:[#allocation18_spill] sm:$0xff] }
0x24d4   : > { %v4631_v21 = vmul.f32 %v7968_v7, %v7913_v47  ;;  %vm4670_vm6 = vcmp.eq.f32.partialorder %v4669_v43, 8.507059e+37  ;;  %v4648_v25 = vmul.f32 %v7975_v51, %v4647_v3  ;;  %vm4651_vm9 = vweird.f32 %v7975_v51 }
0x24d5   : > { %v4668_v28 = vsel %vm4667_vm4, %v7983_v44, %v4664_v39  ;;  %4871 = vperm.xlu0 %5254, %v4584_v24   ;;  %v4639_v18 = vand.u32 2147483647, %v7913_v47  ;;  %v4641_v15 = vand.u32 2147483648, %v7913_v47  ;;  %vm4655_vm10 = vcmp.eq.f32.partialorder %v4654_v33, 8.507059e+37  ;;  %vm4652_vm3 = vmor %vm4650_vm5, %vm4651_vm9 }
0x24d6   : > { %v4673_v50 = vsel %vm4670_vm6, %v4672_v48, %v4668_v28  ;;  %v4632_v5 = vsub.f32 1.0, %v4631_v21  ;;  %v4649_v54 = vadd.f32 %v7975_v51, %v4648_v25  ;;  %v4657_v30 = vor.u32 1.1754944e-38, %v4656_v32 }
0x24d7   : > { %v4674_v62 = vmul.f32 %v8681_v41, %v4673_v50  ;;  %vm4636_vm15 = vweird.f32 %v7968_v7  ;;  %v4898_v40 = vperm.slane %v8138_v17, %v8670_v59  ;;  %v4897_v11 = vperm.slane %v8140_v35, %v8670_v59 }
0x24d8   : > { %v4633_v44 = vmul.f32 %v7968_v7, %v4632_v5  ;;  %v4653_v60 = vsel %vm4652_vm3, %v7975_v51, %v4649_v54  ;;  %vm4635_vm7 = vweird.f32 %v7913_v47  ;;  %vm8248_vm11 = vcmp.eq.f32.partialorder %v4639_v18, 8.507059e+37  ;;  %v8262_v51 = vpop.permute.xlu1 %4784  ;;  %v8685_v47 = vld [vmem:[#allocation19_spill] sm:$0xff] }
0x24d9   : > { %4889 = vperm.xlu2 %5253, %v4674_v62   ;;  %v4691_v61 = vmul.f32 %v8122_v23, %v7925_v52  ;;  %v4658_v8 = vsel %vm4655_vm10, %v4657_v30, %v4653_v60  ;;  %v4642_v45 = vor.u32 1.1754944e-38, %v4641_v15  ;;  %v4699_v17 = vand.u32 2147483647, %v7925_v52  ;;  %vm4637_vm8 = vmor %vm4635_vm7, %vm4636_vm15  ;;  %v8691_v5 = vld [vmem:[#allocation47_spill] sm:$0xff] }
0x24da   : > { %v4634_v46 = vadd.f32 %v7968_v7, %v4633_v44  ;;  %v4659_v35 = vmul.f32 %v8685_v47, %v4658_v8  ;;  %vm4695_vm12 = vweird.f32 %v7925_v52  ;;  %v4601_v16 = vmul.f32 %v7919_v38, %v7825_v0  ;;  %v4815_v44 = vpop.permute.xlu2 %4814 }
0x24db   : > { %v4692_v19 = vsub.f32 1.0, %v4691_v61  ;;  %vm8686_vm13 = vcmask 1041409   ;;  %vm4696_vm14 = vweird.f32 %v8122_v23  ;;  %v4701_v55 = vand.u32 2147483648, %v7925_v52  ;;  %v8696_v61 = vld [vmem:[#allocation46_spill] sm:$0xff] }
0x24dc   : > { %v4638_v12 = vsel %vm4637_vm8, %v7968_v7, %v4634_v46  ;;  %v4945_v14 = vsel %vm8686_vm13, %v4898_v40, %v4897_v11  ;;  %4886 = vperm.xlu1 %5252, %v4659_v35   ;;  %vm8279_vm0 = vcmp.eq.f32.partialorder %v4699_v17, 8.507059e+37  ;;  %v4602_v63 = vsub.f32 1.0, %v4601_v16  ;;  %v4782_v7 = vpop.permute.xlu0 %4781  ;;  %vm4697_vm4 = vmor %vm4695_vm12, %vm4696_vm14 }
0x24dd   : > { %v4643_v49 = vsel %vm8248_vm11, %v4642_v45, %v4638_v12  ;;  %v4693_v56 = vmul.f32 %v8122_v23, %v4692_v19  ;;  %vm4605_vm1 = vweird.f32 %v7825_v0  ;;  %v4611_v2 = vand.u32 2147483648, %v7825_v0 }
0x24de   : > { %v4644_v43 = vmul.f32 %v8689_v53, %v4643_v49  ;;  %v4676_v9 = vmul.f32 %v8021_v20, %v7923_v27  ;;  %v4603_v29 = vmul.f32 %v7919_v38, %v4602_v63  ;;  %vm4606_vm2 = vweird.f32 %v7919_v38 }
0x24df   : > { %v4694_v33 = vadd.f32 %v8122_v23, %v4693_v56  ;;  %v4609_v39 = vand.u32 2147483647, %v7825_v0  ;;  %v4702_v3 = vor.u32 1.1754944e-38, %v4701_v55  ;;  %v4612_v32 = vor.u32 1.1754944e-38, %v4611_v2  ;;  %vm4607_vm6 = vmor %vm4605_vm1, %vm4606_vm2 }
0x24e0   : > { %4883 = vperm.xlu0 %5254, %v4644_v43   ;;  %v4677_v31 = vsub.f32 1.0, %v4676_v9  ;;  %vm4681_vm5 = vweird.f32 %v8021_v20  ;;  %v4604_v48 = vadd.f32 %v7919_v38, %v4603_v29  ;;  %v4686_v21 = vand.u32 2147483648, %v7923_v27 }
0x24e1   : > { %v4698_v24 = vsel %vm4697_vm4, %v8122_v23, %v4694_v33  ;;  %v4900_v28 = vperm.slane %v8183_v37, %v8670_v59  ;;  %v4684_v50 = vand.u32 2147483647, %v7923_v27  ;;  %vm8690_vm9 = vcmask 1042434  }
0x24e2   : > { %v4703_v25 = vsel %vm8279_vm0, %v4702_v3, %v4698_v24  ;;  %v4678_v52 = vmul.f32 %v8021_v20, %v4677_v31  ;;  %v4946_v23 = vsel %vm8690_vm9, %v4899_v57, %v4945_v14  ;;  %v4608_v37 = vsel %vm4607_vm6, %v7919_v38, %v4604_v48  ;;  %vm8698_vm0 = vmmov %vm8690_vm9  ;;  %v4824_v19 = vpop.permute.xlu2 %4823 }
0x24e3   : > { %v4704_v18 = vmul.f32 %v8691_v5, %v4703_v25  ;;  %vm4610_vm10 = vcmp.eq.f32.partialorder %v4609_v39, 8.507059e+37  ;;  %vm8692_vm3 = vcmask 1043459   ;;  %vm4680_vm15 = vweird.f32 %v7923_v27  ;;  %vm8703_vm6 = vmmov %vm8686_vm13 }
0x24e4   : > { %v4947_v15 = vsel %vm8692_vm3, %v4900_v28, %v4946_v23  ;;  %v4613_v41 = vsel %vm4610_vm10, %v4612_v32, %v4608_v37  ;;  %v4679_v0 = vadd.f32 %v8021_v20, %v4678_v52  ;;  %v4901_v62 = vperm.slane %v8185_v58, %v8670_v59  ;;  %v4812_v54 = vpop.permute.xlu1 %4811  ;;  %vm4682_vm7 = vmor %vm4680_vm15, %vm4681_vm5 }
0x24e5   : > { %4895 = vperm.xlu2 %5253, %v4704_v18   ;;  %v4614_v57 = vmul.f32 %v8693_v34, %v4613_v41  ;;  %v4687_v30 = vor.u32 1.1754944e-38, %v4686_v21  ;;  %v4903_v38 = vperm.slane %v8222_v1, %v8670_v59  ;;  %v4904_v27 = vperm.slane %v8218_v36, %v8670_v59  ;;  %vm8699_vm1 = vmmov %vm8692_vm3 }
0x24e6   : > { %v4683_v58 = vsel %vm4682_vm7, %v8021_v20, %v4679_v0  ;;  %vm4685_vm11 = vcmp.eq.f32.partialorder %v4684_v50, 8.507059e+37  ;;  %vm8694_vm8 = vcmask 1044484   ;;  %v4906_v11 = vperm.slane %v4782_v7, %v8670_v59  ;;  %vm8704_vm9 = vmmov %vm8698_vm0 }
0x24e7   : > { %v4948_v40 = vsel %vm8694_vm8, %v4901_v62, %v4947_v15  ;;  %4877 = vperm.xlu1 %5252, %v4614_v57   ;;  %v4688_v60 = vsel %vm4685_vm11, %v4687_v30, %v4683_v58  ;;  %vm8695_vm12 = vcmask 1045509   ;;  %v4950_v1 = vsel %vm8686_vm13, %v4904_v27, %v4903_v38  ;;  %v4809_v20 = vpop.permute.xlu0 %4808  ;;  %vm8700_vm2 = vmmov %vm8694_vm8 }
0x24e8   : > { %v4949_v13 = vsel %vm8695_vm12, %v4902_v6, %v4948_v40  ;;  %v4907_v36 = vperm.slane %v8262_v51, %v8670_v59  ;;  %v4689_v8 = vmul.f32 %v8696_v61, %v4688_v60  ;;  %vm8697_vm14 = vcmask 62464   ;;  %vm8701_vm4 = vmmov %vm8695_vm12 }
0x24e9   : > { %4993 = vst.msk [vmem:[%s8332_s28] sm:$0x3f] %vm8697_vm14, %v4949_v13  ;;  %v4951_v46 = vsel %vm8698_vm0, %v4905_v42, %v4950_v1  ;;  %v4908_v4 = vperm.slane %v8271_v10, %v8670_v59  ;;  %v4915_v51 = vperm.slane %v4809_v20, %v8670_v59  ;;  %v4916_v47 = vperm.slane %v4812_v54, %v8670_v59  ;;  %vm8702_vm5 = vmmov %vm8697_vm14 }
0x24ea   : > { %v4952_v6 = vsel %vm8699_vm1, %v4906_v11, %v4951_v46  ;;  %4892 = vperm.xlu0 %5254, %v4689_v8   ;;  %v4917_v35 = vperm.slane %v4815_v44, %v8670_v59  ;;  %v4920_v55 = vperm.slane %v4824_v19, %v8670_v59  ;;  %vm8705_vm10 = vmmov %vm8699_vm1  ;;  %v4797_v7 = vpop.permute.xlu2 %4796 }
0x24eb   : > { %v4953_v45 = vsel %vm8700_vm2, %v4907_v36, %v4952_v6  ;;  %v4960_v42 = vsel %vm8703_vm6, %v4916_v47, %v4915_v51  ;;  %vm8706_vm3 = vmmov %vm8700_vm2  ;;  %v4911_v29 = vperm.slane %v4797_v7, %v8670_v59 }
0x24ec   : > { %v4954_v17 = vsel %vm8701_vm4, %v4908_v4, %v4953_v45  ;;  %v4821_v26 = vpop.permute.xlu1 %4820  ;;  %v4961_v14 = vsel %vm8704_vm9, %v4917_v35, %v4960_v42  ;;  %vm8707_vm15 = vmmov %vm8701_vm4 }
0x24ed   : > { %4994 = vst.msk [vmem:[%s8332_s28 + $0x8] sm:$0x3f] %vm8702_vm5, %v4954_v17  ;;  %v4919_v12 = vperm.slane %v4821_v26, %v8670_v59  ;;  %vm8708_vm7 = vmmov %vm8702_vm5 }
0x24ee   : > { %vm8709_vm11 = vmmov %vm8703_vm6 }
0x24ef   : > { %vm8710_vm8 = vmmov %vm8698_vm0 }
0x24f0   : > { %v4818_v16 = vpop.permute.xlu0 %4817  ;;  %vm8711_vm12 = vmmov %vm8699_vm1 }
0x24f1   : > { %v4918_v10 = vperm.slane %v4818_v16, %v8670_v59  ;;  %vm8712_vm13 = vmmov %vm8700_vm2 }
0x24f2   : > { %v4806_v39 = vpop.permute.xlu2 %4805  ;;  %vm8713_vm14 = vmmov %vm8701_vm4 }
0x24f3   : > { %v4962_v49 = vsel %vm8705_vm10, %v4918_v10, %v4961_v14  ;;  %v4914_v48 = vperm.slane %v4806_v39, %v8670_v59  ;;  %vm8714_vm0 = vmmov %vm8702_vm5 }
0x24f4   : > { %v4963_v56 = vsel %vm8706_vm3, %v4919_v12, %v4962_v49  ;;  %vm8715_vm1 = vmmov %vm8703_vm6 }
0x24f5   : > { %v4964_v22 = vsel %vm8707_vm15, %v4920_v55, %v4963_v56  ;;  %vm8716_vm2 = vmmov %vm8710_vm8 }
0x24f6   : > { %4996 = vst.msk [vmem:[%s8332_s28 + $0x18] sm:$0x3f] %vm8708_vm7, %v4964_v22  ;;  %vm8717_vm4 = vmmov %vm8705_vm10 }
0x24f7   : > { %vm8718_vm5 = vmmov %vm8706_vm3 }
0x24f8   : > { %vm8719_vm6 = vmmov %vm8713_vm14 }
0x24f9   : > { %vm8720_vm9 = vmmov %vm8714_vm0 }
0x24fa   : > { %v4833_v50 = vpop.permute.xlu2 %4832  ;;  %vm8721_vm10 = vmmov %vm8715_vm1 }
0x24fb   : > { %v4923_v0 = vperm.slane %v4833_v50, %v8670_v59  ;;  %vm8722_vm3 = vmmov %vm8716_vm2 }
0x24fc   : > { %v4794_v63 = vpop.permute.xlu1 %4793  ;;  %vm8723_vm15 = vmmov %vm8717_vm4 }
0x24fd   : > { %v4910_v2 = vperm.slane %v4794_v63, %v8670_v59  ;;  %vm8724_vm7 = vmmov %vm8718_vm5 }
0x2500   : > { %v4791_v53 = vpop.permute.xlu0 %4790 }
0x2501   : > { %v4909_v43 = vperm.slane %v4791_v53, %v8670_v59 }
0x2502   : > { %v4842_v15 = vpop.permute.xlu2 %4841 }
0x2503   : > { %v4955_v33 = vsel %vm8709_vm11, %v4910_v2, %v4909_v43  ;;  %v4926_v30 = vperm.slane %v4842_v15, %v8670_v59  ;;  %vm8725_vm11 = vmmov %vm8719_vm6 }
0x2504   : > { %v4956_v24 = vsel %vm8710_vm8, %v4911_v29, %v4955_v33  ;;  %vm8726_vm8 = vmmov %vm8714_vm0 }
0x2505   : > { %v4803_v9 = vpop.permute.xlu1 %4802 }
0x2506   : > { %v4913_v32 = vperm.slane %v4803_v9, %v8670_v59 }
0x2509   : > { %v4800_v3 = vpop.permute.xlu0 %4799 }
0x250a   : > { %v4912_v31 = vperm.slane %v4800_v3, %v8670_v59 }
0x250c   : > { %v4957_v21 = vsel %vm8711_vm12, %v4912_v31, %v4956_v24  ;;  %v4851_v40 = vpop.permute.xlu2 %4850  ;;  %vm8727_vm12 = vmmov %vm8715_vm1 }
0x250d   : > { %v4958_v28 = vsel %vm8712_vm13, %v4913_v32, %v4957_v21  ;;  %v4929_v61 = vperm.slane %v4851_v40, %v8670_v59  ;;  %vm8728_vm13 = vmmov %vm8716_vm2 }
0x250e   : > { %v4959_v25 = vsel %vm8713_vm14, %v4914_v48, %v4958_v28  ;;  %vm8729_vm14 = vmmov %vm8717_vm4 }
0x250f   : > { %4995 = vst.msk [vmem:[%s8332_s28 + $0x10] sm:$0x3f] %vm8714_vm0, %v4959_v25  ;;  %vm8730_vm0 = vmmov %vm8715_vm1 }
0x2512   : > { %v4830_v52 = vpop.permute.xlu1 %4829 }
0x2513   : > { %v4922_v18 = vperm.slane %v4830_v52, %v8670_v59 }
0x2514   : > { %v4860_v36 = vpop.permute.xlu2 %4859 }
0x2515   : > { %v4932_v45 = vperm.slane %v4860_v36, %v8670_v59 }
0x2516   : > { %v4827_v23 = vpop.permute.xlu0 %4826 }
0x2517   : > { %v4921_v5 = vperm.slane %v4827_v23, %v8670_v59 }
0x2519   : > { %v4965_v41 = vsel %vm8715_vm1, %v4922_v18, %v4921_v5  ;;  %vm8731_vm1 = vmmov %vm8718_vm5 }
0x251a   : > { %v4966_v57 = vsel %vm8716_vm2, %v4923_v0, %v4965_v41 }
0x251c   : > { %v4839_v37 = vpop.permute.xlu1 %4838 }
0x251d   : > { %v4925_v54 = vperm.slane %v4839_v37, %v8670_v59 }
0x251f   : > { %v4836_v62 = vpop.permute.xlu0 %4835  ;;  %v4869_v42 = vpop.permute.xlu2 %4868 }
0x2520   : > { %v4924_v34 = vperm.slane %v4836_v62, %v8670_v59  ;;  %v4935_v53 = vperm.slane %v4869_v42, %v8670_v59 }
0x2522   : > { %v4967_v38 = vsel %vm8717_vm4, %v4924_v34, %v4966_v57  ;;  %vm8732_vm4 = vmmov %vm8719_vm6 }
0x2523   : > { %v4968_v27 = vsel %vm8718_vm5, %v4925_v54, %v4967_v38  ;;  %vm8733_vm5 = vmmov %vm8726_vm8 }
0x2524   : > { %v4969_v58 = vsel %vm8719_vm6, %v4926_v30, %v4968_v27  ;;  %vm8734_vm6 = vmmov %vm8729_vm14 }
0x2525   : > { %4997 = vst.msk [vmem:[%s8332_s28 + $0x20] sm:$0x3f] %vm8720_vm9, %v4969_v58  ;;  %vm8735_vm9 = vmmov %vm8731_vm1 }
0x2527   : > { %v4848_v44 = vpop.permute.xlu1 %4847 }
0x2528   : > { %v4928_v13 = vperm.slane %v4848_v44, %v8670_v59 }
0x2529   : > { %v4845_v11 = vpop.permute.xlu0 %4844  ;;  %v4881_v16 = vpop.permute.xlu2 %4880 }
0x252a   : > { %v4927_v60 = vperm.slane %v4845_v11, %v8670_v59  ;;  %v4939_v43 = vperm.slane %v4881_v16, %v8670_v59 }
0x252c   : > { %v4970_v20 = vsel %vm8721_vm10, %v4928_v13, %v4927_v60  ;;  %vm8736_vm10 = vmmov %vm8732_vm4 }
0x252d   : > { %v4971_v6 = vsel %vm8722_vm3, %v4929_v61, %v4970_v20  ;;  %vm8737_vm3 = vmmov %vm8733_vm5 }
0x2530   : > { %v4857_v1 = vpop.permute.xlu1 %4856 }
0x2531   : > { %v4931_v46 = vperm.slane %v4857_v1, %v8670_v59 }
0x2533   : > { %v4854_v8 = vpop.permute.xlu0 %4853  ;;  %v4890_v49 = vpop.permute.xlu2 %4889 }
0x2534   : > { %v4930_v4 = vperm.slane %v4854_v8, %v8670_v59  ;;  %v4942_v21 = vperm.slane %v4890_v49, %v8670_v59 }
0x2536   : > { %v4972_v17 = vsel %vm8723_vm15, %v4930_v4, %v4971_v6 }
0x2537   : > { %v4973_v51 = vsel %vm8724_vm7, %v4931_v46, %v4972_v17 }
0x2538   : > { %v4974_v47 = vsel %vm8725_vm11, %v4932_v45, %v4973_v51 }
0x2539   : > { %4998 = vst.msk [vmem:[%s8332_s28 + $0x28] sm:$0x3f] %vm8726_vm8, %v4974_v47 }
0x253a   : > { %v4866_v26 = vpop.permute.xlu1 %4865 }
0x253b   : > { %v4934_v55 = vperm.slane %v4866_v26, %v8670_v59 }
0x253e   : > { %v4863_v35 = vpop.permute.xlu0 %4862 }
0x253f   : > { %v4933_v14 = vperm.slane %v4863_v35, %v8670_v59  ;;  %v4896_v31 = vpop.permute.xlu2 %4895 }
0x2540   : > { %v4944_v50 = vperm.slane %v4896_v31, %v8670_v59 }
0x2541   : > { %v4975_v22 = vsel %vm8727_vm12, %v4934_v55, %v4933_v14 }
0x2542   : > { %v4976_v2 = vsel %vm8728_vm13, %v4935_v53, %v4975_v22 }
0x2543   : > { %v4875_v19 = vpop.permute.xlu1 %4874 }
0x2544   : > { %v4937_v9 = vperm.slane %v4875_v19, %v8670_v59 }
0x2547   : > { %v4872_v12 = vpop.permute.xlu0 %4871 }
0x2548   : > { %v4936_v63 = vperm.slane %v4872_v12, %v8670_v59 }
0x254a   : > { %v4977_v29 = vsel %vm8729_vm14, %v4936_v63, %v4976_v2 }
0x254b   : > { %v4978_v24 = vsel %vm8731_vm1, %v4937_v9, %v4977_v29 }
0x254e   : > { %v4887_v10 = vpop.permute.xlu1 %4886 }
0x254f   : > { %v4941_v33 = vperm.slane %v4887_v10, %v8670_v59 }
0x2552   : > { %v4884_v56 = vpop.permute.xlu0 %4883 }
0x2553   : > { %v4940_v7 = vperm.slane %v4884_v56, %v8670_v59 }
0x2555   : > { %v4980_v39 = vsel %vm8730_vm0, %v4940_v7, %v4939_v43 }
0x2556   : > { %v4981_v48 = vsel %vm8716_vm2, %v4941_v33, %v4980_v39 }
0x2557   : > { %v4982_v23 = vsel %vm8734_vm6, %v4942_v21, %v4981_v48 }
0x2559   : > { %v4878_v3 = vpop.permute.xlu1 %4877 }
0x255a   : > { %v4938_v32 = vperm.slane %v4878_v3, %v8670_v59 }
0x255c   : > { %v4893_v28 = vpop.permute.xlu0 %4892  ;;  %v4979_v25 = vsel %vm8732_vm4, %v4938_v32, %v4978_v24 }
0x255d   : > { %v4943_v52 = vperm.slane %v4893_v28, %v8670_v59  ;;  %4999 = vst.msk [vmem:[%s8332_s28 + $0x30] sm:$0x3f] %vm8733_vm5, %v4979_v25 }
0x255f   : > { %v4983_v5 = vsel %vm8735_vm9, %v4943_v52, %v4982_v23 }
0x2560   : > { %v4984_v18 = vsel %vm8736_vm10, %v4944_v50, %v4983_v5 }
0x2561   : > { %5000 = vst.msk [vmem:[%s8332_s28 + $0x38] sm:$0x3f] %vm8737_vm3, %v4984_v18 }
0x2562 PF: > { %s26_s29 = sadd.s32 1, %s5740_s29  }
0x2563   : > { %p23_p8 = scmp.ge.s32.totalorder %s26_s29, 4  }
0x2565   :  { %25 = sbr.rel (!%p23_p8) target bundleno = 2 (0x2), region = 121 }
0x256a   :  { %5023 = vsyncpa [#allocation5], 1 }
0x256b   :  { %5025 = vsyncpa [#allocation5 + $0x1], 1 }
0x256c   :  { %5026 = vsyncpa [#allocation7], 1 }

</bundles_post_ra>
